<compile_context>
chip_gen: v7x
topology: tpu7x:2x2x1
jax: 0.10.0
libtpu: 0.0.40
codegen_flags: <defaults>
</compile_context>

<pallas_src>
import jax
import jax.numpy as jnp
import numpy as np
from jax import lax
from jax.experimental import pallas as pl
from jax.experimental.pallas import tpu as pltpu

BN_EPS = 1e-3
MXU_DTYPE = jnp.bfloat16     # MXU operand dtype (accumulation stays f32)


def _round_up(x, m):
    return (x + m - 1) // m * m


def _resident(shape, index_map):
    # Constant-index block (weights/bias): single-buffered, stays resident in VMEM.
    return pl.BlockSpec(shape, index_map, pipeline_mode=pl.Buffered(1))


def _fold_bn(gamma, beta, mean, var):
    scale = gamma / jnp.sqrt(var + BN_EPS)
    bias = (beta - mean * scale).astype(jnp.float32)
    return scale, bias


# ----------------------------------------------------------------------------
# Kernel 1: 1x1 conv == matmul (+ folded-BN bias + SiLU).  bf16 in, f32 acc.
# ----------------------------------------------------------------------------
def _mm_bias_silu_kernel(x_ref, w_ref, b_ref, o_ref):
    y = jnp.dot(x_ref[...], w_ref[...], preferred_element_type=jnp.float32)
    y = y + b_ref[...]
    o_ref[...] = (y * jax.nn.sigmoid(y)).astype(o_ref.dtype)


def conv1x1_bn_silu(x, w, gamma, beta, mean, var, *, out_dtype=MXU_DTYPE, tile_m=1024):
    B, H, Wd, C = x.shape
    N = w.shape[-1]
    scale, bias = _fold_bn(gamma, beta, mean, var)
    w2d = (w.reshape(C, N) * scale[None, :]).astype(MXU_DTYPE)   # fold BN into weights
    M = B * H * Wd
    x2d = x.reshape(M, C).astype(MXU_DTYPE)
    tm = min(tile_m, _round_up(M, 8))
    # NOTE: if M % tm != 0 the last input tile reads OOB rows (garbage) which are
    # discarded by the masked output store -- correct, matches Pallas semantics.
    y = pl.pallas_call(
        _mm_bias_silu_kernel,
        out_shape=jax.ShapeDtypeStruct((M, N), out_dtype),
        grid=(pl.cdiv(M, tm),),
        in_specs=[
            pl.BlockSpec((tm, C), lambda i: (i, 0)),
            _resident((C, N), lambda i: (0, 0)),
            _resident((1, N), lambda i: (0, 0)),
        ],
        out_specs=pl.BlockSpec((tm, N), lambda i: (i, 0)),
        compiler_params=pltpu.CompilerParams(dimension_semantics=("parallel",)),
    )(x2d, w2d, bias[None, :])
    return y.reshape(B, H, Wd, N)


# ----------------------------------------------------------------------------
# Kernel 2: 1x1 conv on a virtual concat of two tensors (cbs11): the concat is
# folded into the matmul as a sum of two K-sliced partial products.
# ----------------------------------------------------------------------------
def _mm2_bias_silu_kernel(a_ref, b_ref, wa_ref, wb_ref, bias_ref, o_ref):
    y = jnp.dot(a_ref[...], wa_ref[...], preferred_element_type=jnp.float32)
    y = y + jnp.dot(b_ref[...], wb_ref[...], preferred_element_type=jnp.float32)
    y = y + bias_ref[...]
    o_ref[...] = (y * jax.nn.sigmoid(y)).astype(o_ref.dtype)


def conv1x1_dual_bn_silu(a, b, w, gamma, beta, mean, var, *,
                         out_dtype=jnp.float32, tile_m=1024):
    # equivalent to conv1x1_bn_silu(concat([a, b], -1), w, ...)
    B, H, Wd, Ca = a.shape
    Cb = b.shape[-1]
    N = w.shape[-1]
    scale, bias = _fold_bn(gamma, beta, mean, var)
    w2d = (w.reshape(Ca + Cb, N) * scale[None, :]).astype(MXU_DTYPE)
    wa, wb = w2d[:Ca], w2d[Ca:]
    M = B * H * Wd
    a2 = a.reshape(M, Ca).astype(MXU_DTYPE)
    b2 = b.reshape(M, Cb).astype(MXU_DTYPE)
    tm = min(tile_m, _round_up(M, 8))
    y = pl.pallas_call(
        _mm2_bias_silu_kernel,
        out_shape=jax.ShapeDtypeStruct((M, N), out_dtype),
        grid=(pl.cdiv(M, tm),),
        in_specs=[
            pl.BlockSpec((tm, Ca), lambda i: (i, 0)),
            pl.BlockSpec((tm, Cb), lambda i: (i, 0)),
            _resident((Ca, N), lambda i: (0, 0)),
            _resident((Cb, N), lambda i: (0, 0)),
            _resident((1, N), lambda i: (0, 0)),
        ],
        out_specs=pl.BlockSpec((tm, N), lambda i: (i, 0)),
        compiler_params=pltpu.CompilerParams(dimension_semantics=("parallel",)),
    )(a2, b2, wa, wb, bias[None, :])
    return y.reshape(B, H, Wd, N)


# ----------------------------------------------------------------------------
# Kernel 3: 3x3 conv (stride 1, pad 1) + folded-BN bias + SiLU.
# Grid over batch only; zero padding + im2col are built in VMEM and the whole
# image is computed as one (H*W, 9C) @ (9C, N) MXU dot (M = H*W per step).
# ----------------------------------------------------------------------------
def _conv3x3_bn_silu_kernel(x_ref, w_ref, b_ref, o_ref):
    _, H, Wd, C = x_ref.shape
    xb = x_ref[0]                                            # (H, W, C) bf16
    zr = jnp.zeros((1, Wd, C), xb.dtype)
    xh = jnp.concatenate([zr, xb, zr], axis=0)               # (H+2, W,   C)
    zc = jnp.zeros((H + 2, 1, C), xb.dtype)
    xv = jnp.concatenate([zc, xh, zc], axis=1)               # (H+2, W+2, C)
    # in-VMEM im2col: 9 shifted views -> (H, W, 9C) -> (H*W, 9C)
    cols = [xv[kh:kh + H, kw:kw + Wd, :] for kh in range(3) for kw in range(3)]
    patch = jnp.concatenate(cols, axis=-1).reshape(H * Wd, 9 * C)
    y = jnp.dot(patch, w_ref[...], preferred_element_type=jnp.float32)
    y = y + b_ref[...]
    o_ref[0] = (y * jax.nn.sigmoid(y)).astype(o_ref.dtype)


def conv3x3_bn_silu(x, w, gamma, beta, mean, var, *, out_dtype=MXU_DTYPE):
    B, H, Wd, C = x.shape
    N = w.shape[-1]
    scale, bias = _fold_bn(gamma, beta, mean, var)
    # (3,3,C,N) -> (9C, N), kh-major / kw / c ordering matches the in-kernel cols.
    wf = (w * scale[None, None, None, :]).reshape(9 * C, N).astype(MXU_DTYPE)
    y = pl.pallas_call(
        _conv3x3_bn_silu_kernel,
        out_shape=jax.ShapeDtypeStruct((B, H * Wd, N), out_dtype),
        grid=(B,),
        in_specs=[
            pl.BlockSpec((1, H, Wd, C), lambda b: (b, 0, 0, 0)),
            _resident((9 * C, N), lambda b: (0, 0)),
            _resident((1, N), lambda b: (0, 0)),
        ],
        out_specs=pl.BlockSpec((1, H * Wd, N), lambda b: (b, 0, 0)),
        compiler_params=pltpu.CompilerParams(dimension_semantics=("parallel",)),
    )(x.astype(MXU_DTYPE), wf, bias[None, :])
    return y.reshape(B, H, Wd, N)


# ----------------------------------------------------------------------------
# Kernel 4: fused MaxPool(5) + MaxPool(9) + MaxPool(13) + concat.
# -inf halo built in-registers (no wrapper pad); separable running maxes with
# the incremental 5 -> 9 -> 13 trick; output written as four channel slabs.
# ----------------------------------------------------------------------------
def _spp_pool_concat_kernel(x_ref, o_ref):
    _, H, Wd, c = x_ref.shape
    xb = x_ref[0]                                            # (H, W, c)
    ph = jnp.full((6, Wd, c), -jnp.inf, xb.dtype)
    xh = jnp.concatenate([ph, xb, ph], axis=0)               # (H+12, W,    c)
    pw = jnp.full((H + 12, 6, c), -jnp.inf, xb.dtype)
    xv = jnp.concatenate([pw, xh, pw], axis=1)               # (H+12, W+12, c)

    # 5-wide running max along H over padded rows.
    b5 = xv[0:H + 8]
    for d in range(1, 5):
        b5 = jnp.maximum(b5, xv[d:d + H + 8])
    r5 = b5[4:4 + H]
    r9 = jnp.maximum(b5[2:2 + H], b5[6:6 + H])
    r13 = jnp.maximum(jnp.maximum(b5[0:H], b5[4:4 + H]), b5[8:8 + H])

    def wmax5(a):                                            # (H, W+12, c) -> (H, W+8, c)
        m = a[:, 0:Wd + 8]
        for d in range(1, 5):
            m = jnp.maximum(m, a[:, d:d + Wd + 8])
        return m

    c5, c9, c13 = wmax5(r5), wmax5(r9), wmax5(r13)
    p5 = c5[:, 4:4 + Wd]
    p9 = jnp.maximum(c9[:, 2:2 + Wd], c9[:, 6:6 + Wd])
    p13 = jnp.maximum(jnp.maximum(c13[:, 0:Wd], c13[:, 4:4 + Wd]),
                      c13[:, 8:8 + Wd])

    # concat7 == four channel-slab stores (no (H,W,4c) temporary).
    o_ref[0, :, :, 0:c] = xb
    o_ref[0, :, :, c:2 * c] = p5
    o_ref[0, :, :, 2 * c:3 * c] = p9
    o_ref[0, :, :, 3 * c:4 * c] = p13


def spp_pool_concat(x):
    # x: (B, H, W, c)  ->  (B, H, W, 4c) == concat([x, mp5, mp9, mp13], channel)
    B, H, Wd, c = x.shape
    return pl.pallas_call(
        _spp_pool_concat_kernel,
        out_shape=jax.ShapeDtypeStruct((B, H, Wd, 4 * c), x.dtype),
        grid=(B,),
        in_specs=[pl.BlockSpec((1, H, Wd, c), lambda b: (b, 0, 0, 0))],
        out_specs=pl.BlockSpec((1, H, Wd, 4 * c), lambda b: (b, 0, 0, 0)),
        compiler_params=pltpu.CompilerParams(dimension_semantics=("parallel",)),
    )(x)


# ----------------------------------------------------------------------------
# Parameter init / module glue
# ----------------------------------------------------------------------------
def init_cbs(key, cin, cout, k):
    kw_, kg, kb, km, kv = jax.random.split(key, 5)
    w = jax.random.normal(kw_, (k, k, cin, cout), jnp.float32) / np.sqrt(k * k * cin)
    gamma = 1.0 + 0.1 * jax.random.normal(kg, (cout,), jnp.float32)
    beta = 0.1 * jax.random.normal(kb, (cout,), jnp.float32)
    mean = 0.1 * jax.random.normal(km, (cout,), jnp.float32)
    var = jnp.abs(jax.random.normal(kv, (cout,), jnp.float32)) + 0.5
    # kernel size is NOT stored (would become a tracer under jit); recovered from w.shape
    return dict(w=w, gamma=gamma, beta=beta, mean=mean, var=var)


def cbs_apply(x, p, out_dtype=MXU_DTYPE):
    k = p["w"].shape[0]          # static under jit
    if k == 1:
        return conv1x1_bn_silu(x, p["w"], p["gamma"], p["beta"], p["mean"], p["var"],
                               out_dtype=out_dtype)
    return conv3x3_bn_silu(x, p["w"], p["gamma"], p["beta"], p["mean"], p["var"],
                           out_dtype=out_dtype)


def init_sppcspc(key, in_, out_):
    ks = jax.random.split(key, 8)
    c = in_ // 2
    return {
        "cbs0": init_cbs(ks[0], in_, c, 1),
        "cbs1": init_cbs(ks[1], in_, c, 1),
        "cbs2": init_cbs(ks[2], c, c, 3),
        "cbs3": init_cbs(ks[3], c, c, 1),
        "cbs8": init_cbs(ks[4], 2 * in_, c, 1),
        "cbs9": init_cbs(ks[5], c, c, 3),
        "cbs11": init_cbs(ks[6], in_, out_, 1),
    }


def sppcspc_forward(x, params):
    x = x.astype(MXU_DTYPE)                  # bf16 MXU operands; f32 accumulation
    x0 = cbs_apply(x, params["cbs0"])
    x1 = cbs_apply(x, params["cbs1"])
    x1 = cbs_apply(x1, params["cbs2"])
    x1 = cbs_apply(x1, params["cbs3"])
    xc = spp_pool_concat(x1)                 # fused pools + concat7
    xc = cbs_apply(xc, params["cbs8"])
    xc = cbs_apply(xc, params["cbs9"])
    p11 = params["cbs11"]
    # concat10 fused into the cbs11 matmul (sum of two K-sliced products)
    return conv1x1_dual_bn_silu(xc, x0, p11["w"], p11["gamma"], p11["beta"],
                                p11["mean"], p11["var"], out_dtype=jnp.float32)


# ----------------------------------------------------------------------------
# Pure-JAX f32 reference (lax conv / reduce_window) for a correctness check
# ----------------------------------------------------------------------------
def cbs_ref(x, p):
    k = p["w"].shape[0]
    pad = (k - 1) // 2
    y = lax.conv_general_dilated(
        x, p["w"], window_strides=(1, 1),
        padding=((pad, pad), (pad, pad)),
        dimension_numbers=("NHWC", "HWIO", "NHWC"))
    scale = p["gamma"] / jnp.sqrt(p["var"] + BN_EPS)
    bias = p["beta"] - p["mean"] * scale
    y = y * scale + bias
    return y * jax.nn.sigmoid(y)


def maxpool_ref(x, k):
    p = (k - 1) // 2
    return lax.reduce_window(x, -jnp.inf, lax.max,
                             window_dimensions=(1, k, k, 1),
                             window_strides=(1, 1, 1, 1),
                             padding=((0, 0), (p, p), (p, p), (0, 0)))


def sppcspc_ref(x, params):
    x0 = cbs_ref(x, params["cbs0"])
    x1 = cbs_ref(x, params["cbs1"])
    x1 = cbs_ref(x1, params["cbs2"])
    x1 = cbs_ref(x1, params["cbs3"])
    xc = jnp.concatenate([x1, maxpool_ref(x1, 5), maxpool_ref(x1, 9),
                          maxpool_ref(x1, 13)], axis=-1)
    xc = cbs_ref(xc, params["cbs8"])
    xc = cbs_ref(xc, params["cbs9"])
    xc = jnp.concatenate([xc, x0], axis=-1)
    return cbs_ref(xc, params["cbs11"])


if __name__ == "__main__":
    # torch input would be (2, 8, 16, 16) NCHW -> here NHWC (2, 16, 16, 8)
    B, C_in, C_out, H, W = 2, 8, 16, 16, 16

    key = jax.random.PRNGKey(0)
    kx, kp = jax.random.split(key)
    x = jax.random.normal(kx, (B, H, W, C_in), jnp.float32)
    params = init_sppcspc(kp, C_in, C_out)

    out = jax.jit(sppcspc_forward)(x, params)
    out = jax.block_until_ready(out)
    assert out.shape == (B, H, W, C_out), out.shape

    ref = jax.block_until_ready(sppcspc_ref(x, params))
    # bf16 MXU operands / bf16 intermediate activations -> looser tolerance than f32
    np.testing.assert_allclose(np.asarray(out), np.asarray(ref),
                               rtol=5e-2, atol=5e-2)
    print("KERNEL_OK")
</pallas_src>

<mosaic_0001>
module attributes {stable_mosaic.version = 11 : i64} {
  func.func @_mm_bias_silu_kernel(%arg0: i32, %arg1: memref<512x8xbf16, #tpu.memory_space<vmem>>, %arg2: memref<8x4xbf16, #tpu.memory_space<vmem>>, %arg3: memref<1x4xf32, #tpu.memory_space<vmem>>, %arg4: memref<512x4xbf16, #tpu.memory_space<vmem>>) attributes {dimension_semantics = [#tpu.dimension_semantics<parallel>], iteration_bounds = array<i64: 1>, scalar_prefetch = 0 : i64, scratch_operands = 0 : i64, tpu.core_type = #tpu.core_type<tc>, window_params = [{transform_indices = @transform_0, window_bounds = array<i64: 512, 8>}, {pipeline_mode = #tpu.pipeline_mode<synchronous>, transform_indices = @transform_1, window_bounds = array<i64: 8, 4>}, {pipeline_mode = #tpu.pipeline_mode<synchronous>, transform_indices = @transform_2, window_bounds = array<i64: 1, 4>}, {transform_indices = @transform_3, window_bounds = array<i64: 512, 4>}]} {
    %c0 = arith.constant 0 : index
    %c0_0 = arith.constant 0 : index
    %0 = vector.load %arg1[%c0, %c0_0] : memref<512x8xbf16, #tpu.memory_space<vmem>>, vector<512x8xbf16>
    %c0_1 = arith.constant 0 : index
    %c0_2 = arith.constant 0 : index
    %1 = vector.load %arg2[%c0_1, %c0_2] : memref<8x4xbf16, #tpu.memory_space<vmem>>, vector<8x4xbf16>
    %cst = arith.constant dense<0.000000e+00> : vector<512x4xf32>
    %2 = tpu.matmul %0, %1, %cst {dimension_numbers = #tpu.dot_dimension_numbers<[1], [0], [0], [1], [0, 0, 1, 1], [], []>} : vector<512x8xbf16>, vector<8x4xbf16>, vector<512x4xf32> -> vector<512x4xf32>
    %c0_3 = arith.constant 0 : index
    %c0_4 = arith.constant 0 : index
    %3 = vector.load %arg3[%c0_3, %c0_4] : memref<1x4xf32, #tpu.memory_space<vmem>>, vector<1x4xf32>
    %4 = vector.broadcast %3 : vector<1x4xf32> to vector<512x4xf32>
    %5 = arith.addf %2, %4 : vector<512x4xf32>
    %6 = arith.negf %5 : vector<512x4xf32>
    %7 = math.exp %6 : vector<512x4xf32>
    %cst_5 = arith.constant 1.000000e+00 : f32
    %8 = vector.broadcast %cst_5 : f32 to vector<512x4xf32>
    %9 = arith.addf %8, %7 : vector<512x4xf32>
    %10 = arith.divf %8, %9 : vector<512x4xf32>
    %11 = arith.mulf %5, %10 : vector<512x4xf32>
    %12 = arith.truncf %11 : vector<512x4xf32> to vector<512x4xbf16>
    %c0_6 = arith.constant 0 : index
    %c0_7 = arith.constant 0 : index
    %13 = vector.load %arg4[%c0_6, %c0_7] : memref<512x4xbf16, #tpu.memory_space<vmem>>, vector<512x4xbf16>
    tpu.vector_store %arg4[%c0_6, %c0_7], %12 {strides = array<i32>} : memref<512x4xbf16, #tpu.memory_space<vmem>>, vector<512x4xbf16>,
    return
  }
  func.func @transform_0(%arg0: i32) -> (i32, i32) {
    %c0_i32 = arith.constant 0 : i32
    %c0_i32_0 = arith.constant 0 : i32
    return %arg0, %c0_i32 : i32, i32
  }
  func.func @transform_1(%arg0: i32) -> (i32, i32) {
    %c0_i32 = arith.constant 0 : i32
    %c0_i32_0 = arith.constant 0 : i32
    %c0_i32_1 = arith.constant 0 : i32
    return %c0_i32, %c0_i32_0 : i32, i32
  }
  func.func @transform_2(%arg0: i32) -> (i32, i32) {
    %c0_i32 = arith.constant 0 : i32
    %c0_i32_0 = arith.constant 0 : i32
    %c0_i32_1 = arith.constant 0 : i32
    return %c0_i32, %c0_i32_0 : i32, i32
  }
  func.func @transform_3(%arg0: i32) -> (i32, i32) {
    %c0_i32 = arith.constant 0 : i32
    %c0_i32_0 = arith.constant 0 : i32
    return %arg0, %c0_i32 : i32, i32
  }
}

module attributes {stable_mosaic.version = 11 : i64} {
  func.func @_conv3x3_bn_silu_kernel(%arg0: i32, %arg1: memref<1x16x16x4xbf16, #tpu.memory_space<vmem>>, %arg2: memref<36x4xbf16, #tpu.memory_space<vmem>>, %arg3: memref<1x4xf32, #tpu.memory_space<vmem>>, %arg4: memref<1x256x4xbf16, #tpu.memory_space<vmem>>) attributes {dimension_semantics = [#tpu.dimension_semantics<parallel>], iteration_bounds = array<i64: 2>, scalar_prefetch = 0 : i64, scratch_operands = 0 : i64, tpu.core_type = #tpu.core_type<tc>, window_params = [{transform_indices = @transform_0, window_bounds = array<i64: 1, 16, 16, 4>}, {pipeline_mode = #tpu.pipeline_mode<synchronous>, transform_indices = @transform_1, window_bounds = array<i64: 36, 4>}, {pipeline_mode = #tpu.pipeline_mode<synchronous>, transform_indices = @transform_2, window_bounds = array<i64: 1, 4>}, {transform_indices = @transform_3, window_bounds = array<i64: 1, 256, 4>}]} {
    %c0 = arith.constant 0 : index
    %c0_0 = arith.constant 0 : index
    %c0_1 = arith.constant 0 : index
    %c0_2 = arith.constant 0 : index
    %0 = vector.load %arg1[%c0, %c0_0, %c0_1, %c0_2] : memref<1x16x16x4xbf16, #tpu.memory_space<vmem>>, vector<1x16x16x4xbf16>
    %1 = vector.shape_cast %0 : vector<1x16x16x4xbf16> to vector<16x16x4xbf16>
    %cst = arith.constant 0.000000e+00 : bf16
    %2 = vector.broadcast %cst : bf16 to vector<1x16x4xbf16>
    %3 = tpu.concatenate %2, %1, %2 in 0 : vector<1x16x4xbf16>, vector<16x16x4xbf16>, vector<1x16x4xbf16> -> vector<18x16x4xbf16>
    %cst_3 = arith.constant 0.000000e+00 : bf16
    %4 = vector.broadcast %cst_3 : bf16 to vector<18x1x4xbf16>
    %5 = tpu.concatenate %4, %3, %4 in 1 : vector<18x1x4xbf16>, vector<18x16x4xbf16>, vector<18x1x4xbf16> -> vector<18x18x4xbf16>
    %6 = vector.extract_strided_slice %5 {offsets = [0, 0, 0], sizes = [16, 16, 4], strides = [1, 1, 1]} : vector<18x18x4xbf16> to vector<16x16x4xbf16>
    %7 = vector.extract_strided_slice %5 {offsets = [0, 1, 0], sizes = [16, 16, 4], strides = [1, 1, 1]} : vector<18x18x4xbf16> to vector<16x16x4xbf16>
    %8 = vector.extract_strided_slice %5 {offsets = [0, 2, 0], sizes = [16, 16, 4], strides = [1, 1, 1]} : vector<18x18x4xbf16> to vector<16x16x4xbf16>
    %9 = vector.extract_strided_slice %5 {offsets = [1, 0, 0], sizes = [16, 16, 4], strides = [1, 1, 1]} : vector<18x18x4xbf16> to vector<16x16x4xbf16>
    %10 = vector.extract_strided_slice %5 {offsets = [1, 1, 0], sizes = [16, 16, 4], strides = [1, 1, 1]} : vector<18x18x4xbf16> to vector<16x16x4xbf16>
    %11 = vector.extract_strided_slice %5 {offsets = [1, 2, 0], sizes = [16, 16, 4], strides = [1, 1, 1]} : vector<18x18x4xbf16> to vector<16x16x4xbf16>
    %12 = vector.extract_strided_slice %5 {offsets = [2, 0, 0], sizes = [16, 16, 4], strides = [1, 1, 1]} : vector<18x18x4xbf16> to vector<16x16x4xbf16>
    %13 = vector.extract_strided_slice %5 {offsets = [2, 1, 0], sizes = [16, 16, 4], strides = [1, 1, 1]} : vector<18x18x4xbf16> to vector<16x16x4xbf16>
    %14 = vector.extract_strided_slice %5 {offsets = [2, 2, 0], sizes = [16, 16, 4], strides = [1, 1, 1]} : vector<18x18x4xbf16> to vector<16x16x4xbf16>
    %15 = tpu.concatenate %6, %7, %8, %9, %10, %11, %12, %13, %14 in 2 : vector<16x16x4xbf16>, vector<16x16x4xbf16>, vector<16x16x4xbf16>, vector<16x16x4xbf16>, vector<16x16x4xbf16>, vector<16x16x4xbf16>, vector<16x16x4xbf16>, vector<16x16x4xbf16>, vector<16x16x4xbf16> -> vector<16x16x36xbf16>
    %16 = vector.shape_cast %15 : vector<16x16x36xbf16> to vector<256x36xbf16>
    %c0_4 = arith.constant 0 : index
    %c0_5 = arith.constant 0 : index
    %17 = vector.load %arg2[%c0_4, %c0_5] : memref<36x4xbf16, #tpu.memory_space<vmem>>, vector<36x4xbf16>
    %cst_6 = arith.constant dense<0.000000e+00> : vector<256x4xf32>
    %18 = tpu.matmul %16, %17, %cst_6 {dimension_numbers = #tpu.dot_dimension_numbers<[1], [0], [0], [1], [0, 0, 1, 1], [], []>} : vector<256x36xbf16>, vector<36x4xbf16>, vector<256x4xf32> -> vector<256x4xf32>
    %c0_7 = arith.constant 0 : index
    %c0_8 = arith.constant 0 : index
    %19 = vector.load %arg3[%c0_7, %c0_8] : memref<1x4xf32, #tpu.memory_space<vmem>>, vector<1x4xf32>
    %20 = vector.broadcast %19 : vector<1x4xf32> to vector<256x4xf32>
    %21 = arith.addf %18, %20 : vector<256x4xf32>
    %22 = arith.negf %21 : vector<256x4xf32>
    %23 = math.exp %22 : vector<256x4xf32>
    %cst_9 = arith.constant 1.000000e+00 : f32
    %24 = vector.broadcast %cst_9 : f32 to vector<256x4xf32>
    %25 = arith.addf %24, %23 : vector<256x4xf32>
    %26 = arith.divf %24, %25 : vector<256x4xf32>
    %27 = arith.mulf %21, %26 : vector<256x4xf32>
    %28 = arith.truncf %27 : vector<256x4xf32> to vector<256x4xbf16>
    %c0_10 = arith.constant 0 : index
    %c0_11 = arith.constant 0 : index
    %c0_12 = arith.constant 0 : index
    %29 = vector.load %arg4[%c0_10, %c0_11, %c0_12] : memref<1x256x4xbf16, #tpu.memory_space<vmem>>, vector<1x256x4xbf16>
    %30 = vector.shape_cast %29 : vector<1x256x4xbf16> to vector<256x4xbf16>
    %31 = vector.shape_cast %28 : vector<256x4xbf16> to vector<1x256x4xbf16>
    tpu.vector_store %arg4[%c0_10, %c0_11, %c0_12], %31 {strides = array<i32>} : memref<1x256x4xbf16, #tpu.memory_space<vmem>>, vector<1x256x4xbf16>,
    return
  }
  func.func @transform_0(%arg0: i32) -> (i32, i32, i32, i32) {
    %c0_i32 = arith.constant 0 : i32
    %c0_i32_0 = arith.constant 0 : i32
    %c0_i32_1 = arith.constant 0 : i32
    %c0_i32_2 = arith.constant 0 : i32
    return %arg0, %c0_i32, %c0_i32_0, %c0_i32_1 : i32, i32, i32, i32
  }
  func.func @transform_1(%arg0: i32) -> (i32, i32) {
    %c0_i32 = arith.constant 0 : i32
    %c0_i32_0 = arith.constant 0 : i32
    %c0_i32_1 = arith.constant 0 : i32
    return %c0_i32, %c0_i32_0 : i32, i32
  }
  func.func @transform_2(%arg0: i32) -> (i32, i32) {
    %c0_i32 = arith.constant 0 : i32
    %c0_i32_0 = arith.constant 0 : i32
    %c0_i32_1 = arith.constant 0 : i32
    return %c0_i32, %c0_i32_0 : i32, i32
  }
  func.func @transform_3(%arg0: i32) -> (i32, i32, i32) {
    %c0_i32 = arith.constant 0 : i32
    %c0_i32_0 = arith.constant 0 : i32
    %c0_i32_1 = arith.constant 0 : i32
    return %arg0, %c0_i32, %c0_i32_0 : i32, i32, i32
  }
}

module attributes {stable_mosaic.version = 11 : i64} {
  func.func @_mm_bias_silu_kernel(%arg0: i32, %arg1: memref<512x4xbf16, #tpu.memory_space<vmem>>, %arg2: memref<4x4xbf16, #tpu.memory_space<vmem>>, %arg3: memref<1x4xf32, #tpu.memory_space<vmem>>, %arg4: memref<512x4xbf16, #tpu.memory_space<vmem>>) attributes {dimension_semantics = [#tpu.dimension_semantics<parallel>], iteration_bounds = array<i64: 1>, scalar_prefetch = 0 : i64, scratch_operands = 0 : i64, tpu.core_type = #tpu.core_type<tc>, window_params = [{transform_indices = @transform_0, window_bounds = array<i64: 512, 4>}, {pipeline_mode = #tpu.pipeline_mode<synchronous>, transform_indices = @transform_1, window_bounds = array<i64: 4, 4>}, {pipeline_mode = #tpu.pipeline_mode<synchronous>, transform_indices = @transform_2, window_bounds = array<i64: 1, 4>}, {transform_indices = @transform_3, window_bounds = array<i64: 512, 4>}]} {
    %c0 = arith.constant 0 : index
    %c0_0 = arith.constant 0 : index
    %0 = vector.load %arg1[%c0, %c0_0] : memref<512x4xbf16, #tpu.memory_space<vmem>>, vector<512x4xbf16>
    %c0_1 = arith.constant 0 : index
    %c0_2 = arith.constant 0 : index
    %1 = vector.load %arg2[%c0_1, %c0_2] : memref<4x4xbf16, #tpu.memory_space<vmem>>, vector<4x4xbf16>
    %cst = arith.constant dense<0.000000e+00> : vector<512x4xf32>
    %2 = tpu.matmul %0, %1, %cst {dimension_numbers = #tpu.dot_dimension_numbers<[1], [0], [0], [1], [0, 0, 1, 1], [], []>} : vector<512x4xbf16>, vector<4x4xbf16>, vector<512x4xf32> -> vector<512x4xf32>
    %c0_3 = arith.constant 0 : index
    %c0_4 = arith.constant 0 : index
    %3 = vector.load %arg3[%c0_3, %c0_4] : memref<1x4xf32, #tpu.memory_space<vmem>>, vector<1x4xf32>
    %4 = vector.broadcast %3 : vector<1x4xf32> to vector<512x4xf32>
    %5 = arith.addf %2, %4 : vector<512x4xf32>
    %6 = arith.negf %5 : vector<512x4xf32>
    %7 = math.exp %6 : vector<512x4xf32>
    %cst_5 = arith.constant 1.000000e+00 : f32
    %8 = vector.broadcast %cst_5 : f32 to vector<512x4xf32>
    %9 = arith.addf %8, %7 : vector<512x4xf32>
    %10 = arith.divf %8, %9 : vector<512x4xf32>
    %11 = arith.mulf %5, %10 : vector<512x4xf32>
    %12 = arith.truncf %11 : vector<512x4xf32> to vector<512x4xbf16>
    %c0_6 = arith.constant 0 : index
    %c0_7 = arith.constant 0 : index
    %13 = vector.load %arg4[%c0_6, %c0_7] : memref<512x4xbf16, #tpu.memory_space<vmem>>, vector<512x4xbf16>
    tpu.vector_store %arg4[%c0_6, %c0_7], %12 {strides = array<i32>} : memref<512x4xbf16, #tpu.memory_space<vmem>>, vector<512x4xbf16>,
    return
  }
  func.func @transform_0(%arg0: i32) -> (i32, i32) {
    %c0_i32 = arith.constant 0 : i32
    %c0_i32_0 = arith.constant 0 : i32
    return %arg0, %c0_i32 : i32, i32
  }
  func.func @transform_1(%arg0: i32) -> (i32, i32) {
    %c0_i32 = arith.constant 0 : i32
    %c0_i32_0 = arith.constant 0 : i32
    %c0_i32_1 = arith.constant 0 : i32
    return %c0_i32, %c0_i32_0 : i32, i32
  }
  func.func @transform_2(%arg0: i32) -> (i32, i32) {
    %c0_i32 = arith.constant 0 : i32
    %c0_i32_0 = arith.constant 0 : i32
    %c0_i32_1 = arith.constant 0 : i32
    return %c0_i32, %c0_i32_0 : i32, i32
  }
  func.func @transform_3(%arg0: i32) -> (i32, i32) {
    %c0_i32 = arith.constant 0 : i32
    %c0_i32_0 = arith.constant 0 : i32
    return %arg0, %c0_i32 : i32, i32
  }
}

module attributes {stable_mosaic.version = 11 : i64} {
  func.func @_spp_pool_concat_kernel(%arg0: i32, %arg1: memref<1x16x16x4xbf16, #tpu.memory_space<vmem>>, %arg2: memref<1x16x16x16xbf16, #tpu.memory_space<vmem>>) attributes {dimension_semantics = [#tpu.dimension_semantics<parallel>], iteration_bounds = array<i64: 2>, scalar_prefetch = 0 : i64, scratch_operands = 0 : i64, tpu.core_type = #tpu.core_type<tc>, window_params = [{transform_indices = @transform_0, window_bounds = array<i64: 1, 16, 16, 4>}, {transform_indices = @transform_1, window_bounds = array<i64: 1, 16, 16, 16>}]} {
    %c0 = arith.constant 0 : index
    %c0_0 = arith.constant 0 : index
    %c0_1 = arith.constant 0 : index
    %c0_2 = arith.constant 0 : index
    %0 = vector.load %arg1[%c0, %c0_0, %c0_1, %c0_2] : memref<1x16x16x4xbf16, #tpu.memory_space<vmem>>, vector<1x16x16x4xbf16>
    %1 = vector.shape_cast %0 : vector<1x16x16x4xbf16> to vector<16x16x4xbf16>
    %cst = arith.constant 0xFF80 : bf16
    %2 = vector.broadcast %cst : bf16 to vector<6x16x4xbf16>
    %3 = tpu.concatenate %2, %1, %2 in 0 : vector<6x16x4xbf16>, vector<16x16x4xbf16>, vector<6x16x4xbf16> -> vector<28x16x4xbf16>
    %cst_3 = arith.constant 0xFF80 : bf16
    %4 = vector.broadcast %cst_3 : bf16 to vector<28x6x4xbf16>
    %5 = tpu.concatenate %4, %3, %4 in 1 : vector<28x6x4xbf16>, vector<28x16x4xbf16>, vector<28x6x4xbf16> -> vector<28x28x4xbf16>
    %6 = vector.extract_strided_slice %5 {offsets = [0, 0, 0], sizes = [24, 28, 4], strides = [1, 1, 1]} : vector<28x28x4xbf16> to vector<24x28x4xbf16>
    %7 = vector.extract_strided_slice %5 {offsets = [1, 0, 0], sizes = [24, 28, 4], strides = [1, 1, 1]} : vector<28x28x4xbf16> to vector<24x28x4xbf16>
    %8 = arith.maximumf %6, %7 : vector<24x28x4xbf16>
    %9 = vector.extract_strided_slice %5 {offsets = [2, 0, 0], sizes = [24, 28, 4], strides = [1, 1, 1]} : vector<28x28x4xbf16> to vector<24x28x4xbf16>
    %10 = arith.maximumf %8, %9 : vector<24x28x4xbf16>
    %11 = vector.extract_strided_slice %5 {offsets = [3, 0, 0], sizes = [24, 28, 4], strides = [1, 1, 1]} : vector<28x28x4xbf16> to vector<24x28x4xbf16>
    %12 = arith.maximumf %10, %11 : vector<24x28x4xbf16>
    %13 = vector.extract_strided_slice %5 {offsets = [4, 0, 0], sizes = [24, 28, 4], strides = [1, 1, 1]} : vector<28x28x4xbf16> to vector<24x28x4xbf16>
    %14 = arith.maximumf %12, %13 : vector<24x28x4xbf16>
    %15 = vector.extract_strided_slice %14 {offsets = [4, 0, 0], sizes = [16, 28, 4], strides = [1, 1, 1]} : vector<24x28x4xbf16> to vector<16x28x4xbf16>
    %16 = vector.extract_strided_slice %14 {offsets = [2, 0, 0], sizes = [16, 28, 4], strides = [1, 1, 1]} : vector<24x28x4xbf16> to vector<16x28x4xbf16>
    %17 = vector.extract_strided_slice %14 {offsets = [6, 0, 0], sizes = [16, 28, 4], strides = [1, 1, 1]} : vector<24x28x4xbf16> to vector<16x28x4xbf16>
    %18 = arith.maximumf %16, %17 : vector<16x28x4xbf16>
    %19 = vector.extract_strided_slice %14 {offsets = [0, 0, 0], sizes = [16, 28, 4], strides = [1, 1, 1]} : vector<24x28x4xbf16> to vector<16x28x4xbf16>
    %20 = vector.extract_strided_slice %14 {offsets = [4, 0, 0], sizes = [16, 28, 4], strides = [1, 1, 1]} : vector<24x28x4xbf16> to vector<16x28x4xbf16>
    %21 = arith.maximumf %19, %20 : vector<16x28x4xbf16>
    %22 = vector.extract_strided_slice %14 {offsets = [8, 0, 0], sizes = [16, 28, 4], strides = [1, 1, 1]} : vector<24x28x4xbf16> to vector<16x28x4xbf16>
    %23 = arith.maximumf %21, %22 : vector<16x28x4xbf16>
    %24 = vector.extract_strided_slice %15 {offsets = [0, 0, 0], sizes = [16, 24, 4], strides = [1, 1, 1]} : vector<16x28x4xbf16> to vector<16x24x4xbf16>
    %25 = vector.extract_strided_slice %15 {offsets = [0, 1, 0], sizes = [16, 24, 4], strides = [1, 1, 1]} : vector<16x28x4xbf16> to vector<16x24x4xbf16>
    %26 = arith.maximumf %24, %25 : vector<16x24x4xbf16>
    %27 = vector.extract_strided_slice %15 {offsets = [0, 2, 0], sizes = [16, 24, 4], strides = [1, 1, 1]} : vector<16x28x4xbf16> to vector<16x24x4xbf16>
    %28 = arith.maximumf %26, %27 : vector<16x24x4xbf16>
    %29 = vector.extract_strided_slice %15 {offsets = [0, 3, 0], sizes = [16, 24, 4], strides = [1, 1, 1]} : vector<16x28x4xbf16> to vector<16x24x4xbf16>
    %30 = arith.maximumf %28, %29 : vector<16x24x4xbf16>
    %31 = vector.extract_strided_slice %15 {offsets = [0, 4, 0], sizes = [16, 24, 4], strides = [1, 1, 1]} : vector<16x28x4xbf16> to vector<16x24x4xbf16>
    %32 = arith.maximumf %30, %31 : vector<16x24x4xbf16>
    %33 = vector.extract_strided_slice %18 {offsets = [0, 0, 0], sizes = [16, 24, 4], strides = [1, 1, 1]} : vector<16x28x4xbf16> to vector<16x24x4xbf16>
    %34 = vector.extract_strided_slice %18 {offsets = [0, 1, 0], sizes = [16, 24, 4], strides = [1, 1, 1]} : vector<16x28x4xbf16> to vector<16x24x4xbf16>
    %35 = arith.maximumf %33, %34 : vector<16x24x4xbf16>
    %36 = vector.extract_strided_slice %18 {offsets = [0, 2, 0], sizes = [16, 24, 4], strides = [1, 1, 1]} : vector<16x28x4xbf16> to vector<16x24x4xbf16>
    %37 = arith.maximumf %35, %36 : vector<16x24x4xbf16>
    %38 = vector.extract_strided_slice %18 {offsets = [0, 3, 0], sizes = [16, 24, 4], strides = [1, 1, 1]} : vector<16x28x4xbf16> to vector<16x24x4xbf16>
    %39 = arith.maximumf %37, %38 : vector<16x24x4xbf16>
    %40 = vector.extract_strided_slice %18 {offsets = [0, 4, 0], sizes = [16, 24, 4], strides = [1, 1, 1]} : vector<16x28x4xbf16> to vector<16x24x4xbf16>
    %41 = arith.maximumf %39, %40 : vector<16x24x4xbf16>
    %42 = vector.extract_strided_slice %23 {offsets = [0, 0, 0], sizes = [16, 24, 4], strides = [1, 1, 1]} : vector<16x28x4xbf16> to vector<16x24x4xbf16>
    %43 = vector.extract_strided_slice %23 {offsets = [0, 1, 0], sizes = [16, 24, 4], strides = [1, 1, 1]} : vector<16x28x4xbf16> to vector<16x24x4xbf16>
    %44 = arith.maximumf %42, %43 : vector<16x24x4xbf16>
    %45 = vector.extract_strided_slice %23 {offsets = [0, 2, 0], sizes = [16, 24, 4], strides = [1, 1, 1]} : vector<16x28x4xbf16> to vector<16x24x4xbf16>
    %46 = arith.maximumf %44, %45 : vector<16x24x4xbf16>
    %47 = vector.extract_strided_slice %23 {offsets = [0, 3, 0], sizes = [16, 24, 4], strides = [1, 1, 1]} : vector<16x28x4xbf16> to vector<16x24x4xbf16>
    %48 = arith.maximumf %46, %47 : vector<16x24x4xbf16>
    %49 = vector.extract_strided_slice %23 {offsets = [0, 4, 0], sizes = [16, 24, 4], strides = [1, 1, 1]} : vector<16x28x4xbf16> to vector<16x24x4xbf16>
    %50 = arith.maximumf %48, %49 : vector<16x24x4xbf16>
    %51 = vector.extract_strided_slice %32 {offsets = [0, 4, 0], sizes = [16, 16, 4], strides = [1, 1, 1]} : vector<16x24x4xbf16> to vector<16x16x4xbf16>
    %52 = vector.extract_strided_slice %41 {offsets = [0, 2, 0], sizes = [16, 16, 4], strides = [1, 1, 1]} : vector<16x24x4xbf16> to vector<16x16x4xbf16>
    %53 = vector.extract_strided_slice %41 {offsets = [0, 6, 0], sizes = [16, 16, 4], strides = [1, 1, 1]} : vector<16x24x4xbf16> to vector<16x16x4xbf16>
    %54 = arith.maximumf %52, %53 : vector<16x16x4xbf16>
    %55 = vector.extract_strided_slice %50 {offsets = [0, 0, 0], sizes = [16, 16, 4], strides = [1, 1, 1]} : vector<16x24x4xbf16> to vector<16x16x4xbf16>
    %56 = vector.extract_strided_slice %50 {offsets = [0, 4, 0], sizes = [16, 16, 4], strides = [1, 1, 1]} : vector<16x24x4xbf16> to vector<16x16x4xbf16>
    %57 = arith.maximumf %55, %56 : vector<16x16x4xbf16>
    %58 = vector.extract_strided_slice %50 {offsets = [0, 8, 0], sizes = [16, 16, 4], strides = [1, 1, 1]} : vector<16x24x4xbf16> to vector<16x16x4xbf16>
    %59 = arith.maximumf %57, %58 : vector<16x16x4xbf16>
    %c0_4 = arith.constant 0 : index
    %c0_5 = arith.constant 0 : index
    %c0_6 = arith.constant 0 : index
    %c0_7 = arith.constant 0 : index
    %60 = vector.load %arg2[%c0_4, %c0_5, %c0_6, %c0_7] : memref<1x16x16x16xbf16, #tpu.memory_space<vmem>>, vector<1x16x16x4xbf16>
    %61 = vector.shape_cast %60 : vector<1x16x16x4xbf16> to vector<16x16x4xbf16>
    %62 = vector.shape_cast %1 : vector<16x16x4xbf16> to vector<1x16x16x4xbf16>
    tpu.vector_store %arg2[%c0_4, %c0_5, %c0_6, %c0_7], %62 {strides = array<i32>} : memref<1x16x16x16xbf16, #tpu.memory_space<vmem>>, vector<1x16x16x4xbf16>,
    %c0_8 = arith.constant 0 : index
    %c0_9 = arith.constant 0 : index
    %c0_10 = arith.constant 0 : index
    %c4 = arith.constant 4 : index
    %63 = vector.load %arg2[%c0_8, %c0_9, %c0_10, %c4] : memref<1x16x16x16xbf16, #tpu.memory_space<vmem>>, vector<1x16x16x4xbf16>
    %64 = vector.shape_cast %63 : vector<1x16x16x4xbf16> to vector<16x16x4xbf16>
    %65 = vector.shape_cast %51 : vector<16x16x4xbf16> to vector<1x16x16x4xbf16>
    tpu.vector_store %arg2[%c0_8, %c0_9, %c0_10, %c4], %65 {strides = array<i32>} : memref<1x16x16x16xbf16, #tpu.memory_space<vmem>>, vector<1x16x16x4xbf16>,
    %c0_11 = arith.constant 0 : index
    %c0_12 = arith.constant 0 : index
    %c0_13 = arith.constant 0 : index
    %c8 = arith.constant 8 : index
    %66 = vector.load %arg2[%c0_11, %c0_12, %c0_13, %c8] : memref<1x16x16x16xbf16, #tpu.memory_space<vmem>>, vector<1x16x16x4xbf16>
    %67 = vector.shape_cast %66 : vector<1x16x16x4xbf16> to vector<16x16x4xbf16>
    %68 = vector.shape_cast %54 : vector<16x16x4xbf16> to vector<1x16x16x4xbf16>
    tpu.vector_store %arg2[%c0_11, %c0_12, %c0_13, %c8], %68 {strides = array<i32>} : memref<1x16x16x16xbf16, #tpu.memory_space<vmem>>, vector<1x16x16x4xbf16>,
    %c0_14 = arith.constant 0 : index
    %c0_15 = arith.constant 0 : index
    %c0_16 = arith.constant 0 : index
    %c12 = arith.constant 12 : index
    %69 = vector.load %arg2[%c0_14, %c0_15, %c0_16, %c12] : memref<1x16x16x16xbf16, #tpu.memory_space<vmem>>, vector<1x16x16x4xbf16>
    %70 = vector.shape_cast %69 : vector<1x16x16x4xbf16> to vector<16x16x4xbf16>
    %71 = vector.shape_cast %59 : vector<16x16x4xbf16> to vector<1x16x16x4xbf16>
    tpu.vector_store %arg2[%c0_14, %c0_15, %c0_16, %c12], %71 {strides = array<i32>} : memref<1x16x16x16xbf16, #tpu.memory_space<vmem>>, vector<1x16x16x4xbf16>,
    return
  }
  func.func @transform_0(%arg0: i32) -> (i32, i32, i32, i32) {
    %c0_i32 = arith.constant 0 : i32
    %c0_i32_0 = arith.constant 0 : i32
    %c0_i32_1 = arith.constant 0 : i32
    %c0_i32_2 = arith.constant 0 : i32
    return %arg0, %c0_i32, %c0_i32_0, %c0_i32_1 : i32, i32, i32, i32
  }
  func.func @transform_1(%arg0: i32) -> (i32, i32, i32, i32) {
    %c0_i32 = arith.constant 0 : i32
    %c0_i32_0 = arith.constant 0 : i32
    %c0_i32_1 = arith.constant 0 : i32
    %c0_i32_2 = arith.constant 0 : i32
    return %arg0, %c0_i32, %c0_i32_0, %c0_i32_1 : i32, i32, i32, i32
  }
}

module attributes {stable_mosaic.version = 11 : i64} {
  func.func @_mm_bias_silu_kernel(%arg0: i32, %arg1: memref<512x16xbf16, #tpu.memory_space<vmem>>, %arg2: memref<16x4xbf16, #tpu.memory_space<vmem>>, %arg3: memref<1x4xf32, #tpu.memory_space<vmem>>, %arg4: memref<512x4xbf16, #tpu.memory_space<vmem>>) attributes {dimension_semantics = [#tpu.dimension_semantics<parallel>], iteration_bounds = array<i64: 1>, scalar_prefetch = 0 : i64, scratch_operands = 0 : i64, tpu.core_type = #tpu.core_type<tc>, window_params = [{transform_indices = @transform_0, window_bounds = array<i64: 512, 16>}, {pipeline_mode = #tpu.pipeline_mode<synchronous>, transform_indices = @transform_1, window_bounds = array<i64: 16, 4>}, {pipeline_mode = #tpu.pipeline_mode<synchronous>, transform_indices = @transform_2, window_bounds = array<i64: 1, 4>}, {transform_indices = @transform_3, window_bounds = array<i64: 512, 4>}]} {
    %c0 = arith.constant 0 : index
    %c0_0 = arith.constant 0 : index
    %0 = vector.load %arg1[%c0, %c0_0] : memref<512x16xbf16, #tpu.memory_space<vmem>>, vector<512x16xbf16>
    %c0_1 = arith.constant 0 : index
    %c0_2 = arith.constant 0 : index
    %1 = vector.load %arg2[%c0_1, %c0_2] : memref<16x4xbf16, #tpu.memory_space<vmem>>, vector<16x4xbf16>
    %cst = arith.constant dense<0.000000e+00> : vector<512x4xf32>
    %2 = tpu.matmul %0, %1, %cst {dimension_numbers = #tpu.dot_dimension_numbers<[1], [0], [0], [1], [0, 0, 1, 1], [], []>} : vector<512x16xbf16>, vector<16x4xbf16>, vector<512x4xf32> -> vector<512x4xf32>
    %c0_3 = arith.constant 0 : index
    %c0_4 = arith.constant 0 : index
    %3 = vector.load %arg3[%c0_3, %c0_4] : memref<1x4xf32, #tpu.memory_space<vmem>>, vector<1x4xf32>
    %4 = vector.broadcast %3 : vector<1x4xf32> to vector<512x4xf32>
    %5 = arith.addf %2, %4 : vector<512x4xf32>
    %6 = arith.negf %5 : vector<512x4xf32>
    %7 = math.exp %6 : vector<512x4xf32>
    %cst_5 = arith.constant 1.000000e+00 : f32
    %8 = vector.broadcast %cst_5 : f32 to vector<512x4xf32>
    %9 = arith.addf %8, %7 : vector<512x4xf32>
    %10 = arith.divf %8, %9 : vector<512x4xf32>
    %11 = arith.mulf %5, %10 : vector<512x4xf32>
    %12 = arith.truncf %11 : vector<512x4xf32> to vector<512x4xbf16>
    %c0_6 = arith.constant 0 : index
    %c0_7 = arith.constant 0 : index
    %13 = vector.load %arg4[%c0_6, %c0_7] : memref<512x4xbf16, #tpu.memory_space<vmem>>, vector<512x4xbf16>
    tpu.vector_store %arg4[%c0_6, %c0_7], %12 {strides = array<i32>} : memref<512x4xbf16, #tpu.memory_space<vmem>>, vector<512x4xbf16>,
    return
  }
  func.func @transform_0(%arg0: i32) -> (i32, i32) {
    %c0_i32 = arith.constant 0 : i32
    %c0_i32_0 = arith.constant 0 : i32
    return %arg0, %c0_i32 : i32, i32
  }
  func.func @transform_1(%arg0: i32) -> (i32, i32) {
    %c0_i32 = arith.constant 0 : i32
    %c0_i32_0 = arith.constant 0 : i32
    %c0_i32_1 = arith.constant 0 : i32
    return %c0_i32, %c0_i32_0 : i32, i32
  }
  func.func @transform_2(%arg0: i32) -> (i32, i32) {
    %c0_i32 = arith.constant 0 : i32
    %c0_i32_0 = arith.constant 0 : i32
    %c0_i32_1 = arith.constant 0 : i32
    return %c0_i32, %c0_i32_0 : i32, i32
  }
  func.func @transform_3(%arg0: i32) -> (i32, i32) {
    %c0_i32 = arith.constant 0 : i32
    %c0_i32_0 = arith.constant 0 : i32
    return %arg0, %c0_i32 : i32, i32
  }
}

module attributes {stable_mosaic.version = 11 : i64} {
  func.func @_mm2_bias_silu_kernel(%arg0: i32, %arg1: memref<512x4xbf16, #tpu.memory_space<vmem>>, %arg2: memref<512x4xbf16, #tpu.memory_space<vmem>>, %arg3: memref<4x16xbf16, #tpu.memory_space<vmem>>, %arg4: memref<4x16xbf16, #tpu.memory_space<vmem>>, %arg5: memref<1x16xf32, #tpu.memory_space<vmem>>, %arg6: memref<512x16xf32, #tpu.memory_space<vmem>>) attributes {dimension_semantics = [#tpu.dimension_semantics<parallel>], iteration_bounds = array<i64: 1>, scalar_prefetch = 0 : i64, scratch_operands = 0 : i64, tpu.core_type = #tpu.core_type<tc>, window_params = [{transform_indices = @transform_0, window_bounds = array<i64: 512, 4>}, {transform_indices = @transform_1, window_bounds = array<i64: 512, 4>}, {pipeline_mode = #tpu.pipeline_mode<synchronous>, transform_indices = @transform_2, window_bounds = array<i64: 4, 16>}, {pipeline_mode = #tpu.pipeline_mode<synchronous>, transform_indices = @transform_3, window_bounds = array<i64: 4, 16>}, {pipeline_mode = #tpu.pipeline_mode<synchronous>, transform_indices = @transform_4, window_bounds = array<i64: 1, 16>}, {transform_indices = @transform_5, window_bounds = array<i64: 512, 16>}]} {
    %c0 = arith.constant 0 : index
    %c0_0 = arith.constant 0 : index
    %0 = vector.load %arg1[%c0, %c0_0] : memref<512x4xbf16, #tpu.memory_space<vmem>>, vector<512x4xbf16>
    %c0_1 = arith.constant 0 : index
    %c0_2 = arith.constant 0 : index
    %1 = vector.load %arg3[%c0_1, %c0_2] : memref<4x16xbf16, #tpu.memory_space<vmem>>, vector<4x16xbf16>
    %cst = arith.constant dense<0.000000e+00> : vector<512x16xf32>
    %2 = tpu.matmul %0, %1, %cst {dimension_numbers = #tpu.dot_dimension_numbers<[1], [0], [0], [1], [0, 0, 1, 1], [], []>} : vector<512x4xbf16>, vector<4x16xbf16>, vector<512x16xf32> -> vector<512x16xf32>
    %c0_3 = arith.constant 0 : index
    %c0_4 = arith.constant 0 : index
    %3 = vector.load %arg2[%c0_3, %c0_4] : memref<512x4xbf16, #tpu.memory_space<vmem>>, vector<512x4xbf16>
    %c0_5 = arith.constant 0 : index
    %c0_6 = arith.constant 0 : index
    %4 = vector.load %arg4[%c0_5, %c0_6] : memref<4x16xbf16, #tpu.memory_space<vmem>>, vector<4x16xbf16>
    %cst_7 = arith.constant dense<0.000000e+00> : vector<512x16xf32>
    %5 = tpu.matmul %3, %4, %cst_7 {dimension_numbers = #tpu.dot_dimension_numbers<[1], [0], [0], [1], [0, 0, 1, 1], [], []>} : vector<512x4xbf16>, vector<4x16xbf16>, vector<512x16xf32> -> vector<512x16xf32>
    %6 = arith.addf %2, %5 : vector<512x16xf32>
    %c0_8 = arith.constant 0 : index
    %c0_9 = arith.constant 0 : index
    %7 = vector.load %arg5[%c0_8, %c0_9] : memref<1x16xf32, #tpu.memory_space<vmem>>, vector<1x16xf32>
    %8 = vector.broadcast %7 : vector<1x16xf32> to vector<512x16xf32>
    %9 = arith.addf %6, %8 : vector<512x16xf32>
    %10 = arith.negf %9 : vector<512x16xf32>
    %11 = math.exp %10 : vector<512x16xf32>
    %cst_10 = arith.constant 1.000000e+00 : f32
    %12 = vector.broadcast %cst_10 : f32 to vector<512x16xf32>
    %13 = arith.addf %12, %11 : vector<512x16xf32>
    %14 = arith.divf %12, %13 : vector<512x16xf32>
    %15 = arith.mulf %9, %14 : vector<512x16xf32>
    %c0_11 = arith.constant 0 : index
    %c0_12 = arith.constant 0 : index
    %16 = vector.load %arg6[%c0_11, %c0_12] : memref<512x16xf32, #tpu.memory_space<vmem>>, vector<512x16xf32>
    tpu.vector_store %arg6[%c0_11, %c0_12], %15 {strides = array<i32>} : memref<512x16xf32, #tpu.memory_space<vmem>>, vector<512x16xf32>,
    return
  }
  func.func @transform_0(%arg0: i32) -> (i32, i32) {
    %c0_i32 = arith.constant 0 : i32
    %c0_i32_0 = arith.constant 0 : i32
    return %arg0, %c0_i32 : i32, i32
  }
  func.func @transform_1(%arg0: i32) -> (i32, i32) {
    %c0_i32 = arith.constant 0 : i32
    %c0_i32_0 = arith.constant 0 : i32
    return %arg0, %c0_i32 : i32, i32
  }
  func.func @transform_2(%arg0: i32) -> (i32, i32) {
    %c0_i32 = arith.constant 0 : i32
    %c0_i32_0 = arith.constant 0 : i32
    %c0_i32_1 = arith.constant 0 : i32
    return %c0_i32, %c0_i32_0 : i32, i32
  }
  func.func @transform_3(%arg0: i32) -> (i32, i32) {
    %c0_i32 = arith.constant 0 : i32
    %c0_i32_0 = arith.constant 0 : i32
    %c0_i32_1 = arith.constant 0 : i32
    return %c0_i32, %c0_i32_0 : i32, i32
  }
  func.func @transform_4(%arg0: i32) -> (i32, i32) {
    %c0_i32 = arith.constant 0 : i32
    %c0_i32_0 = arith.constant 0 : i32
    %c0_i32_1 = arith.constant 0 : i32
    return %c0_i32, %c0_i32_0 : i32, i32
  }
  func.func @transform_5(%arg0: i32) -> (i32, i32) {
    %c0_i32 = arith.constant 0 : i32
    %c0_i32_0 = arith.constant 0 : i32
    return %arg0, %c0_i32 : i32, i32
  }
}

</mosaic_0001>

<bundles_post_ra>
// kernel: sppcspc_forward.8
= control target key start
LH: loop header
LB: loop body
LE: loop exit
PB: predicated region body
PF: predicated region fallthrough
CT: control target
= control target key end

     0   :  { %vm344_vm0 = vcmask 1043456   ;;  %vm247_vm1 = vcmask 64512   ;;  %vm1341_vm2 = vcmask 27648   ;;  %s2905_s1 = inlined_call_operand.vmem [shape: bf16[8,4], index: 1, kind: input, shape index: {}]   ;;  %s2906_s0 = inlined_call_operand.vmem [shape: bf16[512,8], index: 0, kind: input, shape index: {}]   ;;  %s2907_s2 = inlined_call_operand.vmem [shape: f32[1,4], index: 2, kind: input, shape index: {}]   ;;  %s2908_s3 = inlined_call_operand.vmem [shape: bf16[512,4], index: 3, kind: output, shape index: {}]  }
   0x1   :  { %v79_v0 = vld [vmem:[%s2905_s1] sm:$0xf]  ;;  %v1772_v4 = vld [vmem:[%s2906_s0 + $0x8] sm:$0xff]   ;;  %v1774_v6 = vld [vmem:[%s2906_s0 + $0x10] sm:$0xff]  }
   0x2   :  { %1768 = vmatprep.subr.msk.bf16.mxu0 %vm344_vm0, %v79_v0  ;;  %1769 = vmatprep.subr.msk.bf16.mxu1 %vm344_vm0, %v79_v0  ;;  %v346_v1 = vsel %vm344_vm0, %v79_v0, 0  ;;  %v1770_v2 = vld [vmem:[%s2906_s0] sm:$0xff]   ;;  %v1773_v5 = vld [vmem:[%s2906_s0 + $0x88] sm:$0xff]   ;;  %v1775_v7 = vld [vmem:[%s2906_s0 + $0x90] sm:$0xff]  }
   0x3   :  { %1701 = vmatpush3.bf16.msra.mxu0 %v346_v1  ;;  %1767 = vmatpush3.bf16.msra.mxu1 %v346_v1  ;;  %v1771_v3 = vld [vmem:[%s2906_s0 + $0x80] sm:$0xff]   ;;  %v1776_v8 = vld [vmem:[%s2906_s0 + $0x18] sm:$0xff]   ;;  %v1780_v12 = vld [vmem:[%s2906_s0 + $0x28] sm:$0xff]  }
   0x4   :  { %1702 = vmatprep.mubr.msk.bf16.mxu0 %vm247_vm1, %v1770_v2  ;;  %1734 = vmatprep.mubr.msk.bf16.mxu1 %vm247_vm1, %v1771_v3  ;;  %v1777_v9 = vld [vmem:[%s2906_s0 + $0x98] sm:$0xff]   ;;  %v1778_v10 = vld [vmem:[%s2906_s0 + $0x20] sm:$0xff]   ;;  %v1781_v13 = vld [vmem:[%s2906_s0 + $0xa8] sm:$0xff]  }
   0x5   :  { %v1779_v11 = vld [vmem:[%s2906_s0 + $0xa0] sm:$0xff]   ;;  %v1782_v14 = vld [vmem:[%s2906_s0 + $0x30] sm:$0xff]   ;;  %v1784_v16 = vld [vmem:[%s2906_s0 + $0x38] sm:$0xff]  }
   0x6   :  { %1703 = vmatmul.mubr.msk.bf16.vlgmr.msra.gmra.mrb[0].mxu0 %vm247_vm1, %v1772_v4  ;;  %1735 = vmatmul.mubr.msk.bf16.vlgmr.msra.gmra.mrb[0].mxu1 %vm247_vm1, %v1773_v5  ;;  %v1783_v15 = vld [vmem:[%s2906_s0 + $0xb0] sm:$0xff]   ;;  %v1785_v17 = vld [vmem:[%s2906_s0 + $0xb8] sm:$0xff]   ;;  %v1786_v18 = vld [vmem:[%s2906_s0 + $0x40] sm:$0xff]  }
   0x7   :  { %1706 = vmatprep.mubr.msk.bf16.mxu0 %vm247_vm1, %v1774_v6  ;;  %1738 = vmatprep.mubr.msk.bf16.mxu1 %vm247_vm1, %v1775_v7  ;;  %v1787_v19 = vld [vmem:[%s2906_s0 + $0xc0] sm:$0xff]   ;;  %v1788_v20 = vld [vmem:[%s2906_s0 + $0x48] sm:$0xff]   ;;  %v1790_v22 = vld [vmem:[%s2906_s0 + $0x50] sm:$0xff]  }
   0x8   :  { %v1789_v21 = vld [vmem:[%s2906_s0 + $0xc8] sm:$0xff]   ;;  %v1791_v23 = vld [vmem:[%s2906_s0 + $0xd0] sm:$0xff]   ;;  %v1792_v24 = vld [vmem:[%s2906_s0 + $0x58] sm:$0xff]  }
   0x9   :  { %v1793_v25 = vld [vmem:[%s2906_s0 + $0xd8] sm:$0xff]   ;;  %v1794_v26 = vld [vmem:[%s2906_s0 + $0x60] sm:$0xff]   ;;  %v1796_v28 = vld [vmem:[%s2906_s0 + $0x68] sm:$0xff]  }
   0xa   :  { %v1795_v27 = vld [vmem:[%s2906_s0 + $0xe0] sm:$0xff]   ;;  %v1797_v29 = vld [vmem:[%s2906_s0 + $0xe8] sm:$0xff]   ;;  %v1798_v30 = vld [vmem:[%s2906_s0 + $0x70] sm:$0xff]  }
   0xb   :  { %v1799_v31 = vld [vmem:[%s2906_s0 + $0xf0] sm:$0xff]   ;;  %v1800_v32 = vld [vmem:[%s2906_s0 + $0x78] sm:$0xff]   ;;  %v2213_v34 = vld [vmem:[%s2907_s2] ss:$0 sm:$0xff] }
   0xc   :  { %v1801_v33 = vld [vmem:[%s2906_s0 + $0xf8] sm:$0xff]  }
   0xe   :  { %1707 = vmatmul.mubr.msk.bf16.gmra.mrb[4].mxu0 %vm247_vm1, %v1776_v8  ;;  %1739 = vmatmul.mubr.msk.bf16.gmra.mrb[4].mxu1 %vm247_vm1, %v1777_v9 }
   0xf   :  { %1710 = vmatprep.mubr.msk.bf16.mxu0 %vm247_vm1, %v1778_v10  ;;  %1742 = vmatprep.mubr.msk.bf16.mxu1 %vm247_vm1, %v1779_v11 }
  0x16   :  { %1711 = vmatmul.mubr.msk.bf16.gmra.mrb[8].mxu0 %vm247_vm1, %v1780_v12  ;;  %1743 = vmatmul.mubr.msk.bf16.gmra.mrb[8].mxu1 %vm247_vm1, %v1781_v13 }
  0x17   :  { %1714 = vmatprep.mubr.msk.bf16.mxu0 %vm247_vm1, %v1782_v14  ;;  %1746 = vmatprep.mubr.msk.bf16.mxu1 %vm247_vm1, %v1783_v15 }
  0x1e   :  { %1715 = vmatmul.mubr.msk.bf16.gmra.mrb[12].mxu0 %vm247_vm1, %v1784_v16  ;;  %1747 = vmatmul.mubr.msk.bf16.gmra.mrb[12].mxu1 %vm247_vm1, %v1785_v17 }
  0x1f   :  { %1718 = vmatprep.mubr.msk.bf16.mxu0 %vm247_vm1, %v1786_v18  ;;  %1750 = vmatprep.mubr.msk.bf16.mxu1 %vm247_vm1, %v1787_v19 }
  0x26   :  { %1719 = vmatmul.mubr.msk.bf16.gmra.mrb[16].mxu0 %vm247_vm1, %v1788_v20  ;;  %1751 = vmatmul.mubr.msk.bf16.gmra.mrb[16].mxu1 %vm247_vm1, %v1789_v21 }
  0x27   :  { %1722 = vmatprep.mubr.msk.bf16.mxu0 %vm247_vm1, %v1790_v22  ;;  %1754 = vmatprep.mubr.msk.bf16.mxu1 %vm247_vm1, %v1791_v23 }
  0x2e   :  { %1723 = vmatmul.mubr.msk.bf16.gmra.mrb[20].mxu0 %vm247_vm1, %v1792_v24  ;;  %1755 = vmatmul.mubr.msk.bf16.gmra.mrb[20].mxu1 %vm247_vm1, %v1793_v25 }
  0x2f   :  { %1726 = vmatprep.mubr.msk.bf16.mxu0 %vm247_vm1, %v1794_v26  ;;  %1758 = vmatprep.mubr.msk.bf16.mxu1 %vm247_vm1, %v1795_v27 }
  0x36   :  { %1727 = vmatmul.mubr.msk.bf16.gmra.mrb[24].mxu0 %vm247_vm1, %v1796_v28  ;;  %1759 = vmatmul.mubr.msk.bf16.gmra.mrb[24].mxu1 %vm247_vm1, %v1797_v29 }
  0x37   :  { %1730 = vmatprep.mubr.msk.bf16.mxu0 %vm247_vm1, %v1798_v30  ;;  %1762 = vmatprep.mubr.msk.bf16.mxu1 %vm247_vm1, %v1799_v31 }
  0x3e   :  { %1731 = vmatmul.mubr.msk.bf16.gmra.mrb[28].mxu0 %vm247_vm1, %v1800_v32  ;;  %1763 = vmatmul.mubr.msk.bf16.gmra.mrb[28].mxu1 %vm247_vm1, %v1801_v33 }
  0xd9   :  { %v1704_v35 = vpop.f32.mrb[0].mxu0  ;;  %v1736_v37 = vpop.f32.mrb[0].mxu1 }
  0xda   :  { %v2216_v36 = vadd.f32 %v1704_v35, %v2213_v34  ;;  %v382_v38 = vpop.f32.mrb[1].mxu0  ;;  %v2219_v39 = vadd.f32 %v1736_v37, %v2213_v34  ;;  %v510_v41 = vpop.f32.mrb[1].mxu1 }
  0xdb   :  { %v2222_v40 = vadd.f32 %v2213_v34, %v382_v38  ;;  %v1705_v42 = vpop.f32.mrb[2].mxu0  ;;  %v2226_v44 = vadd.f32 %v2213_v34, %v510_v41  ;;  %v1737_v46 = vpop.f32.mrb[2].mxu1 }
  0xdc   :  { %v1477_v43 = vmul.f32 -1.442695, %v2216_v36  ;;  %v2229_v45 = vadd.f32 %v1705_v42, %v2213_v34  ;;  %v385_v47 = vpop.f32.mrb[3].mxu0  ;;  %v1509_v48 = vmul.f32 -1.442695, %v2219_v39  ;;  %v2234_v50 = vadd.f32 %v1737_v46, %v2213_v34  ;;  %v513_v52 = vpop.f32.mrb[3].mxu1 }
  0xdd   :  { %v1475_v49 = vmul.f32 -1.442695, %v2222_v40  ;;  %v2237_v51 = vadd.f32 %v2213_v34, %v385_v47  ;;  %v1507_v53 = vmul.f32 -1.442695, %v2226_v44  ;;  %v2242_v55 = vadd.f32 %v2213_v34, %v513_v52 }
  0xde   :  { %1802 = vpow2.f32 %v1477_v43  ;;  %v1478_v54 = vmul.f32 -1.442695, %v2229_v45  ;;  %v1510_v56 = vmul.f32 -1.442695, %v2234_v50 }
  0xdf   :  { %1804 = vpow2.f32 %v1509_v48  ;;  %v1476_v57 = vmul.f32 -1.442695, %v2237_v51  ;;  %v1508_v58 = vmul.f32 -1.442695, %v2242_v55 }
  0xe0   :  { %1806 = vpow2.f32 %v1475_v49 }
  0xe1   :  { %1808 = vpow2.f32 %v1507_v53  ;;  %v1708_v59 = vpop.f32.mrb[4].mxu0  ;;  %v1740_v61 = vpop.f32.mrb[4].mxu1 }
  0xe2   :  { %1810 = vpow2.f32 %v1478_v54  ;;  %v2248_v60 = vadd.f32 %v1708_v59, %v2213_v34  ;;  %v398_v62 = vpop.f32.mrb[5].mxu0  ;;  %v2251_v63 = vadd.f32 %v1740_v61, %v2213_v34  ;;  %v526_v1 = vpop.f32.mrb[5].mxu1 }
  0xe3   :  { %1812 = vpow2.f32 %v1510_v56  ;;  %v2254_v0 = vadd.f32 %v2213_v34, %v398_v62  ;;  %v1709_v2 = vpop.f32.mrb[6].mxu0  ;;  %v2258_v4 = vadd.f32 %v2213_v34, %v526_v1  ;;  %v1741_v6 = vpop.f32.mrb[6].mxu1 }
  0xe4   :  { %1814 = vpow2.f32 %v1476_v57  ;;  %v1481_v3 = vmul.f32 -1.442695, %v2248_v60  ;;  %v2261_v5 = vadd.f32 %v1709_v2, %v2213_v34  ;;  %v401_v7 = vpop.f32.mrb[7].mxu0  ;;  %v1513_v8 = vmul.f32 -1.442695, %v2251_v63  ;;  %v529_v10 = vpop.f32.mrb[7].mxu1 }
  0xe5   :  { %1816 = vpow2.f32 %v1508_v58  ;;  %v1479_v9 = vmul.f32 -1.442695, %v2254_v0  ;;  %v1511_v11 = vmul.f32 -1.442695, %v2258_v4  ;;  %v2270_v35 = vadd.f32 %v1741_v6, %v2213_v34 }
  0xe6   :  { %1818 = vpow2.f32 %v1481_v3  ;;  %v1482_v12 = vmul.f32 -1.442695, %v2261_v5  ;;  %v2273_v41 = vadd.f32 %v2213_v34, %v401_v7  ;;  %v2276_v46 = vadd.f32 %v2213_v34, %v529_v10 }
  0xe7   :  { %1820 = vpow2.f32 %v1513_v8  ;;  %v1514_v57 = vmul.f32 -1.442695, %v2270_v35 }
  0xe8   :  { %v1803_v13 = vpop.eup %1802  ;;  %1822 = vpow2.f32 %v1479_v9  ;;  %v1480_v2 = vmul.f32 -1.442695, %v2273_v41  ;;  %v1512_v10 = vmul.f32 -1.442695, %v2276_v46 }
  0xe9   :  { %v1805_v14 = vpop.eup %1804  ;;  %v831_v15 = vadd.f32 1.0, %v1803_v13  ;;  %1824 = vpow2.f32 %v1511_v11  ;;  %v1712_v16 = vpop.f32.mrb[8].mxu0 }
  0xea   :  { %v1807_v17 = vpop.eup %1806  ;;  %v863_v18 = vadd.f32 1.0, %v1805_v14  ;;  %1826 = vpow2.f32 %v1482_v12  ;;  %v1744_v19 = vpop.f32.mrb[8].mxu1  ;;  %v2279_v49 = vadd.f32 %v1712_v16, %v2213_v34 }
  0xeb   :  { %v414_v20 = vpop.f32.mrb[9].mxu0  ;;  %v1809_v21 = vpop.eup %1808  ;;  %1828 = vrcp.f32 %v831_v15  ;;  %v829_v22 = vadd.f32 1.0, %v1807_v17  ;;  %v2282_v52 = vadd.f32 %v1744_v19, %v2213_v34 }
  0xec   :  { %v542_v23 = vpop.f32.mrb[9].mxu1  ;;  %v1713_v24 = vpop.f32.mrb[10].mxu0  ;;  %1830 = vrcp.f32 %v863_v18  ;;  %v861_v26 = vadd.f32 1.0, %v1809_v21  ;;  %v2288_v58 = vadd.f32 %v2213_v34, %v414_v20  ;;  %v1485_v16 = vmul.f32 -1.442695, %v2279_v49 }
  0xed   :  { %v1811_v25 = vpop.eup %1810  ;;  %v1745_v27 = vpop.f32.mrb[10].mxu1  ;;  %1832 = vrcp.f32 %v829_v22  ;;  %v2296_v3 = vadd.f32 %v2213_v34, %v542_v23  ;;  %v2304_v11 = vadd.f32 %v1713_v24, %v2213_v34  ;;  %v1517_v17 = vmul.f32 -1.442695, %v2282_v52 }
  0xee   :  { %v417_v28 = vpop.f32.mrb[11].mxu0  ;;  %v1813_v29 = vpop.eup %1812  ;;  %v832_v30 = vadd.f32 1.0, %v1811_v25  ;;  %1834 = vrcp.f32 %v861_v26  ;;  %v1483_v21 = vmul.f32 -1.442695, %v2288_v58  ;;  %v2317_v22 = vadd.f32 %v1745_v27, %v2213_v34 }
  0xef   :  { %v2267_v31 = vpop.f32.mrb[11].mxu1  ;;  %v1815_v32 = vpop.eup %1814  ;;  %v864_v33 = vadd.f32 1.0, %v1813_v29  ;;  %v1515_v25 = vmul.f32 -1.442695, %v2296_v3  ;;  %v2322_v26 = vadd.f32 %v2213_v34, %v417_v28 }
  0xf0   :  { %v1817_v37 = vpop.eup %1816  ;;  %1836 = vrcp.f32 %v832_v30  ;;  %v830_v38 = vadd.f32 1.0, %v1815_v32 }
  0xf1   :  { %v1819_v42 = vpop.eup %1818  ;;  %1838 = vrcp.f32 %v864_v33  ;;  %v862_v43 = vadd.f32 1.0, %v1817_v37  ;;  %v2284_v53 = vpop.f32.mrb[12].mxu0 }
  0xf2   :  { %v1821_v47 = vpop.eup %1820  ;;  %1840 = vrcp.f32 %v830_v38  ;;  %v835_v48 = vadd.f32 1.0, %v1819_v42  ;;  %v2290_v59 = vpop.f32.mrb[12].mxu1 }
  0xf3   :  { %v1823_v54 = vpop.eup %1822  ;;  %1842 = vrcp.f32 %v862_v43  ;;  %v867_v56 = vadd.f32 1.0, %v1821_v47  ;;  %v2292_v61 = vpop.f32.mrb[13].mxu0  ;;  %v1518_v43 = vmul.f32 -1.442695, %v2317_v22 }
  0xf4   :  { %v1825_v62 = vpop.eup %1824  ;;  %1844 = vrcp.f32 %v835_v48  ;;  %v833_v1 = vadd.f32 1.0, %v1823_v54  ;;  %v2298_v6 = vpop.f32.mrb[13].mxu1 }
  0xf5   :  { %v2300_v7 = vpop.f32.mrb[14].mxu0  ;;  %v1827_v8 = vpop.eup %1826  ;;  %1846 = vrcp.f32 %v867_v56  ;;  %v865_v9 = vadd.f32 1.0, %v1825_v62 }
  0xf6   :  { %v2306_v12 = vpop.f32.mrb[14].mxu1  ;;  %v2308_v13 = vpop.f32.mrb[15].mxu0  ;;  %1848 = vrcp.f32 %v833_v1  ;;  %v836_v15 = vadd.f32 1.0, %v1827_v8 }
  0xf7   :  { %v1829_v14 = vpop.eup %1828  ;;  %v2312_v18 = vpop.f32.mrb[15].mxu1  ;;  %1850 = vrcp.f32 %v865_v9 }
  0xf8   :  { %v1831_v19 = vpop.eup %1830  ;;  %v1023_v20 = vmul.f32 %v1829_v14, %v2216_v36  ;;  %1852 = vrcp.f32 %v836_v15  ;;  %v1486_v36 = vmul.f32 -1.442695, %v2304_v11 }
  0xf9   :  { %v1833_v23 = vpop.eup %1832  ;;  %v1055_v24 = vmul.f32 %v1831_v19, %v2219_v39  ;;  %1854 = vpow2.f32 %v1514_v57  ;;  %v2329_v39 = vadd.f32 %v2213_v34, %v2267_v31  ;;  %v2331_v38 = vpop.f32.mrb[16].mxu0 }
  0xfa   :  { %v1835_v29 = vpop.eup %1834  ;;  %v1605_v30 = vpack.c.bf16 %v1023_v20, %v1023_v20  ;;  %v1021_v32 = vmul.f32 %v1833_v23, %v2222_v40  ;;  %1856 = vpow2.f32 %v1480_v2  ;;  %v2341_v47 = vpop.f32.mrb[17].mxu0 }
  0xfb   :  { %v1837_v33 = vpop.eup %1836  ;;  %v1637_v37 = vpack.c.bf16 %v1055_v24, %v1055_v24  ;;  %v1053_v27 = vmul.f32 %v1835_v29, %v2226_v44  ;;  %1858 = vpow2.f32 %v1512_v10  ;;  %v2339_v44 = vpop.f32.mrb[16].mxu1  ;;  %v1516_v19 = vmul.f32 -1.442695, %v2329_v39 }
  0xfc   :  { %v1839_v28 = vpop.eup %1838  ;;  %1344 = vst.msk [vmem:[%s2908_s3 + $0x8] sm:$0xf] %vm1341_vm2, %v1605_v30  ;;  %v1603_v40 = vpack.c.bf16 %v1021_v32, %v1021_v32  ;;  %v1024_v42 = vmul.f32 %v1837_v33, %v2229_v45  ;;  %1860 = vpow2.f32 %v1485_v16  ;;  %v2350_v45 = vadd.f32 %v2284_v53, %v2213_v34  ;;  %v2352_v56 = vpop.f32.mrb[17].mxu1 }
  0xfd   :  { %v1841_v31 = vpop.eup %1840  ;;  %1376 = vst.msk [vmem:[%s2908_s3 + $0x88] sm:$0xf] %vm1341_vm2, %v1637_v37  ;;  %v1635_v48 = vpack.c.bf16 %v1053_v27, %v1053_v27  ;;  %v1056_v54 = vmul.f32 %v1839_v28, %v2234_v50  ;;  %v2354_v57 = vpop.f32.mrb[18].mxu0  ;;  %1862 = vpow2.f32 %v1517_v17  ;;  %v2363_v50 = vadd.f32 %v2290_v59, %v2213_v34 }
  0xfe   :  { %v1843_v62 = vpop.eup %1842  ;;  %1342 = vst.msk [vmem:[%s2908_s3] sm:$0xf] %vm1341_vm2, %v1603_v40  ;;  %v1606_v1 = vpack.c.bf16 %v1024_v42, %v1024_v42  ;;  %v1022_v2 = vmul.f32 %v1841_v31, %v2237_v51  ;;  %v2365_v53 = vpop.f32.mrb[18].mxu1  ;;  %1864 = vpow2.f32 %v1483_v21  ;;  %v1484_v51 = vmul.f32 -1.442695, %v2322_v26 }
  0xff   :  { %v2367_v8 = vpop.f32.mrb[19].mxu0  ;;  %v1845_v9 = vpop.eup %1844  ;;  %1374 = vst.msk [vmem:[%s2908_s3 + $0x80] sm:$0xf] %vm1341_vm2, %v1635_v48  ;;  %v1638_v10 = vpack.c.bf16 %v1056_v54, %v1056_v54  ;;  %v1054_v14 = vmul.f32 %v1843_v62, %v2242_v55  ;;  %1866 = vpow2.f32 %v1515_v25  ;;  %v1489_v23 = vmul.f32 -1.442695, %v2350_v45 }
 0x100   :  { %v2375_v15 = vpop.f32.mrb[19].mxu1  ;;  %v1847_v59 = vpop.eup %1846  ;;  %1345 = vst.msk [vmem:[%s2908_s3 + $0xc] sm:$0xf] %vm1341_vm2, %v1606_v1  ;;  %v1604_v16 = vpack.c.bf16 %v1022_v2, %v1022_v2  ;;  %v1027_v17 = vmul.f32 %v1845_v9, %v2248_v60  ;;  %1868 = vpow2.f32 %v1486_v36  ;;  %v1521_v29 = vmul.f32 -1.442695, %v2363_v50 }
 0x101   :  { %v1849_v20 = vpop.eup %1848  ;;  %1377 = vst.msk [vmem:[%s2908_s3 + $0x8c] sm:$0xf] %vm1341_vm2, %v1638_v10  ;;  %v1636_v55 = vpack.c.bf16 %v1054_v14, %v1054_v14  ;;  %v1059_v21 = vmul.f32 %v1847_v59, %v2251_v63  ;;  %1870 = vpow2.f32 %v1518_v43  ;;  %v2400_v36 = vpop.f32.mrb[20].mxu0  ;;  %v2439_v59 = vadd.f32 %v2213_v34, %v2292_v61 }
 0x102   :  { %v1851_v24 = vpop.eup %1850  ;;  %1343 = vst.msk [vmem:[%s2908_s3 + $0x4] sm:$0xf] %vm1341_vm2, %v1604_v16  ;;  %v1609_v60 = vpack.c.bf16 %v1027_v17, %v1027_v17  ;;  %v1025_v25 = vmul.f32 %v1849_v20, %v2254_v0  ;;  %1872 = vpow2.f32 %v1484_v51  ;;  %v2407_v27 = vpop.f32.mrb[20].mxu1  ;;  %v2446_v61 = vadd.f32 %v2213_v34, %v2298_v6 }
 0x103   :  { %v1853_v30 = vpop.eup %1852  ;;  %1375 = vst.msk [vmem:[%s2908_s3 + $0x84] sm:$0xf] %vm1341_vm2, %v1636_v55  ;;  %v1641_v63 = vpack.c.bf16 %v1059_v21, %v1059_v21  ;;  %v1057_v32 = vmul.f32 %v1851_v24, %v2258_v4  ;;  %1874 = vpow2.f32 %v1516_v19  ;;  %v2409_v28 = vpop.f32.mrb[21].mxu0 }
 0x104   :  { %v1855_v33 = vpop.eup %1854  ;;  %1348 = vst.msk [vmem:[%s2908_s3 + $0x18] sm:$0xf] %vm1341_vm2, %v1609_v60  ;;  %v1607_v0 = vpack.c.bf16 %v1025_v25, %v1025_v25  ;;  %v1028_v37 = vmul.f32 %v1853_v30, %v2261_v5  ;;  %1876 = vpow2.f32 %v1489_v23  ;;  %v2415_v43 = vpop.f32.mrb[21].mxu1  ;;  %v1487_v25 = vmul.f32 -1.442695, %v2439_v59 }
 0x105   :  { %v1857_v40 = vpop.eup %1856  ;;  %1380 = vst.msk [vmem:[%s2908_s3 + $0x98] sm:$0xf] %vm1341_vm2, %v1641_v63  ;;  %v1639_v4 = vpack.c.bf16 %v1057_v32, %v1057_v32  ;;  %v868_v42 = vadd.f32 1.0, %v1855_v33  ;;  %v2417_v31 = vpop.f32.mrb[22].mxu0  ;;  %1878 = vpow2.f32 %v1521_v29  ;;  %v2454_v33 = vadd.f32 %v2300_v7, %v2213_v34 }
 0x106   :  { %v1859_v48 = vpop.eup %1858  ;;  %1346 = vst.msk [vmem:[%s2908_s3 + $0x10] sm:$0xf] %vm1341_vm2, %v1607_v0  ;;  %v1610_v5 = vpack.c.bf16 %v1028_v37, %v1028_v37  ;;  %v834_v54 = vadd.f32 1.0, %v1857_v40  ;;  %v2423_v62 = vpop.f32.mrb[22].mxu1  ;;  %v2458_v0 = vadd.f32 %v2306_v12, %v2213_v34 }
 0x107   :  { %v2425_v1 = vpop.f32.mrb[23].mxu0  ;;  %v1861_v2 = vpop.eup %1860  ;;  %1378 = vst.msk [vmem:[%s2908_s3 + $0x90] sm:$0xf] %vm1341_vm2, %v1639_v4  ;;  %1880 = vrcp.f32 %v868_v42  ;;  %v866_v9 = vadd.f32 1.0, %v1859_v48  ;;  %v2466_v42 = vadd.f32 %v2213_v34, %v2308_v13  ;;  %v2470_v48 = vadd.f32 %v2213_v34, %v2312_v18 }
 0x108   :  { %v2431_v10 = vpop.f32.mrb[23].mxu1  ;;  %v1863_v14 = vpop.eup %1862  ;;  %1349 = vst.msk [vmem:[%s2908_s3 + $0x1c] sm:$0xf] %vm1341_vm2, %v1610_v5  ;;  %1882 = vrcp.f32 %v834_v54  ;;  %v839_v51 = vadd.f32 1.0, %v1861_v2  ;;  %v2478_v2 = vadd.f32 %v2331_v38, %v2213_v34  ;;  %v1490_v38 = vmul.f32 -1.442695, %v2454_v33 }
 0x109   :  { %v1865_v16 = vpop.eup %1864  ;;  %1884 = vrcp.f32 %v866_v9  ;;  %v871_v17 = vadd.f32 1.0, %v1863_v14  ;;  %v2441_v23 = vpop.f32.mrb[24].mxu0  ;;  %v2482_v9 = vadd.f32 %v2339_v44, %v2213_v34 }
 0x10a   :  { %v1867_v19 = vpop.eup %1866  ;;  %1886 = vrcp.f32 %v839_v51  ;;  %v837_v20 = vadd.f32 1.0, %v1865_v16  ;;  %v2448_v29 = vpop.f32.mrb[24].mxu1  ;;  %v1519_v51 = vmul.f32 -1.442695, %v2446_v61  ;;  %v2489_v16 = vadd.f32 %v2213_v34, %v2341_v47 }
 0x10b   :  { %v1869_v55 = vpop.eup %1868  ;;  %1888 = vrcp.f32 %v871_v17  ;;  %v869_v21 = vadd.f32 1.0, %v1867_v19  ;;  %v2450_v30 = vpop.f32.mrb[25].mxu0  ;;  %v1493_v47 = vmul.f32 -1.442695, %v2478_v2 }
 0x10c   :  { %v1871_v24 = vpop.eup %1870  ;;  %1890 = vrcp.f32 %v837_v20  ;;  %v840_v60 = vadd.f32 1.0, %v1869_v55  ;;  %v2460_v37 = vpop.f32.mrb[25].mxu1  ;;  %v1522_v20 = vmul.f32 -1.442695, %v2458_v0 }
 0x10d   :  { %v1873_v63 = vpop.eup %1872  ;;  %1892 = vrcp.f32 %v869_v21  ;;  %v872_v32 = vadd.f32 1.0, %v1871_v24  ;;  %v2462_v40 = vpop.f32.mrb[26].mxu0  ;;  %v1488_v21 = vmul.f32 -1.442695, %v2466_v42  ;;  %v1520_v24 = vmul.f32 -1.442695, %v2470_v48 }
 0x10e   :  { %v1875_v6 = vpop.eup %1874  ;;  %1894 = vrcp.f32 %v840_v60  ;;  %v838_v4 = vadd.f32 1.0, %v1873_v63  ;;  %v2472_v7 = vpop.f32.mrb[26].mxu1 }
 0x10f   :  { %v2474_v5 = vpop.f32.mrb[27].mxu0  ;;  %v1877_v12 = vpop.eup %1876  ;;  %1896 = vrcp.f32 %v872_v32  ;;  %v870_v54 = vadd.f32 1.0, %v1875_v6  ;;  %v1525_v32 = vmul.f32 -1.442695, %v2482_v9 }
 0x110   :  { %v2484_v13 = vpop.f32.mrb[27].mxu1  ;;  %v1879_v14 = vpop.eup %1878  ;;  %1898 = vrcp.f32 %v838_v4  ;;  %v843_v18 = vadd.f32 1.0, %v1877_v12 }
 0x111   :  { %v1881_v17 = vpop.eup %1880  ;;  %1900 = vrcp.f32 %v870_v54  ;;  %v875_v19 = vadd.f32 1.0, %v1879_v14  ;;  %v2499_v6 = vpop.f32.mrb[28].mxu0 }
 0x112   :  { %v1883_v44 = vpop.eup %1882  ;;  %v1060_v55 = vmul.f32 %v1881_v17, %v2270_v35  ;;  %1902 = vrcp.f32 %v843_v18  ;;  %2909 = vst [vmem:[#allocation2_spill] sm:$0xff] %v2499_v6  ;;  %v1491_v35 = vmul.f32 -1.442695, %v2489_v16  ;;  %v2503_v14 = vpop.f32.mrb[28].mxu1 }
 0x113   :  { %v1885_v60 = vpop.eup %1884  ;;  %v1026_v63 = vmul.f32 %v1883_v44, %v2273_v41  ;;  %1904 = vrcp.f32 %v875_v19  ;;  %v2505_v18 = vpop.f32.mrb[29].mxu0  ;;  %v2510_v44 = vadd.f32 %v2213_v34, %v2352_v56 }
 0x114   :  { %v1887_v4 = vpop.eup %1886  ;;  %v1642_v12 = vpack.c.bf16 %v1060_v55, %v1060_v55  ;;  %v1058_v54 = vmul.f32 %v1885_v60, %v2276_v46  ;;  %1906 = vpow2.f32 %v1487_v25  ;;  %v2512_v6 = vpop.f32.mrb[29].mxu1 }
 0x115   :  { %v1889_v17 = vpop.eup %1888  ;;  %v1608_v41 = vpack.c.bf16 %v1026_v63, %v1026_v63  ;;  %v1031_v19 = vmul.f32 %v1887_v4, %v2279_v49  ;;  %1908 = vpow2.f32 %v1519_v51  ;;  %v2514_v55 = vpop.f32.mrb[30].mxu0  ;;  %v2523_v49 = vadd.f32 %v2354_v57, %v2213_v34 }
 0x116   :  { %v1891_v46 = vpop.eup %1890  ;;  %1381 = vst.msk [vmem:[%s2908_s3 + $0x9c] sm:$0xf] %vm1341_vm2, %v1642_v12  ;;  %v1640_v25 = vpack.c.bf16 %v1058_v54, %v1058_v54  ;;  %v1063_v60 = vmul.f32 %v1889_v17, %v2282_v52  ;;  %1910 = vpow2.f32 %v1490_v38  ;;  %v2525_v56 = vpop.f32.mrb[30].mxu1  ;;  %v2536_v52 = vadd.f32 %v2365_v53, %v2213_v34 }
 0x117   :  { %v2527_v51 = vpop.f32.mrb[31].mxu0  ;;  %v1893_v63 = vpop.eup %1892  ;;  %1347 = vst.msk [vmem:[%s2908_s3 + $0x14] sm:$0xf] %vm1341_vm2, %v1608_v41  ;;  %v1613_v4 = vpack.c.bf16 %v1031_v19, %v1031_v19  ;;  %v1029_v12 = vmul.f32 %v1891_v46, %v2288_v58  ;;  %1912 = vpow2.f32 %v1522_v20  ;;  %v2547_v58 = vadd.f32 %v2213_v34, %v2367_v8 }
 0x118   :  { %v2538_v57 = vpop.f32.mrb[31].mxu1  ;;  %v1895_v38 = vpop.eup %1894  ;;  %1379 = vst.msk [vmem:[%s2908_s3 + $0x94] sm:$0xf] %vm1341_vm2, %v1640_v25  ;;  %v1645_v54 = vpack.c.bf16 %v1063_v60, %v1063_v60  ;;  %v1061_v17 = vmul.f32 %v1893_v63, %v2296_v3  ;;  %1914 = vpow2.f32 %v1488_v21  ;;  %v1523_v19 = vmul.f32 -1.442695, %v2510_v44 }
 0x119   :  { %v1897_v20 = vpop.eup %1896  ;;  %1352 = vst.msk [vmem:[%s2908_s3 + $0x28] sm:$0xf] %vm1341_vm2, %v1613_v4  ;;  %v1611_v53 = vpack.c.bf16 %v1029_v12, %v1029_v12  ;;  %v1032_v41 = vmul.f32 %v1895_v38, %v2304_v11  ;;  %1916 = vpow2.f32 %v1520_v24  ;;  %v1494_v21 = vmul.f32 -1.442695, %v2523_v49 }
 0x11a   :  { %v1899_v46 = vpop.eup %1898  ;;  %1384 = vst.msk [vmem:[%s2908_s3 + $0xa8] sm:$0xf] %vm1341_vm2, %v1645_v54  ;;  %v1643_v3 = vpack.c.bf16 %v1061_v17, %v1061_v17  ;;  %v1064_v8 = vmul.f32 %v1897_v20, %v2317_v22  ;;  %1918 = vpow2.f32 %v1493_v47  ;;  %v1526_v60 = vmul.f32 -1.442695, %v2536_v52 }
 0x11b   :  { %v1901_v25 = vpop.eup %1900  ;;  %1350 = vst.msk [vmem:[%s2908_s3 + $0x20] sm:$0xf] %vm1341_vm2, %v1611_v53  ;;  %v1614_v11 = vpack.c.bf16 %v1032_v41, %v1032_v41  ;;  %v1030_v24 = vmul.f32 %v1899_v46, %v2322_v26  ;;  %1920 = vpow2.f32 %v1525_v32  ;;  %v1492_v4 = vmul.f32 -1.442695, %v2547_v58 }
 0x11c   :  { %v1903_v63 = vpop.eup %1902  ;;  %1382 = vst.msk [vmem:[%s2908_s3 + $0xa0] sm:$0xf] %vm1341_vm2, %v1643_v3  ;;  %v1646_v22 = vpack.c.bf16 %v1064_v8, %v1064_v8  ;;  %v1062_v47 = vmul.f32 %v1901_v25, %v2329_v39  ;;  %1922 = vpow2.f32 %v1491_v35  ;;  %v2601_v25 = vadd.f32 %v2213_v34, %v2375_v15 }
 0x11d   :  { %v1905_v12 = vpop.eup %1904  ;;  %1353 = vst.msk [vmem:[%s2908_s3 + $0x2c] sm:$0xf] %vm1341_vm2, %v1614_v11  ;;  %v1612_v26 = vpack.c.bf16 %v1030_v24, %v1030_v24  ;;  %v1035_v32 = vmul.f32 %v1903_v63, %v2350_v45  ;;  %1924 = vpow2.f32 %v1523_v19 }
 0x11e   :  { %v1907_v38 = vpop.eup %1906  ;;  %1385 = vst.msk [vmem:[%s2908_s3 + $0xac] sm:$0xf] %vm1341_vm2, %v1646_v22  ;;  %v1644_v39 = vpack.c.bf16 %v1062_v47, %v1062_v47  ;;  %v1067_v35 = vmul.f32 %v1905_v12, %v2363_v50  ;;  %1926 = vpow2.f32 %v1494_v21  ;;  %v2609_v12 = vadd.f32 %v2407_v27, %v2213_v34 }
 0x11f   :  { %v1909_v54 = vpop.eup %1908  ;;  %1351 = vst.msk [vmem:[%s2908_s3 + $0x24] sm:$0xf] %vm1341_vm2, %v1612_v26  ;;  %v1617_v17 = vpack.c.bf16 %v1035_v32, %v1035_v32  ;;  %v841_v20 = vadd.f32 1.0, %v1907_v38  ;;  %1928 = vpow2.f32 %v1526_v60  ;;  %v1524_v32 = vmul.f32 -1.442695, %v2601_v25 }
 0x120   :  { %v1911_v45 = vpop.eup %1910  ;;  %1383 = vst.msk [vmem:[%s2908_s3 + $0xa4] sm:$0xf] %vm1341_vm2, %v1644_v39  ;;  %v1649_v53 = vpack.c.bf16 %v1067_v35, %v1067_v35  ;;  %v873_v41 = vadd.f32 1.0, %v1909_v54  ;;  %1930 = vpow2.f32 %v1492_v4  ;;  %v2605_v4 = vadd.f32 %v2400_v36, %v2213_v34 }
 0x121   :  { %v1913_v50 = vpop.eup %1912  ;;  %1356 = vst.msk [vmem:[%s2908_s3 + $0x38] sm:$0xf] %vm1341_vm2, %v1617_v17  ;;  %1932 = vrcp.f32 %v841_v20  ;;  %v844_v19 = vadd.f32 1.0, %v1911_v45  ;;  %v2614_v38 = vadd.f32 %v2213_v34, %v2409_v28  ;;  %v2618_v36 = vadd.f32 %v2213_v34, %v2415_v43 }
 0x122   :  { %v1915_v46 = vpop.eup %1914  ;;  %1388 = vst.msk [vmem:[%s2908_s3 + $0xb8] sm:$0xf] %vm1341_vm2, %v1649_v53  ;;  %1934 = vrcp.f32 %v873_v41  ;;  %v876_v3 = vadd.f32 1.0, %v1913_v50  ;;  %v2622_v27 = vadd.f32 %v2417_v31, %v2213_v34  ;;  %v2626_v20 = vadd.f32 %v2423_v62, %v2213_v34 }
 0x123   :  { %v1917_v8 = vpop.eup %1916  ;;  %1936 = vrcp.f32 %v844_v19  ;;  %v842_v21 = vadd.f32 1.0, %v1915_v46  ;;  %v2630_v28 = vadd.f32 %v2213_v34, %v2425_v1  ;;  %v1497_v43 = vmul.f32 -1.442695, %v2605_v4 }
 0x124   :  { %v1919_v11 = vpop.eup %1918  ;;  %1938 = vrcp.f32 %v876_v3  ;;  %v874_v24 = vadd.f32 1.0, %v1917_v8  ;;  %v1529_v41 = vmul.f32 -1.442695, %v2609_v12  ;;  %v1495_v19 = vmul.f32 -1.442695, %v2614_v38 }
 0x125   :  { %v1921_v60 = vpop.eup %1920  ;;  %1940 = vrcp.f32 %v842_v21  ;;  %v847_v63 = vadd.f32 1.0, %v1919_v11  ;;  %v2637_v62 = vadd.f32 %v2213_v34, %v2431_v10  ;;  %v1527_v3 = vmul.f32 -1.442695, %v2618_v36 }
 0x126   :  { %v1923_v22 = vpop.eup %1922  ;;  %1942 = vrcp.f32 %v874_v24  ;;  %v879_v47 = vadd.f32 1.0, %v1921_v60  ;;  %v1498_v8 = vmul.f32 -1.442695, %v2622_v27  ;;  %v1530_v24 = vmul.f32 -1.442695, %v2626_v20 }
 0x127   :  { %v1925_v26 = vpop.eup %1924  ;;  %1944 = vrcp.f32 %v847_v63  ;;  %v845_v15 = vadd.f32 1.0, %v1923_v22  ;;  %v1496_v60 = vmul.f32 -1.442695, %v2630_v28 }
 0x128   :  { %v1927_v39 = vpop.eup %1926  ;;  %1946 = vrcp.f32 %v879_v47  ;;  %v877_v35 = vadd.f32 1.0, %v1925_v26 }
 0x129   :  { %v1929_v54 = vpop.eup %1928  ;;  %1948 = vrcp.f32 %v845_v15  ;;  %v848_v17 = vadd.f32 1.0, %v1927_v39 }
 0x12a   :  { %v1931_v45 = vpop.eup %1930  ;;  %1950 = vrcp.f32 %v877_v35  ;;  %v880_v53 = vadd.f32 1.0, %v1929_v54 }
 0x12b   :  { %v1933_v31 = vpop.eup %1932  ;;  %1952 = vrcp.f32 %v848_v17  ;;  %v846_v50 = vadd.f32 1.0, %v1931_v45  ;;  %v2668_v17 = vadd.f32 %v2213_v34, %v2450_v30 }
 0x12c   :  { %v1935_v46 = vpop.eup %1934  ;;  %v1033_v1 = vmul.f32 %v1933_v31, %v2439_v59  ;;  %1954 = vrcp.f32 %v880_v53  ;;  %v2648_v59 = vadd.f32 %v2441_v23, %v2213_v34  ;;  %v2659_v23 = vadd.f32 %v2448_v29, %v2213_v34 }
 0x12d   :  { %v1937_v21 = vpop.eup %1936  ;;  %v1065_v11 = vmul.f32 %v1935_v46, %v2446_v61  ;;  %1956 = vrcp.f32 %v846_v50  ;;  %v1528_v61 = vmul.f32 -1.442695, %v2637_v62  ;;  %v2677_v53 = vadd.f32 %v2213_v34, %v2460_v37 }
 0x12e   :  { %v1939_v63 = vpop.eup %1938  ;;  %v1615_v22 = vpack.c.bf16 %v1033_v1, %v1033_v1  ;;  %v1036_v10 = vmul.f32 %v1937_v21, %v2454_v33  ;;  %1958 = vpow2.f32 %v1524_v32  ;;  %v1499_v46 = vmul.f32 -1.442695, %v2668_v17 }
 0x12f   :  { %v1941_v47 = vpop.eup %1940  ;;  %v1647_v26 = vpack.c.bf16 %v1065_v11, %v1065_v11  ;;  %v1068_v15 = vmul.f32 %v1939_v63, %v2458_v0  ;;  %1960 = vpow2.f32 %v1497_v43 }
 0x130   :  { %v1943_v39 = vpop.eup %1942  ;;  %1354 = vst.msk [vmem:[%s2908_s3 + $0x30] sm:$0xf] %vm1341_vm2, %v1615_v22  ;;  %v1618_v35 = vpack.c.bf16 %v1036_v10, %v1036_v10  ;;  %v1034_v33 = vmul.f32 %v1941_v47, %v2466_v42  ;;  %1962 = vpow2.f32 %v1529_v41  ;;  %v1501_v41 = vmul.f32 -1.442695, %v2648_v59 }
 0x131   :  { %v1945_v32 = vpop.eup %1944  ;;  %1386 = vst.msk [vmem:[%s2908_s3 + $0xb0] sm:$0xf] %vm1341_vm2, %v1647_v26  ;;  %v1650_v0 = vpack.c.bf16 %v1068_v15, %v1068_v15  ;;  %v1066_v54 = vmul.f32 %v1943_v39, %v2470_v48  ;;  %1964 = vpow2.f32 %v1495_v19 }
 0x132   :  { %v1947_v42 = vpop.eup %1946  ;;  %1357 = vst.msk [vmem:[%s2908_s3 + $0x3c] sm:$0xf] %vm1341_vm2, %v1618_v35  ;;  %v1616_v29 = vpack.c.bf16 %v1034_v33, %v1034_v33  ;;  %v1039_v45 = vmul.f32 %v1945_v32, %v2478_v2  ;;  %1966 = vpow2.f32 %v1527_v3  ;;  %v1533_v2 = vmul.f32 -1.442695, %v2659_v23 }
 0x133   :  { %v1949_v48 = vpop.eup %1948  ;;  %1389 = vst.msk [vmem:[%s2908_s3 + $0xbc] sm:$0xf] %vm1341_vm2, %v1650_v0  ;;  %v1648_v30 = vpack.c.bf16 %v1066_v54, %v1066_v54  ;;  %v1071_v43 = vmul.f32 %v1947_v42, %v2482_v9  ;;  %1968 = vpow2.f32 %v1498_v8  ;;  %v1531_v8 = vmul.f32 -1.442695, %v2677_v53 }
 0x134   :  { %v1951_v31 = vpop.eup %1950  ;;  %1355 = vst.msk [vmem:[%s2908_s3 + $0x34] sm:$0xf] %vm1341_vm2, %v1616_v29  ;;  %v1621_v34 = vpack.c.bf16 %v1039_v45, %v1039_v45  ;;  %v1037_v37 = vmul.f32 %v1949_v48, %v2489_v16  ;;  %1970 = vpow2.f32 %v1530_v24  ;;  %v2058_v48 = vld [vmem:[%s2907_s2] ss:$0 sm:$0xff] }
 0x135   :  { %v1953_v50 = vpop.eup %1952  ;;  %1387 = vst.msk [vmem:[%s2908_s3 + $0xb4] sm:$0xf] %vm1341_vm2, %v1648_v30  ;;  %v1653_v9 = vpack.c.bf16 %v1071_v43, %v1071_v43  ;;  %v1069_v19 = vmul.f32 %v1951_v31, %v2510_v44  ;;  %1972 = vpow2.f32 %v1496_v60  ;;  %v2733_v30 = vadd.f32 %v2058_v48, %v2462_v40 }
 0x136   :  { %v1955_v1 = vpop.eup %1954  ;;  %1360 = vst.msk [vmem:[%s2908_s3 + $0x48] sm:$0xf] %vm1341_vm2, %v1621_v34  ;;  %v1619_v16 = vpack.c.bf16 %v1037_v37, %v1037_v37  ;;  %v1040_v3 = vmul.f32 %v1953_v50, %v2523_v49  ;;  %1974 = vpow2.f32 %v1528_v61  ;;  %v2736_v43 = vadd.f32 %v2058_v48, %v2472_v7 }
 0x137   :  { %v1957_v21 = vpop.eup %1956  ;;  %1392 = vst.msk [vmem:[%s2908_s3 + $0xc8] sm:$0xf] %vm1341_vm2, %v1653_v9  ;;  %v1651_v44 = vpack.c.bf16 %v1069_v19, %v1069_v19  ;;  %v1072_v11 = vmul.f32 %v1955_v1, %v2536_v52  ;;  %1976 = vpow2.f32 %v1501_v41  ;;  %v2739_v34 = vadd.f32 %v2058_v48, %v2474_v5  ;;  %v2910_v9 = vld [vmem:[#allocation2_spill] sm:$0xff] }
 0x138   :  { %v1959_v24 = vpop.eup %1958  ;;  %1358 = vst.msk [vmem:[%s2908_s3 + $0x40] sm:$0xf] %vm1341_vm2, %v1619_v16  ;;  %v1622_v49 = vpack.c.bf16 %v1040_v3, %v1040_v3  ;;  %v1038_v60 = vmul.f32 %v1957_v21, %v2547_v58  ;;  %1978 = vpow2.f32 %v1533_v2  ;;  %v2742_v37 = vadd.f32 %v2058_v48, %v2484_v13 }
 0x139   :  { %v1961_v63 = vpop.eup %1960  ;;  %1390 = vst.msk [vmem:[%s2908_s3 + $0xc0] sm:$0xf] %vm1341_vm2, %v1651_v44  ;;  %v1654_v22 = vpack.c.bf16 %v1072_v11, %v1072_v11  ;;  %v878_v10 = vadd.f32 1.0, %v1959_v24  ;;  %1980 = vpow2.f32 %v1499_v46  ;;  %v2745_v19 = vadd.f32 %v2058_v48, %v2910_v9 }
 0x13a   :  { %v1963_v52 = vpop.eup %1962  ;;  %1361 = vst.msk [vmem:[%s2908_s3 + $0x4c] sm:$0xf] %vm1341_vm2, %v1622_v49  ;;  %v1620_v47 = vpack.c.bf16 %v1038_v60, %v1038_v60  ;;  %v851_v26 = vadd.f32 1.0, %v1961_v63  ;;  %1982 = vpow2.f32 %v1531_v8  ;;  %v2748_v40 = vadd.f32 %v2058_v48, %v2503_v14 }
 0x13b   :  { %v1965_v58 = vpop.eup %1964  ;;  %1393 = vst.msk [vmem:[%s2908_s3 + $0xcc] sm:$0xf] %vm1341_vm2, %v1654_v22  ;;  %1984 = vrcp.f32 %v878_v10  ;;  %v883_v15 = vadd.f32 1.0, %v1963_v52  ;;  %v2751_v1 = vadd.f32 %v2058_v48, %v2505_v18  ;;  %v2754_v5 = vadd.f32 %v2058_v48, %v2512_v6 }
 0x13c   :  { %v1967_v61 = vpop.eup %1966  ;;  %1359 = vst.msk [vmem:[%s2908_s3 + $0x44] sm:$0xf] %vm1341_vm2, %v1620_v47  ;;  %1986 = vrcp.f32 %v851_v26  ;;  %v849_v39 = vadd.f32 1.0, %v1965_v58  ;;  %v1502_v3 = vmul.f32 -1.442695, %v2733_v30 }
 0x13d   :  { %v1969_v35 = vpop.eup %1968  ;;  %1988 = vrcp.f32 %v883_v15  ;;  %v881_v33 = vadd.f32 1.0, %v1967_v61  ;;  %v1534_v8 = vmul.f32 -1.442695, %v2736_v43  ;;  %v1500_v44 = vmul.f32 -1.442695, %v2739_v34 }
 0x13e   :  { %v1971_v32 = vpop.eup %1970  ;;  %1990 = vrcp.f32 %v849_v39  ;;  %v852_v0 = vadd.f32 1.0, %v1969_v35  ;;  %v1532_v11 = vmul.f32 -1.442695, %v2742_v37  ;;  %v1505_v6 = vmul.f32 -1.442695, %v2745_v19 }
 0x13f   :  { %v1973_v54 = vpop.eup %1972  ;;  %1992 = vrcp.f32 %v881_v33  ;;  %v884_v42 = vadd.f32 1.0, %v1971_v32  ;;  %v1537_v49 = vmul.f32 -1.442695, %v2748_v40  ;;  %v1503_v22 = vmul.f32 -1.442695, %v2751_v1 }
 0x140   :  { %v1975_v29 = vpop.eup %1974  ;;  %1994 = vrcp.f32 %v852_v0  ;;  %v850_v45 = vadd.f32 1.0, %v1973_v54  ;;  %v1535_v10 = vmul.f32 -1.442695, %v2754_v5  ;;  %v2788_v32 = vadd.f32 %v2058_v48, %v2538_v57 }
 0x141   :  { %v1977_v41 = vpop.eup %1976  ;;  %1996 = vrcp.f32 %v884_v42  ;;  %v882_v31 = vadd.f32 1.0, %v1975_v29 }
 0x142   :  { %v1979_v2 = vpop.eup %1978  ;;  %1998 = vrcp.f32 %v850_v45  ;;  %v855_v50 = vadd.f32 1.0, %v1977_v41 }
 0x143   :  { %v1981_v7 = vpop.eup %1980  ;;  %2000 = vrcp.f32 %v882_v31  ;;  %v887_v46 = vadd.f32 1.0, %v1979_v2 }
 0x144   :  { %v1983_v13 = vpop.eup %1982  ;;  %2002 = vrcp.f32 %v855_v50  ;;  %v853_v16 = vadd.f32 1.0, %v1981_v7  ;;  %v1536_v50 = vmul.f32 -1.442695, %v2788_v32 }
 0x145   :  { %v1985_v21 = vpop.eup %1984  ;;  %2004 = vrcp.f32 %v887_v46  ;;  %v885_v14 = vadd.f32 1.0, %v1983_v13 }
 0x146   :  { %v1987_v24 = vpop.eup %1986  ;;  %v1070_v18 = vmul.f32 %v1985_v21, %v2601_v25  ;;  %2006 = vrcp.f32 %v853_v16  ;;  %v2768_v25 = vadd.f32 %v2058_v48, %v2514_v55  ;;  %v2780_v55 = vadd.f32 %v2058_v48, %v2527_v51 }
 0x147   :  { %v1989_v60 = vpop.eup %1988  ;;  %v1043_v63 = vmul.f32 %v1987_v24, %v2605_v4  ;;  %2008 = vrcp.f32 %v885_v14  ;;  %v2772_v4 = vadd.f32 %v2058_v48, %v2525_v56 }
 0x148   :  { %v1991_v52 = vpop.eup %1990  ;;  %v1652_v47 = vpack.c.bf16 %v1070_v18, %v1070_v18  ;;  %v1075_v26 = vmul.f32 %v1989_v60, %v2609_v12  ;;  %2010 = vpow2.f32 %v1502_v3  ;;  %v1506_v54 = vmul.f32 -1.442695, %v2768_v25 }
 0x149   :  { %v1993_v58 = vpop.eup %1992  ;;  %v1625_v15 = vpack.c.bf16 %v1043_v63, %v1043_v63  ;;  %v1041_v61 = vmul.f32 %v1991_v52, %v2614_v38  ;;  %2012 = vpow2.f32 %v1534_v8  ;;  %v1538_v29 = vmul.f32 -1.442695, %v2772_v4 }
 0x14a   :  { %v1995_v39 = vpop.eup %1994  ;;  %1391 = vst.msk [vmem:[%s2908_s3 + $0xc4] sm:$0xf] %vm1341_vm2, %v1652_v47  ;;  %v1657_v35 = vpack.c.bf16 %v1075_v26, %v1075_v26  ;;  %v1073_v12 = vmul.f32 %v1993_v58, %v2618_v36  ;;  %2014 = vpow2.f32 %v1500_v44  ;;  %v1504_v41 = vmul.f32 -1.442695, %v2780_v55 }
 0x14b   :  { %v1997_v33 = vpop.eup %1996  ;;  %1364 = vst.msk [vmem:[%s2908_s3 + $0x58] sm:$0xf] %vm1341_vm2, %v1625_v15  ;;  %v1623_v56 = vpack.c.bf16 %v1041_v61, %v1041_v61  ;;  %v1044_v38 = vmul.f32 %v1995_v39, %v2622_v27  ;;  %2016 = vpow2.f32 %v1532_v11 }
 0x14c   :  { %v1999_v0 = vpop.eup %1998  ;;  %1396 = vst.msk [vmem:[%s2908_s3 + $0xd8] sm:$0xf] %vm1341_vm2, %v1657_v35  ;;  %v1655_v51 = vpack.c.bf16 %v1073_v12, %v1073_v12  ;;  %v1076_v36 = vmul.f32 %v1997_v33, %v2626_v20  ;;  %2018 = vpow2.f32 %v1505_v6 }
 0x14d   :  { %v2001_v42 = vpop.eup %2000  ;;  %1362 = vst.msk [vmem:[%s2908_s3 + $0x50] sm:$0xf] %vm1341_vm2, %v1623_v56  ;;  %v1626_v57 = vpack.c.bf16 %v1044_v38, %v1044_v38  ;;  %v1042_v27 = vmul.f32 %v1999_v0, %v2630_v28  ;;  %2020 = vpow2.f32 %v1537_v49 }
 0x14e   :  { %v2003_v45 = vpop.eup %2002  ;;  %1394 = vst.msk [vmem:[%s2908_s3 + $0xd0] sm:$0xf] %vm1341_vm2, %v1655_v51  ;;  %v1658_v20 = vpack.c.bf16 %v1076_v36, %v1076_v36  ;;  %v1074_v48 = vmul.f32 %v2001_v42, %v2637_v62  ;;  %2022 = vpow2.f32 %v1503_v22 }
 0x14f   :  { %v2005_v31 = vpop.eup %2004  ;;  %1365 = vst.msk [vmem:[%s2908_s3 + $0x5c] sm:$0xf] %vm1341_vm2, %v1626_v57  ;;  %v1624_v28 = vpack.c.bf16 %v1042_v27, %v1042_v27  ;;  %v1047_v2 = vmul.f32 %v2003_v45, %v2648_v59  ;;  %2024 = vpow2.f32 %v1535_v10 }
 0x150   :  { %v2007_v9 = vpop.eup %2006  ;;  %1397 = vst.msk [vmem:[%s2908_s3 + $0xdc] sm:$0xf] %vm1341_vm2, %v1658_v20  ;;  %v1656_v62 = vpack.c.bf16 %v1074_v48, %v1074_v48  ;;  %v1079_v7 = vmul.f32 %v2005_v31, %v2659_v23  ;;  %2026 = vpow2.f32 %v1506_v54 }
 0x151   :  { %v2009_v46 = vpop.eup %2008  ;;  %1363 = vst.msk [vmem:[%s2908_s3 + $0x54] sm:$0xf] %vm1341_vm2, %v1624_v28  ;;  %v1629_v59 = vpack.c.bf16 %v1047_v2, %v1047_v2  ;;  %v1045_v13 = vmul.f32 %v2007_v9, %v2668_v17  ;;  %2028 = vpow2.f32 %v1538_v29 }
 0x152   :  { %v2011_v16 = vpop.eup %2010  ;;  %1395 = vst.msk [vmem:[%s2908_s3 + $0xd4] sm:$0xf] %vm1341_vm2, %v1656_v62  ;;  %v1661_v3 = vpack.c.bf16 %v1079_v7, %v1079_v7  ;;  %v1077_v23 = vmul.f32 %v2009_v46, %v2677_v53  ;;  %2030 = vpow2.f32 %v1504_v41 }
 0x153   :  { %v2013_v8 = vpop.eup %2012  ;;  %1368 = vst.msk [vmem:[%s2908_s3 + $0x68] sm:$0xf] %vm1341_vm2, %v1629_v59  ;;  %v1627_v21 = vpack.c.bf16 %v1045_v13, %v1045_v13  ;;  %v856_v14 = vadd.f32 1.0, %v2011_v16  ;;  %2032 = vpow2.f32 %v1536_v50 }
 0x154   :  { %v2015_v17 = vpop.eup %2014  ;;  %1400 = vst.msk [vmem:[%s2908_s3 + $0xe8] sm:$0xf] %vm1341_vm2, %v1661_v3  ;;  %v1659_v44 = vpack.c.bf16 %v1077_v23, %v1077_v23  ;;  %v888_v11 = vadd.f32 1.0, %v2013_v8 }
 0x155   :  { %v2017_v24 = vpop.eup %2016  ;;  %1366 = vst.msk [vmem:[%s2908_s3 + $0x60] sm:$0xf] %vm1341_vm2, %v1627_v21  ;;  %2034 = vrcp.f32 %v856_v14  ;;  %v854_v53 = vadd.f32 1.0, %v2015_v17 }
 0x156   :  { %v2019_v18 = vpop.eup %2018  ;;  %1398 = vst.msk [vmem:[%s2908_s3 + $0xe0] sm:$0xf] %vm1341_vm2, %v1659_v44  ;;  %2036 = vrcp.f32 %v888_v11  ;;  %v886_v6 = vadd.f32 1.0, %v2017_v24 }
 0x157   :  { %v2021_v49 = vpop.eup %2020  ;;  %2038 = vrcp.f32 %v854_v53  ;;  %v859_v60 = vadd.f32 1.0, %v2019_v18 }
 0x158   :  { %v2023_v63 = vpop.eup %2022  ;;  %2040 = vrcp.f32 %v886_v6  ;;  %v891_v22 = vadd.f32 1.0, %v2021_v49 }
 0x159   :  { %v2025_v10 = vpop.eup %2024  ;;  %2042 = vrcp.f32 %v859_v60  ;;  %v857_v52 = vadd.f32 1.0, %v2023_v63 }
 0x15a   :  { %v2027_v47 = vpop.eup %2026  ;;  %2044 = vrcp.f32 %v891_v22  ;;  %v889_v26 = vadd.f32 1.0, %v2025_v10 }
 0x15b   :  { %v2029_v58 = vpop.eup %2028  ;;  %2046 = vrcp.f32 %v857_v52  ;;  %v860_v15 = vadd.f32 1.0, %v2027_v47 }
 0x15c   :  { %v2031_v61 = vpop.eup %2030  ;;  %2048 = vrcp.f32 %v889_v26  ;;  %v892_v39 = vadd.f32 1.0, %v2029_v58 }
 0x15d   :  { %v2033_v35 = vpop.eup %2032  ;;  %2050 = vrcp.f32 %v860_v15  ;;  %v858_v12 = vadd.f32 1.0, %v2031_v61 }
 0x15e   :  { %2052 = vrcp.f32 %v892_v39  ;;  %v890_v33 = vadd.f32 1.0, %v2033_v35 }
 0x15f   :  { %v2035_v56 = vpop.eup %2034  ;;  %2054 = vrcp.f32 %v858_v12 }
 0x160   :  { %v2037_v38 = vpop.eup %2036  ;;  %v1048_v0 = vmul.f32 %v2035_v56, %v2733_v30  ;;  %2056 = vrcp.f32 %v890_v33 }
 0x161   :  { %v2039_v51 = vpop.eup %2038  ;;  %v1080_v36 = vmul.f32 %v2037_v38, %v2736_v43 }
 0x162   :  { %v2041_v54 = vpop.eup %2040  ;;  %v1630_v42 = vpack.c.bf16 %v1048_v0, %v1048_v0  ;;  %v1046_v57 = vmul.f32 %v2039_v51, %v2739_v34 }
 0x163   :  { %v2043_v27 = vpop.eup %2042  ;;  %v1662_v29 = vpack.c.bf16 %v1080_v36, %v1080_v36  ;;  %v1078_v45 = vmul.f32 %v2041_v54, %v2742_v37 }
 0x164   :  { %v2045_v20 = vpop.eup %2044  ;;  %1369 = vst.msk [vmem:[%s2908_s3 + $0x6c] sm:$0xf] %vm1341_vm2, %v1630_v42  ;;  %v1628_v48 = vpack.c.bf16 %v1046_v57, %v1046_v57  ;;  %v1051_v30 = vmul.f32 %v2043_v27, %v2745_v19 }
 0x165   :  { %v2047_v41 = vpop.eup %2046  ;;  %1401 = vst.msk [vmem:[%s2908_s3 + $0xec] sm:$0xf] %vm1341_vm2, %v1662_v29  ;;  %v1660_v43 = vpack.c.bf16 %v1078_v45, %v1078_v45  ;;  %v1083_v34 = vmul.f32 %v2045_v20, %v2748_v40 }
 0x166   :  { %v2049_v31 = vpop.eup %2048  ;;  %1367 = vst.msk [vmem:[%s2908_s3 + $0x64] sm:$0xf] %vm1341_vm2, %v1628_v48  ;;  %v1633_v37 = vpack.c.bf16 %v1051_v30, %v1051_v30  ;;  %v1049_v28 = vmul.f32 %v2047_v41, %v2751_v1 }
 0x167   :  { %v2051_v2 = vpop.eup %2050  ;;  %1399 = vst.msk [vmem:[%s2908_s3 + $0xe4] sm:$0xf] %vm1341_vm2, %v1660_v43  ;;  %v1665_v19 = vpack.c.bf16 %v1083_v34, %v1083_v34  ;;  %v1081_v50 = vmul.f32 %v2049_v31, %v2754_v5 }
 0x168   :  { %v2053_v9 = vpop.eup %2052  ;;  %1372 = vst.msk [vmem:[%s2908_s3 + $0x78] sm:$0xf] %vm1341_vm2, %v1633_v37  ;;  %v1631_v40 = vpack.c.bf16 %v1049_v28, %v1049_v28  ;;  %v1052_v62 = vmul.f32 %v2051_v2, %v2768_v25 }
 0x169   :  { %v2055_v7 = vpop.eup %2054  ;;  %1404 = vst.msk [vmem:[%s2908_s3 + $0xf8] sm:$0xf] %vm1341_vm2, %v1665_v19  ;;  %v1663_v1 = vpack.c.bf16 %v1081_v50, %v1081_v50  ;;  %v1084_v46 = vmul.f32 %v2053_v9, %v2772_v4 }
 0x16a   :  { %v2057_v59 = vpop.eup %2056  ;;  %1370 = vst.msk [vmem:[%s2908_s3 + $0x70] sm:$0xf] %vm1341_vm2, %v1631_v40  ;;  %v1634_v5 = vpack.c.bf16 %v1052_v62, %v1052_v62  ;;  %v1050_v13 = vmul.f32 %v2055_v7, %v2780_v55 }
 0x16b   :  { %1402 = vst.msk [vmem:[%s2908_s3 + $0xf0] sm:$0xf] %vm1341_vm2, %v1663_v1  ;;  %v1666_v25 = vpack.c.bf16 %v1084_v46, %v1084_v46  ;;  %v1082_v16 = vmul.f32 %v2057_v59, %v2788_v32 }
 0x16c   :  { %1373 = vst.msk [vmem:[%s2908_s3 + $0x7c] sm:$0xf] %vm1341_vm2, %v1634_v5  ;;  %v1632_v4 = vpack.c.bf16 %v1050_v13, %v1050_v13 }
 0x16d   :  { %1405 = vst.msk [vmem:[%s2908_s3 + $0xfc] sm:$0xf] %vm1341_vm2, %v1666_v25  ;;  %v1664_v55 = vpack.c.bf16 %v1082_v16, %v1082_v16 }
 0x16e   :  { %1371 = vst.msk [vmem:[%s2908_s3 + $0x74] sm:$0xf] %vm1341_vm2, %v1632_v4 }
 0x16f   :  { %1403 = vst.msk [vmem:[%s2908_s3 + $0xf4] sm:$0xf] %vm1341_vm2, %v1664_v55 }

// kernel: sppcspc_forward.11
= control target key start
LH: loop header
LB: loop body
LE: loop exit
PB: predicated region body
PF: predicated region fallthrough
CT: control target
= control target key end

     0   :  { %vm344_vm0 = vcmask 1041408   ;;  %vm247_vm1 = vcmask 31744   ;;  %vm1341_vm2 = vcmask 27648   ;;  %s2905_s1 = inlined_call_operand.vmem [shape: bf16[4,4], index: 1, kind: input, shape index: {}]   ;;  %s2906_s0 = inlined_call_operand.vmem [shape: bf16[512,4], index: 0, kind: input, shape index: {}]   ;;  %s2907_s2 = inlined_call_operand.vmem [shape: f32[1,4], index: 2, kind: input, shape index: {}]   ;;  %s2908_s3 = inlined_call_operand.vmem [shape: bf16[512,4], index: 3, kind: output, shape index: {}]  }
   0x1   :  { %v79_v0 = vld [vmem:[%s2905_s1] sm:$0x3]  ;;  %v1772_v4 = vld [vmem:[%s2906_s0 + $0x8] sm:$0xff]   ;;  %v1774_v6 = vld [vmem:[%s2906_s0 + $0x10] sm:$0xff]  }
   0x2   :  { %1768 = vmatprep.subr.msk.bf16.mxu0 %vm344_vm0, %v79_v0  ;;  %1769 = vmatprep.subr.msk.bf16.mxu1 %vm344_vm0, %v79_v0  ;;  %v346_v1 = vsel %vm344_vm0, %v79_v0, 0  ;;  %v1770_v2 = vld [vmem:[%s2906_s0] sm:$0xff]   ;;  %v1773_v5 = vld [vmem:[%s2906_s0 + $0x88] sm:$0xff]   ;;  %v1775_v7 = vld [vmem:[%s2906_s0 + $0x90] sm:$0xff]  }
   0x3   :  { %1701 = vmatpush3.bf16.msra.mxu0 %v346_v1  ;;  %1767 = vmatpush3.bf16.msra.mxu1 %v346_v1  ;;  %v1771_v3 = vld [vmem:[%s2906_s0 + $0x80] sm:$0xff]   ;;  %v1776_v8 = vld [vmem:[%s2906_s0 + $0x18] sm:$0xff]   ;;  %v1780_v12 = vld [vmem:[%s2906_s0 + $0x28] sm:$0xff]  }
   0x4   :  { %1702 = vmatprep.mubr.msk.bf16.mxu0 %vm247_vm1, %v1770_v2  ;;  %1734 = vmatprep.mubr.msk.bf16.mxu1 %vm247_vm1, %v1771_v3  ;;  %v1777_v9 = vld [vmem:[%s2906_s0 + $0x98] sm:$0xff]   ;;  %v1778_v10 = vld [vmem:[%s2906_s0 + $0x20] sm:$0xff]   ;;  %v1781_v13 = vld [vmem:[%s2906_s0 + $0xa8] sm:$0xff]  }
   0x5   :  { %v1779_v11 = vld [vmem:[%s2906_s0 + $0xa0] sm:$0xff]   ;;  %v1782_v14 = vld [vmem:[%s2906_s0 + $0x30] sm:$0xff]   ;;  %v1784_v16 = vld [vmem:[%s2906_s0 + $0x38] sm:$0xff]  }
   0x6   :  { %1703 = vmatmul.mubr.msk.bf16.vlgmr.msra.gmra.mrb[0].mxu0 %vm247_vm1, %v1772_v4  ;;  %1735 = vmatmul.mubr.msk.bf16.vlgmr.msra.gmra.mrb[0].mxu1 %vm247_vm1, %v1773_v5  ;;  %v1783_v15 = vld [vmem:[%s2906_s0 + $0xb0] sm:$0xff]   ;;  %v1785_v17 = vld [vmem:[%s2906_s0 + $0xb8] sm:$0xff]   ;;  %v1786_v18 = vld [vmem:[%s2906_s0 + $0x40] sm:$0xff]  }
   0x7   :  { %1706 = vmatprep.mubr.msk.bf16.mxu0 %vm247_vm1, %v1774_v6  ;;  %1738 = vmatprep.mubr.msk.bf16.mxu1 %vm247_vm1, %v1775_v7  ;;  %v1787_v19 = vld [vmem:[%s2906_s0 + $0xc0] sm:$0xff]   ;;  %v1788_v20 = vld [vmem:[%s2906_s0 + $0x48] sm:$0xff]   ;;  %v1790_v22 = vld [vmem:[%s2906_s0 + $0x50] sm:$0xff]  }
   0x8   :  { %v1789_v21 = vld [vmem:[%s2906_s0 + $0xc8] sm:$0xff]   ;;  %v1791_v23 = vld [vmem:[%s2906_s0 + $0xd0] sm:$0xff]   ;;  %v1792_v24 = vld [vmem:[%s2906_s0 + $0x58] sm:$0xff]  }
   0x9   :  { %v1793_v25 = vld [vmem:[%s2906_s0 + $0xd8] sm:$0xff]   ;;  %v1794_v26 = vld [vmem:[%s2906_s0 + $0x60] sm:$0xff]   ;;  %v1796_v28 = vld [vmem:[%s2906_s0 + $0x68] sm:$0xff]  }
   0xa   :  { %v1795_v27 = vld [vmem:[%s2906_s0 + $0xe0] sm:$0xff]   ;;  %v1797_v29 = vld [vmem:[%s2906_s0 + $0xe8] sm:$0xff]   ;;  %v1798_v30 = vld [vmem:[%s2906_s0 + $0x70] sm:$0xff]  }
   0xb   :  { %v1799_v31 = vld [vmem:[%s2906_s0 + $0xf0] sm:$0xff]   ;;  %v1800_v32 = vld [vmem:[%s2906_s0 + $0x78] sm:$0xff]   ;;  %v2213_v34 = vld [vmem:[%s2907_s2] ss:$0 sm:$0xff] }
   0xc   :  { %v1801_v33 = vld [vmem:[%s2906_s0 + $0xf8] sm:$0xff]  }
   0xe   :  { %1707 = vmatmul.mubr.msk.bf16.gmra.mrb[4].mxu0 %vm247_vm1, %v1776_v8  ;;  %1739 = vmatmul.mubr.msk.bf16.gmra.mrb[4].mxu1 %vm247_vm1, %v1777_v9 }
   0xf   :  { %1710 = vmatprep.mubr.msk.bf16.mxu0 %vm247_vm1, %v1778_v10  ;;  %1742 = vmatprep.mubr.msk.bf16.mxu1 %vm247_vm1, %v1779_v11 }
  0x16   :  { %1711 = vmatmul.mubr.msk.bf16.gmra.mrb[8].mxu0 %vm247_vm1, %v1780_v12  ;;  %1743 = vmatmul.mubr.msk.bf16.gmra.mrb[8].mxu1 %vm247_vm1, %v1781_v13 }
  0x17   :  { %1714 = vmatprep.mubr.msk.bf16.mxu0 %vm247_vm1, %v1782_v14  ;;  %1746 = vmatprep.mubr.msk.bf16.mxu1 %vm247_vm1, %v1783_v15 }
  0x1e   :  { %1715 = vmatmul.mubr.msk.bf16.gmra.mrb[12].mxu0 %vm247_vm1, %v1784_v16  ;;  %1747 = vmatmul.mubr.msk.bf16.gmra.mrb[12].mxu1 %vm247_vm1, %v1785_v17 }
  0x1f   :  { %1718 = vmatprep.mubr.msk.bf16.mxu0 %vm247_vm1, %v1786_v18  ;;  %1750 = vmatprep.mubr.msk.bf16.mxu1 %vm247_vm1, %v1787_v19 }
  0x26   :  { %1719 = vmatmul.mubr.msk.bf16.gmra.mrb[16].mxu0 %vm247_vm1, %v1788_v20  ;;  %1751 = vmatmul.mubr.msk.bf16.gmra.mrb[16].mxu1 %vm247_vm1, %v1789_v21 }
  0x27   :  { %1722 = vmatprep.mubr.msk.bf16.mxu0 %vm247_vm1, %v1790_v22  ;;  %1754 = vmatprep.mubr.msk.bf16.mxu1 %vm247_vm1, %v1791_v23 }
  0x2e   :  { %1723 = vmatmul.mubr.msk.bf16.gmra.mrb[20].mxu0 %vm247_vm1, %v1792_v24  ;;  %1755 = vmatmul.mubr.msk.bf16.gmra.mrb[20].mxu1 %vm247_vm1, %v1793_v25 }
  0x2f   :  { %1726 = vmatprep.mubr.msk.bf16.mxu0 %vm247_vm1, %v1794_v26  ;;  %1758 = vmatprep.mubr.msk.bf16.mxu1 %vm247_vm1, %v1795_v27 }
  0x36   :  { %1727 = vmatmul.mubr.msk.bf16.gmra.mrb[24].mxu0 %vm247_vm1, %v1796_v28  ;;  %1759 = vmatmul.mubr.msk.bf16.gmra.mrb[24].mxu1 %vm247_vm1, %v1797_v29 }
  0x37   :  { %1730 = vmatprep.mubr.msk.bf16.mxu0 %vm247_vm1, %v1798_v30  ;;  %1762 = vmatprep.mubr.msk.bf16.mxu1 %vm247_vm1, %v1799_v31 }
  0x3e   :  { %1731 = vmatmul.mubr.msk.bf16.gmra.mrb[28].mxu0 %vm247_vm1, %v1800_v32  ;;  %1763 = vmatmul.mubr.msk.bf16.gmra.mrb[28].mxu1 %vm247_vm1, %v1801_v33 }
  0xd9   :  { %v1704_v35 = vpop.f32.mrb[0].mxu0  ;;  %v1736_v37 = vpop.f32.mrb[0].mxu1 }
  0xda   :  { %v2216_v36 = vadd.f32 %v1704_v35, %v2213_v34  ;;  %v382_v38 = vpop.f32.mrb[1].mxu0  ;;  %v2219_v39 = vadd.f32 %v1736_v37, %v2213_v34  ;;  %v510_v41 = vpop.f32.mrb[1].mxu1 }
  0xdb   :  { %v2222_v40 = vadd.f32 %v2213_v34, %v382_v38  ;;  %v1705_v42 = vpop.f32.mrb[2].mxu0  ;;  %v2226_v44 = vadd.f32 %v2213_v34, %v510_v41  ;;  %v1737_v46 = vpop.f32.mrb[2].mxu1 }
  0xdc   :  { %v1477_v43 = vmul.f32 -1.442695, %v2216_v36  ;;  %v2229_v45 = vadd.f32 %v1705_v42, %v2213_v34  ;;  %v385_v47 = vpop.f32.mrb[3].mxu0  ;;  %v1509_v48 = vmul.f32 -1.442695, %v2219_v39  ;;  %v2234_v50 = vadd.f32 %v1737_v46, %v2213_v34  ;;  %v513_v52 = vpop.f32.mrb[3].mxu1 }
  0xdd   :  { %v1475_v49 = vmul.f32 -1.442695, %v2222_v40  ;;  %v2237_v51 = vadd.f32 %v2213_v34, %v385_v47  ;;  %v1507_v53 = vmul.f32 -1.442695, %v2226_v44  ;;  %v2242_v55 = vadd.f32 %v2213_v34, %v513_v52 }
  0xde   :  { %1802 = vpow2.f32 %v1477_v43  ;;  %v1478_v54 = vmul.f32 -1.442695, %v2229_v45  ;;  %v1510_v56 = vmul.f32 -1.442695, %v2234_v50 }
  0xdf   :  { %1804 = vpow2.f32 %v1509_v48  ;;  %v1476_v57 = vmul.f32 -1.442695, %v2237_v51  ;;  %v1508_v58 = vmul.f32 -1.442695, %v2242_v55 }
  0xe0   :  { %1806 = vpow2.f32 %v1475_v49 }
  0xe1   :  { %1808 = vpow2.f32 %v1507_v53  ;;  %v1708_v59 = vpop.f32.mrb[4].mxu0  ;;  %v1740_v61 = vpop.f32.mrb[4].mxu1 }
  0xe2   :  { %1810 = vpow2.f32 %v1478_v54  ;;  %v2248_v60 = vadd.f32 %v1708_v59, %v2213_v34  ;;  %v398_v62 = vpop.f32.mrb[5].mxu0  ;;  %v2251_v63 = vadd.f32 %v1740_v61, %v2213_v34  ;;  %v526_v1 = vpop.f32.mrb[5].mxu1 }
  0xe3   :  { %1812 = vpow2.f32 %v1510_v56  ;;  %v2254_v0 = vadd.f32 %v2213_v34, %v398_v62  ;;  %v1709_v2 = vpop.f32.mrb[6].mxu0  ;;  %v2258_v4 = vadd.f32 %v2213_v34, %v526_v1  ;;  %v1741_v6 = vpop.f32.mrb[6].mxu1 }
  0xe4   :  { %1814 = vpow2.f32 %v1476_v57  ;;  %v1481_v3 = vmul.f32 -1.442695, %v2248_v60  ;;  %v2261_v5 = vadd.f32 %v1709_v2, %v2213_v34  ;;  %v401_v7 = vpop.f32.mrb[7].mxu0  ;;  %v1513_v8 = vmul.f32 -1.442695, %v2251_v63  ;;  %v529_v10 = vpop.f32.mrb[7].mxu1 }
  0xe5   :  { %1816 = vpow2.f32 %v1508_v58  ;;  %v1479_v9 = vmul.f32 -1.442695, %v2254_v0  ;;  %v1511_v11 = vmul.f32 -1.442695, %v2258_v4  ;;  %v2270_v35 = vadd.f32 %v1741_v6, %v2213_v34 }
  0xe6   :  { %1818 = vpow2.f32 %v1481_v3  ;;  %v1482_v12 = vmul.f32 -1.442695, %v2261_v5  ;;  %v2273_v41 = vadd.f32 %v2213_v34, %v401_v7  ;;  %v2276_v46 = vadd.f32 %v2213_v34, %v529_v10 }
  0xe7   :  { %1820 = vpow2.f32 %v1513_v8  ;;  %v1514_v57 = vmul.f32 -1.442695, %v2270_v35 }
  0xe8   :  { %v1803_v13 = vpop.eup %1802  ;;  %1822 = vpow2.f32 %v1479_v9  ;;  %v1480_v2 = vmul.f32 -1.442695, %v2273_v41  ;;  %v1512_v10 = vmul.f32 -1.442695, %v2276_v46 }
  0xe9   :  { %v1805_v14 = vpop.eup %1804  ;;  %v831_v15 = vadd.f32 1.0, %v1803_v13  ;;  %1824 = vpow2.f32 %v1511_v11  ;;  %v1712_v16 = vpop.f32.mrb[8].mxu0 }
  0xea   :  { %v1807_v17 = vpop.eup %1806  ;;  %v863_v18 = vadd.f32 1.0, %v1805_v14  ;;  %1826 = vpow2.f32 %v1482_v12  ;;  %v1744_v19 = vpop.f32.mrb[8].mxu1  ;;  %v2279_v49 = vadd.f32 %v1712_v16, %v2213_v34 }
  0xeb   :  { %v414_v20 = vpop.f32.mrb[9].mxu0  ;;  %v1809_v21 = vpop.eup %1808  ;;  %1828 = vrcp.f32 %v831_v15  ;;  %v829_v22 = vadd.f32 1.0, %v1807_v17  ;;  %v2282_v52 = vadd.f32 %v1744_v19, %v2213_v34 }
  0xec   :  { %v542_v23 = vpop.f32.mrb[9].mxu1  ;;  %v1713_v24 = vpop.f32.mrb[10].mxu0  ;;  %1830 = vrcp.f32 %v863_v18  ;;  %v861_v26 = vadd.f32 1.0, %v1809_v21  ;;  %v2288_v58 = vadd.f32 %v2213_v34, %v414_v20  ;;  %v1485_v16 = vmul.f32 -1.442695, %v2279_v49 }
  0xed   :  { %v1811_v25 = vpop.eup %1810  ;;  %v1745_v27 = vpop.f32.mrb[10].mxu1  ;;  %1832 = vrcp.f32 %v829_v22  ;;  %v2296_v3 = vadd.f32 %v2213_v34, %v542_v23  ;;  %v2304_v11 = vadd.f32 %v1713_v24, %v2213_v34  ;;  %v1517_v17 = vmul.f32 -1.442695, %v2282_v52 }
  0xee   :  { %v417_v28 = vpop.f32.mrb[11].mxu0  ;;  %v1813_v29 = vpop.eup %1812  ;;  %v832_v30 = vadd.f32 1.0, %v1811_v25  ;;  %1834 = vrcp.f32 %v861_v26  ;;  %v1483_v21 = vmul.f32 -1.442695, %v2288_v58  ;;  %v2317_v22 = vadd.f32 %v1745_v27, %v2213_v34 }
  0xef   :  { %v2267_v31 = vpop.f32.mrb[11].mxu1  ;;  %v1815_v32 = vpop.eup %1814  ;;  %v864_v33 = vadd.f32 1.0, %v1813_v29  ;;  %v1515_v25 = vmul.f32 -1.442695, %v2296_v3  ;;  %v2322_v26 = vadd.f32 %v2213_v34, %v417_v28 }
  0xf0   :  { %v1817_v37 = vpop.eup %1816  ;;  %1836 = vrcp.f32 %v832_v30  ;;  %v830_v38 = vadd.f32 1.0, %v1815_v32 }
  0xf1   :  { %v1819_v42 = vpop.eup %1818  ;;  %1838 = vrcp.f32 %v864_v33  ;;  %v862_v43 = vadd.f32 1.0, %v1817_v37  ;;  %v2284_v53 = vpop.f32.mrb[12].mxu0 }
  0xf2   :  { %v1821_v47 = vpop.eup %1820  ;;  %1840 = vrcp.f32 %v830_v38  ;;  %v835_v48 = vadd.f32 1.0, %v1819_v42  ;;  %v2290_v59 = vpop.f32.mrb[12].mxu1 }
  0xf3   :  { %v1823_v54 = vpop.eup %1822  ;;  %1842 = vrcp.f32 %v862_v43  ;;  %v867_v56 = vadd.f32 1.0, %v1821_v47  ;;  %v2292_v61 = vpop.f32.mrb[13].mxu0  ;;  %v1518_v43 = vmul.f32 -1.442695, %v2317_v22 }
  0xf4   :  { %v1825_v62 = vpop.eup %1824  ;;  %1844 = vrcp.f32 %v835_v48  ;;  %v833_v1 = vadd.f32 1.0, %v1823_v54  ;;  %v2298_v6 = vpop.f32.mrb[13].mxu1 }
  0xf5   :  { %v2300_v7 = vpop.f32.mrb[14].mxu0  ;;  %v1827_v8 = vpop.eup %1826  ;;  %1846 = vrcp.f32 %v867_v56  ;;  %v865_v9 = vadd.f32 1.0, %v1825_v62 }
  0xf6   :  { %v2306_v12 = vpop.f32.mrb[14].mxu1  ;;  %v2308_v13 = vpop.f32.mrb[15].mxu0  ;;  %1848 = vrcp.f32 %v833_v1  ;;  %v836_v15 = vadd.f32 1.0, %v1827_v8 }
  0xf7   :  { %v1829_v14 = vpop.eup %1828  ;;  %v2312_v18 = vpop.f32.mrb[15].mxu1  ;;  %1850 = vrcp.f32 %v865_v9 }
  0xf8   :  { %v1831_v19 = vpop.eup %1830  ;;  %v1023_v20 = vmul.f32 %v1829_v14, %v2216_v36  ;;  %1852 = vrcp.f32 %v836_v15  ;;  %v1486_v36 = vmul.f32 -1.442695, %v2304_v11 }
  0xf9   :  { %v1833_v23 = vpop.eup %1832  ;;  %v1055_v24 = vmul.f32 %v1831_v19, %v2219_v39  ;;  %1854 = vpow2.f32 %v1514_v57  ;;  %v2329_v39 = vadd.f32 %v2213_v34, %v2267_v31  ;;  %v2331_v38 = vpop.f32.mrb[16].mxu0 }
  0xfa   :  { %v1835_v29 = vpop.eup %1834  ;;  %v1605_v30 = vpack.c.bf16 %v1023_v20, %v1023_v20  ;;  %v1021_v32 = vmul.f32 %v1833_v23, %v2222_v40  ;;  %1856 = vpow2.f32 %v1480_v2  ;;  %v2341_v47 = vpop.f32.mrb[17].mxu0 }
  0xfb   :  { %v1837_v33 = vpop.eup %1836  ;;  %v1637_v37 = vpack.c.bf16 %v1055_v24, %v1055_v24  ;;  %v1053_v27 = vmul.f32 %v1835_v29, %v2226_v44  ;;  %1858 = vpow2.f32 %v1512_v10  ;;  %v2339_v44 = vpop.f32.mrb[16].mxu1  ;;  %v1516_v19 = vmul.f32 -1.442695, %v2329_v39 }
  0xfc   :  { %v1839_v28 = vpop.eup %1838  ;;  %1344 = vst.msk [vmem:[%s2908_s3 + $0x8] sm:$0xf] %vm1341_vm2, %v1605_v30  ;;  %v1603_v40 = vpack.c.bf16 %v1021_v32, %v1021_v32  ;;  %v1024_v42 = vmul.f32 %v1837_v33, %v2229_v45  ;;  %1860 = vpow2.f32 %v1485_v16  ;;  %v2350_v45 = vadd.f32 %v2284_v53, %v2213_v34  ;;  %v2352_v56 = vpop.f32.mrb[17].mxu1 }
  0xfd   :  { %v1841_v31 = vpop.eup %1840  ;;  %1376 = vst.msk [vmem:[%s2908_s3 + $0x88] sm:$0xf] %vm1341_vm2, %v1637_v37  ;;  %v1635_v48 = vpack.c.bf16 %v1053_v27, %v1053_v27  ;;  %v1056_v54 = vmul.f32 %v1839_v28, %v2234_v50  ;;  %v2354_v57 = vpop.f32.mrb[18].mxu0  ;;  %1862 = vpow2.f32 %v1517_v17  ;;  %v2363_v50 = vadd.f32 %v2290_v59, %v2213_v34 }
  0xfe   :  { %v1843_v62 = vpop.eup %1842  ;;  %1342 = vst.msk [vmem:[%s2908_s3] sm:$0xf] %vm1341_vm2, %v1603_v40  ;;  %v1606_v1 = vpack.c.bf16 %v1024_v42, %v1024_v42  ;;  %v1022_v2 = vmul.f32 %v1841_v31, %v2237_v51  ;;  %v2365_v53 = vpop.f32.mrb[18].mxu1  ;;  %1864 = vpow2.f32 %v1483_v21  ;;  %v1484_v51 = vmul.f32 -1.442695, %v2322_v26 }
  0xff   :  { %v2367_v8 = vpop.f32.mrb[19].mxu0  ;;  %v1845_v9 = vpop.eup %1844  ;;  %1374 = vst.msk [vmem:[%s2908_s3 + $0x80] sm:$0xf] %vm1341_vm2, %v1635_v48  ;;  %v1638_v10 = vpack.c.bf16 %v1056_v54, %v1056_v54  ;;  %v1054_v14 = vmul.f32 %v1843_v62, %v2242_v55  ;;  %1866 = vpow2.f32 %v1515_v25  ;;  %v1489_v23 = vmul.f32 -1.442695, %v2350_v45 }
 0x100   :  { %v2375_v15 = vpop.f32.mrb[19].mxu1  ;;  %v1847_v59 = vpop.eup %1846  ;;  %1345 = vst.msk [vmem:[%s2908_s3 + $0xc] sm:$0xf] %vm1341_vm2, %v1606_v1  ;;  %v1604_v16 = vpack.c.bf16 %v1022_v2, %v1022_v2  ;;  %v1027_v17 = vmul.f32 %v1845_v9, %v2248_v60  ;;  %1868 = vpow2.f32 %v1486_v36  ;;  %v1521_v29 = vmul.f32 -1.442695, %v2363_v50 }
 0x101   :  { %v1849_v20 = vpop.eup %1848  ;;  %1377 = vst.msk [vmem:[%s2908_s3 + $0x8c] sm:$0xf] %vm1341_vm2, %v1638_v10  ;;  %v1636_v55 = vpack.c.bf16 %v1054_v14, %v1054_v14  ;;  %v1059_v21 = vmul.f32 %v1847_v59, %v2251_v63  ;;  %1870 = vpow2.f32 %v1518_v43  ;;  %v2400_v36 = vpop.f32.mrb[20].mxu0  ;;  %v2439_v59 = vadd.f32 %v2213_v34, %v2292_v61 }
 0x102   :  { %v1851_v24 = vpop.eup %1850  ;;  %1343 = vst.msk [vmem:[%s2908_s3 + $0x4] sm:$0xf] %vm1341_vm2, %v1604_v16  ;;  %v1609_v60 = vpack.c.bf16 %v1027_v17, %v1027_v17  ;;  %v1025_v25 = vmul.f32 %v1849_v20, %v2254_v0  ;;  %1872 = vpow2.f32 %v1484_v51  ;;  %v2407_v27 = vpop.f32.mrb[20].mxu1  ;;  %v2446_v61 = vadd.f32 %v2213_v34, %v2298_v6 }
 0x103   :  { %v1853_v30 = vpop.eup %1852  ;;  %1375 = vst.msk [vmem:[%s2908_s3 + $0x84] sm:$0xf] %vm1341_vm2, %v1636_v55  ;;  %v1641_v63 = vpack.c.bf16 %v1059_v21, %v1059_v21  ;;  %v1057_v32 = vmul.f32 %v1851_v24, %v2258_v4  ;;  %1874 = vpow2.f32 %v1516_v19  ;;  %v2409_v28 = vpop.f32.mrb[21].mxu0 }
 0x104   :  { %v1855_v33 = vpop.eup %1854  ;;  %1348 = vst.msk [vmem:[%s2908_s3 + $0x18] sm:$0xf] %vm1341_vm2, %v1609_v60  ;;  %v1607_v0 = vpack.c.bf16 %v1025_v25, %v1025_v25  ;;  %v1028_v37 = vmul.f32 %v1853_v30, %v2261_v5  ;;  %1876 = vpow2.f32 %v1489_v23  ;;  %v2415_v43 = vpop.f32.mrb[21].mxu1  ;;  %v1487_v25 = vmul.f32 -1.442695, %v2439_v59 }
 0x105   :  { %v1857_v40 = vpop.eup %1856  ;;  %1380 = vst.msk [vmem:[%s2908_s3 + $0x98] sm:$0xf] %vm1341_vm2, %v1641_v63  ;;  %v1639_v4 = vpack.c.bf16 %v1057_v32, %v1057_v32  ;;  %v868_v42 = vadd.f32 1.0, %v1855_v33  ;;  %v2417_v31 = vpop.f32.mrb[22].mxu0  ;;  %1878 = vpow2.f32 %v1521_v29  ;;  %v2454_v33 = vadd.f32 %v2300_v7, %v2213_v34 }
 0x106   :  { %v1859_v48 = vpop.eup %1858  ;;  %1346 = vst.msk [vmem:[%s2908_s3 + $0x10] sm:$0xf] %vm1341_vm2, %v1607_v0  ;;  %v1610_v5 = vpack.c.bf16 %v1028_v37, %v1028_v37  ;;  %v834_v54 = vadd.f32 1.0, %v1857_v40  ;;  %v2423_v62 = vpop.f32.mrb[22].mxu1  ;;  %v2458_v0 = vadd.f32 %v2306_v12, %v2213_v34 }
 0x107   :  { %v2425_v1 = vpop.f32.mrb[23].mxu0  ;;  %v1861_v2 = vpop.eup %1860  ;;  %1378 = vst.msk [vmem:[%s2908_s3 + $0x90] sm:$0xf] %vm1341_vm2, %v1639_v4  ;;  %1880 = vrcp.f32 %v868_v42  ;;  %v866_v9 = vadd.f32 1.0, %v1859_v48  ;;  %v2466_v42 = vadd.f32 %v2213_v34, %v2308_v13  ;;  %v2470_v48 = vadd.f32 %v2213_v34, %v2312_v18 }
 0x108   :  { %v2431_v10 = vpop.f32.mrb[23].mxu1  ;;  %v1863_v14 = vpop.eup %1862  ;;  %1349 = vst.msk [vmem:[%s2908_s3 + $0x1c] sm:$0xf] %vm1341_vm2, %v1610_v5  ;;  %1882 = vrcp.f32 %v834_v54  ;;  %v839_v51 = vadd.f32 1.0, %v1861_v2  ;;  %v2478_v2 = vadd.f32 %v2331_v38, %v2213_v34  ;;  %v1490_v38 = vmul.f32 -1.442695, %v2454_v33 }
 0x109   :  { %v1865_v16 = vpop.eup %1864  ;;  %1884 = vrcp.f32 %v866_v9  ;;  %v871_v17 = vadd.f32 1.0, %v1863_v14  ;;  %v2441_v23 = vpop.f32.mrb[24].mxu0  ;;  %v2482_v9 = vadd.f32 %v2339_v44, %v2213_v34 }
 0x10a   :  { %v1867_v19 = vpop.eup %1866  ;;  %1886 = vrcp.f32 %v839_v51  ;;  %v837_v20 = vadd.f32 1.0, %v1865_v16  ;;  %v2448_v29 = vpop.f32.mrb[24].mxu1  ;;  %v1519_v51 = vmul.f32 -1.442695, %v2446_v61  ;;  %v2489_v16 = vadd.f32 %v2213_v34, %v2341_v47 }
 0x10b   :  { %v1869_v55 = vpop.eup %1868  ;;  %1888 = vrcp.f32 %v871_v17  ;;  %v869_v21 = vadd.f32 1.0, %v1867_v19  ;;  %v2450_v30 = vpop.f32.mrb[25].mxu0  ;;  %v1493_v47 = vmul.f32 -1.442695, %v2478_v2 }
 0x10c   :  { %v1871_v24 = vpop.eup %1870  ;;  %1890 = vrcp.f32 %v837_v20  ;;  %v840_v60 = vadd.f32 1.0, %v1869_v55  ;;  %v2460_v37 = vpop.f32.mrb[25].mxu1  ;;  %v1522_v20 = vmul.f32 -1.442695, %v2458_v0 }
 0x10d   :  { %v1873_v63 = vpop.eup %1872  ;;  %1892 = vrcp.f32 %v869_v21  ;;  %v872_v32 = vadd.f32 1.0, %v1871_v24  ;;  %v2462_v40 = vpop.f32.mrb[26].mxu0  ;;  %v1488_v21 = vmul.f32 -1.442695, %v2466_v42  ;;  %v1520_v24 = vmul.f32 -1.442695, %v2470_v48 }
 0x10e   :  { %v1875_v6 = vpop.eup %1874  ;;  %1894 = vrcp.f32 %v840_v60  ;;  %v838_v4 = vadd.f32 1.0, %v1873_v63  ;;  %v2472_v7 = vpop.f32.mrb[26].mxu1 }
 0x10f   :  { %v2474_v5 = vpop.f32.mrb[27].mxu0  ;;  %v1877_v12 = vpop.eup %1876  ;;  %1896 = vrcp.f32 %v872_v32  ;;  %v870_v54 = vadd.f32 1.0, %v1875_v6  ;;  %v1525_v32 = vmul.f32 -1.442695, %v2482_v9 }
 0x110   :  { %v2484_v13 = vpop.f32.mrb[27].mxu1  ;;  %v1879_v14 = vpop.eup %1878  ;;  %1898 = vrcp.f32 %v838_v4  ;;  %v843_v18 = vadd.f32 1.0, %v1877_v12 }
 0x111   :  { %v1881_v17 = vpop.eup %1880  ;;  %1900 = vrcp.f32 %v870_v54  ;;  %v875_v19 = vadd.f32 1.0, %v1879_v14  ;;  %v2499_v6 = vpop.f32.mrb[28].mxu0 }
 0x112   :  { %v1883_v44 = vpop.eup %1882  ;;  %v1060_v55 = vmul.f32 %v1881_v17, %v2270_v35  ;;  %1902 = vrcp.f32 %v843_v18  ;;  %2909 = vst [vmem:[#allocation2_spill] sm:$0xff] %v2499_v6  ;;  %v1491_v35 = vmul.f32 -1.442695, %v2489_v16  ;;  %v2503_v14 = vpop.f32.mrb[28].mxu1 }
 0x113   :  { %v1885_v60 = vpop.eup %1884  ;;  %v1026_v63 = vmul.f32 %v1883_v44, %v2273_v41  ;;  %1904 = vrcp.f32 %v875_v19  ;;  %v2505_v18 = vpop.f32.mrb[29].mxu0  ;;  %v2510_v44 = vadd.f32 %v2213_v34, %v2352_v56 }
 0x114   :  { %v1887_v4 = vpop.eup %1886  ;;  %v1642_v12 = vpack.c.bf16 %v1060_v55, %v1060_v55  ;;  %v1058_v54 = vmul.f32 %v1885_v60, %v2276_v46  ;;  %1906 = vpow2.f32 %v1487_v25  ;;  %v2512_v6 = vpop.f32.mrb[29].mxu1 }
 0x115   :  { %v1889_v17 = vpop.eup %1888  ;;  %v1608_v41 = vpack.c.bf16 %v1026_v63, %v1026_v63  ;;  %v1031_v19 = vmul.f32 %v1887_v4, %v2279_v49  ;;  %1908 = vpow2.f32 %v1519_v51  ;;  %v2514_v55 = vpop.f32.mrb[30].mxu0  ;;  %v2523_v49 = vadd.f32 %v2354_v57, %v2213_v34 }
 0x116   :  { %v1891_v46 = vpop.eup %1890  ;;  %1381 = vst.msk [vmem:[%s2908_s3 + $0x9c] sm:$0xf] %vm1341_vm2, %v1642_v12  ;;  %v1640_v25 = vpack.c.bf16 %v1058_v54, %v1058_v54  ;;  %v1063_v60 = vmul.f32 %v1889_v17, %v2282_v52  ;;  %1910 = vpow2.f32 %v1490_v38  ;;  %v2525_v56 = vpop.f32.mrb[30].mxu1  ;;  %v2536_v52 = vadd.f32 %v2365_v53, %v2213_v34 }
 0x117   :  { %v2527_v51 = vpop.f32.mrb[31].mxu0  ;;  %v1893_v63 = vpop.eup %1892  ;;  %1347 = vst.msk [vmem:[%s2908_s3 + $0x14] sm:$0xf] %vm1341_vm2, %v1608_v41  ;;  %v1613_v4 = vpack.c.bf16 %v1031_v19, %v1031_v19  ;;  %v1029_v12 = vmul.f32 %v1891_v46, %v2288_v58  ;;  %1912 = vpow2.f32 %v1522_v20  ;;  %v2547_v58 = vadd.f32 %v2213_v34, %v2367_v8 }
 0x118   :  { %v2538_v57 = vpop.f32.mrb[31].mxu1  ;;  %v1895_v38 = vpop.eup %1894  ;;  %1379 = vst.msk [vmem:[%s2908_s3 + $0x94] sm:$0xf] %vm1341_vm2, %v1640_v25  ;;  %v1645_v54 = vpack.c.bf16 %v1063_v60, %v1063_v60  ;;  %v1061_v17 = vmul.f32 %v1893_v63, %v2296_v3  ;;  %1914 = vpow2.f32 %v1488_v21  ;;  %v1523_v19 = vmul.f32 -1.442695, %v2510_v44 }
 0x119   :  { %v1897_v20 = vpop.eup %1896  ;;  %1352 = vst.msk [vmem:[%s2908_s3 + $0x28] sm:$0xf] %vm1341_vm2, %v1613_v4  ;;  %v1611_v53 = vpack.c.bf16 %v1029_v12, %v1029_v12  ;;  %v1032_v41 = vmul.f32 %v1895_v38, %v2304_v11  ;;  %1916 = vpow2.f32 %v1520_v24  ;;  %v1494_v21 = vmul.f32 -1.442695, %v2523_v49 }
 0x11a   :  { %v1899_v46 = vpop.eup %1898  ;;  %1384 = vst.msk [vmem:[%s2908_s3 + $0xa8] sm:$0xf] %vm1341_vm2, %v1645_v54  ;;  %v1643_v3 = vpack.c.bf16 %v1061_v17, %v1061_v17  ;;  %v1064_v8 = vmul.f32 %v1897_v20, %v2317_v22  ;;  %1918 = vpow2.f32 %v1493_v47  ;;  %v1526_v60 = vmul.f32 -1.442695, %v2536_v52 }
 0x11b   :  { %v1901_v25 = vpop.eup %1900  ;;  %1350 = vst.msk [vmem:[%s2908_s3 + $0x20] sm:$0xf] %vm1341_vm2, %v1611_v53  ;;  %v1614_v11 = vpack.c.bf16 %v1032_v41, %v1032_v41  ;;  %v1030_v24 = vmul.f32 %v1899_v46, %v2322_v26  ;;  %1920 = vpow2.f32 %v1525_v32  ;;  %v1492_v4 = vmul.f32 -1.442695, %v2547_v58 }
 0x11c   :  { %v1903_v63 = vpop.eup %1902  ;;  %1382 = vst.msk [vmem:[%s2908_s3 + $0xa0] sm:$0xf] %vm1341_vm2, %v1643_v3  ;;  %v1646_v22 = vpack.c.bf16 %v1064_v8, %v1064_v8  ;;  %v1062_v47 = vmul.f32 %v1901_v25, %v2329_v39  ;;  %1922 = vpow2.f32 %v1491_v35  ;;  %v2601_v25 = vadd.f32 %v2213_v34, %v2375_v15 }
 0x11d   :  { %v1905_v12 = vpop.eup %1904  ;;  %1353 = vst.msk [vmem:[%s2908_s3 + $0x2c] sm:$0xf] %vm1341_vm2, %v1614_v11  ;;  %v1612_v26 = vpack.c.bf16 %v1030_v24, %v1030_v24  ;;  %v1035_v32 = vmul.f32 %v1903_v63, %v2350_v45  ;;  %1924 = vpow2.f32 %v1523_v19 }
 0x11e   :  { %v1907_v38 = vpop.eup %1906  ;;  %1385 = vst.msk [vmem:[%s2908_s3 + $0xac] sm:$0xf] %vm1341_vm2, %v1646_v22  ;;  %v1644_v39 = vpack.c.bf16 %v1062_v47, %v1062_v47  ;;  %v1067_v35 = vmul.f32 %v1905_v12, %v2363_v50  ;;  %1926 = vpow2.f32 %v1494_v21  ;;  %v2609_v12 = vadd.f32 %v2407_v27, %v2213_v34 }
 0x11f   :  { %v1909_v54 = vpop.eup %1908  ;;  %1351 = vst.msk [vmem:[%s2908_s3 + $0x24] sm:$0xf] %vm1341_vm2, %v1612_v26  ;;  %v1617_v17 = vpack.c.bf16 %v1035_v32, %v1035_v32  ;;  %v841_v20 = vadd.f32 1.0, %v1907_v38  ;;  %1928 = vpow2.f32 %v1526_v60  ;;  %v1524_v32 = vmul.f32 -1.442695, %v2601_v25 }
 0x120   :  { %v1911_v45 = vpop.eup %1910  ;;  %1383 = vst.msk [vmem:[%s2908_s3 + $0xa4] sm:$0xf] %vm1341_vm2, %v1644_v39  ;;  %v1649_v53 = vpack.c.bf16 %v1067_v35, %v1067_v35  ;;  %v873_v41 = vadd.f32 1.0, %v1909_v54  ;;  %1930 = vpow2.f32 %v1492_v4  ;;  %v2605_v4 = vadd.f32 %v2400_v36, %v2213_v34 }
 0x121   :  { %v1913_v50 = vpop.eup %1912  ;;  %1356 = vst.msk [vmem:[%s2908_s3 + $0x38] sm:$0xf] %vm1341_vm2, %v1617_v17  ;;  %1932 = vrcp.f32 %v841_v20  ;;  %v844_v19 = vadd.f32 1.0, %v1911_v45  ;;  %v2614_v38 = vadd.f32 %v2213_v34, %v2409_v28  ;;  %v2618_v36 = vadd.f32 %v2213_v34, %v2415_v43 }
 0x122   :  { %v1915_v46 = vpop.eup %1914  ;;  %1388 = vst.msk [vmem:[%s2908_s3 + $0xb8] sm:$0xf] %vm1341_vm2, %v1649_v53  ;;  %1934 = vrcp.f32 %v873_v41  ;;  %v876_v3 = vadd.f32 1.0, %v1913_v50  ;;  %v2622_v27 = vadd.f32 %v2417_v31, %v2213_v34  ;;  %v2626_v20 = vadd.f32 %v2423_v62, %v2213_v34 }
 0x123   :  { %v1917_v8 = vpop.eup %1916  ;;  %1936 = vrcp.f32 %v844_v19  ;;  %v842_v21 = vadd.f32 1.0, %v1915_v46  ;;  %v2630_v28 = vadd.f32 %v2213_v34, %v2425_v1  ;;  %v1497_v43 = vmul.f32 -1.442695, %v2605_v4 }
 0x124   :  { %v1919_v11 = vpop.eup %1918  ;;  %1938 = vrcp.f32 %v876_v3  ;;  %v874_v24 = vadd.f32 1.0, %v1917_v8  ;;  %v1529_v41 = vmul.f32 -1.442695, %v2609_v12  ;;  %v1495_v19 = vmul.f32 -1.442695, %v2614_v38 }
 0x125   :  { %v1921_v60 = vpop.eup %1920  ;;  %1940 = vrcp.f32 %v842_v21  ;;  %v847_v63 = vadd.f32 1.0, %v1919_v11  ;;  %v2637_v62 = vadd.f32 %v2213_v34, %v2431_v10  ;;  %v1527_v3 = vmul.f32 -1.442695, %v2618_v36 }
 0x126   :  { %v1923_v22 = vpop.eup %1922  ;;  %1942 = vrcp.f32 %v874_v24  ;;  %v879_v47 = vadd.f32 1.0, %v1921_v60  ;;  %v1498_v8 = vmul.f32 -1.442695, %v2622_v27  ;;  %v1530_v24 = vmul.f32 -1.442695, %v2626_v20 }
 0x127   :  { %v1925_v26 = vpop.eup %1924  ;;  %1944 = vrcp.f32 %v847_v63  ;;  %v845_v15 = vadd.f32 1.0, %v1923_v22  ;;  %v1496_v60 = vmul.f32 -1.442695, %v2630_v28 }
 0x128   :  { %v1927_v39 = vpop.eup %1926  ;;  %1946 = vrcp.f32 %v879_v47  ;;  %v877_v35 = vadd.f32 1.0, %v1925_v26 }
 0x129   :  { %v1929_v54 = vpop.eup %1928  ;;  %1948 = vrcp.f32 %v845_v15  ;;  %v848_v17 = vadd.f32 1.0, %v1927_v39 }
 0x12a   :  { %v1931_v45 = vpop.eup %1930  ;;  %1950 = vrcp.f32 %v877_v35  ;;  %v880_v53 = vadd.f32 1.0, %v1929_v54 }
 0x12b   :  { %v1933_v31 = vpop.eup %1932  ;;  %1952 = vrcp.f32 %v848_v17  ;;  %v846_v50 = vadd.f32 1.0, %v1931_v45  ;;  %v2668_v17 = vadd.f32 %v2213_v34, %v2450_v30 }
 0x12c   :  { %v1935_v46 = vpop.eup %1934  ;;  %v1033_v1 = vmul.f32 %v1933_v31, %v2439_v59  ;;  %1954 = vrcp.f32 %v880_v53  ;;  %v2648_v59 = vadd.f32 %v2441_v23, %v2213_v34  ;;  %v2659_v23 = vadd.f32 %v2448_v29, %v2213_v34 }
 0x12d   :  { %v1937_v21 = vpop.eup %1936  ;;  %v1065_v11 = vmul.f32 %v1935_v46, %v2446_v61  ;;  %1956 = vrcp.f32 %v846_v50  ;;  %v1528_v61 = vmul.f32 -1.442695, %v2637_v62  ;;  %v2677_v53 = vadd.f32 %v2213_v34, %v2460_v37 }
 0x12e   :  { %v1939_v63 = vpop.eup %1938  ;;  %v1615_v22 = vpack.c.bf16 %v1033_v1, %v1033_v1  ;;  %v1036_v10 = vmul.f32 %v1937_v21, %v2454_v33  ;;  %1958 = vpow2.f32 %v1524_v32  ;;  %v1499_v46 = vmul.f32 -1.442695, %v2668_v17 }
 0x12f   :  { %v1941_v47 = vpop.eup %1940  ;;  %v1647_v26 = vpack.c.bf16 %v1065_v11, %v1065_v11  ;;  %v1068_v15 = vmul.f32 %v1939_v63, %v2458_v0  ;;  %1960 = vpow2.f32 %v1497_v43 }
 0x130   :  { %v1943_v39 = vpop.eup %1942  ;;  %1354 = vst.msk [vmem:[%s2908_s3 + $0x30] sm:$0xf] %vm1341_vm2, %v1615_v22  ;;  %v1618_v35 = vpack.c.bf16 %v1036_v10, %v1036_v10  ;;  %v1034_v33 = vmul.f32 %v1941_v47, %v2466_v42  ;;  %1962 = vpow2.f32 %v1529_v41  ;;  %v1501_v41 = vmul.f32 -1.442695, %v2648_v59 }
 0x131   :  { %v1945_v32 = vpop.eup %1944  ;;  %1386 = vst.msk [vmem:[%s2908_s3 + $0xb0] sm:$0xf] %vm1341_vm2, %v1647_v26  ;;  %v1650_v0 = vpack.c.bf16 %v1068_v15, %v1068_v15  ;;  %v1066_v54 = vmul.f32 %v1943_v39, %v2470_v48  ;;  %1964 = vpow2.f32 %v1495_v19 }
 0x132   :  { %v1947_v42 = vpop.eup %1946  ;;  %1357 = vst.msk [vmem:[%s2908_s3 + $0x3c] sm:$0xf] %vm1341_vm2, %v1618_v35  ;;  %v1616_v29 = vpack.c.bf16 %v1034_v33, %v1034_v33  ;;  %v1039_v45 = vmul.f32 %v1945_v32, %v2478_v2  ;;  %1966 = vpow2.f32 %v1527_v3  ;;  %v1533_v2 = vmul.f32 -1.442695, %v2659_v23 }
 0x133   :  { %v1949_v48 = vpop.eup %1948  ;;  %1389 = vst.msk [vmem:[%s2908_s3 + $0xbc] sm:$0xf] %vm1341_vm2, %v1650_v0  ;;  %v1648_v30 = vpack.c.bf16 %v1066_v54, %v1066_v54  ;;  %v1071_v43 = vmul.f32 %v1947_v42, %v2482_v9  ;;  %1968 = vpow2.f32 %v1498_v8  ;;  %v1531_v8 = vmul.f32 -1.442695, %v2677_v53 }
 0x134   :  { %v1951_v31 = vpop.eup %1950  ;;  %1355 = vst.msk [vmem:[%s2908_s3 + $0x34] sm:$0xf] %vm1341_vm2, %v1616_v29  ;;  %v1621_v34 = vpack.c.bf16 %v1039_v45, %v1039_v45  ;;  %v1037_v37 = vmul.f32 %v1949_v48, %v2489_v16  ;;  %1970 = vpow2.f32 %v1530_v24  ;;  %v2058_v48 = vld [vmem:[%s2907_s2] ss:$0 sm:$0xff] }
 0x135   :  { %v1953_v50 = vpop.eup %1952  ;;  %1387 = vst.msk [vmem:[%s2908_s3 + $0xb4] sm:$0xf] %vm1341_vm2, %v1648_v30  ;;  %v1653_v9 = vpack.c.bf16 %v1071_v43, %v1071_v43  ;;  %v1069_v19 = vmul.f32 %v1951_v31, %v2510_v44  ;;  %1972 = vpow2.f32 %v1496_v60  ;;  %v2733_v30 = vadd.f32 %v2058_v48, %v2462_v40 }
 0x136   :  { %v1955_v1 = vpop.eup %1954  ;;  %1360 = vst.msk [vmem:[%s2908_s3 + $0x48] sm:$0xf] %vm1341_vm2, %v1621_v34  ;;  %v1619_v16 = vpack.c.bf16 %v1037_v37, %v1037_v37  ;;  %v1040_v3 = vmul.f32 %v1953_v50, %v2523_v49  ;;  %1974 = vpow2.f32 %v1528_v61  ;;  %v2736_v43 = vadd.f32 %v2058_v48, %v2472_v7 }
 0x137   :  { %v1957_v21 = vpop.eup %1956  ;;  %1392 = vst.msk [vmem:[%s2908_s3 + $0xc8] sm:$0xf] %vm1341_vm2, %v1653_v9  ;;  %v1651_v44 = vpack.c.bf16 %v1069_v19, %v1069_v19  ;;  %v1072_v11 = vmul.f32 %v1955_v1, %v2536_v52  ;;  %1976 = vpow2.f32 %v1501_v41  ;;  %v2739_v34 = vadd.f32 %v2058_v48, %v2474_v5  ;;  %v2910_v9 = vld [vmem:[#allocation2_spill] sm:$0xff] }
 0x138   :  { %v1959_v24 = vpop.eup %1958  ;;  %1358 = vst.msk [vmem:[%s2908_s3 + $0x40] sm:$0xf] %vm1341_vm2, %v1619_v16  ;;  %v1622_v49 = vpack.c.bf16 %v1040_v3, %v1040_v3  ;;  %v1038_v60 = vmul.f32 %v1957_v21, %v2547_v58  ;;  %1978 = vpow2.f32 %v1533_v2  ;;  %v2742_v37 = vadd.f32 %v2058_v48, %v2484_v13 }
 0x139   :  { %v1961_v63 = vpop.eup %1960  ;;  %1390 = vst.msk [vmem:[%s2908_s3 + $0xc0] sm:$0xf] %vm1341_vm2, %v1651_v44  ;;  %v1654_v22 = vpack.c.bf16 %v1072_v11, %v1072_v11  ;;  %v878_v10 = vadd.f32 1.0, %v1959_v24  ;;  %1980 = vpow2.f32 %v1499_v46  ;;  %v2745_v19 = vadd.f32 %v2058_v48, %v2910_v9 }
 0x13a   :  { %v1963_v52 = vpop.eup %1962  ;;  %1361 = vst.msk [vmem:[%s2908_s3 + $0x4c] sm:$0xf] %vm1341_vm2, %v1622_v49  ;;  %v1620_v47 = vpack.c.bf16 %v1038_v60, %v1038_v60  ;;  %v851_v26 = vadd.f32 1.0, %v1961_v63  ;;  %1982 = vpow2.f32 %v1531_v8  ;;  %v2748_v40 = vadd.f32 %v2058_v48, %v2503_v14 }
 0x13b   :  { %v1965_v58 = vpop.eup %1964  ;;  %1393 = vst.msk [vmem:[%s2908_s3 + $0xcc] sm:$0xf] %vm1341_vm2, %v1654_v22  ;;  %1984 = vrcp.f32 %v878_v10  ;;  %v883_v15 = vadd.f32 1.0, %v1963_v52  ;;  %v2751_v1 = vadd.f32 %v2058_v48, %v2505_v18  ;;  %v2754_v5 = vadd.f32 %v2058_v48, %v2512_v6 }
 0x13c   :  { %v1967_v61 = vpop.eup %1966  ;;  %1359 = vst.msk [vmem:[%s2908_s3 + $0x44] sm:$0xf] %vm1341_vm2, %v1620_v47  ;;  %1986 = vrcp.f32 %v851_v26  ;;  %v849_v39 = vadd.f32 1.0, %v1965_v58  ;;  %v1502_v3 = vmul.f32 -1.442695, %v2733_v30 }
 0x13d   :  { %v1969_v35 = vpop.eup %1968  ;;  %1988 = vrcp.f32 %v883_v15  ;;  %v881_v33 = vadd.f32 1.0, %v1967_v61  ;;  %v1534_v8 = vmul.f32 -1.442695, %v2736_v43  ;;  %v1500_v44 = vmul.f32 -1.442695, %v2739_v34 }
 0x13e   :  { %v1971_v32 = vpop.eup %1970  ;;  %1990 = vrcp.f32 %v849_v39  ;;  %v852_v0 = vadd.f32 1.0, %v1969_v35  ;;  %v1532_v11 = vmul.f32 -1.442695, %v2742_v37  ;;  %v1505_v6 = vmul.f32 -1.442695, %v2745_v19 }
 0x13f   :  { %v1973_v54 = vpop.eup %1972  ;;  %1992 = vrcp.f32 %v881_v33  ;;  %v884_v42 = vadd.f32 1.0, %v1971_v32  ;;  %v1537_v49 = vmul.f32 -1.442695, %v2748_v40  ;;  %v1503_v22 = vmul.f32 -1.442695, %v2751_v1 }
 0x140   :  { %v1975_v29 = vpop.eup %1974  ;;  %1994 = vrcp.f32 %v852_v0  ;;  %v850_v45 = vadd.f32 1.0, %v1973_v54  ;;  %v1535_v10 = vmul.f32 -1.442695, %v2754_v5  ;;  %v2788_v32 = vadd.f32 %v2058_v48, %v2538_v57 }
 0x141   :  { %v1977_v41 = vpop.eup %1976  ;;  %1996 = vrcp.f32 %v884_v42  ;;  %v882_v31 = vadd.f32 1.0, %v1975_v29 }
 0x142   :  { %v1979_v2 = vpop.eup %1978  ;;  %1998 = vrcp.f32 %v850_v45  ;;  %v855_v50 = vadd.f32 1.0, %v1977_v41 }
 0x143   :  { %v1981_v7 = vpop.eup %1980  ;;  %2000 = vrcp.f32 %v882_v31  ;;  %v887_v46 = vadd.f32 1.0, %v1979_v2 }
 0x144   :  { %v1983_v13 = vpop.eup %1982  ;;  %2002 = vrcp.f32 %v855_v50  ;;  %v853_v16 = vadd.f32 1.0, %v1981_v7  ;;  %v1536_v50 = vmul.f32 -1.442695, %v2788_v32 }
 0x145   :  { %v1985_v21 = vpop.eup %1984  ;;  %2004 = vrcp.f32 %v887_v46  ;;  %v885_v14 = vadd.f32 1.0, %v1983_v13 }
 0x146   :  { %v1987_v24 = vpop.eup %1986  ;;  %v1070_v18 = vmul.f32 %v1985_v21, %v2601_v25  ;;  %2006 = vrcp.f32 %v853_v16  ;;  %v2768_v25 = vadd.f32 %v2058_v48, %v2514_v55  ;;  %v2780_v55 = vadd.f32 %v2058_v48, %v2527_v51 }
 0x147   :  { %v1989_v60 = vpop.eup %1988  ;;  %v1043_v63 = vmul.f32 %v1987_v24, %v2605_v4  ;;  %2008 = vrcp.f32 %v885_v14  ;;  %v2772_v4 = vadd.f32 %v2058_v48, %v2525_v56 }
 0x148   :  { %v1991_v52 = vpop.eup %1990  ;;  %v1652_v47 = vpack.c.bf16 %v1070_v18, %v1070_v18  ;;  %v1075_v26 = vmul.f32 %v1989_v60, %v2609_v12  ;;  %2010 = vpow2.f32 %v1502_v3  ;;  %v1506_v54 = vmul.f32 -1.442695, %v2768_v25 }
 0x149   :  { %v1993_v58 = vpop.eup %1992  ;;  %v1625_v15 = vpack.c.bf16 %v1043_v63, %v1043_v63  ;;  %v1041_v61 = vmul.f32 %v1991_v52, %v2614_v38  ;;  %2012 = vpow2.f32 %v1534_v8  ;;  %v1538_v29 = vmul.f32 -1.442695, %v2772_v4 }
 0x14a   :  { %v1995_v39 = vpop.eup %1994  ;;  %1391 = vst.msk [vmem:[%s2908_s3 + $0xc4] sm:$0xf] %vm1341_vm2, %v1652_v47  ;;  %v1657_v35 = vpack.c.bf16 %v1075_v26, %v1075_v26  ;;  %v1073_v12 = vmul.f32 %v1993_v58, %v2618_v36  ;;  %2014 = vpow2.f32 %v1500_v44  ;;  %v1504_v41 = vmul.f32 -1.442695, %v2780_v55 }
 0x14b   :  { %v1997_v33 = vpop.eup %1996  ;;  %1364 = vst.msk [vmem:[%s2908_s3 + $0x58] sm:$0xf] %vm1341_vm2, %v1625_v15  ;;  %v1623_v56 = vpack.c.bf16 %v1041_v61, %v1041_v61  ;;  %v1044_v38 = vmul.f32 %v1995_v39, %v2622_v27  ;;  %2016 = vpow2.f32 %v1532_v11 }
 0x14c   :  { %v1999_v0 = vpop.eup %1998  ;;  %1396 = vst.msk [vmem:[%s2908_s3 + $0xd8] sm:$0xf] %vm1341_vm2, %v1657_v35  ;;  %v1655_v51 = vpack.c.bf16 %v1073_v12, %v1073_v12  ;;  %v1076_v36 = vmul.f32 %v1997_v33, %v2626_v20  ;;  %2018 = vpow2.f32 %v1505_v6 }
 0x14d   :  { %v2001_v42 = vpop.eup %2000  ;;  %1362 = vst.msk [vmem:[%s2908_s3 + $0x50] sm:$0xf] %vm1341_vm2, %v1623_v56  ;;  %v1626_v57 = vpack.c.bf16 %v1044_v38, %v1044_v38  ;;  %v1042_v27 = vmul.f32 %v1999_v0, %v2630_v28  ;;  %2020 = vpow2.f32 %v1537_v49 }
 0x14e   :  { %v2003_v45 = vpop.eup %2002  ;;  %1394 = vst.msk [vmem:[%s2908_s3 + $0xd0] sm:$0xf] %vm1341_vm2, %v1655_v51  ;;  %v1658_v20 = vpack.c.bf16 %v1076_v36, %v1076_v36  ;;  %v1074_v48 = vmul.f32 %v2001_v42, %v2637_v62  ;;  %2022 = vpow2.f32 %v1503_v22 }
 0x14f   :  { %v2005_v31 = vpop.eup %2004  ;;  %1365 = vst.msk [vmem:[%s2908_s3 + $0x5c] sm:$0xf] %vm1341_vm2, %v1626_v57  ;;  %v1624_v28 = vpack.c.bf16 %v1042_v27, %v1042_v27  ;;  %v1047_v2 = vmul.f32 %v2003_v45, %v2648_v59  ;;  %2024 = vpow2.f32 %v1535_v10 }
 0x150   :  { %v2007_v9 = vpop.eup %2006  ;;  %1397 = vst.msk [vmem:[%s2908_s3 + $0xdc] sm:$0xf] %vm1341_vm2, %v1658_v20  ;;  %v1656_v62 = vpack.c.bf16 %v1074_v48, %v1074_v48  ;;  %v1079_v7 = vmul.f32 %v2005_v31, %v2659_v23  ;;  %2026 = vpow2.f32 %v1506_v54 }
 0x151   :  { %v2009_v46 = vpop.eup %2008  ;;  %1363 = vst.msk [vmem:[%s2908_s3 + $0x54] sm:$0xf] %vm1341_vm2, %v1624_v28  ;;  %v1629_v59 = vpack.c.bf16 %v1047_v2, %v1047_v2  ;;  %v1045_v13 = vmul.f32 %v2007_v9, %v2668_v17  ;;  %2028 = vpow2.f32 %v1538_v29 }
 0x152   :  { %v2011_v16 = vpop.eup %2010  ;;  %1395 = vst.msk [vmem:[%s2908_s3 + $0xd4] sm:$0xf] %vm1341_vm2, %v1656_v62  ;;  %v1661_v3 = vpack.c.bf16 %v1079_v7, %v1079_v7  ;;  %v1077_v23 = vmul.f32 %v2009_v46, %v2677_v53  ;;  %2030 = vpow2.f32 %v1504_v41 }
 0x153   :  { %v2013_v8 = vpop.eup %2012  ;;  %1368 = vst.msk [vmem:[%s2908_s3 + $0x68] sm:$0xf] %vm1341_vm2, %v1629_v59  ;;  %v1627_v21 = vpack.c.bf16 %v1045_v13, %v1045_v13  ;;  %v856_v14 = vadd.f32 1.0, %v2011_v16  ;;  %2032 = vpow2.f32 %v1536_v50 }
 0x154   :  { %v2015_v17 = vpop.eup %2014  ;;  %1400 = vst.msk [vmem:[%s2908_s3 + $0xe8] sm:$0xf] %vm1341_vm2, %v1661_v3  ;;  %v1659_v44 = vpack.c.bf16 %v1077_v23, %v1077_v23  ;;  %v888_v11 = vadd.f32 1.0, %v2013_v8 }
 0x155   :  { %v2017_v24 = vpop.eup %2016  ;;  %1366 = vst.msk [vmem:[%s2908_s3 + $0x60] sm:$0xf] %vm1341_vm2, %v1627_v21  ;;  %2034 = vrcp.f32 %v856_v14  ;;  %v854_v53 = vadd.f32 1.0, %v2015_v17 }
 0x156   :  { %v2019_v18 = vpop.eup %2018  ;;  %1398 = vst.msk [vmem:[%s2908_s3 + $0xe0] sm:$0xf] %vm1341_vm2, %v1659_v44  ;;  %2036 = vrcp.f32 %v888_v11  ;;  %v886_v6 = vadd.f32 1.0, %v2017_v24 }
 0x157   :  { %v2021_v49 = vpop.eup %2020  ;;  %2038 = vrcp.f32 %v854_v53  ;;  %v859_v60 = vadd.f32 1.0, %v2019_v18 }
 0x158   :  { %v2023_v63 = vpop.eup %2022  ;;  %2040 = vrcp.f32 %v886_v6  ;;  %v891_v22 = vadd.f32 1.0, %v2021_v49 }
 0x159   :  { %v2025_v10 = vpop.eup %2024  ;;  %2042 = vrcp.f32 %v859_v60  ;;  %v857_v52 = vadd.f32 1.0, %v2023_v63 }
 0x15a   :  { %v2027_v47 = vpop.eup %2026  ;;  %2044 = vrcp.f32 %v891_v22  ;;  %v889_v26 = vadd.f32 1.0, %v2025_v10 }
 0x15b   :  { %v2029_v58 = vpop.eup %2028  ;;  %2046 = vrcp.f32 %v857_v52  ;;  %v860_v15 = vadd.f32 1.0, %v2027_v47 }
 0x15c   :  { %v2031_v61 = vpop.eup %2030  ;;  %2048 = vrcp.f32 %v889_v26  ;;  %v892_v39 = vadd.f32 1.0, %v2029_v58 }
 0x15d   :  { %v2033_v35 = vpop.eup %2032  ;;  %2050 = vrcp.f32 %v860_v15  ;;  %v858_v12 = vadd.f32 1.0, %v2031_v61 }
 0x15e   :  { %2052 = vrcp.f32 %v892_v39  ;;  %v890_v33 = vadd.f32 1.0, %v2033_v35 }
 0x15f   :  { %v2035_v56 = vpop.eup %2034  ;;  %2054 = vrcp.f32 %v858_v12 }
 0x160   :  { %v2037_v38 = vpop.eup %2036  ;;  %v1048_v0 = vmul.f32 %v2035_v56, %v2733_v30  ;;  %2056 = vrcp.f32 %v890_v33 }
 0x161   :  { %v2039_v51 = vpop.eup %2038  ;;  %v1080_v36 = vmul.f32 %v2037_v38, %v2736_v43 }
 0x162   :  { %v2041_v54 = vpop.eup %2040  ;;  %v1630_v42 = vpack.c.bf16 %v1048_v0, %v1048_v0  ;;  %v1046_v57 = vmul.f32 %v2039_v51, %v2739_v34 }
 0x163   :  { %v2043_v27 = vpop.eup %2042  ;;  %v1662_v29 = vpack.c.bf16 %v1080_v36, %v1080_v36  ;;  %v1078_v45 = vmul.f32 %v2041_v54, %v2742_v37 }
 0x164   :  { %v2045_v20 = vpop.eup %2044  ;;  %1369 = vst.msk [vmem:[%s2908_s3 + $0x6c] sm:$0xf] %vm1341_vm2, %v1630_v42  ;;  %v1628_v48 = vpack.c.bf16 %v1046_v57, %v1046_v57  ;;  %v1051_v30 = vmul.f32 %v2043_v27, %v2745_v19 }
 0x165   :  { %v2047_v41 = vpop.eup %2046  ;;  %1401 = vst.msk [vmem:[%s2908_s3 + $0xec] sm:$0xf] %vm1341_vm2, %v1662_v29  ;;  %v1660_v43 = vpack.c.bf16 %v1078_v45, %v1078_v45  ;;  %v1083_v34 = vmul.f32 %v2045_v20, %v2748_v40 }
 0x166   :  { %v2049_v31 = vpop.eup %2048  ;;  %1367 = vst.msk [vmem:[%s2908_s3 + $0x64] sm:$0xf] %vm1341_vm2, %v1628_v48  ;;  %v1633_v37 = vpack.c.bf16 %v1051_v30, %v1051_v30  ;;  %v1049_v28 = vmul.f32 %v2047_v41, %v2751_v1 }
 0x167   :  { %v2051_v2 = vpop.eup %2050  ;;  %1399 = vst.msk [vmem:[%s2908_s3 + $0xe4] sm:$0xf] %vm1341_vm2, %v1660_v43  ;;  %v1665_v19 = vpack.c.bf16 %v1083_v34, %v1083_v34  ;;  %v1081_v50 = vmul.f32 %v2049_v31, %v2754_v5 }
 0x168   :  { %v2053_v9 = vpop.eup %2052  ;;  %1372 = vst.msk [vmem:[%s2908_s3 + $0x78] sm:$0xf] %vm1341_vm2, %v1633_v37  ;;  %v1631_v40 = vpack.c.bf16 %v1049_v28, %v1049_v28  ;;  %v1052_v62 = vmul.f32 %v2051_v2, %v2768_v25 }
 0x169   :  { %v2055_v7 = vpop.eup %2054  ;;  %1404 = vst.msk [vmem:[%s2908_s3 + $0xf8] sm:$0xf] %vm1341_vm2, %v1665_v19  ;;  %v1663_v1 = vpack.c.bf16 %v1081_v50, %v1081_v50  ;;  %v1084_v46 = vmul.f32 %v2053_v9, %v2772_v4 }
 0x16a   :  { %v2057_v59 = vpop.eup %2056  ;;  %1370 = vst.msk [vmem:[%s2908_s3 + $0x70] sm:$0xf] %vm1341_vm2, %v1631_v40  ;;  %v1634_v5 = vpack.c.bf16 %v1052_v62, %v1052_v62  ;;  %v1050_v13 = vmul.f32 %v2055_v7, %v2780_v55 }
 0x16b   :  { %1402 = vst.msk [vmem:[%s2908_s3 + $0xf0] sm:$0xf] %vm1341_vm2, %v1663_v1  ;;  %v1666_v25 = vpack.c.bf16 %v1084_v46, %v1084_v46  ;;  %v1082_v16 = vmul.f32 %v2057_v59, %v2788_v32 }
 0x16c   :  { %1373 = vst.msk [vmem:[%s2908_s3 + $0x7c] sm:$0xf] %vm1341_vm2, %v1634_v5  ;;  %v1632_v4 = vpack.c.bf16 %v1050_v13, %v1050_v13 }
 0x16d   :  { %1405 = vst.msk [vmem:[%s2908_s3 + $0xfc] sm:$0xf] %vm1341_vm2, %v1666_v25  ;;  %v1664_v55 = vpack.c.bf16 %v1082_v16, %v1082_v16 }
 0x16e   :  { %1371 = vst.msk [vmem:[%s2908_s3 + $0x74] sm:$0xf] %vm1341_vm2, %v1632_v4 }
 0x16f   :  { %1403 = vst.msk [vmem:[%s2908_s3 + $0xf4] sm:$0xf] %vm1341_vm2, %v1664_v55 }

// kernel: sppcspc_forward.10
= control target key start
LH: loop header
LB: loop body
LE: loop exit
PB: predicated region body
PF: predicated region fallthrough
CT: control target
= control target key end

     0   :  { %s2361_s12 = smov 0   ;;  %s3237_s0 = inlined_call_operand.vmem [shape: bf16[2,16,16,4], index: 0, kind: input, shape index: {}]   ;;  %s3238_s1 = inlined_call_operand.vmem [shape: bf16[36,4], index: 1, kind: input, shape index: {}]   ;;  %s3239_s2 = inlined_call_operand.vmem [shape: f32[1,4], index: 2, kind: input, shape index: {}]   ;;  %s3240_s3 = inlined_call_operand.vmem [shape: bf16[2,256,4], index: 3, kind: output, shape index: {}]  }
   0x1 LB: > { %s1950_s13 = sadd.s32 4294967295, %s2330_s12   ;;  %p1954_p0 = scmp.ge.s32.totalorder %s2330_s12, 1  ;;  %s2330_s12 = sphi %s2361_s12, %s13_s12  }
   0x2   : > { %p137_p1 = scmp.lt.s32.totalorder %s2330_s12, 3 }
   0x4   : > { %p138_p2 = pnand %p1954_p0, %p137_p1 }
   0x5   : > { %vm437_vm0 = vcmask (!%p138_p2), 1040384   ;;  %vm438_vm1 = vsmask.f32 (!%p138_p2), 256  ;;  %v2332_v0 = vmov (!%p138_p2), 0   ;;  %p161_p3 = scmp.lt.s32.totalorder (!%p138_p2), %s1950_s13, 1  ;;  %vm731_vm3 = vcmask (!%p138_p2), 1046528  }
   0x6   : > { %141 = sbr.rel (%p138_p2) target bundleno = 640 (0x280), region = 32  ;;  %v287_v1 = vrot.slane (!%p138_p2), %v2332_v0, 7  ;;  %vm2369_vm2 = vmand (!%p138_p2), %vm437_vm0, %vm438_vm1  ;;  %vm474_vm4 = vsmask.f32 (!%p138_p2), 7424  ;;  %s2333_s18 = smov (!%p138_p2), 8   ;;  %vm1345_vm5 = vcmask (!%p138_p2), 1041408  }
   0x7   : > { %s2334_s19 = smov (!%p138_p2), 4   ;;  %s2335_s20 = smov (!%p138_p2), 12   ;;  %vm1021_vm6 = vcmask (!%p138_p2), 31744   ;;  %vm1054_vm7 = vcmask (!%p138_p2), 64512   ;;  %vm1087_vm8 = vcmask (!%p138_p2), 97280   ;;  %vm1120_vm9 = vcmask (!%p138_p2), 130048  }
   0x8   : > { %v2375_v3 = vsel (!%p138_p2), %vm2369_vm2, 0, %v287_v1  ;;  %v457_v4 = vsel (!%p138_p2), %vm2369_vm2, %v287_v1, 0  ;;  %s2336_s21 = smov (!%p138_p2), 16   ;;  %s2337_s22 = smov (!%p138_p2), 20   ;;  %vm1153_vm10 = vcmask (!%p138_p2), 162816   ;;  %vm1186_vm11 = vcmask (!%p138_p2), 195584  }
   0x9   : > { %v732_v5 = vrot.slane (!%p138_p2), %v2375_v3, 1  ;;  %v733_v6 = vrot.slane (!%p138_p2), %v457_v4, 1  ;;  %v476_v7 = vshrl.u32 (!%p138_p2), %v2375_v3, 16  ;;  %v478_v8 = vshll.u32 (!%p138_p2), %v2375_v3, 16  ;;  %s2338_s25 = smov (!%p138_p2), 24   ;;  %s2339_s28 = smov (!%p138_p2), 28  }
   0xa   : > { %v483_v9 = vshll.u32 (!%p138_p2), %v457_v4, 16  ;;  %s2340_s4 = smov (!%p138_p2), 32   ;;  %vm1219_vm12 = vcmask (!%p138_p2), 228352   ;;  %vm1252_vm13 = vcmask (!%p138_p2), 261120   ;;  %vm1312_vm14 = vcmask (!%p138_p2), 293888  }
   0xb   : > { %v2386_v10 = vsel (!%p138_p2), %vm731_vm3, %v732_v5, %v733_v6  ;;  %v480_v11 = vrot.slane (!%p138_p2), %v478_v8, 1  ;;  %vm1862_vm15 = vcmask (!%p138_p2), 27648  }
   0xc   : > { %780 = vrot.lane.b32.xlu0 (!%p138_p2), %v2386_v10, %s2333_s18  ;;  %v485_v12 = vrot.slane (!%p138_p2), %v483_v9, 1 }
   0xd   : > { %s3244_s13 = smov (!%p161_p3, %s1950_s13), 1  ;;  %v481_v14 = vor.u32 %v480_v11, %v476_v7 }
   0xe   : > { %s2061_s14 = sshll.u32 %s3244_s13, 7 }
   0xf   : > { %s2393_s17 = scalar_lea.vmem %s3237_s0, %s2061_s14  ;;  %v2400_v18 = vsel %vm474_vm4, %v481_v14, %v485_v12  ;;  %s3144_s9 = scalar_lea.vmem %s3240_s3, %s2061_s14 }
  0x10   : > { %v2177_v13 = vld [vmem:[%s2393_s17 + $0x40] sm:$0xff]   ;;  %v2179_v21 = vld [vmem:[%s2393_s17 + $0x48] sm:$0xff]   ;;  %667 = vrot.lane.b32.xlu0 %v2400_v18, %s2334_s19  ;;  %v2181_v24 = vld [vmem:[%s2393_s17 + $0x38] sm:$0xff]  }
  0x11   : > { %v2178_v15 = vld [vmem:[%s2393_s17] sm:$0xff]   ;;  %v348_v16 = vshrl.u32 %v2177_v13, 16  ;;  %v351_v17 = vshll.u32 %v2177_v13, 16  ;;  %v2180_v22 = vld [vmem:[%s2393_s17 + $0x8] sm:$0xff]   ;;  %v355_v26 = vshrl.u32 %v2179_v21, 16  ;;  %v358_v27 = vshll.u32 %v2179_v21, 16 }
  0x12   : > { %v292_v19 = vshrl.u32 %v2178_v15, 16  ;;  %v295_v20 = vshll.u32 %v2178_v15, 16  ;;  %v299_v28 = vshrl.u32 %v2180_v22, 16  ;;  %v302_v30 = vshll.u32 %v2180_v22, 16 }
  0x13   : > { %v350_v23 = vrot.slane %v348_v16, 7  ;;  %v341_v31 = vshrl.u32 %v2181_v24, 16  ;;  %v344_v32 = vshll.u32 %v2181_v24, 16  ;;  %v357_v34 = vrot.slane %v355_v26, 7 }
  0x14   : > { %v294_v25 = vrot.slane %v292_v19, 7  ;;  %v301_v35 = vrot.slane %v299_v28, 7  ;;  %v2182_v19 = vld [vmem:[%s2393_s17 + $0x10] sm:$0xff]  }
  0x15   : > { %v353_v29 = vor.u32 %v351_v17, %v350_v23  ;;  %v343_v38 = vrot.slane %v341_v31, 7  ;;  %v360_v40 = vor.u32 %v358_v27, %v357_v34  ;;  %v466_v46 = vsel %vm2369_vm2, %v350_v23, 0 }
  0x16   : > { %v297_v33 = vor.u32 %v295_v20, %v294_v25  ;;  %v458_v36 = vsel %vm2369_vm2, %v294_v25, 0  ;;  %v304_v41 = vor.u32 %v302_v30, %v301_v35  ;;  %v760_v54 = vrot.slane %v466_v46, 1 }
  0x17   : > { %v2411_v37 = vsel %vm2369_vm2, 0, %v353_v29  ;;  %v736_v42 = vrot.slane %v458_v36, 1  ;;  %v346_v43 = vor.u32 %v344_v32, %v343_v38  ;;  %v465_v44 = vsel %vm2369_vm2, %v343_v38, 0 }
  0x18   : > { %829 = vrot.lane.b32.xlu1 %v2411_v37, %s2335_s20  ;;  %v2417_v39 = vsel %vm2369_vm2, 0, %v297_v33  ;;  %v2428_v47 = vsel %vm2369_vm2, 0, %v360_v40  ;;  %v2432_v48 = vsel %vm2369_vm2, 0, %v304_v41  ;;  %v757_v49 = vrot.slane %v465_v44, 1  ;;  %v2183_v33 = vld [vmem:[%s2393_s17 + $0x50] sm:$0xff]  }
  0x19   : > { %813 = vrot.lane.b32.xlu0 %v2417_v39, %s2335_s20  ;;  %v735_v45 = vrot.slane %v2417_v39, 1  ;;  %v579_v50 = vshll.u32 %v465_v44, 16  ;;  %v2436_v51 = vsel %vm2369_vm2, 0, %v346_v43  ;;  %v759_v52 = vrot.slane %v2411_v37, 1 }
  0x1a   : > { %v756_v53 = vrot.slane %v2436_v51, 1  ;;  %v572_v55 = vshrl.u32 %v2436_v51, 16  ;;  %v574_v56 = vshll.u32 %v2436_v51, 16  ;;  %v488_v58 = vshrl.u32 %v2417_v39, 16 }
  0x1b   : > { %v737_v57 = vsel %vm731_vm3, %v735_v45, %v736_v42  ;;  %v490_v59 = vshll.u32 %v2417_v39, 16  ;;  %v495_v60 = vshll.u32 %v458_v36, 16  ;;  %v581_v63 = vrot.slane %v579_v50, 1 }
  0x1c   : > { %831 = vrot.lane.b32.xlu1 %v2428_v47, %s2335_s20  ;;  %v2450_v61 = vsel %vm731_vm3, %v756_v53, %v757_v49  ;;  %v576_v62 = vrot.slane %v574_v56, 1  ;;  %v502_v0 = vshll.u32 %v2432_v48, 16  ;;  %v459_v4 = vsel %vm2369_vm2, %v301_v35, 0 }
  0x1d   : > { %815 = vrot.lane.b32.xlu0 %v2432_v48, %s2335_s20  ;;  %v492_v1 = vrot.slane %v490_v59, 1  ;;  %v586_v5 = vshll.u32 %v2411_v37, 16  ;;  %v2459_v6 = vsel %vm731_vm3, %v759_v52, %v760_v54  ;;  %v497_v8 = vrot.slane %v495_v60, 1 }
  0x1e   : > { %v577_v7 = vor.u32 %v576_v62, %v572_v55  ;;  %v500_v9 = vshrl.u32 %v2432_v48, 16  ;;  %v584_v12 = vshrl.u32 %v2411_v37, 16  ;;  %v591_v14 = vshll.u32 %v466_v46, 16 }
  0x1f   : > { %v493_v11 = vor.u32 %v492_v1, %v488_v58  ;;  %v588_v13 = vrot.slane %v586_v5, 1  ;;  %v504_v16 = vrot.slane %v502_v0, 1  ;;  %v507_v17 = vshll.u32 %v459_v4, 16  ;;  %v2191_v0 = vld [vmem:[%s3238_s1 + $0x8] sm:$0xff]  }
  0x20   : > { %796 = vrot.lane.b32.xlu1 %v2450_v61, %s2333_s18  ;;  %v2465_v15 = vsel %vm474_vm4, %v577_v7, %v581_v63  ;;  %v593_v22 = vrot.slane %v591_v14, 1  ;;  %v598_v23 = vshll.u32 %v2428_v47, 16  ;;  %v467_v26 = vsel %vm2369_vm2, %v357_v34, 0 }
  0x21   : > { %782 = vrot.lane.b32.xlu0 %v737_v57, %s2333_s18  ;;  %v498_v20 = vsel %vm474_vm4, %v493_v11, %v497_v8  ;;  %v589_v21 = vor.u32 %v588_v13, %v584_v12  ;;  %v505_v24 = vor.u32 %v504_v16, %v500_v9  ;;  %v509_v25 = vrot.slane %v507_v17, 1  ;;  %v2193_v13 = vld [vmem:[%s3238_s1 + $0x10] ss:$0 sps:$4 sm:$0x33]  }
  0x22   : > { %v306_v27 = vshrl.u32 %v2182_v19, 16  ;;  %v596_v29 = vshrl.u32 %v2428_v47, 16  ;;  %v600_v30 = vrot.slane %v598_v23, 1  ;;  %v603_v31 = vshll.u32 %v467_v26, 16 }
  0x23   : > { %v2479_v28 = vsel %vm474_vm4, %v589_v21, %v593_v22  ;;  %v2483_v32 = vsel %vm474_vm4, %v505_v24, %v509_v25  ;;  %v309_v36 = vshll.u32 %v2182_v19, 16  ;;  %v738_v40 = vrot.slane %v2432_v48, 1  ;;  %v2184_v22 = vld [vmem:[%s2393_s17 + $0x18] sm:$0xff]  }
  0x24   : > { %798 = vrot.lane.b32.xlu1 %v2459_v6, %s2333_s18  ;;  %v308_v35 = vrot.slane %v306_v27, 7  ;;  %v601_v34 = vor.u32 %v600_v30, %v596_v29  ;;  %v605_v38 = vrot.slane %v603_v31, 1  ;;  %v739_v41 = vrot.slane %v459_v4, 1  ;;  %v2185_v27 = vld [vmem:[%s2393_s17 + $0x58] sm:$0xff]  }
  0x25   : > { %683 = vrot.lane.b32.xlu0 %v2465_v15, %s2334_s19  ;;  %v362_v42 = vshrl.u32 %v2183_v33, 16  ;;  %v365_v49 = vshll.u32 %v2183_v33, 16  ;;  %v762_v52 = vrot.slane %v2428_v47, 1  ;;  %v763_v53 = vrot.slane %v467_v26, 1 }
  0x26   : > { %v311_v43 = vor.u32 %v309_v36, %v308_v35  ;;  %v2495_v44 = vsel %vm474_vm4, %v601_v34, %v605_v38  ;;  %v2498_v45 = vsel %vm731_vm3, %v738_v40, %v739_v41  ;;  %v460_v56 = vsel %vm2369_vm2, %v308_v35, 0 }
  0x27   : > { %v364_v46 = vrot.slane %v362_v42, 7  ;;  %v2520_v58 = vsel %vm731_vm3, %v762_v52, %v763_v53  ;;  %v519_v62 = vshll.u32 %v460_v56, 16  ;;  %v1347_v17 = vsel %vm1345_vm5, %v2193_v13, 0 }
  0x28   : > { %669 = vrot.lane.b32.xlu1 %v498_v20, %s2334_s19  ;;  %v2502_v50 = vsel %vm2369_vm2, 0, %v311_v43  ;;  %v742_v21 = vrot.slane %v460_v56, 1  ;;  %v313_v24 = vshrl.u32 %v2184_v22, 16  ;;  %v316_v30 = vshll.u32 %v2184_v22, 16 }
  0x29   : > { %857 = vrot.lane.b32.xlu0 %v498_v20, %s2336_s21  ;;  %v514_v54 = vshll.u32 %v2502_v50, 16  ;;  %v367_v55 = vor.u32 %v365_v49, %v364_v46  ;;  %v512_v59 = vshrl.u32 %v2502_v50, 16  ;;  %v521_v5 = vrot.slane %v519_v62, 1 }
  0x2a   : > { %v468_v7 = vsel %vm2369_vm2, %v364_v46, 0  ;;  %v741_v20 = vrot.slane %v2502_v50, 1  ;;  %v315_v29 = vrot.slane %v313_v24, 7  ;;  %v372_v36 = vshll.u32 %v2185_v27, 16  ;;  %v2186_v46 = vld [vmem:[%s2393_s17 + $0x20] sm:$0xff]  }
  0x2b   : > { %v516_v60 = vrot.slane %v514_v54, 1  ;;  %v2525_v63 = vsel %vm2369_vm2, 0, %v367_v55  ;;  %v615_v11 = vshll.u32 %v468_v7, 16  ;;  %v766_v26 = vrot.slane %v468_v7, 1 }
  0x2c   : > { %685 = vrot.lane.b32.xlu1 %v2479_v28, %s2334_s19  ;;  %v610_v1 = vshll.u32 %v2525_v63, 16  ;;  %v608_v8 = vshrl.u32 %v2525_v63, 16  ;;  %v743_v23 = vsel %vm731_vm3, %v741_v20, %v742_v21  ;;  %v765_v25 = vrot.slane %v2525_v63, 1 }
  0x2d   : > { %859 = vrot.lane.b32.xlu0 %v2483_v32, %s2336_s21  ;;  %v517_v4 = vor.u32 %v516_v60, %v512_v59  ;;  %v617_v16 = vrot.slane %v615_v11, 1  ;;  %v318_v33 = vor.u32 %v316_v30, %v315_v29  ;;  %v461_v41 = vsel %vm2369_vm2, %v315_v29, 0  ;;  %v2187_v60 = vld [vmem:[%s2393_s17 + $0x60] sm:$0xff]  }
  0x2e   : > { %v612_v9 = vrot.slane %v610_v1, 1  ;;  %v767_v31 = vsel %vm731_vm3, %v765_v25, %v766_v26  ;;  %v320_v55 = vshrl.u32 %v2186_v46, 16  ;;  %v745_v7 = vrot.slane %v461_v41, 1 }
  0x2f   : > { %v522_v12 = vsel %vm474_vm4, %v517_v4, %v521_v5  ;;  %v2577_v34 = vsel %vm2369_vm2, 0, %v318_v33 }
  0x30   : > { %873 = vrot.lane.b32.xlu1 %v2479_v28, %s2336_s21  ;;  %v613_v14 = vor.u32 %v612_v9, %v608_v8  ;;  %v526_v38 = vshll.u32 %v2577_v34, 16  ;;  %v524_v42 = vshrl.u32 %v2577_v34, 16  ;;  %v322_v62 = vrot.slane %v320_v55, 7 }
  0x31   : > { %893 = vrot.lane.b32.xlu0 %v737_v57, %s2337_s22  ;;  %v2190_v57 = vld [vmem:[%s3238_s1] sm:$0xff]   ;;  %v744_v5 = vrot.slane %v2577_v34, 1  ;;  %v376_v8 = vshrl.u32 %v2187_v60, 16 }
  0x32   : > { %2114 = vmatprep.subr.bf16.mxu0 %v2190_v57  ;;  %2152 = vmatprep.subr.bf16.mxu1 %v2190_v57  ;;  %v2554_v19 = vsel %vm474_vm4, %v613_v14, %v617_v16  ;;  %v528_v43 = vrot.slane %v526_v38, 1  ;;  %v379_v14 = vshll.u32 %v2187_v60, 16  ;;  %v462_v22 = vsel %vm2369_vm2, %v322_v62, 0 }
  0x33   : > { %2115 = vmatpush3.bf16.msra.mxu0 %v2190_v57  ;;  %2155 = vmatpush3.bf16.msra.mxu1 %v2190_v57  ;;  %v543_v26 = vshll.u32 %v462_v22, 16 }
  0x34   : > { %875 = vrot.lane.b32.xlu1 %v2495_v44, %s2336_s21  ;;  %2116 = vmatprep.subr.bf16.mxu0 %v2191_v0  ;;  %v529_v52 = vor.u32 %v528_v43, %v524_v42 }
  0x35   : > { %895 = vrot.lane.b32.xlu0 %v2498_v45, %s2337_s22  ;;  %2153 = vmatprep.subr.bf16.mxu1 %v2191_v0 }
  0x37   : > { %2117 = vmatpush3.bf16.msra.mxu0 %v2191_v0  ;;  %2156 = vmatpush3.bf16.msra.mxu1 %v2191_v0  ;;  %v323_v0 = vshll.u32 %v2186_v46, 16 }
  0x38   : > { %909 = vrot.lane.b32.xlu1 %v2459_v6, %s2337_s22  ;;  %2158 = vmatprep.subr.msk.bf16.mxu0 %vm1345_vm5, %v2193_v13 }
  0x39   : > { %925 = vrot.lane.b32.xlu0 %v2432_v48, %s2338_s25  ;;  %2159 = vmatprep.subr.msk.bf16.mxu1 %vm1345_vm5, %v2193_v13  ;;  %v325_v9 = vor.u32 %v323_v0, %v322_v62  ;;  %v378_v13 = vrot.slane %v376_v8, 7 }
  0x3b   : > { %2119 = vmatpush3.bf16.msra.mxu0 %v1347_v17  ;;  %2157 = vmatpush3.bf16.msra.mxu1 %v1347_v17  ;;  %v2620_v16 = vsel %vm2369_vm2, 0, %v325_v9  ;;  %v381_v21 = vor.u32 %v379_v14, %v378_v13 }
  0x3c   : > { %911 = vrot.lane.b32.xlu1 %v2520_v58, %s2337_s22  ;;  %v538_v20 = vshll.u32 %v2620_v16, 16  ;;  %v536_v24 = vshrl.u32 %v2620_v16, 16 }
  0x3d   : > { %927 = vrot.lane.b32.xlu0 %v2502_v50, %s2338_s25 }
  0x3e   : > { %v540_v25 = vrot.slane %v538_v20, 1 }
  0x40   : > { %941 = vrot.lane.b32.xlu1 %v2428_v47, %s2338_s25  ;;  %v541_v30 = vor.u32 %v540_v25, %v536_v24 }
  0x41   : > { %957 = vrot.lane.b32.xlu0 %v2483_v32, %s2339_s28 }
  0x44   : > { %943 = vrot.lane.b32.xlu1 %v2525_v63, %s2338_s25 }
  0x45   : > { %959 = vrot.lane.b32.xlu0 %v522_v12, %s2339_s28 }
  0x48   : > { %973 = vrot.lane.b32.xlu1 %v2495_v44, %s2339_s28 }
  0x49   : > { %989 = vrot.lane.b32.xlu0 %v2498_v45, %s2340_s4 }
  0x4c   : > { %975 = vrot.lane.b32.xlu1 %v2554_v19, %s2339_s28 }
  0x4d   : > { %671 = vrot.lane.b32.xlu0 %v2483_v32, %s2334_s19  ;;  %v369_v32 = vshrl.u32 %v2185_v27, 16  ;;  %v2638_v27 = vsel %vm2369_vm2, 0, %v381_v21 }
  0x4e   : > { %v634_v29 = vshll.u32 %v2638_v27, 16  ;;  %v771_v60 = vrot.slane %v2638_v27, 1 }
  0x4f   : > { %v371_v35 = vrot.slane %v369_v32, 7  ;;  %v470_v32 = vsel %vm2369_vm2, %v378_v13, 0 }
  0x50   : > { %1005 = vrot.lane.b32.xlu1 %v2520_v58, %s2340_s4  ;;  %v639_v38 = vshll.u32 %v470_v32, 16  ;;  %v772_v62 = vrot.slane %v470_v32, 1 }
  0x51   : > { %991 = vrot.lane.b32.xlu0 %v743_v23, %s2340_s4  ;;  %v374_v40 = vor.u32 %v372_v36, %v371_v35  ;;  %v469_v54 = vsel %vm2369_vm2, %v371_v35, 0  ;;  %v632_v35 = vshrl.u32 %v2638_v27, 16  ;;  %v636_v36 = vrot.slane %v634_v29, 1 }
  0x52   : > { %v641_v43 = vrot.slane %v639_v38, 1  ;;  %v2192_v38 = vld [vmem:[%s2393_s17 + $0x30] sm:$0xff]  }
  0x53   : > { %v637_v42 = vor.u32 %v636_v36, %v632_v35 }
  0x54   : > { %687 = vrot.lane.b32.xlu1 %v2495_v44, %s2334_s19  ;;  %v531_v44 = vshll.u32 %v461_v41, 16 }
  0x55   : > { %673 = vrot.lane.b32.xlu0 %v522_v12, %s2334_s19 }
  0x56   : > { %v533_v53 = vrot.slane %v531_v44, 1  ;;  %v2666_v44 = vsel %vm474_vm4, %v637_v42, %v641_v43 }
  0x58   : > { %1007 = vrot.lane.b32.xlu1 %v767_v31, %s2340_s4  ;;  %v534_v59 = vsel %vm474_vm4, %v529_v52, %v533_v53  ;;  %v748_v52 = vrot.slane %v462_v22, 1 }
  0x59   : > { %784 = vrot.lane.b32.xlu0 %v2498_v45, %s2333_s18  ;;  %v2592_v45 = vsel %vm2369_vm2, 0, %v374_v40 }
  0x5a   : > { %v622_v49 = vshll.u32 %v2592_v45, 16  ;;  %v620_v56 = vshrl.u32 %v2592_v45, 16  ;;  %v768_v17 = vrot.slane %v2592_v45, 1 }
  0x5c   : > { %689 = vrot.lane.b32.xlu1 %v2554_v19, %s2334_s19  ;;  %v624_v57 = vrot.slane %v622_v49, 1  ;;  %v747_v49 = vrot.slane %v2620_v16, 1 }
  0x5d   : > { %786 = vrot.lane.b32.xlu0 %v743_v23, %s2333_s18 }
  0x5e   : > { %v625_v1 = vor.u32 %v624_v57, %v620_v56  ;;  %v2680_v56 = vsel %vm731_vm3, %v747_v49, %v748_v52 }
  0x60   : > { %800 = vrot.lane.b32.xlu1 %v2520_v58, %s2333_s18  ;;  %v627_v58 = vshll.u32 %v469_v54, 16 }
  0x61   : > { %817 = vrot.lane.b32.xlu0 %v2502_v50, %s2335_s20 }
  0x62   : > { %v629_v4 = vrot.slane %v627_v58, 1 }
  0x64   : > { %802 = vrot.lane.b32.xlu1 %v767_v31, %s2333_s18  ;;  %v630_v11 = vsel %vm474_vm4, %v625_v1, %v629_v4 }
  0x65   : > { %819 = vrot.lane.b32.xlu0 %v2577_v34, %s2335_s20 }
  0x68   : > { %833 = vrot.lane.b32.xlu1 %v2525_v63, %s2335_s20 }
  0x69   : > { %861 = vrot.lane.b32.xlu0 %v522_v12, %s2336_s21  ;;  %v2616_v12 = vsel %vm731_vm3, %v744_v5, %v745_v7  ;;  %v2698_v7 = vsel %vm731_vm3, %v771_v60, %v772_v62 }
  0x6c   : > { %835 = vrot.lane.b32.xlu1 %v2592_v45, %s2335_s20 }
  0x6d   : > { %863 = vrot.lane.b32.xlu0 %v534_v59, %s2336_s21 }
  0x70   : > { %877 = vrot.lane.b32.xlu1 %v2554_v19, %s2336_s21  ;;  %v769_v19 = vrot.slane %v469_v54, 1  ;;  %v2188_v54 = vld [vmem:[%s2393_s17 + $0x28] sm:$0xff]  }
  0x71   : > { %897 = vrot.lane.b32.xlu0 %v743_v23, %s2337_s22  ;;  %v327_v58 = vshrl.u32 %v2188_v54, 16  ;;  %v330_v5 = vshll.u32 %v2188_v54, 16 }
  0x72   : > { %v2633_v23 = vsel %vm731_vm3, %v768_v17, %v769_v19 }
  0x73   : > { %v329_v4 = vrot.slane %v327_v58, 7  ;;  %v334_v58 = vshrl.u32 %v2192_v38, 16 }
  0x74   : > { %879 = vrot.lane.b32.xlu1 %v630_v11, %s2336_s21 }
  0x75   : > { %899 = vrot.lane.b32.xlu0 %v2616_v12, %s2337_s22  ;;  %v332_v14 = vor.u32 %v330_v5, %v329_v4 }
  0x77   : > { %v2714_v21 = vsel %vm2369_vm2, 0, %v332_v14 }
  0x78   : > { %913 = vrot.lane.b32.xlu1 %v767_v31, %s2337_s22  ;;  %v545_v31 = vrot.slane %v543_v26, 1  ;;  %v463_v26 = vsel %vm2369_vm2, %v329_v4, 0 }
  0x79   : > { %929 = vrot.lane.b32.xlu0 %v2577_v34, %s2338_s25  ;;  %v555_v32 = vshll.u32 %v463_v26, 16 }
  0x7a   : > { %v2654_v40 = vsel %vm474_vm4, %v541_v30, %v545_v31  ;;  %v548_v30 = vshrl.u32 %v2714_v21, 16 }
  0x7b   : > { %v557_v49 = vrot.slane %v555_v32, 1 }
  0x7c   : > { %915 = vrot.lane.b32.xlu1 %v2633_v23, %s2337_s22 }
  0x7d   : > { %931 = vrot.lane.b32.xlu0 %v2620_v16, %s2338_s25 }
  0x7e   : > { %v2650_v33 = vpop.permute.xlu0 %780 }
  0x80   : > { %945 = vrot.lane.b32.xlu1 %v2592_v45, %s2338_s25 }
  0x81   : > { %961 = vrot.lane.b32.xlu0 %v534_v59, %s2339_s28 }
  0x82   : > { %v2660_v41 = vpop.permute.xlu0 %667 }
  0x84   : > { %947 = vrot.lane.b32.xlu1 %v2638_v27, %s2338_s25 }
  0x85   : > { %963 = vrot.lane.b32.xlu0 %v2654_v40, %s2339_s28 }
  0x88   : > { %977 = vrot.lane.b32.xlu1 %v630_v11, %s2339_s28 }
  0x89   : > { %993 = vrot.lane.b32.xlu0 %v2616_v12, %s2340_s4 }
  0x8a   : > { %v2668_v46 = vpop.permute.xlu1 %829 }
  0x8b   : > { %v2671_v53 = vpop.permute.xlu0 %813 }
  0x8c   : > { %979 = vrot.lane.b32.xlu1 %v2666_v44, %s2339_s28 }
  0x8d   : > { %675 = vrot.lane.b32.xlu0 %v534_v59, %s2334_s19  ;;  %v2189_v59 = vld [vmem:[%s2393_s17 + $0x68] sm:$0xff]  }
  0x8e   : > { %v2677_v55 = vpop.permute.xlu1 %831  ;;  %v383_v9 = vshrl.u32 %v2189_v59, 16  ;;  %v386_v19 = vshll.u32 %v2189_v59, 16 }
  0x8f   : > { %v2682_v57 = vpop.permute.xlu0 %815 }
  0x90   : > { %1009 = vrot.lane.b32.xlu1 %v2633_v23, %s2340_s4 }
  0x91   : > { %995 = vrot.lane.b32.xlu0 %v2680_v56, %s2340_s4 }
  0x92   : > { %v2689_v0 = vpop.permute.xlu1 %796 }
  0x93   : > { %v2692_v1 = vpop.permute.xlu0 %782 }
  0x94   : > { %691 = vrot.lane.b32.xlu1 %v630_v11, %s2334_s19  ;;  %v385_v11 = vrot.slane %v383_v9, 7  ;;  %v2194_v9 = vld [vmem:[%s2393_s17 + $0x70] sm:$0xff]  }
  0x95   : > { %677 = vrot.lane.b32.xlu0 %v2654_v40, %s2334_s19  ;;  %v390_v32 = vshrl.u32 %v2194_v9, 16 }
  0x96   : > { %v2700_v8 = vpop.permute.xlu1 %798  ;;  %v388_v24 = vor.u32 %v386_v19, %v385_v11  ;;  %v471_v52 = vsel %vm2369_vm2, %v385_v11, 0  ;;  %v336_v11 = vrot.slane %v334_v58, 7  ;;  %v337_v19 = vshll.u32 %v2192_v38, 16 }
  0x97   : > { %v2702_v13 = vpop.permute.xlu0 %683  ;;  %v651_v59 = vshll.u32 %v471_v52, 16  ;;  %v1023_v38 = vsel %vm1021_vm6, %v2375_v3, %v2660_v41 }
  0x98   : > { %1011 = vrot.lane.b32.xlu1 %v2698_v7, %s2340_s4  ;;  %v2736_v35 = vsel %vm2369_vm2, 0, %v388_v24  ;;  %v1056_v41 = vsel %vm1054_vm7, %v1023_v38, %v2650_v33 }
  0x99   : > { %788 = vrot.lane.b32.xlu0 %v2616_v12, %s2333_s18  ;;  %v550_v12 = vshll.u32 %v2714_v21, 16  ;;  %v644_v60 = vshrl.u32 %v2736_v35, 16 }
  0x9a   : > { %v2708_v17 = vpop.permute.xlu1 %669 }
  0x9b   : > { %v2710_v20 = vpop.permute.xlu0 %857  ;;  %v552_v31 = vrot.slane %v550_v12, 1  ;;  %v653_v12 = vrot.slane %v651_v59, 1 }
  0x9c   : > { %693 = vrot.lane.b32.xlu1 %v2666_v44, %s2334_s19 }
  0x9d   : > { %790 = vrot.lane.b32.xlu0 %v2680_v56, %s2333_s18  ;;  %v553_v43 = vor.u32 %v552_v31, %v548_v30  ;;  %v750_v30 = vrot.slane %v2714_v21, 1  ;;  %v751_v31 = vrot.slane %v463_v26, 1 }
  0x9e   : > { %v2720_v22 = vpop.permute.xlu1 %685 }
  0x9f   : > { %v2723_v25 = vpop.permute.xlu0 %859  ;;  %v2760_v5 = vsel %vm474_vm4, %v553_v43, %v557_v49  ;;  %v339_v43 = vor.u32 %v337_v19, %v336_v11  ;;  %v2783_v26 = vsel %vm731_vm3, %v750_v30, %v751_v31  ;;  %v775_v19 = vrot.slane %v471_v52, 1 }
  0xa0   : > { %804 = vrot.lane.b32.xlu1 %v2633_v23, %s2333_s18  ;;  %v646_v23 = vshll.u32 %v2736_v35, 16  ;;  %v1089_v30 = vsel %vm1087_vm8, %v1056_v41, %v2671_v53  ;;  %v1025_v31 = vsel %vm1021_vm6, %v2417_v39, %v2708_v17 }
  0xa1   : > { %821 = vrot.lane.b32.xlu0 %v2620_v16, %s2335_s20 }
  0xa2   : > { %v2731_v29 = vpop.permute.xlu1 %873  ;;  %v648_v62 = vrot.slane %v646_v23, 1 }
  0xa3   : > { %v2738_v36 = vpop.permute.xlu0 %893 }
  0xa4   : > { %806 = vrot.lane.b32.xlu1 %v2698_v7, %s2333_s18 }
  0xa5   : > { %823 = vrot.lane.b32.xlu0 %v2714_v21, %s2335_s20 }
  0xa6   : > { %v2746_v42 = vpop.permute.xlu1 %875 }
  0xa7   : > { %v2750_v54 = vpop.permute.xlu0 %895 }
  0xa8   : > { %837 = vrot.lane.b32.xlu1 %v2638_v27, %s2335_s20 }
  0xa9   : > { %865 = vrot.lane.b32.xlu0 %v2654_v40, %s2336_s21  ;;  %v649_v40 = vor.u32 %v648_v62, %v644_v60  ;;  %v392_v60 = vrot.slane %v390_v32, 7  ;;  %v393_v62 = vshll.u32 %v2194_v9, 16  ;;  %v1039_v32 = vsel %vm1021_vm6, %v2436_v51, %v2702_v13 }
  0xaa   : > { %v2757_v4 = vpop.permute.xlu1 %909 }
  0xab   : > { %v926_v14 = vpop.permute.xlu0 %925  ;;  %v2780_v49 = vsel %vm474_vm4, %v649_v40, %v653_v12  ;;  %v2800_v40 = vsel %vm2369_vm2, %v336_v11, 0  ;;  %v395_v12 = vor.u32 %v393_v62, %v392_v60  ;;  %v1122_v11 = vsel %vm1120_vm9, %v1089_v30, %v2710_v20 }
  0xac   : > { %839 = vrot.lane.b32.xlu1 %v2736_v35, %s2335_s20  ;;  %v1155_v53 = vsel %vm1153_vm10, %v1122_v11, %v2738_v36  ;;  %v567_v13 = vshll.u32 %v2800_v40, 16  ;;  %v1058_v20 = vsel %vm1054_vm7, %v1025_v31, %v2692_v1  ;;  %v1072_v62 = vsel %vm1054_vm7, %v1039_v32, %v2689_v0 }
  0xad   : > { %867 = vrot.lane.b32.xlu0 %v2760_v5, %s2336_s21  ;;  %v2829_v36 = vsel %vm2369_vm2, 0, %v395_v12  ;;  %v1091_v1 = vsel %vm1087_vm8, %v1058_v20, %v2682_v57 }
  0xae   : > { %v2767_v24 = vpop.permute.xlu1 %911  ;;  %v658_v0 = vshll.u32 %v2829_v36, 16  ;;  %v569_v30 = vrot.slane %v567_v13, 1  ;;  %v1124_v32 = vsel %vm1120_vm9, %v1091_v1, %v2723_v25  ;;  %v656_v25 = vshrl.u32 %v2829_v36, 16 }
  0xaf   : > { %v2770_v23 = vpop.permute.xlu0 %927 }
  0xb0   : > { %881 = vrot.lane.b32.xlu1 %v2666_v44, %s2336_s21  ;;  %v2787_v44 = vsel %vm2369_vm2, 0, %v339_v43 }
  0xb1   : > { %901 = vrot.lane.b32.xlu0 %v2680_v56, %s2337_s22  ;;  %v774_v56 = vrot.slane %v2736_v35, 1  ;;  %v562_v33 = vshll.u32 %v2787_v44, 16  ;;  %v560_v17 = vshrl.u32 %v2787_v44, 16 }
  0xb2   : > { %v942_v58 = vpop.permute.xlu1 %941 }
  0xb3   : > { %v958_v59 = vpop.permute.xlu0 %957  ;;  %v2820_v39 = vsel %vm731_vm3, %v774_v56, %v775_v19  ;;  %v564_v38 = vrot.slane %v562_v33, 1 }
  0xb4   : > { %883 = vrot.lane.b32.xlu1 %v2780_v49, %s2336_s21 }
  0xb5   : > { %903 = vrot.lane.b32.xlu0 %v2783_v26, %s2337_s22  ;;  %v565_v12 = vor.u32 %v564_v38, %v560_v17  ;;  %v660_v17 = vrot.slane %v658_v0, 1 }
  0xb6   : > { %v2796_v9 = vpop.permute.xlu1 %943 }
  0xb7   : > { %v960_v52 = vpop.permute.xlu0 %959  ;;  %v2873_v20 = vsel %vm474_vm4, %v565_v12, %v569_v30  ;;  %v754_v12 = vrot.slane %v2800_v40, 1  ;;  %v777_v40 = vrot.slane %v2829_v36, 1 }
  0xb8   : > { %917 = vrot.lane.b32.xlu1 %v2698_v7, %s2337_s22  ;;  %v1188_v7 = vsel %vm1186_vm11, %v1155_v53, %v926_v14  ;;  %v2844_v14 = vsel %vm2369_vm2, %v392_v60, 0  ;;  %v1041_v60 = vsel %vm1021_vm6, %v2411_v37, %v2720_v22 }
  0xb9   : > { %933 = vrot.lane.b32.xlu0 %v2714_v21, %s2338_s25  ;;  %v1221_v41 = vsel %vm1219_vm12, %v1188_v7, %v958_v59  ;;  %v1105_v59 = vsel %vm1087_vm8, %v1072_v62, %v2668_v46  ;;  %v663_v46 = vshll.u32 %v2844_v14, 16 }
  0xba   : > { %v974_v43 = vpop.permute.xlu1 %973  ;;  %v1138_v57 = vsel %vm1120_vm9, %v1105_v59, %v2731_v29  ;;  %v1157_v29 = vsel %vm1153_vm10, %v1124_v32, %v2750_v54  ;;  %v1074_v54 = vsel %vm1054_vm7, %v1041_v60, %v2700_v8  ;;  %v778_v32 = vrot.slane %v2844_v14, 1 }
  0xbb   : > { %v990_v56 = vpop.permute.xlu0 %989  ;;  %v1171_v11 = vsel %vm1153_vm10, %v1138_v57, %v2757_v4  ;;  %v1190_v22 = vsel %vm1186_vm11, %v1157_v29, %v2770_v23  ;;  %v661_v23 = vor.u32 %v660_v17, %v656_v25  ;;  %v1107_v8 = vsel %vm1087_vm8, %v1074_v54, %v2677_v55 }
  0xbc   : > { %v1254_v19 = vsel %vm1252_vm13, %v1221_v41, %v990_v56  ;;  %919 = vrot.lane.b32.xlu1 %v2820_v39, %s2337_s22  ;;  %v1204_v53 = vsel %vm1186_vm11, %v1171_v11, %v942_v58  ;;  %v1223_v58 = vsel %vm1219_vm12, %v1190_v22, %v960_v52  ;;  %v1140_v41 = vsel %vm1120_vm9, %v1107_v8, %v2746_v42  ;;  %v2195_v11 = vld [vmem:[%s2393_s17 + $0x78] sm:$0xff]  }
  0xbd   : > { %935 = vrot.lane.b32.xlu0 %v2787_v44, %s2338_s25  ;;  %2120 = vmatprep.mubr.msk.bf16.mxu0 %vm1312_vm14, %v1254_v19  ;;  %v1237_v4 = vsel %vm1219_vm12, %v1204_v53, %v974_v43  ;;  %v665_v43 = vrot.slane %v663_v46, 1  ;;  %v1173_v19 = vsel %vm1153_vm10, %v1140_v41, %v2767_v24  ;;  %v753_v42 = vrot.slane %v2787_v44, 1 }
  0xbe   : > { %v976_v33 = vpop.permute.xlu1 %975  ;;  %v1206_v1 = vsel %vm1186_vm11, %v1173_v19, %v2796_v9  ;;  %v397_v53 = vshrl.u32 %v2195_v11, 16  ;;  %v400_v22 = vshll.u32 %v2195_v11, 16 }
  0xbf   : > { %v2851_v31 = vpop.permute.xlu0 %671  ;;  %v666_v55 = vsel %vm474_vm4, %v661_v23, %v665_v43  ;;  %v1239_v0 = vsel %vm1219_vm12, %v1206_v1, %v976_v33  ;;  %v755_v33 = vsel %vm731_vm3, %v753_v42, %v754_v12 }
  0xc0   : > { %949 = vrot.lane.b32.xlu1 %v2736_v35, %s2338_s25  ;;  %v399_v17 = vrot.slane %v397_v53, 7 }
  0xc1   : > { %965 = vrot.lane.b32.xlu0 %v2760_v5, %s2339_s28 }
  0xc2   : > { %v1006_v13 = vpop.permute.xlu1 %1005  ;;  %v473_v23 = vsel %vm2369_vm2, %v399_v17, 0 }
  0xc3   : > { %v992_v7 = vpop.permute.xlu0 %991  ;;  %v1270_v38 = vsel %vm1252_vm13, %v1237_v4, %v1006_v13  ;;  %v402_v13 = vor.u32 %v400_v22, %v399_v17  ;;  %v853_v41 = vshll.u32 %v473_v23, 16  ;;  %v891_v11 = vrot.slane %v473_v23, 1 }
  0xc4   : > { %v1256_v62 = vsel %vm1252_vm13, %v1223_v58, %v992_v7  ;;  %951 = vrot.lane.b32.xlu1 %v2829_v36, %s2338_s25  ;;  %2136 = vmatprep.mubr.msk.bf16.mxu1 %vm1312_vm14, %v1270_v38 }
  0xc5   : > { %967 = vrot.lane.b32.xlu0 %v2873_v20, %s2339_s28  ;;  %2121 = vmatmul.mubr.msk.bf16.vlgmr.msra.gmra.mrb[0].mxu0 %vm1312_vm14, %v1256_v62  ;;  %v456_v58 = vsel %vm2369_vm2, 0, %v402_v13  ;;  %v855_v2 = vrot.slane %v853_v41, 1 }
  0xc6   : > { %v2888_v52 = vpop.permute.xlu1 %687  ;;  %v848_v38 = vshll.u32 %v456_v58, 16  ;;  %v846_v43 = vshrl.u32 %v456_v58, 16 }
  0xc7   : > { %v2892_v56 = vpop.permute.xlu0 %673 }
  0xc8   : > { %981 = vrot.lane.b32.xlu1 %v2780_v49, %s2339_s28  ;;  %v850_v8 = vrot.slane %v848_v38, 1 }
  0xc9   : > { %997 = vrot.lane.b32.xlu0 %v2783_v26, %s2340_s4 }
  0xca   : > { %v1008_v59 = vpop.permute.xlu1 %1007 }
  0xcb   : > { %v2906_v24 = vpop.permute.xlu0 %784  ;;  %v1272_v30 = vsel %vm1252_vm13, %v1239_v0, %v1008_v59  ;;  %v851_v0 = vor.u32 %v850_v8, %v846_v43 }
  0xcc   : > { %983 = vrot.lane.b32.xlu1 %v666_v55, %s2339_s28  ;;  %2137 = vmatmul.mubr.msk.bf16.vlgmr.msra.gmra.mrb[0].mxu1 %vm1312_vm14, %v1272_v30 }
  0xcd   : > { %679 = vrot.lane.b32.xlu0 %v2760_v5, %s2334_s19  ;;  %v779_v5 = vsel %vm731_vm3, %v777_v40, %v778_v32  ;;  %v1027_v40 = vsel %vm1021_vm6, %v2432_v48, %v2851_v31  ;;  %v890_v32 = vrot.slane %v456_v58, 1 }
  0xce   : > { %v2913_v9 = vpop.permute.xlu1 %689 }
  0xcf   : > { %v2916_v57 = vpop.permute.xlu0 %786  ;;  %v892_v48 = vsel %vm731_vm3, %v890_v32, %v891_v11 }
  0xd0   : > { %1013 = vrot.lane.b32.xlu1 %v2820_v39, %s2340_s4 }
  0xd1   : > { %999 = vrot.lane.b32.xlu0 %v755_v33, %s2340_s4 }
  0xd2   : > { %v2923_v60 = vpop.permute.xlu1 %800 }
  0xd3   : > { %v818_v46 = vpop.permute.xlu0 %817 }
  0xd4   : > { %695 = vrot.lane.b32.xlu1 %v2780_v49, %s2334_s19 }
  0xd5   : > { %681 = vrot.lane.b32.xlu0 %v2873_v20, %s2334_s19 }
  0xd6   : > { %v2931_v29 = vpop.permute.xlu1 %802 }
  0xd7   : > { %v2933_v25 = vpop.permute.xlu0 %819 }
  0xd8   : > { %1015 = vrot.lane.b32.xlu1 %v779_v5, %s2340_s4 }
  0xd9   : > { %792 = vrot.lane.b32.xlu0 %v2783_v26, %s2333_s18 }
  0xda   : > { %v2938_v14 = vpop.permute.xlu1 %833 }
  0xdb   : > { %v862_v49 = vpop.permute.xlu0 %861 }
  0xdc   : > { %697 = vrot.lane.b32.xlu1 %v666_v55, %s2334_s19 }
  0xdd   : > { %794 = vrot.lane.b32.xlu0 %v755_v33, %s2333_s18 }
  0xde   : > { %v2942_v4 = vpop.permute.xlu1 %835 }
  0xdf   : > { %v864_v54 = vpop.permute.xlu0 %863 }
  0xe0   : > { %808 = vrot.lane.b32.xlu1 %v2820_v39, %s2333_s18 }
  0xe1   : > { %825 = vrot.lane.b32.xlu0 %v2787_v44, %s2335_s20 }
  0xe2   : > { %v878_v26 = vpop.permute.xlu1 %877 }
  0xe3   : > { %v898_v7 = vpop.permute.xlu0 %897 }
  0xe4   : > { %810 = vrot.lane.b32.xlu1 %v779_v5, %s2333_s18 }
  0xe5   : > { %827 = vrot.lane.b32.xlu0 %v2436_v51, %s2335_s20 }
  0xe6   : > { %v2953_v62 = vpop.permute.xlu1 %879 }
  0xe7   : > { %v900_v39 = vpop.permute.xlu0 %899 }
  0xe8   : > { %841 = vrot.lane.b32.xlu1 %v2829_v36, %s2335_s20 }
  0xe9   : > { %869 = vrot.lane.b32.xlu0 %v2873_v20, %s2336_s21  ;;  %v856_v20 = vsel %vm474_vm4, %v851_v0, %v855_v2 }
  0xea   : > { %v914_v19 = vpop.permute.xlu1 %913 }
  0xeb   : > { %v930_v1 = vpop.permute.xlu0 %929 }
  0xec   : > { %843 = vrot.lane.b32.xlu1 %v456_v58, %s2335_s20 }
  0xed   : > { %871 = vrot.lane.b32.xlu0 %v2465_v15, %s2336_s21 }
  0xee   : > { %v916_v59 = vpop.permute.xlu1 %915 }
  0xef   : > { %v932_v42 = vpop.permute.xlu0 %931 }
  0xf0   : > { %885 = vrot.lane.b32.xlu1 %v666_v55, %s2336_s21  ;;  %v1060_v55 = vsel %vm1054_vm7, %v1027_v40, %v2906_v24  ;;  %v1029_v24 = vsel %vm1021_vm6, %v2502_v50, %v2892_v56 }
  0xf1   : > { %905 = vrot.lane.b32.xlu0 %v755_v33, %s2337_s22  ;;  %v1093_v33 = vsel %vm1087_vm8, %v1060_v55, %v818_v46  ;;  %v1062_v50 = vsel %vm1054_vm7, %v1029_v24, %v2916_v57 }
  0xf2   : > { %v946_v12 = vpop.permute.xlu1 %945  ;;  %v1126_v22 = vsel %vm1120_vm9, %v1093_v33, %v862_v49 }
  0xf3   : > { %v962_v30 = vpop.permute.xlu0 %961  ;;  %v1159_v13 = vsel %vm1153_vm10, %v1126_v22, %v898_v7 }
  0xf4   : > { %887 = vrot.lane.b32.xlu1 %v856_v20, %s2336_s21  ;;  %v1192_v31 = vsel %vm1186_vm11, %v1159_v13, %v930_v1 }
  0xf5   : > { %907 = vrot.lane.b32.xlu0 %v2450_v61, %s2337_s22  ;;  %v1225_v46 = vsel %vm1219_vm12, %v1192_v31, %v962_v30 }
  0xf6   : > { %v948_v53 = vpop.permute.xlu1 %947 }
  0xf7   : > { %v964_v17 = vpop.permute.xlu0 %963 }
  0xf8   : > { %921 = vrot.lane.b32.xlu1 %v779_v5, %s2337_s22  ;;  %v1043_v5 = vsel %vm1021_vm6, %v2428_v47, %v2888_v52  ;;  %v1095_v47 = vsel %vm1087_vm8, %v1062_v50, %v2933_v25 }
  0xf9   : > { %937 = vrot.lane.b32.xlu0 %v2436_v51, %s2338_s25  ;;  %v1076_v51 = vsel %vm1054_vm7, %v1043_v5, %v2923_v60  ;;  %v1128_v60 = vsel %vm1120_vm9, %v1095_v47, %v864_v54 }
  0xfa   : > { %v978_v38 = vpop.permute.xlu1 %977  ;;  %v1109_v56 = vsel %vm1087_vm8, %v1076_v51, %v2938_v14 }
  0xfb   : > { %v994_v23 = vpop.permute.xlu0 %993  ;;  %v1142_v52 = vsel %vm1120_vm9, %v1109_v56, %v878_v26 }
  0xfc   : > { %v1258_v49 = vsel %vm1252_vm13, %v1225_v46, %v994_v23  ;;  %923 = vrot.lane.b32.xlu1 %v892_v48, %s2337_s22  ;;  %v1175_v8 = vsel %vm1153_vm10, %v1142_v52, %v914_v19 }
  0xfd   : > { %939 = vrot.lane.b32.xlu0 %v2411_v37, %s2338_s25  ;;  %2124 = vmatprep.mubr.msk.bf16.mxu0 %vm1312_vm14, %v1258_v49  ;;  %v1161_v37 = vsel %vm1153_vm10, %v1128_v60, %v900_v39  ;;  %v1208_v57 = vsel %vm1186_vm11, %v1175_v8, %v946_v12 }
  0xfe   : > { %v980_v7 = vpop.permute.xlu1 %979  ;;  %v1194_v14 = vsel %vm1186_vm11, %v1161_v37, %v932_v42  ;;  %v1241_v25 = vsel %vm1219_vm12, %v1208_v57, %v978_v38 }
  0xff   : > { %v676_v43 = vpop.permute.xlu0 %675  ;;  %v1227_v26 = vsel %vm1219_vm12, %v1194_v14, %v964_v17 }
 0x100   : > { %953 = vrot.lane.b32.xlu1 %v456_v58, %s2338_s25  ;;  %v1045_v58 = vsel %vm1021_vm6, %v2525_v63, %v2913_v9  ;;  %v1031_v24 = vsel %vm1021_vm6, %v2577_v34, %v676_v43 }
 0x101   : > { %969 = vrot.lane.b32.xlu0 %v2465_v15, %s2339_s28  ;;  %v1078_v15 = vsel %vm1054_vm7, %v1045_v58, %v2931_v29 }
 0x102   : > { %v1010_v41 = vpop.permute.xlu1 %1009  ;;  %v1111_v19 = vsel %vm1087_vm8, %v1078_v15, %v2942_v4 }
 0x103   : > { %v996_v1 = vpop.permute.xlu0 %995  ;;  %v1274_v54 = vsel %vm1252_vm13, %v1241_v25, %v1010_v41  ;;  %v1144_v63 = vsel %vm1120_vm9, %v1111_v19, %v2953_v62 }
 0x104   : > { %v1260_v39 = vsel %vm1252_vm13, %v1227_v26, %v996_v1  ;;  %955 = vrot.lane.b32.xlu1 %v2375_v3, %s2338_s25  ;;  %2140 = vmatprep.mubr.msk.bf16.mxu1 %vm1312_vm14, %v1274_v54  ;;  %v1177_v3 = vsel %vm1153_vm10, %v1144_v63, %v916_v59 }
 0x105   : > { %971 = vrot.lane.b32.xlu0 %v2479_v28, %s2339_s28  ;;  %2125 = vmatmul.mubr.msk.bf16.gmra.mrb[4].mxu0 %vm1312_vm14, %v1260_v39  ;;  %v1210_v2 = vsel %vm1186_vm11, %v1177_v3, %v948_v53 }
 0x106   : > { %v692_v0 = vpop.permute.xlu1 %691  ;;  %v1243_v28 = vsel %vm1219_vm12, %v1210_v2, %v980_v7 }
 0x107   : > { %v678_v9 = vpop.permute.xlu0 %677  ;;  %v1047_v34 = vsel %vm1021_vm6, %v2592_v45, %v692_v0 }
 0x108   : > { %985 = vrot.lane.b32.xlu1 %v856_v20, %s2339_s28  ;;  %v1033_v7 = vsel %vm1021_vm6, %v2620_v16, %v678_v9 }
 0x109   : > { %1001 = vrot.lane.b32.xlu0 %v2450_v61, %s2340_s4 }
 0x10a   : > { %v1012_v29 = vpop.permute.xlu1 %1011 }
 0x10b   : > { %v789_v42 = vpop.permute.xlu0 %788  ;;  %v1276_v4 = vsel %vm1252_vm13, %v1243_v28, %v1012_v29 }
 0x10c   : > { %987 = vrot.lane.b32.xlu1 %v2400_v18, %s2339_s28  ;;  %2141 = vmatmul.mubr.msk.bf16.gmra.mrb[4].mxu1 %vm1312_vm14, %v1276_v4 }
 0x10d   : > { %1003 = vrot.lane.b32.xlu0 %v2459_v6, %s2340_s4 }
 0x10e   : > { %v694_v62 = vpop.permute.xlu1 %693 }
 0x10f   : > { %v791_v59 = vpop.permute.xlu0 %790  ;;  %v1049_v63 = vsel %vm1021_vm6, %v2638_v27, %v694_v62 }
 0x110   : > { %1017 = vrot.lane.b32.xlu1 %v892_v48, %s2340_s4  ;;  %v1066_v8 = vsel %vm1054_vm7, %v1033_v7, %v791_v59 }
 0x112   : > { %v805_v20 = vpop.permute.xlu1 %804 }
 0x113   : > { %v822_v61 = vpop.permute.xlu0 %821  ;;  %v1080_v60 = vsel %vm1054_vm7, %v1047_v34, %v805_v20 }
 0x114   : > { %1019 = vrot.lane.b32.xlu1 %v2386_v10, %s2340_s4  ;;  %v1064_v10 = vsel %vm1054_vm7, %v1031_v24, %v789_v42 }
 0x115   : > { %v1097_v23 = vsel %vm1087_vm8, %v1064_v10, %v822_v61 }
 0x116   : > { %v807_v12 = vpop.permute.xlu1 %806 }
 0x117   : > { %v824_v30 = vpop.permute.xlu0 %823  ;;  %v1082_v3 = vsel %vm1054_vm7, %v1049_v63, %v807_v12 }
 0x118   : > { %v1099_v14 = vsel %vm1087_vm8, %v1066_v8, %v824_v30 }
 0x11a   : > { %v838_v40 = vpop.permute.xlu1 %837 }
 0x11b   : > { %v866_v32 = vpop.permute.xlu0 %865  ;;  %v1113_v37 = vsel %vm1087_vm8, %v1080_v60, %v838_v40 }
 0x11c   : > { %v1130_v49 = vsel %vm1120_vm9, %v1097_v23, %v866_v32 }
 0x11e   : > { %v840_v11 = vpop.permute.xlu1 %839 }
 0x11f   : > { %v868_v18 = vpop.permute.xlu0 %867  ;;  %v1115_v2 = vsel %vm1087_vm8, %v1082_v3, %v840_v11 }
 0x120   : > { %v1132_v41 = vsel %vm1120_vm9, %v1099_v14, %v868_v18 }
 0x122   : > { %v882_v55 = vpop.permute.xlu1 %881 }
 0x123   : > { %v902_v53 = vpop.permute.xlu0 %901  ;;  %v1146_v16 = vsel %vm1120_vm9, %v1113_v37, %v882_v55 }
 0x124   : > { %v1163_v51 = vsel %vm1153_vm10, %v1130_v49, %v902_v53 }
 0x126   : > { %v884_v33 = vpop.permute.xlu1 %883 }
 0x127   : > { %v904_v17 = vpop.permute.xlu0 %903  ;;  %v1148_v29 = vsel %vm1120_vm9, %v1115_v2, %v884_v33 }
 0x128   : > { %v1165_v26 = vsel %vm1153_vm10, %v1132_v41, %v904_v17 }
 0x12a   : > { %v918_v6 = vpop.permute.xlu1 %917 }
 0x12b   : > { %v934_v22 = vpop.permute.xlu0 %933  ;;  %v1179_v45 = vsel %vm1153_vm10, %v1146_v16, %v918_v6 }
 0x12c   : > { %v1196_v50 = vsel %vm1186_vm11, %v1163_v51, %v934_v22 }
 0x12e   : > { %v920_v13 = vpop.permute.xlu1 %919 }
 0x12f   : > { %v936_v31 = vpop.permute.xlu0 %935  ;;  %v1181_v4 = vsel %vm1153_vm10, %v1148_v29, %v920_v13 }
 0x130   : > { %v1198_v54 = vsel %vm1186_vm11, %v1165_v26, %v936_v31 }
 0x132   : > { %v950_v48 = vpop.permute.xlu1 %949 }
 0x133   : > { %v966_v38 = vpop.permute.xlu0 %965  ;;  %v1212_v1 = vsel %vm1186_vm11, %v1179_v45, %v950_v48 }
 0x134   : > { %v1229_v47 = vsel %vm1219_vm12, %v1196_v50, %v966_v38 }
 0x136   : > { %v952_v46 = vpop.permute.xlu1 %951 }
 0x137   : > { %v968_v5 = vpop.permute.xlu0 %967  ;;  %v1214_v59 = vsel %vm1186_vm11, %v1181_v4, %v952_v46 }
 0x138   : > { %v1231_v15 = vsel %vm1219_vm12, %v1198_v54, %v968_v5 }
 0x13a   : > { %v982_v56 = vpop.permute.xlu1 %981 }
 0x13b   : > { %v998_v52 = vpop.permute.xlu0 %997  ;;  %v1245_v58 = vsel %vm1219_vm12, %v1212_v1, %v982_v56 }
 0x13c   : > { %v1262_v43 = vsel %vm1252_vm13, %v1229_v47, %v998_v52 }
 0x13d   : > { %2128 = vmatprep.mubr.msk.bf16.mxu0 %vm1312_vm14, %v1262_v43 }
 0x13e   : > { %v984_v57 = vpop.permute.xlu1 %983 }
 0x13f   : > { %v680_v25 = vpop.permute.xlu0 %679  ;;  %v1247_v27 = vsel %vm1219_vm12, %v1214_v59, %v984_v57 }
 0x140   : > { %v1035_v5 = vsel %vm1021_vm6, %v2714_v21, %v680_v25 }
 0x142   : > { %v1014_v39 = vpop.permute.xlu1 %1013 }
 0x143   : > { %v1000_v19 = vpop.permute.xlu0 %999  ;;  %v1278_v0 = vsel %vm1252_vm13, %v1245_v58, %v1014_v39 }
 0x144   : > { %v1264_v9 = vsel %vm1252_vm13, %v1231_v15, %v1000_v19  ;;  %2144 = vmatprep.mubr.msk.bf16.mxu1 %vm1312_vm14, %v1278_v0 }
 0x145   : > { %2129 = vmatmul.mubr.msk.bf16.gmra.mrb[8].mxu0 %vm1312_vm14, %v1264_v9 }
 0x146   : > { %v696_v28 = vpop.permute.xlu1 %695 }
 0x147   : > { %v682_v42 = vpop.permute.xlu0 %681 }
 0x148   : > { %v1037_v50 = vsel %vm1021_vm6, %v2787_v44, %v682_v42  ;;  %v1051_v44 = vsel %vm1021_vm6, %v2736_v35, %v696_v28 }
 0x14a   : > { %v1016_v62 = vpop.permute.xlu1 %1015 }
 0x14b   : > { %v793_v20 = vpop.permute.xlu0 %792  ;;  %v1280_v61 = vsel %vm1252_vm13, %v1247_v27, %v1016_v62  ;;  %v3129_v27 = vld [vmem:[%s3239_s2] ss:$0 sm:$0xff] }
 0x14c   : > { %2145 = vmatmul.mubr.msk.bf16.gmra.mrb[8].mxu1 %vm1312_vm14, %v1280_v61  ;;  %v1068_v49 = vsel %vm1054_vm7, %v1035_v5, %v793_v20 }
 0x14e   : > { %v698_v12 = vpop.permute.xlu1 %697 }
 0x14f   : > { %v795_v30 = vpop.permute.xlu0 %794  ;;  %v1053_v58 = vsel %vm1021_vm6, %v2829_v36, %v698_v12 }
 0x150   : > { %v1070_v34 = vsel %vm1054_vm7, %v1037_v50, %v795_v30 }
 0x152   : > { %v809_v40 = vpop.permute.xlu1 %808 }
 0x153   : > { %v826_v32 = vpop.permute.xlu0 %825  ;;  %v1084_v16 = vsel %vm1054_vm7, %v1051_v44, %v809_v40 }
 0x154   : > { %v1101_v56 = vsel %vm1087_vm8, %v1068_v49, %v826_v32 }
 0x156   : > { %v811_v11 = vpop.permute.xlu1 %810 }
 0x157   : > { %v828_v18 = vpop.permute.xlu0 %827  ;;  %v1086_v19 = vsel %vm1054_vm7, %v1053_v58, %v811_v11 }
 0x158   : > { %v1103_v21 = vsel %vm1087_vm8, %v1070_v34, %v828_v18 }
 0x15a   : > { %v842_v55 = vpop.permute.xlu1 %841 }
 0x15b   : > { %v870_v53 = vpop.permute.xlu0 %869  ;;  %v1117_v41 = vsel %vm1087_vm8, %v1084_v16, %v842_v55 }
 0x15c   : > { %v1134_v47 = vsel %vm1120_vm9, %v1101_v56, %v870_v53 }
 0x15e   : > { %v844_v33 = vpop.permute.xlu1 %843 }
 0x15f   : > { %v872_v17 = vpop.permute.xlu0 %871  ;;  %v1119_v63 = vsel %vm1087_vm8, %v1086_v19, %v844_v33 }
 0x160   : > { %v1136_v57 = vsel %vm1120_vm9, %v1103_v21, %v872_v17 }
 0x162   : > { %v886_v6 = vpop.permute.xlu1 %885 }
 0x163   : > { %v906_v22 = vpop.permute.xlu0 %905  ;;  %v1150_v1 = vsel %vm1120_vm9, %v1117_v41, %v886_v6 }
 0x164   : > { %v1167_v52 = vsel %vm1153_vm10, %v1134_v47, %v906_v22 }
 0x166   : > { %v888_v13 = vpop.permute.xlu1 %887 }
 0x167   : > { %v908_v31 = vpop.permute.xlu0 %907  ;;  %v1152_v2 = vsel %vm1120_vm9, %v1119_v63, %v888_v13 }
 0x168   : > { %v1169_v25 = vsel %vm1153_vm10, %v1136_v57, %v908_v31 }
 0x16a   : > { %v922_v48 = vpop.permute.xlu1 %921 }
 0x16b   : > { %v938_v38 = vpop.permute.xlu0 %937  ;;  %v1183_v39 = vsel %vm1153_vm10, %v1150_v1, %v922_v48 }
 0x16c   : > { %v1200_v43 = vsel %vm1186_vm11, %v1167_v52, %v938_v38 }
 0x16e   : > { %v924_v24 = vpop.permute.xlu1 %923 }
 0x16f   : > { %v940_v10 = vpop.permute.xlu0 %939  ;;  %v1185_v36 = vsel %vm1153_vm10, %v1152_v2, %v924_v24 }
 0x170   : > { %v1202_v45 = vsel %vm1186_vm11, %v1169_v25, %v940_v10 }
 0x172   : > { %v954_v46 = vpop.permute.xlu1 %953 }
 0x173   : > { %v970_v23 = vpop.permute.xlu0 %969  ;;  %v1216_v0 = vsel %vm1186_vm11, %v1183_v39, %v954_v46 }
 0x174   : > { %v1233_v8 = vsel %vm1219_vm12, %v1200_v43, %v970_v23 }
 0x176   : > { %v956_v51 = vpop.permute.xlu1 %955 }
 0x177   : > { %v972_v7 = vpop.permute.xlu0 %971  ;;  %v1218_v29 = vsel %vm1186_vm11, %v1185_v36, %v956_v51 }
 0x178   : > { %v1235_v54 = vsel %vm1219_vm12, %v1202_v45, %v972_v7 }
 0x17a   : > { %v986_v60 = vpop.permute.xlu1 %985 }
 0x17b   : > { %v1002_v37 = vpop.permute.xlu0 %1001  ;;  %v1249_v9 = vsel %vm1219_vm12, %v1216_v0, %v986_v60 }
 0x17c   : > { %v1266_v14 = vsel %vm1252_vm13, %v1233_v8, %v1002_v37 }
 0x17d   : > { %2132 = vmatprep.mubr.msk.bf16.mxu0 %vm1312_vm14, %v1266_v14 }
 0x17e   : > { %v988_v26 = vpop.permute.xlu1 %987 }
 0x17f   : > { %v1004_v35 = vpop.permute.xlu0 %1003  ;;  %v1251_v42 = vsel %vm1219_vm12, %v1218_v29, %v988_v26 }
 0x180   : > { %v1268_v15 = vsel %vm1252_vm13, %v1235_v54, %v1004_v35 }
 0x181   : > { %2133 = vmatmul.mubr.msk.bf16.gmra.mrb[12].mxu0 %vm1312_vm14, %v1268_v15 }
 0x182   : > { %v1018_v3 = vpop.permute.xlu1 %1017 }
 0x183   : > { %v1282_v28 = vsel %vm1252_vm13, %v1249_v9, %v1018_v3 }
 0x184   : > { %2148 = vmatprep.mubr.msk.bf16.mxu1 %vm1312_vm14, %v1282_v28 }
 0x186   : > { %v1020_v4 = vpop.permute.xlu1 %1019 }
 0x187   : > { %v1284_v59 = vsel %vm1252_vm13, %v1251_v42, %v1020_v4 }
 0x188   : > { %2149 = vmatmul.mubr.msk.bf16.gmra.mrb[12].mxu1 %vm1312_vm14, %v1284_v59 }
 0x198   : > { %v2122_v62 = vpop.f32.mrb[0].mxu0 }
 0x199   : > { %v1392_v20 = vadd.f32 %v2122_v62, %v3129_v27  ;;  %v1383_v61 = vpop.f32.mrb[1].mxu0 }
 0x19a   : > { %v1384_v12 = vadd.f32 %v3129_v27, %v1383_v61  ;;  %v2123_v30 = vpop.f32.mrb[2].mxu0 }
 0x19b   : > { %v1997_v40 = vmul.f32 -1.442695, %v1392_v20  ;;  %v1395_v32 = vadd.f32 %v2123_v30, %v3129_v27  ;;  %v1386_v11 = vpop.f32.mrb[3].mxu0 }
 0x19c   : > { %v1995_v18 = vmul.f32 -1.442695, %v1384_v12  ;;  %v1387_v55 = vadd.f32 %v3129_v27, %v1386_v11 }
 0x19d   : > { %2196 = vpow2.f32 %v1997_v40  ;;  %v1998_v53 = vmul.f32 -1.442695, %v1395_v32 }
 0x19e   : > { %2198 = vpow2.f32 %v1995_v18  ;;  %v1996_v33 = vmul.f32 -1.442695, %v1387_v55 }
 0x19f   : > { %2200 = vpow2.f32 %v1998_v53  ;;  %v2138_v17 = vpop.f32.mrb[0].mxu1 }
 0x1a0   : > { %2202 = vpow2.f32 %v1996_v33  ;;  %v1456_v6 = vadd.f32 %v2138_v17, %v3129_v27  ;;  %v1447_v22 = vpop.f32.mrb[1].mxu1 }
 0x1a1   : > { %v1448_v13 = vadd.f32 %v3129_v27, %v1447_v22  ;;  %v2139_v31 = vpop.f32.mrb[2].mxu1 }
 0x1a2   : > { %v2013_v48 = vmul.f32 -1.442695, %v1456_v6  ;;  %v1459_v38 = vadd.f32 %v2139_v31, %v3129_v27  ;;  %v1450_v24 = vpop.f32.mrb[3].mxu1 }
 0x1a3   : > { %v2011_v10 = vmul.f32 -1.442695, %v1448_v13  ;;  %v1451_v46 = vadd.f32 %v3129_v27, %v1450_v24 }
 0x1a4   : > { %2204 = vpow2.f32 %v2013_v48  ;;  %v2014_v23 = vmul.f32 -1.442695, %v1459_v38 }
 0x1a5   : > { %2206 = vpow2.f32 %v2011_v10  ;;  %v2012_v5 = vmul.f32 -1.442695, %v1451_v46 }
 0x1a6   : > { %2208 = vpow2.f32 %v2014_v23 }
 0x1a7   : > { %v2197_v49 = vpop.eup %2196  ;;  %2210 = vpow2.f32 %v2012_v5 }
 0x1a8   : > { %v2199_v51 = vpop.eup %2198  ;;  %v1608_v50 = vadd.f32 1.0, %v2197_v49 }
 0x1a9   : > { %v2201_v56 = vpop.eup %2200  ;;  %v1606_v7 = vadd.f32 1.0, %v2199_v51 }
 0x1aa   : > { %v2203_v47 = vpop.eup %2202  ;;  %2212 = vrcp.f32 %v1608_v50  ;;  %v1609_v52 = vadd.f32 1.0, %v2201_v56 }
 0x1ab   : > { %2214 = vrcp.f32 %v1606_v7  ;;  %v1607_v34 = vadd.f32 1.0, %v2203_v47 }
 0x1ac   : > { %2216 = vrcp.f32 %v1609_v52 }
 0x1ad   : > { %2218 = vrcp.f32 %v1607_v34 }
 0x1ae   : > { %v2205_v43 = vpop.eup %2204 }
 0x1af   : > { %v2207_v60 = vpop.eup %2206  ;;  %v1624_v21 = vadd.f32 1.0, %v2205_v43 }
 0x1b0   : > { %v2209_v8 = vpop.eup %2208  ;;  %v1622_v37 = vadd.f32 1.0, %v2207_v60 }
 0x1b1   : > { %v2211_v44 = vpop.eup %2210  ;;  %2220 = vrcp.f32 %v1624_v21  ;;  %v1625_v57 = vadd.f32 1.0, %v2209_v8 }
 0x1b2   : > { %2222 = vrcp.f32 %v1622_v37  ;;  %v1623_v14 = vadd.f32 1.0, %v2211_v44 }
 0x1b3   : > { %2224 = vrcp.f32 %v1625_v57 }
 0x1b4   : > { %v2213_v16 = vpop.eup %2212  ;;  %2226 = vrcp.f32 %v1623_v14 }
 0x1b5   : > { %v2215_v25 = vpop.eup %2214  ;;  %v1704_v41 = vmul.f32 %v2213_v16, %v1392_v20 }
 0x1b6   : > { %v2217_v45 = vpop.eup %2216  ;;  %v1702_v26 = vmul.f32 %v2215_v25, %v1384_v12 }
 0x1b7   : > { %v2219_v1 = vpop.eup %2218  ;;  %v2065_v54 = vpack.c.bf16 %v1704_v41, %v1704_v41  ;;  %v1705_v35 = vmul.f32 %v2217_v45, %v1395_v32 }
 0x1b8   : > { %v2063_v58 = vpack.c.bf16 %v1702_v26, %v1702_v26  ;;  %v1703_v39 = vmul.f32 %v2219_v1, %v1387_v55 }
 0x1b9   : > { %1865 = vst.msk [vmem:[%s3144_s9 + $0x8] sm:$0xf] %vm1862_vm15, %v2065_v54  ;;  %v2066_v15 = vpack.c.bf16 %v1705_v35, %v1705_v35 }
 0x1ba   : > { %1863 = vst.msk [vmem:[%s3144_s9] sm:$0xf] %vm1862_vm15, %v2063_v58  ;;  %v2064_v19 = vpack.c.bf16 %v1703_v39, %v1703_v39 }
 0x1bb   : > { %v2221_v0 = vpop.eup %2220  ;;  %1866 = vst.msk [vmem:[%s3144_s9 + $0xc] sm:$0xf] %vm1862_vm15, %v2066_v15 }
 0x1bc   : > { %v2223_v63 = vpop.eup %2222  ;;  %1864 = vst.msk [vmem:[%s3144_s9 + $0x4] sm:$0xf] %vm1862_vm15, %v2064_v19  ;;  %v1720_v9 = vmul.f32 %v2221_v0, %v1456_v6 }
 0x1bd   : > { %v2225_v3 = vpop.eup %2224  ;;  %v1718_v2 = vmul.f32 %v2223_v63, %v1448_v13 }
 0x1be   : > { %v2227_v28 = vpop.eup %2226  ;;  %v2081_v36 = vpack.c.bf16 %v1720_v9, %v1720_v9  ;;  %v1721_v29 = vmul.f32 %v2225_v3, %v1459_v38 }
 0x1bf   : > { %v2079_v42 = vpack.c.bf16 %v1718_v2, %v1718_v2  ;;  %v1719_v4 = vmul.f32 %v2227_v28, %v1451_v46 }
 0x1c0   : > { %1881 = vst.msk [vmem:[%s3144_s9 + $0x48] sm:$0xf] %vm1862_vm15, %v2081_v36  ;;  %v2082_v59 = vpack.c.bf16 %v1721_v29, %v1721_v29 }
 0x1c1   : > { %1879 = vst.msk [vmem:[%s3144_s9 + $0x40] sm:$0xf] %vm1862_vm15, %v2079_v42  ;;  %v2080_v62 = vpack.c.bf16 %v1719_v4, %v1719_v4 }
 0x1c2   : > { %1882 = vst.msk [vmem:[%s3144_s9 + $0x4c] sm:$0xf] %vm1862_vm15, %v2082_v59 }
 0x1c3   : > { %1880 = vst.msk [vmem:[%s3144_s9 + $0x44] sm:$0xf] %vm1862_vm15, %v2080_v62 }
 0x1d8   : > { %v2126_v20 = vpop.f32.mrb[4].mxu0 }
 0x1d9   : > { %v1408_v61 = vadd.f32 %v2126_v20, %v3129_v27  ;;  %v1399_v12 = vpop.f32.mrb[5].mxu0 }
 0x1da   : > { %v1400_v30 = vadd.f32 %v3129_v27, %v1399_v12  ;;  %v2127_v40 = vpop.f32.mrb[6].mxu0 }
 0x1db   : > { %v2001_v32 = vmul.f32 -1.442695, %v1408_v61  ;;  %v1411_v11 = vadd.f32 %v2127_v40, %v3129_v27  ;;  %v1402_v18 = vpop.f32.mrb[7].mxu0 }
 0x1dc   : > { %v1999_v55 = vmul.f32 -1.442695, %v1400_v30  ;;  %v1403_v53 = vadd.f32 %v3129_v27, %v1402_v18 }
 0x1dd   : > { %2228 = vpow2.f32 %v2001_v32  ;;  %v2002_v33 = vmul.f32 -1.442695, %v1411_v11 }
 0x1de   : > { %2230 = vpow2.f32 %v1999_v55  ;;  %v2000_v17 = vmul.f32 -1.442695, %v1403_v53 }
 0x1df   : > { %2232 = vpow2.f32 %v2002_v33  ;;  %v2142_v6 = vpop.f32.mrb[4].mxu1 }
 0x1e0   : > { %2234 = vpow2.f32 %v2000_v17  ;;  %v1472_v22 = vadd.f32 %v2142_v6, %v3129_v27  ;;  %v1463_v13 = vpop.f32.mrb[5].mxu1 }
 0x1e1   : > { %v1464_v31 = vadd.f32 %v3129_v27, %v1463_v13  ;;  %v2143_v48 = vpop.f32.mrb[6].mxu1 }
 0x1e2   : > { %v2017_v38 = vmul.f32 -1.442695, %v1472_v22  ;;  %v1475_v24 = vadd.f32 %v2143_v48, %v3129_v27  ;;  %v1466_v10 = vpop.f32.mrb[7].mxu1 }
 0x1e3   : > { %v2015_v46 = vmul.f32 -1.442695, %v1464_v31  ;;  %v1467_v23 = vadd.f32 %v3129_v27, %v1466_v10 }
 0x1e4   : > { %2236 = vpow2.f32 %v2017_v38  ;;  %v2018_v5 = vmul.f32 -1.442695, %v1475_v24 }
 0x1e5   : > { %2238 = vpow2.f32 %v2015_v46  ;;  %v2016_v49 = vmul.f32 -1.442695, %v1467_v23 }
 0x1e6   : > { %2240 = vpow2.f32 %v2018_v5 }
 0x1e7   : > { %v2229_v51 = vpop.eup %2228  ;;  %2242 = vpow2.f32 %v2016_v49 }
 0x1e8   : > { %v2231_v50 = vpop.eup %2230  ;;  %v1612_v56 = vadd.f32 1.0, %v2229_v51 }
 0x1e9   : > { %v2233_v7 = vpop.eup %2232  ;;  %v1610_v47 = vadd.f32 1.0, %v2231_v50 }
 0x1ea   : > { %v2235_v52 = vpop.eup %2234  ;;  %2244 = vrcp.f32 %v1612_v56  ;;  %v1613_v34 = vadd.f32 1.0, %v2233_v7 }
 0x1eb   : > { %2246 = vrcp.f32 %v1610_v47  ;;  %v1611_v43 = vadd.f32 1.0, %v2235_v52 }
 0x1ec   : > { %2248 = vrcp.f32 %v1613_v34 }
 0x1ed   : > { %2250 = vrcp.f32 %v1611_v43 }
 0x1ee   : > { %v2237_v60 = vpop.eup %2236 }
 0x1ef   : > { %v2239_v21 = vpop.eup %2238  ;;  %v1628_v8 = vadd.f32 1.0, %v2237_v60 }
 0x1f0   : > { %v2241_v37 = vpop.eup %2240  ;;  %v1626_v44 = vadd.f32 1.0, %v2239_v21 }
 0x1f1   : > { %v2243_v57 = vpop.eup %2242  ;;  %2252 = vrcp.f32 %v1628_v8  ;;  %v1629_v14 = vadd.f32 1.0, %v2241_v37 }
 0x1f2   : > { %2254 = vrcp.f32 %v1626_v44  ;;  %v1627_v16 = vadd.f32 1.0, %v2243_v57 }
 0x1f3   : > { %2256 = vrcp.f32 %v1629_v14 }
 0x1f4   : > { %v2245_v25 = vpop.eup %2244  ;;  %2258 = vrcp.f32 %v1627_v16 }
 0x1f5   : > { %v2247_v41 = vpop.eup %2246  ;;  %v1708_v45 = vmul.f32 %v2245_v25, %v1408_v61 }
 0x1f6   : > { %v2249_v26 = vpop.eup %2248  ;;  %v1706_v1 = vmul.f32 %v2247_v41, %v1400_v30 }
 0x1f7   : > { %v2251_v54 = vpop.eup %2250  ;;  %v2069_v35 = vpack.c.bf16 %v1708_v45, %v1708_v45  ;;  %v1709_v58 = vmul.f32 %v2249_v26, %v1411_v11 }
 0x1f8   : > { %v2067_v39 = vpack.c.bf16 %v1706_v1, %v1706_v1  ;;  %v1707_v15 = vmul.f32 %v2251_v54, %v1403_v53 }
 0x1f9   : > { %1869 = vst.msk [vmem:[%s3144_s9 + $0x18] sm:$0xf] %vm1862_vm15, %v2069_v35  ;;  %v2070_v19 = vpack.c.bf16 %v1709_v58, %v1709_v58 }
 0x1fa   : > { %1867 = vst.msk [vmem:[%s3144_s9 + $0x10] sm:$0xf] %vm1862_vm15, %v2067_v39  ;;  %v2068_v0 = vpack.c.bf16 %v1707_v15, %v1707_v15 }
 0x1fb   : > { %v2253_v63 = vpop.eup %2252  ;;  %1870 = vst.msk [vmem:[%s3144_s9 + $0x1c] sm:$0xf] %vm1862_vm15, %v2070_v19 }
 0x1fc   : > { %v2255_v9 = vpop.eup %2254  ;;  %1868 = vst.msk [vmem:[%s3144_s9 + $0x14] sm:$0xf] %vm1862_vm15, %v2068_v0  ;;  %v1724_v3 = vmul.f32 %v2253_v63, %v1472_v22 }
 0x1fd   : > { %v2257_v2 = vpop.eup %2256  ;;  %v1722_v28 = vmul.f32 %v2255_v9, %v1464_v31 }
 0x1fe   : > { %v2259_v36 = vpop.eup %2258  ;;  %v2085_v29 = vpack.c.bf16 %v1724_v3, %v1724_v3  ;;  %v1725_v42 = vmul.f32 %v2257_v2, %v1475_v24 }
 0x1ff   : > { %v2083_v4 = vpack.c.bf16 %v1722_v28, %v1722_v28  ;;  %v1723_v59 = vmul.f32 %v2259_v36, %v1467_v23 }
 0x200   : > { %1885 = vst.msk [vmem:[%s3144_s9 + $0x58] sm:$0xf] %vm1862_vm15, %v2085_v29  ;;  %v2086_v62 = vpack.c.bf16 %v1725_v42, %v1725_v42 }
 0x201   : > { %1883 = vst.msk [vmem:[%s3144_s9 + $0x50] sm:$0xf] %vm1862_vm15, %v2083_v4  ;;  %v2084_v20 = vpack.c.bf16 %v1723_v59, %v1723_v59 }
 0x202   : > { %1886 = vst.msk [vmem:[%s3144_s9 + $0x5c] sm:$0xf] %vm1862_vm15, %v2086_v62 }
 0x203   : > { %1884 = vst.msk [vmem:[%s3144_s9 + $0x54] sm:$0xf] %vm1862_vm15, %v2084_v20 }
 0x218   : > { %v2130_v61 = vpop.f32.mrb[8].mxu0 }
 0x219   : > { %v1424_v12 = vadd.f32 %v2130_v61, %v3129_v27  ;;  %v1415_v30 = vpop.f32.mrb[9].mxu0 }
 0x21a   : > { %v1416_v40 = vadd.f32 %v3129_v27, %v1415_v30  ;;  %v2131_v32 = vpop.f32.mrb[10].mxu0 }
 0x21b   : > { %v2005_v11 = vmul.f32 -1.442695, %v1424_v12  ;;  %v1427_v18 = vadd.f32 %v2131_v32, %v3129_v27  ;;  %v1418_v55 = vpop.f32.mrb[11].mxu0 }
 0x21c   : > { %v2003_v53 = vmul.f32 -1.442695, %v1416_v40  ;;  %v1419_v33 = vadd.f32 %v3129_v27, %v1418_v55 }
 0x21d   : > { %2260 = vpow2.f32 %v2005_v11  ;;  %v2006_v17 = vmul.f32 -1.442695, %v1427_v18 }
 0x21e   : > { %2262 = vpow2.f32 %v2003_v53  ;;  %v2004_v6 = vmul.f32 -1.442695, %v1419_v33 }
 0x21f   : > { %2264 = vpow2.f32 %v2006_v17  ;;  %v2146_v22 = vpop.f32.mrb[8].mxu1 }
 0x220   : > { %2266 = vpow2.f32 %v2004_v6  ;;  %v1488_v13 = vadd.f32 %v2146_v22, %v3129_v27  ;;  %v1479_v31 = vpop.f32.mrb[9].mxu1 }
 0x221   : > { %v1480_v48 = vadd.f32 %v3129_v27, %v1479_v31  ;;  %v2147_v38 = vpop.f32.mrb[10].mxu1 }
 0x222   : > { %v2021_v24 = vmul.f32 -1.442695, %v1488_v13  ;;  %v1491_v10 = vadd.f32 %v2147_v38, %v3129_v27  ;;  %v1482_v46 = vpop.f32.mrb[11].mxu1 }
 0x223   : > { %v2019_v23 = vmul.f32 -1.442695, %v1480_v48  ;;  %v1483_v5 = vadd.f32 %v3129_v27, %v1482_v46 }
 0x224   : > { %2268 = vpow2.f32 %v2021_v24  ;;  %v2022_v49 = vmul.f32 -1.442695, %v1491_v10 }
 0x225   : > { %2270 = vpow2.f32 %v2019_v23  ;;  %v2020_v51 = vmul.f32 -1.442695, %v1483_v5 }
 0x226   : > { %2272 = vpow2.f32 %v2022_v49 }
 0x227   : > { %v2261_v50 = vpop.eup %2260  ;;  %2274 = vpow2.f32 %v2020_v51 }
 0x228   : > { %v2263_v56 = vpop.eup %2262  ;;  %v1616_v7 = vadd.f32 1.0, %v2261_v50 }
 0x229   : > { %v2265_v47 = vpop.eup %2264  ;;  %v1614_v52 = vadd.f32 1.0, %v2263_v56 }
 0x22a   : > { %v2267_v34 = vpop.eup %2266  ;;  %2276 = vrcp.f32 %v1616_v7  ;;  %v1617_v43 = vadd.f32 1.0, %v2265_v47 }
 0x22b   : > { %2278 = vrcp.f32 %v1614_v52  ;;  %v1615_v60 = vadd.f32 1.0, %v2267_v34 }
 0x22c   : > { %2280 = vrcp.f32 %v1617_v43 }
 0x22d   : > { %2282 = vrcp.f32 %v1615_v60 }
 0x22e   : > { %v2269_v21 = vpop.eup %2268 }
 0x22f   : > { %v2271_v8 = vpop.eup %2270  ;;  %v1632_v37 = vadd.f32 1.0, %v2269_v21 }
 0x230   : > { %v2273_v44 = vpop.eup %2272  ;;  %v1630_v57 = vadd.f32 1.0, %v2271_v8 }
 0x231   : > { %v2275_v14 = vpop.eup %2274  ;;  %2284 = vrcp.f32 %v1632_v37  ;;  %v1633_v16 = vadd.f32 1.0, %v2273_v44 }
 0x232   : > { %2286 = vrcp.f32 %v1630_v57  ;;  %v1631_v25 = vadd.f32 1.0, %v2275_v14 }
 0x233   : > { %2288 = vrcp.f32 %v1633_v16 }
 0x234   : > { %v2277_v41 = vpop.eup %2276  ;;  %2290 = vrcp.f32 %v1631_v25 }
 0x235   : > { %v2279_v45 = vpop.eup %2278  ;;  %v1712_v26 = vmul.f32 %v2277_v41, %v1424_v12 }
 0x236   : > { %v2281_v1 = vpop.eup %2280  ;;  %v1710_v54 = vmul.f32 %v2279_v45, %v1416_v40 }
 0x237   : > { %v2283_v35 = vpop.eup %2282  ;;  %v2073_v58 = vpack.c.bf16 %v1712_v26, %v1712_v26  ;;  %v1713_v39 = vmul.f32 %v2281_v1, %v1427_v18 }
 0x238   : > { %v2071_v15 = vpack.c.bf16 %v1710_v54, %v1710_v54  ;;  %v1711_v19 = vmul.f32 %v2283_v35, %v1419_v33 }
 0x239   : > { %1873 = vst.msk [vmem:[%s3144_s9 + $0x28] sm:$0xf] %vm1862_vm15, %v2073_v58  ;;  %v2074_v0 = vpack.c.bf16 %v1713_v39, %v1713_v39 }
 0x23a   : > { %1871 = vst.msk [vmem:[%s3144_s9 + $0x20] sm:$0xf] %vm1862_vm15, %v2071_v15  ;;  %v2072_v63 = vpack.c.bf16 %v1711_v19, %v1711_v19 }
 0x23b   : > { %v2285_v9 = vpop.eup %2284  ;;  %1874 = vst.msk [vmem:[%s3144_s9 + $0x2c] sm:$0xf] %vm1862_vm15, %v2074_v0 }
 0x23c   : > { %v2287_v3 = vpop.eup %2286  ;;  %1872 = vst.msk [vmem:[%s3144_s9 + $0x24] sm:$0xf] %vm1862_vm15, %v2072_v63  ;;  %v1728_v2 = vmul.f32 %v2285_v9, %v1488_v13 }
 0x23d   : > { %v2289_v28 = vpop.eup %2288  ;;  %v1726_v36 = vmul.f32 %v2287_v3, %v1480_v48 }
 0x23e   : > { %v2291_v29 = vpop.eup %2290  ;;  %v2089_v42 = vpack.c.bf16 %v1728_v2, %v1728_v2  ;;  %v1729_v4 = vmul.f32 %v2289_v28, %v1491_v10 }
 0x23f   : > { %v2087_v59 = vpack.c.bf16 %v1726_v36, %v1726_v36  ;;  %v1727_v62 = vmul.f32 %v2291_v29, %v1483_v5 }
 0x240   : > { %1889 = vst.msk [vmem:[%s3144_s9 + $0x68] sm:$0xf] %vm1862_vm15, %v2089_v42  ;;  %v2090_v20 = vpack.c.bf16 %v1729_v4, %v1729_v4 }
 0x241   : > { %1887 = vst.msk [vmem:[%s3144_s9 + $0x60] sm:$0xf] %vm1862_vm15, %v2087_v59  ;;  %v2088_v61 = vpack.c.bf16 %v1727_v62, %v1727_v62 }
 0x242   : > { %1890 = vst.msk [vmem:[%s3144_s9 + $0x6c] sm:$0xf] %vm1862_vm15, %v2090_v20 }
 0x243   : > { %1888 = vst.msk [vmem:[%s3144_s9 + $0x64] sm:$0xf] %vm1862_vm15, %v2088_v61 }
 0x254   : > { %v2134_v12 = vpop.f32.mrb[12].mxu0 }
 0x255   : > { %v1440_v30 = vadd.f32 %v2134_v12, %v3129_v27  ;;  %v1431_v40 = vpop.f32.mrb[13].mxu0 }
 0x256   : > { %v1432_v32 = vadd.f32 %v3129_v27, %v1431_v40  ;;  %v2135_v11 = vpop.f32.mrb[14].mxu0 }
 0x257   : > { %v2009_v18 = vmul.f32 -1.442695, %v1440_v30  ;;  %v1443_v55 = vadd.f32 %v2135_v11, %v3129_v27  ;;  %v1434_v53 = vpop.f32.mrb[15].mxu0 }
 0x258   : > { %v2007_v33 = vmul.f32 -1.442695, %v1432_v32  ;;  %v1435_v17 = vadd.f32 %v3129_v27, %v1434_v53 }
 0x259   : > { %2292 = vpow2.f32 %v2009_v18  ;;  %v2010_v6 = vmul.f32 -1.442695, %v1443_v55 }
 0x25a   : > { %2294 = vpow2.f32 %v2007_v33  ;;  %v2008_v22 = vmul.f32 -1.442695, %v1435_v17 }
 0x25b   : > { %2296 = vpow2.f32 %v2010_v6  ;;  %v2150_v13 = vpop.f32.mrb[12].mxu1 }
 0x25c   : > { %2298 = vpow2.f32 %v2008_v22  ;;  %v1504_v31 = vadd.f32 %v2150_v13, %v3129_v27  ;;  %v1495_v48 = vpop.f32.mrb[13].mxu1 }
 0x25d   : > { %v1496_v38 = vadd.f32 %v3129_v27, %v1495_v48  ;;  %v2151_v24 = vpop.f32.mrb[14].mxu1 }
 0x25e   : > { %v2025_v10 = vmul.f32 -1.442695, %v1504_v31  ;;  %v1507_v46 = vadd.f32 %v2151_v24, %v3129_v27  ;;  %v1498_v23 = vpop.f32.mrb[15].mxu1 }
 0x25f   : > { %v2023_v5 = vmul.f32 -1.442695, %v1496_v38  ;;  %v1499_v49 = vadd.f32 %v3129_v27, %v1498_v23 }
 0x260   : > { %2300 = vpow2.f32 %v2025_v10  ;;  %v2026_v51 = vmul.f32 -1.442695, %v1507_v46 }
 0x261   : > { %2302 = vpow2.f32 %v2023_v5  ;;  %v2024_v50 = vmul.f32 -1.442695, %v1499_v49 }
 0x262   : > { %2304 = vpow2.f32 %v2026_v51 }
 0x263   : > { %v2293_v56 = vpop.eup %2292  ;;  %2306 = vpow2.f32 %v2024_v50 }
 0x264   : > { %v2295_v7 = vpop.eup %2294  ;;  %v1620_v47 = vadd.f32 1.0, %v2293_v56 }
 0x265   : > { %v2297_v52 = vpop.eup %2296  ;;  %v1618_v34 = vadd.f32 1.0, %v2295_v7 }
 0x266   : > { %v2299_v43 = vpop.eup %2298  ;;  %2308 = vrcp.f32 %v1620_v47  ;;  %v1621_v60 = vadd.f32 1.0, %v2297_v52 }
 0x267   : > { %2310 = vrcp.f32 %v1618_v34  ;;  %v1619_v21 = vadd.f32 1.0, %v2299_v43 }
 0x268   : > { %2312 = vrcp.f32 %v1621_v60 }
 0x269   : > { %2314 = vrcp.f32 %v1619_v21 }
 0x26a   : > { %v2301_v8 = vpop.eup %2300 }
 0x26b   : > { %v2303_v27 = vpop.eup %2302  ;;  %v1636_v37 = vadd.f32 1.0, %v2301_v8 }
 0x26c   : > { %v2305_v44 = vpop.eup %2304  ;;  %v1634_v57 = vadd.f32 1.0, %v2303_v27 }
 0x26d   : > { %v2307_v14 = vpop.eup %2306  ;;  %2316 = vrcp.f32 %v1636_v37  ;;  %v1637_v16 = vadd.f32 1.0, %v2305_v44 }
 0x26e   : > { %2318 = vrcp.f32 %v1634_v57  ;;  %v1635_v25 = vadd.f32 1.0, %v2307_v14 }
 0x26f   : > { %2320 = vrcp.f32 %v1637_v16 }
 0x270   : > { %v2309_v41 = vpop.eup %2308  ;;  %2322 = vrcp.f32 %v1635_v25 }
 0x271   : > { %v2311_v45 = vpop.eup %2310  ;;  %v1716_v26 = vmul.f32 %v2309_v41, %v1440_v30 }
 0x272   : > { %v2313_v1 = vpop.eup %2312  ;;  %v1714_v54 = vmul.f32 %v2311_v45, %v1432_v32 }
 0x273   : > { %v2315_v35 = vpop.eup %2314  ;;  %v2077_v58 = vpack.c.bf16 %v1716_v26, %v1716_v26  ;;  %v1717_v39 = vmul.f32 %v2313_v1, %v1443_v55 }
 0x274   : > { %v2075_v15 = vpack.c.bf16 %v1714_v54, %v1714_v54  ;;  %v1715_v19 = vmul.f32 %v2315_v35, %v1435_v17 }
 0x275   : > { %1877 = vst.msk [vmem:[%s3144_s9 + $0x38] sm:$0xf] %vm1862_vm15, %v2077_v58  ;;  %v2078_v0 = vpack.c.bf16 %v1717_v39, %v1717_v39 }
 0x276   : > { %1875 = vst.msk [vmem:[%s3144_s9 + $0x30] sm:$0xf] %vm1862_vm15, %v2075_v15  ;;  %v2076_v63 = vpack.c.bf16 %v1715_v19, %v1715_v19 }
 0x277   : > { %v2317_v9 = vpop.eup %2316  ;;  %1878 = vst.msk [vmem:[%s3144_s9 + $0x3c] sm:$0xf] %vm1862_vm15, %v2078_v0 }
 0x278   : > { %v2319_v3 = vpop.eup %2318  ;;  %1876 = vst.msk [vmem:[%s3144_s9 + $0x34] sm:$0xf] %vm1862_vm15, %v2076_v63  ;;  %v1732_v2 = vmul.f32 %v2317_v9, %v1504_v31 }
 0x279   : > { %v2321_v28 = vpop.eup %2320  ;;  %v1730_v36 = vmul.f32 %v2319_v3, %v1496_v38 }
 0x27a   : > { %v2323_v29 = vpop.eup %2322  ;;  %v2093_v42 = vpack.c.bf16 %v1732_v2, %v1732_v2  ;;  %v1733_v4 = vmul.f32 %v2321_v28, %v1507_v46 }
 0x27b   : > { %v2091_v59 = vpack.c.bf16 %v1730_v36, %v1730_v36  ;;  %v1731_v62 = vmul.f32 %v2323_v29, %v1499_v49 }
 0x27c   : > { %1893 = vst.msk [vmem:[%s3144_s9 + $0x78] sm:$0xf] %vm1862_vm15, %v2093_v42  ;;  %v2094_v20 = vpack.c.bf16 %v1733_v4, %v1733_v4 }
 0x27d   : > { %1891 = vst.msk [vmem:[%s3144_s9 + $0x70] sm:$0xf] %vm1862_vm15, %v2091_v59  ;;  %v2092_v61 = vpack.c.bf16 %v1731_v62, %v1731_v62 }
 0x27e   : > { %1894 = vst.msk [vmem:[%s3144_s9 + $0x7c] sm:$0xf] %vm1862_vm15, %v2094_v20 }
 0x27f   : > { %1892 = vst.msk [vmem:[%s3144_s9 + $0x74] sm:$0xf] %vm1862_vm15, %v2092_v61 }
 0x280 PF: > { %s13_s12 = sadd.s32 1, %s2330_s12  }
 0x281   : > { %p10_p4 = scmp.ge.s32.totalorder %s13_s12, 4  }
 0x283   :  { %12 = sbr.rel (!%p10_p4) target bundleno = 1 (0x1), region = 62 }

// kernel: sppcspc_forward.13
= control target key start
LH: loop header
LB: loop body
LE: loop exit
PB: predicated region body
PF: predicated region fallthrough
CT: control target
= control target key end

     0   :  { %vm254_vm0 = vcmask 130048   ;;  %vm1344_vm1 = vcmask 27648   ;;  %s2905_s1 = inlined_call_operand.vmem [shape: bf16[16,4], index: 1, kind: input, shape index: {}]   ;;  %s2906_s0 = inlined_call_operand.vmem [shape: bf16[512,16], index: 0, kind: input, shape index: {}]   ;;  %s2907_s2 = inlined_call_operand.vmem [shape: f32[1,4], index: 2, kind: input, shape index: {}]   ;;  %s2908_s3 = inlined_call_operand.vmem [shape: bf16[512,4], index: 3, kind: output, shape index: {}]  }
   0x1   :  { %v1772_v0 = vld [vmem:[%s2905_s1] sm:$0xff]   ;;  %v1775_v3 = vld [vmem:[%s2906_s0 + $0x8] sm:$0xff]   ;;  %v1777_v5 = vld [vmem:[%s2906_s0 + $0x10] sm:$0xff]  }
   0x2   :  { %v1773_v1 = vld [vmem:[%s2906_s0] sm:$0xff]   ;;  %1704 = vmatprep.subr.bf16.mxu0 %v1772_v0  ;;  %1770 = vmatprep.subr.bf16.mxu1 %v1772_v0  ;;  %v1776_v4 = vld [vmem:[%s2906_s0 + $0x88] sm:$0xff]   ;;  %v1778_v6 = vld [vmem:[%s2906_s0 + $0x90] sm:$0xff]  }
   0x3   :  { %v1774_v2 = vld [vmem:[%s2906_s0 + $0x80] sm:$0xff]   ;;  %1705 = vmatpush3.bf16.msra.mxu0 %v1772_v0  ;;  %1771 = vmatpush3.bf16.msra.mxu1 %v1772_v0  ;;  %v1779_v7 = vld [vmem:[%s2906_s0 + $0x18] sm:$0xff]   ;;  %v1783_v11 = vld [vmem:[%s2906_s0 + $0x28] sm:$0xff]  }
   0x4   :  { %1706 = vmatprep.mubr.msk.bf16.mxu0 %vm254_vm0, %v1773_v1  ;;  %1738 = vmatprep.mubr.msk.bf16.mxu1 %vm254_vm0, %v1774_v2  ;;  %v1780_v8 = vld [vmem:[%s2906_s0 + $0x98] sm:$0xff]   ;;  %v1781_v9 = vld [vmem:[%s2906_s0 + $0x20] sm:$0xff]   ;;  %v1784_v12 = vld [vmem:[%s2906_s0 + $0xa8] sm:$0xff]  }
   0x5   :  { %v1782_v10 = vld [vmem:[%s2906_s0 + $0xa0] sm:$0xff]   ;;  %v1785_v13 = vld [vmem:[%s2906_s0 + $0x30] sm:$0xff]   ;;  %v1787_v15 = vld [vmem:[%s2906_s0 + $0x38] sm:$0xff]  }
   0x6   :  { %1707 = vmatmul.mubr.msk.bf16.vlgmr.msra.gmra.mrb[0].mxu0 %vm254_vm0, %v1775_v3  ;;  %1739 = vmatmul.mubr.msk.bf16.vlgmr.msra.gmra.mrb[0].mxu1 %vm254_vm0, %v1776_v4  ;;  %v1786_v14 = vld [vmem:[%s2906_s0 + $0xb0] sm:$0xff]   ;;  %v1788_v16 = vld [vmem:[%s2906_s0 + $0xb8] sm:$0xff]   ;;  %v1789_v17 = vld [vmem:[%s2906_s0 + $0x40] sm:$0xff]  }
   0x7   :  { %1710 = vmatprep.mubr.msk.bf16.mxu0 %vm254_vm0, %v1777_v5  ;;  %1742 = vmatprep.mubr.msk.bf16.mxu1 %vm254_vm0, %v1778_v6  ;;  %v1790_v18 = vld [vmem:[%s2906_s0 + $0xc0] sm:$0xff]   ;;  %v1791_v19 = vld [vmem:[%s2906_s0 + $0x48] sm:$0xff]   ;;  %v1793_v21 = vld [vmem:[%s2906_s0 + $0x50] sm:$0xff]  }
   0x8   :  { %v1792_v20 = vld [vmem:[%s2906_s0 + $0xc8] sm:$0xff]   ;;  %v1794_v22 = vld [vmem:[%s2906_s0 + $0xd0] sm:$0xff]   ;;  %v1795_v23 = vld [vmem:[%s2906_s0 + $0x58] sm:$0xff]  }
   0x9   :  { %v1796_v24 = vld [vmem:[%s2906_s0 + $0xd8] sm:$0xff]   ;;  %v1797_v25 = vld [vmem:[%s2906_s0 + $0x60] sm:$0xff]   ;;  %v1799_v27 = vld [vmem:[%s2906_s0 + $0x68] sm:$0xff]  }
   0xa   :  { %v1798_v26 = vld [vmem:[%s2906_s0 + $0xe0] sm:$0xff]   ;;  %v1800_v28 = vld [vmem:[%s2906_s0 + $0xe8] sm:$0xff]   ;;  %v1801_v29 = vld [vmem:[%s2906_s0 + $0x70] sm:$0xff]  }
   0xb   :  { %v1802_v30 = vld [vmem:[%s2906_s0 + $0xf0] sm:$0xff]   ;;  %v1803_v31 = vld [vmem:[%s2906_s0 + $0x78] sm:$0xff]   ;;  %v2216_v33 = vld [vmem:[%s2907_s2] ss:$0 sm:$0xff] }
   0xc   :  { %v1804_v32 = vld [vmem:[%s2906_s0 + $0xf8] sm:$0xff]  }
   0xe   :  { %1711 = vmatmul.mubr.msk.bf16.gmra.mrb[4].mxu0 %vm254_vm0, %v1779_v7  ;;  %1743 = vmatmul.mubr.msk.bf16.gmra.mrb[4].mxu1 %vm254_vm0, %v1780_v8 }
   0xf   :  { %1714 = vmatprep.mubr.msk.bf16.mxu0 %vm254_vm0, %v1781_v9  ;;  %1746 = vmatprep.mubr.msk.bf16.mxu1 %vm254_vm0, %v1782_v10 }
  0x16   :  { %1715 = vmatmul.mubr.msk.bf16.gmra.mrb[8].mxu0 %vm254_vm0, %v1783_v11  ;;  %1747 = vmatmul.mubr.msk.bf16.gmra.mrb[8].mxu1 %vm254_vm0, %v1784_v12 }
  0x17   :  { %1718 = vmatprep.mubr.msk.bf16.mxu0 %vm254_vm0, %v1785_v13  ;;  %1750 = vmatprep.mubr.msk.bf16.mxu1 %vm254_vm0, %v1786_v14 }
  0x1e   :  { %1719 = vmatmul.mubr.msk.bf16.gmra.mrb[12].mxu0 %vm254_vm0, %v1787_v15  ;;  %1751 = vmatmul.mubr.msk.bf16.gmra.mrb[12].mxu1 %vm254_vm0, %v1788_v16 }
  0x1f   :  { %1722 = vmatprep.mubr.msk.bf16.mxu0 %vm254_vm0, %v1789_v17  ;;  %1754 = vmatprep.mubr.msk.bf16.mxu1 %vm254_vm0, %v1790_v18 }
  0x26   :  { %1723 = vmatmul.mubr.msk.bf16.gmra.mrb[16].mxu0 %vm254_vm0, %v1791_v19  ;;  %1755 = vmatmul.mubr.msk.bf16.gmra.mrb[16].mxu1 %vm254_vm0, %v1792_v20 }
  0x27   :  { %1726 = vmatprep.mubr.msk.bf16.mxu0 %vm254_vm0, %v1793_v21  ;;  %1758 = vmatprep.mubr.msk.bf16.mxu1 %vm254_vm0, %v1794_v22 }
  0x2e   :  { %1727 = vmatmul.mubr.msk.bf16.gmra.mrb[20].mxu0 %vm254_vm0, %v1795_v23  ;;  %1759 = vmatmul.mubr.msk.bf16.gmra.mrb[20].mxu1 %vm254_vm0, %v1796_v24 }
  0x2f   :  { %1730 = vmatprep.mubr.msk.bf16.mxu0 %vm254_vm0, %v1797_v25  ;;  %1762 = vmatprep.mubr.msk.bf16.mxu1 %vm254_vm0, %v1798_v26 }
  0x36   :  { %1731 = vmatmul.mubr.msk.bf16.gmra.mrb[24].mxu0 %vm254_vm0, %v1799_v27  ;;  %1763 = vmatmul.mubr.msk.bf16.gmra.mrb[24].mxu1 %vm254_vm0, %v1800_v28 }
  0x37   :  { %1734 = vmatprep.mubr.msk.bf16.mxu0 %vm254_vm0, %v1801_v29  ;;  %1766 = vmatprep.mubr.msk.bf16.mxu1 %vm254_vm0, %v1802_v30 }
  0x3e   :  { %1735 = vmatmul.mubr.msk.bf16.gmra.mrb[28].mxu0 %vm254_vm0, %v1803_v31  ;;  %1767 = vmatmul.mubr.msk.bf16.gmra.mrb[28].mxu1 %vm254_vm0, %v1804_v32 }
  0xd9   :  { %v1708_v34 = vpop.f32.mrb[0].mxu0  ;;  %v1740_v35 = vpop.f32.mrb[0].mxu1 }
  0xda   :  { %v2219_v36 = vadd.f32 %v1708_v34, %v2216_v33  ;;  %v2222_v37 = vadd.f32 %v1740_v35, %v2216_v33  ;;  %v385_v38 = vpop.f32.mrb[1].mxu0  ;;  %v513_v39 = vpop.f32.mrb[1].mxu1 }
  0xdb   :  { %v2225_v40 = vadd.f32 %v2216_v33, %v385_v38  ;;  %v2228_v41 = vadd.f32 %v2216_v33, %v513_v39  ;;  %v1709_v42 = vpop.f32.mrb[2].mxu0  ;;  %v1741_v43 = vpop.f32.mrb[2].mxu1 }
  0xdc   :  { %v1481_v44 = vmul.f32 -1.442695, %v2219_v36  ;;  %v1513_v45 = vmul.f32 -1.442695, %v2222_v37  ;;  %v2233_v46 = vadd.f32 %v1709_v42, %v2216_v33  ;;  %v2236_v47 = vadd.f32 %v1741_v43, %v2216_v33  ;;  %v388_v48 = vpop.f32.mrb[3].mxu0  ;;  %v516_v49 = vpop.f32.mrb[3].mxu1 }
  0xdd   :  { %v1479_v50 = vmul.f32 -1.442695, %v2225_v40  ;;  %v1511_v51 = vmul.f32 -1.442695, %v2228_v41  ;;  %v2241_v52 = vadd.f32 %v2216_v33, %v388_v48  ;;  %v2244_v53 = vadd.f32 %v2216_v33, %v516_v49 }
  0xde   :  { %1805 = vpow2.f32 %v1481_v44  ;;  %v1482_v54 = vmul.f32 -1.442695, %v2233_v46  ;;  %v1514_v55 = vmul.f32 -1.442695, %v2236_v47 }
  0xdf   :  { %1807 = vpow2.f32 %v1513_v45  ;;  %v1480_v56 = vmul.f32 -1.442695, %v2241_v52  ;;  %v1512_v57 = vmul.f32 -1.442695, %v2244_v53 }
  0xe0   :  { %1809 = vpow2.f32 %v1479_v50 }
  0xe1   :  { %1811 = vpow2.f32 %v1511_v51  ;;  %v1712_v58 = vpop.f32.mrb[4].mxu0  ;;  %v1744_v59 = vpop.f32.mrb[4].mxu1 }
  0xe2   :  { %1813 = vpow2.f32 %v1482_v54  ;;  %v2251_v60 = vadd.f32 %v1712_v58, %v2216_v33  ;;  %v2254_v61 = vadd.f32 %v1744_v59, %v2216_v33  ;;  %v401_v62 = vpop.f32.mrb[5].mxu0  ;;  %v529_v63 = vpop.f32.mrb[5].mxu1 }
  0xe3   :  { %1815 = vpow2.f32 %v1514_v55  ;;  %v2257_v0 = vadd.f32 %v2216_v33, %v401_v62  ;;  %v2260_v1 = vadd.f32 %v2216_v33, %v529_v63  ;;  %v1713_v2 = vpop.f32.mrb[6].mxu0  ;;  %v1745_v3 = vpop.f32.mrb[6].mxu1 }
  0xe4   :  { %1817 = vpow2.f32 %v1480_v56  ;;  %v1485_v4 = vmul.f32 -1.442695, %v2251_v60  ;;  %v1517_v5 = vmul.f32 -1.442695, %v2254_v61  ;;  %v2265_v6 = vadd.f32 %v1713_v2, %v2216_v33  ;;  %v404_v7 = vpop.f32.mrb[7].mxu0  ;;  %v532_v8 = vpop.f32.mrb[7].mxu1 }
  0xe5   :  { %1819 = vpow2.f32 %v1512_v57  ;;  %v1483_v9 = vmul.f32 -1.442695, %v2257_v0  ;;  %v1515_v10 = vmul.f32 -1.442695, %v2260_v1  ;;  %v2271_v30 = vadd.f32 %v1745_v3, %v2216_v33 }
  0xe6   :  { %1821 = vpow2.f32 %v1485_v4  ;;  %v1486_v11 = vmul.f32 -1.442695, %v2265_v6  ;;  %v2274_v35 = vadd.f32 %v2216_v33, %v404_v7  ;;  %v2277_v42 = vadd.f32 %v2216_v33, %v532_v8 }
  0xe7   :  { %1823 = vpow2.f32 %v1517_v5  ;;  %v1518_v50 = vmul.f32 -1.442695, %v2271_v30 }
  0xe8   :  { %v1806_v12 = vpop.eup %1805  ;;  %1825 = vpow2.f32 %v1483_v9  ;;  %v1484_v57 = vmul.f32 -1.442695, %v2274_v35  ;;  %v1516_v3 = vmul.f32 -1.442695, %v2277_v42 }
  0xe9   :  { %v1808_v13 = vpop.eup %1807  ;;  %v834_v14 = vadd.f32 1.0, %v1806_v12  ;;  %1827 = vpow2.f32 %v1515_v10  ;;  %v1716_v15 = vpop.f32.mrb[8].mxu0 }
  0xea   :  { %v1748_v16 = vpop.f32.mrb[8].mxu1  ;;  %v1810_v17 = vpop.eup %1809  ;;  %v866_v18 = vadd.f32 1.0, %v1808_v13  ;;  %1829 = vpow2.f32 %v1486_v11  ;;  %v2280_v45 = vadd.f32 %v1716_v15, %v2216_v33 }
  0xeb   :  { %v417_v19 = vpop.f32.mrb[9].mxu0  ;;  %v545_v20 = vpop.f32.mrb[9].mxu1  ;;  %1831 = vrcp.f32 %v834_v14  ;;  %v832_v22 = vadd.f32 1.0, %v1810_v17  ;;  %v2284_v51 = vadd.f32 %v1748_v16, %v2216_v33 }
  0xec   :  { %v1812_v21 = vpop.eup %1811  ;;  %v1717_v23 = vpop.f32.mrb[10].mxu0  ;;  %1833 = vrcp.f32 %v866_v18  ;;  %v2290_v58 = vadd.f32 %v2216_v33, %v417_v19  ;;  %v2298_v4 = vadd.f32 %v2216_v33, %v545_v20  ;;  %v1489_v10 = vmul.f32 -1.442695, %v2280_v45 }
  0xed   :  { %v1749_v24 = vpop.f32.mrb[10].mxu1  ;;  %v1814_v25 = vpop.eup %1813  ;;  %v864_v26 = vadd.f32 1.0, %v1812_v21  ;;  %1835 = vrcp.f32 %v832_v22  ;;  %v1521_v15 = vmul.f32 -1.442695, %v2284_v51  ;;  %v2311_v16 = vadd.f32 %v1717_v23, %v2216_v33 }
  0xee   :  { %v420_v27 = vpop.f32.mrb[11].mxu0  ;;  %v1816_v28 = vpop.eup %1815  ;;  %v835_v29 = vadd.f32 1.0, %v1814_v25  ;;  %v1487_v20 = vmul.f32 -1.442695, %v2290_v58  ;;  %v2318_v21 = vadd.f32 %v1749_v24, %v2216_v33 }
  0xef   :  { %v548_v31 = vpop.f32.mrb[11].mxu1  ;;  %v1818_v32 = vpop.eup %1817  ;;  %1837 = vrcp.f32 %v864_v26  ;;  %v867_v34 = vadd.f32 1.0, %v1816_v28  ;;  %v1519_v26 = vmul.f32 -1.442695, %v2298_v4  ;;  %v2323_v23 = vadd.f32 %v2216_v33, %v420_v27 }
  0xf0   :  { %v1820_v38 = vpop.eup %1819  ;;  %1839 = vrcp.f32 %v835_v29  ;;  %v833_v39 = vadd.f32 1.0, %v1818_v32 }
  0xf1   :  { %v1822_v43 = vpop.eup %1821  ;;  %1841 = vrcp.f32 %v867_v34  ;;  %v865_v44 = vadd.f32 1.0, %v1820_v38  ;;  %v2286_v54 = vpop.f32.mrb[12].mxu0 }
  0xf2   :  { %v1824_v48 = vpop.eup %1823  ;;  %1843 = vrcp.f32 %v833_v39  ;;  %v838_v49 = vadd.f32 1.0, %v1822_v43  ;;  %v2292_v59 = vpop.f32.mrb[12].mxu1 }
  0xf3   :  { %v1826_v55 = vpop.eup %1825  ;;  %1845 = vrcp.f32 %v865_v44  ;;  %v870_v56 = vadd.f32 1.0, %v1824_v48  ;;  %v2294_v62 = vpop.f32.mrb[13].mxu0  ;;  %v1522_v44 = vmul.f32 -1.442695, %v2318_v21 }
  0xf4   :  { %v1828_v63 = vpop.eup %1827  ;;  %1847 = vrcp.f32 %v838_v49  ;;  %v836_v2 = vadd.f32 1.0, %v1826_v55  ;;  %v2300_v5 = vpop.f32.mrb[13].mxu1 }
  0xf5   :  { %v2302_v7 = vpop.f32.mrb[14].mxu0  ;;  %v1830_v8 = vpop.eup %1829  ;;  %1849 = vrcp.f32 %v870_v56  ;;  %v868_v9 = vadd.f32 1.0, %v1828_v63 }
  0xf6   :  { %v2305_v11 = vpop.f32.mrb[14].mxu1  ;;  %v2307_v12 = vpop.f32.mrb[15].mxu0  ;;  %1851 = vrcp.f32 %v836_v2  ;;  %v839_v14 = vadd.f32 1.0, %v1830_v8 }
  0xf7   :  { %v1832_v13 = vpop.eup %1831  ;;  %v2313_v17 = vpop.f32.mrb[15].mxu1  ;;  %1853 = vrcp.f32 %v868_v9 }
  0xf8   :  { %v1834_v18 = vpop.eup %1833  ;;  %v1026_v19 = vmul.f32 %v1832_v13, %v2219_v36  ;;  %1855 = vrcp.f32 %v839_v14  ;;  %v2327_v36 = vadd.f32 %v2216_v33, %v548_v31 }
  0xf9   :  { %v1836_v22 = vpop.eup %1835  ;;  %v1058_v25 = vmul.f32 %v1834_v18, %v2222_v37  ;;  %1857 = vpow2.f32 %v1518_v50  ;;  %v1490_v37 = vmul.f32 -1.442695, %v2311_v16  ;;  %v2331_v39 = vpop.f32.mrb[16].mxu0 }
  0xfa   :  { %v1838_v28 = vpop.eup %1837  ;;  %v1609_v29 = vpack.c.bf16 %v1026_v19, %v1026_v19  ;;  %v1024_v32 = vmul.f32 %v1836_v22, %v2225_v40  ;;  %1859 = vpow2.f32 %v1484_v57  ;;  %v2333_v43 = vpop.f32.mrb[16].mxu1  ;;  %v1520_v18 = vmul.f32 -1.442695, %v2327_v36 }
  0xfb   :  { %v1840_v34 = vpop.eup %1839  ;;  %v1641_v24 = vpack.c.bf16 %v1058_v25, %v1058_v25  ;;  %v1056_v38 = vmul.f32 %v1838_v28, %v2228_v41  ;;  %1861 = vpow2.f32 %v1516_v3  ;;  %v2341_v41 = vpop.f32.mrb[17].mxu0 }
  0xfc   :  { %v1842_v27 = vpop.eup %1841  ;;  %1347 = vst.msk [vmem:[%s2908_s3 + $0x8] sm:$0xf] %vm1344_vm1, %v1609_v29  ;;  %v1607_v40 = vpack.c.bf16 %v1024_v32, %v1024_v32  ;;  %v1027_v31 = vmul.f32 %v1840_v34, %v2233_v46  ;;  %v2343_v48 = vpop.f32.mrb[17].mxu1  ;;  %1863 = vpow2.f32 %v1489_v10  ;;  %v2352_v46 = vadd.f32 %v2286_v54, %v2216_v33 }
  0xfd   :  { %v1844_v49 = vpop.eup %1843  ;;  %1379 = vst.msk [vmem:[%s2908_s3 + $0x88] sm:$0xf] %vm1344_vm1, %v1641_v24  ;;  %v1639_v50 = vpack.c.bf16 %v1056_v38, %v1056_v38  ;;  %v1059_v55 = vmul.f32 %v1842_v27, %v2236_v47  ;;  %v2354_v56 = vpop.f32.mrb[18].mxu0  ;;  %1865 = vpow2.f32 %v1521_v15  ;;  %v2365_v47 = vadd.f32 %v2292_v59, %v2216_v33 }
  0xfe   :  { %v2356_v57 = vpop.f32.mrb[18].mxu1  ;;  %v1846_v63 = vpop.eup %1845  ;;  %1345 = vst.msk [vmem:[%s2908_s3] sm:$0xf] %vm1344_vm1, %v1607_v40  ;;  %v1610_v2 = vpack.c.bf16 %v1027_v31, %v1027_v31  ;;  %v1025_v3 = vmul.f32 %v1844_v49, %v2241_v52  ;;  %1867 = vpow2.f32 %v1487_v20  ;;  %v1488_v52 = vmul.f32 -1.442695, %v2323_v23 }
  0xff   :  { %v2367_v54 = vpop.f32.mrb[19].mxu0  ;;  %v2369_v8 = vpop.f32.mrb[19].mxu1  ;;  %1377 = vst.msk [vmem:[%s2908_s3 + $0x80] sm:$0xf] %vm1344_vm1, %v1639_v50  ;;  %v1642_v10 = vpack.c.bf16 %v1059_v55, %v1059_v55  ;;  %v1057_v13 = vmul.f32 %v1846_v63, %v2244_v53  ;;  %1869 = vpow2.f32 %v1519_v26  ;;  %v1493_v22 = vmul.f32 -1.442695, %v2352_v46 }
 0x100   :  { %v1848_v9 = vpop.eup %1847  ;;  %1348 = vst.msk [vmem:[%s2908_s3 + $0xc] sm:$0xf] %vm1344_vm1, %v1610_v2  ;;  %v1608_v59 = vpack.c.bf16 %v1025_v3, %v1025_v3  ;;  %1871 = vpow2.f32 %v1490_v37  ;;  %v1525_v28 = vmul.f32 -1.442695, %v2365_v47 }
 0x101   :  { %v1850_v14 = vpop.eup %1849  ;;  %v1030_v15 = vmul.f32 %v1848_v9, %v2251_v60  ;;  %1380 = vst.msk [vmem:[%s2908_s3 + $0x8c] sm:$0xf] %vm1344_vm1, %v1642_v10  ;;  %v1640_v53 = vpack.c.bf16 %v1057_v13, %v1057_v13  ;;  %1873 = vpow2.f32 %v1522_v44  ;;  %v2400_v34 = vpop.f32.mrb[20].mxu0 }
 0x102   :  { %v1852_v19 = vpop.eup %1851  ;;  %v1062_v20 = vmul.f32 %v1850_v14, %v2254_v61  ;;  %1346 = vst.msk [vmem:[%s2908_s3 + $0x4] sm:$0xf] %vm1344_vm1, %v1608_v59  ;;  %1875 = vpow2.f32 %v1488_v52  ;;  %v2402_v24 = vpop.f32.mrb[20].mxu1  ;;  %v2439_v14 = vadd.f32 %v2216_v33, %v2294_v62  ;;  %v2448_v62 = vadd.f32 %v2216_v33, %v2300_v5 }
 0x103   :  { %v1854_v25 = vpop.eup %1853  ;;  %v1613_v60 = vpack.c.bf16 %v1030_v15, %v1030_v15  ;;  %v1028_v26 = vmul.f32 %v1852_v19, %v2257_v0  ;;  %1378 = vst.msk [vmem:[%s2908_s3 + $0x84] sm:$0xf] %vm1344_vm1, %v1640_v53  ;;  %1877 = vpow2.f32 %v1520_v18  ;;  %v2409_v27 = vpop.f32.mrb[21].mxu0 }
 0x104   :  { %v1856_v29 = vpop.eup %1855  ;;  %v1645_v61 = vpack.c.bf16 %v1062_v20, %v1062_v20  ;;  %v1060_v32 = vmul.f32 %v1854_v25, %v2260_v1  ;;  %v2411_v40 = vpop.f32.mrb[21].mxu1  ;;  %1879 = vpow2.f32 %v1493_v22 }
 0x105   :  { %v1858_v38 = vpop.eup %1857  ;;  %1351 = vst.msk [vmem:[%s2908_s3 + $0x18] sm:$0xf] %vm1344_vm1, %v1613_v60  ;;  %v1611_v0 = vpack.c.bf16 %v1028_v26, %v1028_v26  ;;  %v1031_v37 = vmul.f32 %v1856_v29, %v2265_v6  ;;  %v2417_v49 = vpop.f32.mrb[22].mxu0  ;;  %1881 = vpow2.f32 %v1525_v28  ;;  %v1491_v28 = vmul.f32 -1.442695, %v2439_v14 }
 0x106   :  { %v1860_v1 = vpop.eup %1859  ;;  %1383 = vst.msk [vmem:[%s2908_s3 + $0x98] sm:$0xf] %vm1344_vm1, %v1645_v61  ;;  %v1643_v31 = vpack.c.bf16 %v1060_v32, %v1060_v32  ;;  %v871_v44 = vadd.f32 1.0, %v1858_v38  ;;  %v2419_v50 = vpop.f32.mrb[22].mxu1 }
 0x107   :  { %v1862_v55 = vpop.eup %1861  ;;  %1349 = vst.msk [vmem:[%s2908_s3 + $0x10] sm:$0xf] %vm1344_vm1, %v1611_v0  ;;  %v1614_v6 = vpack.c.bf16 %v1031_v37, %v1031_v37  ;;  %v837_v63 = vadd.f32 1.0, %v1860_v1  ;;  %v2425_v2 = vpop.f32.mrb[23].mxu0  ;;  %v2456_v0 = vadd.f32 %v2302_v7, %v2216_v33  ;;  %v2460_v37 = vadd.f32 %v2305_v11, %v2216_v33 }
 0x108   :  { %v2427_v3 = vpop.f32.mrb[23].mxu1  ;;  %v1864_v9 = vpop.eup %1863  ;;  %1381 = vst.msk [vmem:[%s2908_s3 + $0x90] sm:$0xf] %vm1344_vm1, %v1643_v31  ;;  %1883 = vrcp.f32 %v871_v44  ;;  %v869_v10 = vadd.f32 1.0, %v1862_v55  ;;  %v2468_v55 = vadd.f32 %v2216_v33, %v2307_v12 }
 0x109   :  { %v1866_v13 = vpop.eup %1865  ;;  %1352 = vst.msk [vmem:[%s2908_s3 + $0x1c] sm:$0xf] %vm1344_vm1, %v1614_v6  ;;  %1885 = vrcp.f32 %v837_v63  ;;  %v842_v52 = vadd.f32 1.0, %v1864_v9  ;;  %v2441_v22 = vpop.f32.mrb[24].mxu0  ;;  %v2472_v6 = vadd.f32 %v2216_v33, %v2313_v17  ;;  %v1523_v17 = vmul.f32 -1.442695, %v2448_v62 }
 0x10a   :  { %v1868_v59 = vpop.eup %1867  ;;  %1887 = vrcp.f32 %v869_v10  ;;  %v874_v15 = vadd.f32 1.0, %v1866_v13  ;;  %v2443_v25 = vpop.f32.mrb[24].mxu1  ;;  %v2480_v10 = vadd.f32 %v2331_v39, %v2216_v33  ;;  %v2484_v13 = vadd.f32 %v2333_v43, %v2216_v33 }
 0x10b   :  { %v1870_v18 = vpop.eup %1869  ;;  %1889 = vrcp.f32 %v842_v52  ;;  %v840_v19 = vadd.f32 1.0, %v1868_v59  ;;  %v2450_v29 = vpop.f32.mrb[25].mxu0  ;;  %v2489_v59 = vadd.f32 %v2216_v33, %v2341_v41  ;;  %v1526_v39 = vmul.f32 -1.442695, %v2460_v37 }
 0x10c   :  { %v1872_v53 = vpop.eup %1871  ;;  %1891 = vrcp.f32 %v874_v15  ;;  %v872_v20 = vadd.f32 1.0, %v1870_v18  ;;  %v2452_v61 = vpop.f32.mrb[25].mxu1  ;;  %v1497_v41 = vmul.f32 -1.442695, %v2480_v10 }
 0x10d   :  { %v1874_v60 = vpop.eup %1873  ;;  %1893 = vrcp.f32 %v840_v19  ;;  %v843_v26 = vadd.f32 1.0, %v1872_v53  ;;  %v2462_v1 = vpop.f32.mrb[26].mxu0  ;;  %v1494_v19 = vmul.f32 -1.442695, %v2456_v0 }
 0x10e   :  { %v1876_v32 = vpop.eup %1875  ;;  %1895 = vrcp.f32 %v872_v20  ;;  %v875_v38 = vadd.f32 1.0, %v1874_v60  ;;  %v2464_v31 = vpop.f32.mrb[26].mxu1  ;;  %v1492_v20 = vmul.f32 -1.442695, %v2468_v55  ;;  %v1524_v60 = vmul.f32 -1.442695, %v2472_v6 }
 0x10f   :  { %v1878_v5 = vpop.eup %1877  ;;  %1897 = vrcp.f32 %v843_v26  ;;  %v841_v44 = vadd.f32 1.0, %v1876_v32  ;;  %v2474_v7 = vpop.f32.mrb[27].mxu0 }
 0x110   :  { %v2476_v63 = vpop.f32.mrb[27].mxu1  ;;  %v1880_v11 = vpop.eup %1879  ;;  %1899 = vrcp.f32 %v875_v38  ;;  %v873_v9 = vadd.f32 1.0, %v1878_v5  ;;  %v1529_v38 = vmul.f32 -1.442695, %v2484_v13 }
 0x111   :  { %v1882_v12 = vpop.eup %1881  ;;  %1901 = vrcp.f32 %v841_v44  ;;  %v846_v52 = vadd.f32 1.0, %v1880_v11  ;;  %v2499_v5 = vpop.f32.mrb[28].mxu0 }
 0x112   :  { %v1884_v15 = vpop.eup %1883  ;;  %1903 = vrcp.f32 %v873_v9  ;;  %v878_v18 = vadd.f32 1.0, %v1882_v12  ;;  %2909 = vst [vmem:[#allocation2_spill] sm:$0xff] %v2499_v5  ;;  %v2501_v44 = vpop.f32.mrb[28].mxu1  ;;  %v1495_v12 = vmul.f32 -1.442695, %v2489_v59  ;;  %v2512_v5 = vadd.f32 %v2216_v33, %v2343_v48 }
 0x113   :  { %v1886_v53 = vpop.eup %1885  ;;  %v1063_v43 = vmul.f32 %v1884_v15, %v2271_v30  ;;  %1905 = vrcp.f32 %v846_v52  ;;  %2910 = vst [vmem:[#allocation3_spill] sm:$0xff] %v2501_v44  ;;  %v2505_v52 = vpop.f32.mrb[29].mxu0 }
 0x114   :  { %v1888_v26 = vpop.eup %1887  ;;  %v1029_v32 = vmul.f32 %v1886_v53, %v2274_v35  ;;  %1907 = vrcp.f32 %v878_v18  ;;  %v2507_v15 = vpop.f32.mrb[29].mxu1 }
 0x115   :  { %v1890_v11 = vpop.eup %1889  ;;  %v1646_v9 = vpack.c.bf16 %v1063_v43, %v1063_v43  ;;  %v1061_v30 = vmul.f32 %v1888_v26, %v2277_v42  ;;  %1909 = vpow2.f32 %v1491_v28  ;;  %v2514_v44 = vpop.f32.mrb[30].mxu0 }
 0x116   :  { %v1892_v35 = vpop.eup %1891  ;;  %v1612_v18 = vpack.c.bf16 %v1029_v32, %v1029_v32  ;;  %v1034_v53 = vmul.f32 %v1890_v11, %v2280_v45  ;;  %1911 = vpow2.f32 %v1523_v17  ;;  %v2516_v43 = vpop.f32.mrb[30].mxu1  ;;  %v2525_v45 = vadd.f32 %v2354_v56, %v2216_v33 }
 0x117   :  { %v1894_v42 = vpop.eup %1893  ;;  %1384 = vst.msk [vmem:[%s2908_s3 + $0x9c] sm:$0xf] %vm1344_vm1, %v1646_v9  ;;  %v1644_v28 = vpack.c.bf16 %v1061_v30, %v1061_v30  ;;  %v1066_v26 = vmul.f32 %v1892_v35, %v2284_v51  ;;  %1913 = vpow2.f32 %v1494_v19  ;;  %v2527_v48 = vpop.f32.mrb[31].mxu0  ;;  %v2538_v51 = vadd.f32 %v2356_v57, %v2216_v33 }
 0x118   :  { %v2529_v17 = vpop.f32.mrb[31].mxu1  ;;  %v1896_v32 = vpop.eup %1895  ;;  %1350 = vst.msk [vmem:[%s2908_s3 + $0x14] sm:$0xf] %vm1344_vm1, %v1612_v18  ;;  %v1617_v11 = vpack.c.bf16 %v1034_v53, %v1034_v53  ;;  %v1032_v9 = vmul.f32 %v1894_v42, %v2290_v58  ;;  %1915 = vpow2.f32 %v1526_v39  ;;  %v2547_v35 = vadd.f32 %v2216_v33, %v2367_v54 }
 0x119   :  { %v1898_v56 = vpop.eup %1897  ;;  %1382 = vst.msk [vmem:[%s2908_s3 + $0x94] sm:$0xf] %vm1344_vm1, %v1644_v28  ;;  %v1649_v19 = vpack.c.bf16 %v1066_v26, %v1066_v26  ;;  %v1064_v30 = vmul.f32 %v1896_v32, %v2298_v4  ;;  %1917 = vpow2.f32 %v1492_v20  ;;  %v1527_v18 = vmul.f32 -1.442695, %v2512_v5 }
 0x11a   :  { %v1900_v58 = vpop.eup %1899  ;;  %1355 = vst.msk [vmem:[%s2908_s3 + $0x28] sm:$0xf] %vm1344_vm1, %v1617_v11  ;;  %v1615_v57 = vpack.c.bf16 %v1032_v9, %v1032_v9  ;;  %v1035_v39 = vmul.f32 %v1898_v56, %v2311_v16  ;;  %1919 = vpow2.f32 %v1524_v60  ;;  %v1498_v20 = vmul.f32 -1.442695, %v2525_v45 }
 0x11b   :  { %v1902_v53 = vpop.eup %1901  ;;  %1387 = vst.msk [vmem:[%s2908_s3 + $0xa8] sm:$0xf] %vm1344_vm1, %v1649_v19  ;;  %v1647_v4 = vpack.c.bf16 %v1064_v30, %v1064_v30  ;;  %v1067_v54 = vmul.f32 %v1900_v58, %v2318_v21  ;;  %1921 = vpow2.f32 %v1497_v41  ;;  %v1530_v28 = vmul.f32 -1.442695, %v2538_v51 }
 0x11c   :  { %v1904_v42 = vpop.eup %1903  ;;  %1353 = vst.msk [vmem:[%s2908_s3 + $0x20] sm:$0xf] %vm1344_vm1, %v1615_v57  ;;  %v1618_v16 = vpack.c.bf16 %v1035_v39, %v1035_v39  ;;  %v1033_v60 = vmul.f32 %v1902_v53, %v2323_v23  ;;  %1923 = vpow2.f32 %v1529_v38  ;;  %v1496_v32 = vmul.f32 -1.442695, %v2547_v35 }
 0x11d   :  { %v1906_v26 = vpop.eup %1905  ;;  %1385 = vst.msk [vmem:[%s2908_s3 + $0xa0] sm:$0xf] %vm1344_vm1, %v1647_v4  ;;  %v1650_v21 = vpack.c.bf16 %v1067_v54, %v1067_v54  ;;  %v1065_v41 = vmul.f32 %v1904_v42, %v2327_v36  ;;  %1925 = vpow2.f32 %v1495_v12 }
 0x11e   :  { %v1908_v11 = vpop.eup %1907  ;;  %1356 = vst.msk [vmem:[%s2908_s3 + $0x2c] sm:$0xf] %vm1344_vm1, %v1618_v16  ;;  %v1616_v23 = vpack.c.bf16 %v1033_v60, %v1033_v60  ;;  %v1038_v38 = vmul.f32 %v1906_v26, %v2352_v46  ;;  %1927 = vpow2.f32 %v1527_v18 }
 0x11f   :  { %v1910_v9 = vpop.eup %1909  ;;  %1388 = vst.msk [vmem:[%s2908_s3 + $0xac] sm:$0xf] %vm1344_vm1, %v1650_v21  ;;  %v1648_v36 = vpack.c.bf16 %v1065_v41, %v1065_v41  ;;  %v1070_v12 = vmul.f32 %v1908_v11, %v2365_v47  ;;  %1929 = vpow2.f32 %v1498_v20  ;;  %v2601_v20 = vadd.f32 %v2216_v33, %v2369_v8 }
 0x120   :  { %v1912_v56 = vpop.eup %1911  ;;  %1354 = vst.msk [vmem:[%s2908_s3 + $0x24] sm:$0xf] %vm1344_vm1, %v1616_v23  ;;  %v1621_v19 = vpack.c.bf16 %v1038_v38, %v1038_v38  ;;  %v844_v30 = vadd.f32 1.0, %v1910_v9  ;;  %1931 = vpow2.f32 %v1530_v28  ;;  %v2605_v41 = vadd.f32 %v2400_v34, %v2216_v33 }
 0x121   :  { %v1914_v46 = vpop.eup %1913  ;;  %1386 = vst.msk [vmem:[%s2908_s3 + $0xa4] sm:$0xf] %vm1344_vm1, %v1648_v36  ;;  %v1653_v58 = vpack.c.bf16 %v1070_v12, %v1070_v12  ;;  %v876_v57 = vadd.f32 1.0, %v1912_v56  ;;  %1933 = vpow2.f32 %v1496_v32  ;;  %v2609_v32 = vadd.f32 %v2402_v24, %v2216_v33 }
 0x122   :  { %v1916_v47 = vpop.eup %1915  ;;  %1359 = vst.msk [vmem:[%s2908_s3 + $0x38] sm:$0xf] %vm1344_vm1, %v1621_v19  ;;  %1935 = vrcp.f32 %v844_v30  ;;  %v847_v39 = vadd.f32 1.0, %v1914_v46  ;;  %v1528_v23 = vmul.f32 -1.442695, %v2601_v20  ;;  %v2614_v38 = vadd.f32 %v2216_v33, %v2409_v27 }
 0x123   :  { %v1918_v18 = vpop.eup %1917  ;;  %1391 = vst.msk [vmem:[%s2908_s3 + $0xb8] sm:$0xf] %vm1344_vm1, %v1653_v58  ;;  %1937 = vrcp.f32 %v876_v57  ;;  %v879_v53 = vadd.f32 1.0, %v1916_v47  ;;  %v2618_v34 = vadd.f32 %v2216_v33, %v2411_v40  ;;  %v2622_v24 = vadd.f32 %v2417_v49, %v2216_v33 }
 0x124   :  { %v1920_v4 = vpop.eup %1919  ;;  %1939 = vrcp.f32 %v847_v39  ;;  %v845_v54 = vadd.f32 1.0, %v1918_v18  ;;  %v2626_v19 = vadd.f32 %v2419_v50, %v2216_v33  ;;  %v2630_v27 = vadd.f32 %v2216_v33, %v2425_v2 }
 0x125   :  { %v1922_v42 = vpop.eup %1921  ;;  %1941 = vrcp.f32 %v879_v53  ;;  %v877_v16 = vadd.f32 1.0, %v1920_v4  ;;  %v1501_v40 = vmul.f32 -1.442695, %v2605_v41  ;;  %v1533_v58 = vmul.f32 -1.442695, %v2609_v32 }
 0x126   :  { %v1924_v60 = vpop.eup %1923  ;;  %1943 = vrcp.f32 %v845_v54  ;;  %v850_v28 = vadd.f32 1.0, %v1922_v42  ;;  %v1499_v47 = vmul.f32 -1.442695, %v2614_v38  ;;  %v2637_v50 = vadd.f32 %v2216_v33, %v2427_v3 }
 0x127   :  { %v1926_v26 = vpop.eup %1925  ;;  %1945 = vrcp.f32 %v877_v16  ;;  %v882_v21 = vadd.f32 1.0, %v1924_v60  ;;  %v1531_v18 = vmul.f32 -1.442695, %v2618_v34  ;;  %v1502_v53 = vmul.f32 -1.442695, %v2622_v24 }
 0x128   :  { %v1928_v11 = vpop.eup %1927  ;;  %1947 = vrcp.f32 %v850_v28  ;;  %v848_v8 = vadd.f32 1.0, %v1926_v26  ;;  %v1534_v42 = vmul.f32 -1.442695, %v2626_v19  ;;  %v1500_v16 = vmul.f32 -1.442695, %v2630_v27 }
 0x129   :  { %v1930_v9 = vpop.eup %1929  ;;  %1949 = vrcp.f32 %v882_v21  ;;  %v880_v36 = vadd.f32 1.0, %v1928_v11 }
 0x12a   :  { %v1932_v12 = vpop.eup %1931  ;;  %1951 = vrcp.f32 %v848_v8  ;;  %v851_v56 = vadd.f32 1.0, %v1930_v9 }
 0x12b   :  { %v1934_v30 = vpop.eup %1933  ;;  %1953 = vrcp.f32 %v880_v36  ;;  %v883_v46 = vadd.f32 1.0, %v1932_v12  ;;  %v2668_v12 = vadd.f32 %v2216_v33, %v2450_v29 }
 0x12c   :  { %v1936_v49 = vpop.eup %1935  ;;  %1955 = vrcp.f32 %v851_v56  ;;  %v849_v57 = vadd.f32 1.0, %v1934_v30  ;;  %v2677_v30 = vadd.f32 %v2216_v33, %v2452_v61 }
 0x12d   :  { %v1938_v39 = vpop.eup %1937  ;;  %v1036_v2 = vmul.f32 %v1936_v49, %v2439_v14  ;;  %1957 = vrcp.f32 %v883_v46  ;;  %v2648_v14 = vadd.f32 %v2441_v22, %v2216_v33  ;;  %v2659_v22 = vadd.f32 %v2443_v25, %v2216_v33 }
 0x12e   :  { %v1940_v4 = vpop.eup %1939  ;;  %v1068_v54 = vmul.f32 %v1938_v39, %v2448_v62  ;;  %1959 = vrcp.f32 %v849_v57  ;;  %v1532_v62 = vmul.f32 -1.442695, %v2637_v50 }
 0x12f   :  { %v1942_v60 = vpop.eup %1941  ;;  %v1619_v28 = vpack.c.bf16 %v1036_v2, %v1036_v2  ;;  %v1039_v3 = vmul.f32 %v1940_v4, %v2456_v0  ;;  %1961 = vpow2.f32 %v1528_v23 }
 0x130   :  { %v1944_v26 = vpop.eup %1943  ;;  %v1651_v21 = vpack.c.bf16 %v1068_v54, %v1068_v54  ;;  %v1071_v11 = vmul.f32 %v1942_v60, %v2460_v37  ;;  %1963 = vpow2.f32 %v1501_v40  ;;  %v1505_v40 = vmul.f32 -1.442695, %v2648_v14 }
 0x131   :  { %v1946_v8 = vpop.eup %1945  ;;  %1357 = vst.msk [vmem:[%s2908_s3 + $0x30] sm:$0xf] %vm1344_vm1, %v1619_v28  ;;  %v1622_v9 = vpack.c.bf16 %v1039_v3, %v1039_v3  ;;  %v1037_v0 = vmul.f32 %v1944_v26, %v2468_v55  ;;  %1965 = vpow2.f32 %v1533_v58 }
 0x132   :  { %v1948_v23 = vpop.eup %1947  ;;  %1389 = vst.msk [vmem:[%s2908_s3 + $0xb0] sm:$0xf] %vm1344_vm1, %v1651_v21  ;;  %v1654_v37 = vpack.c.bf16 %v1071_v11, %v1071_v11  ;;  %v1069_v36 = vmul.f32 %v1946_v8, %v2472_v6  ;;  %1967 = vpow2.f32 %v1499_v47  ;;  %v1503_v47 = vmul.f32 -1.442695, %v2668_v12 }
 0x133   :  { %v1950_v55 = vpop.eup %1949  ;;  %1360 = vst.msk [vmem:[%s2908_s3 + $0x3c] sm:$0xf] %vm1344_vm1, %v1622_v9  ;;  %v1620_v25 = vpack.c.bf16 %v1037_v0, %v1037_v0  ;;  %v1042_v56 = vmul.f32 %v1948_v23, %v2480_v10  ;;  %1969 = vpow2.f32 %v1531_v18  ;;  %v1537_v10 = vmul.f32 -1.442695, %v2659_v22 }
 0x134   :  { %v1952_v6 = vpop.eup %1951  ;;  %1392 = vst.msk [vmem:[%s2908_s3 + $0xbc] sm:$0xf] %vm1344_vm1, %v1654_v37  ;;  %v1652_v29 = vpack.c.bf16 %v1069_v36, %v1069_v36  ;;  %v1074_v46 = vmul.f32 %v1950_v55, %v2484_v13  ;;  %1971 = vpow2.f32 %v1502_v53  ;;  %v1535_v18 = vmul.f32 -1.442695, %v2677_v30 }
 0x135   :  { %v1954_v58 = vpop.eup %1953  ;;  %1358 = vst.msk [vmem:[%s2908_s3 + $0x34] sm:$0xf] %vm1344_vm1, %v1620_v25  ;;  %v1625_v33 = vpack.c.bf16 %v1042_v56, %v1042_v56  ;;  %v1040_v61 = vmul.f32 %v1952_v6, %v2489_v59  ;;  %1973 = vpow2.f32 %v1534_v42  ;;  %v2061_v56 = vld [vmem:[%s2907_s2] ss:$0 sm:$0xff] }
 0x136   :  { %v1956_v49 = vpop.eup %1955  ;;  %1390 = vst.msk [vmem:[%s2908_s3 + $0xb4] sm:$0xf] %vm1344_vm1, %v1652_v29  ;;  %v1657_v13 = vpack.c.bf16 %v1074_v46, %v1074_v46  ;;  %v1072_v57 = vmul.f32 %v1954_v58, %v2512_v5  ;;  %1975 = vpow2.f32 %v1500_v16  ;;  %v2733_v6 = vadd.f32 %v2061_v56, %v2462_v1  ;;  %v2912_v1 = vld [vmem:[#allocation3_spill] sm:$0xff] }
 0x137   :  { %v1958_v39 = vpop.eup %1957  ;;  %1363 = vst.msk [vmem:[%s2908_s3 + $0x48] sm:$0xf] %vm1344_vm1, %v1625_v33  ;;  %v1623_v59 = vpack.c.bf16 %v1040_v61, %v1040_v61  ;;  %v1043_v2 = vmul.f32 %v1956_v49, %v2525_v45  ;;  %1977 = vpow2.f32 %v1532_v62  ;;  %v2736_v29 = vadd.f32 %v2061_v56, %v2464_v31  ;;  %v2911_v49 = vld [vmem:[#allocation2_spill] sm:$0xff] }
 0x138   :  { %v1960_v53 = vpop.eup %1959  ;;  %1395 = vst.msk [vmem:[%s2908_s3 + $0xc8] sm:$0xf] %vm1344_vm1, %v1657_v13  ;;  %v1655_v5 = vpack.c.bf16 %v1072_v57, %v1072_v57  ;;  %v1075_v4 = vmul.f32 %v1958_v39, %v2538_v51  ;;  %1979 = vpow2.f32 %v1505_v40  ;;  %v2739_v58 = vadd.f32 %v2061_v56, %v2474_v7 }
 0x139   :  { %v1962_v54 = vpop.eup %1961  ;;  %1361 = vst.msk [vmem:[%s2908_s3 + $0x40] sm:$0xf] %vm1344_vm1, %v1623_v59  ;;  %v1626_v45 = vpack.c.bf16 %v1043_v2, %v1043_v2  ;;  %v1041_v42 = vmul.f32 %v1960_v53, %v2547_v35  ;;  %1981 = vpow2.f32 %v1537_v10  ;;  %v2742_v33 = vadd.f32 %v2061_v56, %v2476_v63 }
 0x13a   :  { %v1964_v16 = vpop.eup %1963  ;;  %1393 = vst.msk [vmem:[%s2908_s3 + $0xc0] sm:$0xf] %vm1344_vm1, %v1655_v5  ;;  %v1658_v60 = vpack.c.bf16 %v1075_v4, %v1075_v4  ;;  %v881_v28 = vadd.f32 1.0, %v1962_v54  ;;  %1983 = vpow2.f32 %v1503_v47  ;;  %v2745_v13 = vadd.f32 %v2061_v56, %v2911_v49 }
 0x13b   :  { %v1966_v51 = vpop.eup %1965  ;;  %1364 = vst.msk [vmem:[%s2908_s3 + $0x4c] sm:$0xf] %vm1344_vm1, %v1626_v45  ;;  %v1624_v3 = vpack.c.bf16 %v1041_v42, %v1041_v42  ;;  %v854_v26 = vadd.f32 1.0, %v1964_v16  ;;  %1985 = vpow2.f32 %v1535_v18  ;;  %v2748_v57 = vadd.f32 %v2061_v56, %v2912_v1 }
 0x13c   :  { %v1968_v35 = vpop.eup %1967  ;;  %1396 = vst.msk [vmem:[%s2908_s3 + $0xcc] sm:$0xf] %vm1344_vm1, %v1658_v60  ;;  %1987 = vrcp.f32 %v881_v28  ;;  %v886_v21 = vadd.f32 1.0, %v1966_v51  ;;  %v2751_v39 = vadd.f32 %v2061_v56, %v2505_v52  ;;  %v2754_v7 = vadd.f32 %v2061_v56, %v2507_v15 }
 0x13d   :  { %v1970_v11 = vpop.eup %1969  ;;  %1362 = vst.msk [vmem:[%s2908_s3 + $0x44] sm:$0xf] %vm1344_vm1, %v1624_v3  ;;  %1989 = vrcp.f32 %v854_v26  ;;  %v852_v62 = vadd.f32 1.0, %v1968_v35  ;;  %v1506_v2 = vmul.f32 -1.442695, %v2733_v6 }
 0x13e   :  { %v1972_v8 = vpop.eup %1971  ;;  %1991 = vrcp.f32 %v886_v21  ;;  %v884_v9 = vadd.f32 1.0, %v1970_v11  ;;  %v1538_v18 = vmul.f32 -1.442695, %v2736_v29  ;;  %v1504_v4 = vmul.f32 -1.442695, %v2739_v58 }
 0x13f   :  { %v1974_v0 = vpop.eup %1973  ;;  %1993 = vrcp.f32 %v852_v62  ;;  %v855_v23 = vadd.f32 1.0, %v1972_v8  ;;  %v1536_v54 = vmul.f32 -1.442695, %v2742_v33  ;;  %v1509_v15 = vmul.f32 -1.442695, %v2745_v13 }
 0x140   :  { %v1976_v37 = vpop.eup %1975  ;;  %1995 = vrcp.f32 %v884_v9  ;;  %v887_v36 = vadd.f32 1.0, %v1974_v0  ;;  %v1541_v42 = vmul.f32 -1.442695, %v2748_v57  ;;  %v1507_v28 = vmul.f32 -1.442695, %v2751_v39 }
 0x141   :  { %v1978_v55 = vpop.eup %1977  ;;  %1997 = vrcp.f32 %v855_v23  ;;  %v853_v25 = vadd.f32 1.0, %v1976_v37  ;;  %v1539_v51 = vmul.f32 -1.442695, %v2754_v7  ;;  %v2788_v23 = vadd.f32 %v2061_v56, %v2529_v17 }
 0x142   :  { %v1980_v46 = vpop.eup %1979  ;;  %1999 = vrcp.f32 %v887_v36  ;;  %v885_v40 = vadd.f32 1.0, %v1978_v55 }
 0x143   :  { %v1982_v61 = vpop.eup %1981  ;;  %2001 = vrcp.f32 %v853_v25  ;;  %v858_v10 = vadd.f32 1.0, %v1980_v46  ;;  %v1540_v49 = vmul.f32 -1.442695, %v2788_v23 }
 0x144   :  { %v1984_v31 = vpop.eup %1983  ;;  %2003 = vrcp.f32 %v885_v40  ;;  %v890_v47 = vadd.f32 1.0, %v1982_v61 }
 0x145   :  { %v1986_v63 = vpop.eup %1985  ;;  %2005 = vrcp.f32 %v858_v10  ;;  %v856_v59 = vadd.f32 1.0, %v1984_v31 }
 0x146   :  { %v1988_v53 = vpop.eup %1987  ;;  %2007 = vrcp.f32 %v890_v47  ;;  %v888_v5 = vadd.f32 1.0, %v1986_v63 }
 0x147   :  { %v1990_v45 = vpop.eup %1989  ;;  %v1073_v52 = vmul.f32 %v1988_v53, %v2601_v20  ;;  %2009 = vrcp.f32 %v856_v59  ;;  %v2768_v20 = vadd.f32 %v2061_v56, %v2514_v44  ;;  %v2780_v44 = vadd.f32 %v2061_v56, %v2527_v48 }
 0x148   :  { %v1992_v16 = vpop.eup %1991  ;;  %v1046_v60 = vmul.f32 %v1990_v45, %v2605_v41  ;;  %2011 = vrcp.f32 %v888_v5  ;;  %v2772_v41 = vadd.f32 %v2061_v56, %v2516_v43 }
 0x149   :  { %v1994_v3 = vpop.eup %1993  ;;  %v1656_v26 = vpack.c.bf16 %v1073_v52, %v1073_v52  ;;  %v1078_v35 = vmul.f32 %v1992_v16, %v2609_v32  ;;  %2013 = vpow2.f32 %v1506_v2  ;;  %v1510_v36 = vmul.f32 -1.442695, %v2768_v20 }
 0x14a   :  { %v1996_v21 = vpop.eup %1995  ;;  %v1629_v11 = vpack.c.bf16 %v1046_v60, %v1046_v60  ;;  %v1044_v62 = vmul.f32 %v1994_v3, %v2614_v38  ;;  %2015 = vpow2.f32 %v1538_v18  ;;  %v1542_v25 = vmul.f32 -1.442695, %v2772_v41 }
 0x14b   :  { %v1998_v8 = vpop.eup %1997  ;;  %1394 = vst.msk [vmem:[%s2908_s3 + $0xc4] sm:$0xf] %vm1344_vm1, %v1656_v26  ;;  %v1661_v9 = vpack.c.bf16 %v1078_v35, %v1078_v35  ;;  %v1076_v32 = vmul.f32 %v1996_v21, %v2618_v34  ;;  %2017 = vpow2.f32 %v1504_v4  ;;  %v1508_v40 = vmul.f32 -1.442695, %v2780_v44 }
 0x14c   :  { %v2000_v0 = vpop.eup %1999  ;;  %1367 = vst.msk [vmem:[%s2908_s3 + $0x58] sm:$0xf] %vm1344_vm1, %v1629_v11  ;;  %v1627_v43 = vpack.c.bf16 %v1044_v62, %v1044_v62  ;;  %v1047_v38 = vmul.f32 %v1998_v8, %v2622_v24  ;;  %2019 = vpow2.f32 %v1536_v54 }
 0x14d   :  { %v2002_v37 = vpop.eup %2001  ;;  %1399 = vst.msk [vmem:[%s2908_s3 + $0xd8] sm:$0xf] %vm1344_vm1, %v1661_v9  ;;  %v1659_v48 = vpack.c.bf16 %v1076_v32, %v1076_v32  ;;  %v1079_v34 = vmul.f32 %v2000_v0, %v2626_v19  ;;  %2021 = vpow2.f32 %v1509_v15 }
 0x14e   :  { %v2004_v55 = vpop.eup %2003  ;;  %1365 = vst.msk [vmem:[%s2908_s3 + $0x50] sm:$0xf] %vm1344_vm1, %v1627_v43  ;;  %v1630_v17 = vpack.c.bf16 %v1047_v38, %v1047_v38  ;;  %v1045_v24 = vmul.f32 %v2002_v37, %v2630_v27  ;;  %2023 = vpow2.f32 %v1541_v42 }
 0x14f   :  { %v2006_v56 = vpop.eup %2005  ;;  %1397 = vst.msk [vmem:[%s2908_s3 + $0xd0] sm:$0xf] %vm1344_vm1, %v1659_v48  ;;  %v1662_v19 = vpack.c.bf16 %v1079_v34, %v1079_v34  ;;  %v1077_v46 = vmul.f32 %v2004_v55, %v2637_v50  ;;  %2025 = vpow2.f32 %v1507_v28 }
 0x150   :  { %v2008_v61 = vpop.eup %2007  ;;  %1368 = vst.msk [vmem:[%s2908_s3 + $0x5c] sm:$0xf] %vm1344_vm1, %v1630_v17  ;;  %v1628_v27 = vpack.c.bf16 %v1045_v24, %v1045_v24  ;;  %v1050_v10 = vmul.f32 %v2006_v56, %v2648_v14  ;;  %2027 = vpow2.f32 %v1539_v51 }
 0x151   :  { %v2010_v1 = vpop.eup %2009  ;;  %1400 = vst.msk [vmem:[%s2908_s3 + $0xdc] sm:$0xf] %vm1344_vm1, %v1662_v19  ;;  %v1660_v50 = vpack.c.bf16 %v1077_v46, %v1077_v46  ;;  %v1082_v31 = vmul.f32 %v2008_v61, %v2659_v22  ;;  %2029 = vpow2.f32 %v1510_v36 }
 0x152   :  { %v2012_v47 = vpop.eup %2011  ;;  %1366 = vst.msk [vmem:[%s2908_s3 + $0x54] sm:$0xf] %vm1344_vm1, %v1628_v27  ;;  %v1633_v14 = vpack.c.bf16 %v1050_v10, %v1050_v10  ;;  %v1048_v63 = vmul.f32 %v2010_v1, %v2668_v12  ;;  %2031 = vpow2.f32 %v1542_v25 }
 0x153   :  { %v2014_v59 = vpop.eup %2013  ;;  %1398 = vst.msk [vmem:[%s2908_s3 + $0xd4] sm:$0xf] %vm1344_vm1, %v1660_v50  ;;  %v1665_v2 = vpack.c.bf16 %v1082_v31, %v1082_v31  ;;  %v1080_v22 = vmul.f32 %v2012_v47, %v2677_v30  ;;  %2033 = vpow2.f32 %v1508_v40 }
 0x154   :  { %v2016_v18 = vpop.eup %2015  ;;  %1371 = vst.msk [vmem:[%s2908_s3 + $0x68] sm:$0xf] %vm1344_vm1, %v1633_v14  ;;  %v1631_v53 = vpack.c.bf16 %v1048_v63, %v1048_v63  ;;  %v859_v5 = vadd.f32 1.0, %v2014_v59  ;;  %2035 = vpow2.f32 %v1540_v49 }
 0x155   :  { %v2018_v12 = vpop.eup %2017  ;;  %1403 = vst.msk [vmem:[%s2908_s3 + $0xe8] sm:$0xf] %vm1344_vm1, %v1665_v2  ;;  %v1663_v4 = vpack.c.bf16 %v1080_v22, %v1080_v22  ;;  %v891_v54 = vadd.f32 1.0, %v2016_v18 }
 0x156   :  { %v2020_v45 = vpop.eup %2019  ;;  %1369 = vst.msk [vmem:[%s2908_s3 + $0x60] sm:$0xf] %vm1344_vm1, %v1631_v53  ;;  %2037 = vrcp.f32 %v859_v5  ;;  %v857_v30 = vadd.f32 1.0, %v2018_v12 }
 0x157   :  { %v2022_v52 = vpop.eup %2021  ;;  %1401 = vst.msk [vmem:[%s2908_s3 + $0xe0] sm:$0xf] %vm1344_vm1, %v1663_v4  ;;  %2039 = vrcp.f32 %v891_v54  ;;  %v889_v15 = vadd.f32 1.0, %v2020_v45 }
 0x158   :  { %v2024_v42 = vpop.eup %2023  ;;  %2041 = vrcp.f32 %v857_v30  ;;  %v862_v16 = vadd.f32 1.0, %v2022_v52 }
 0x159   :  { %v2026_v60 = vpop.eup %2025  ;;  %2043 = vrcp.f32 %v889_v15  ;;  %v894_v28 = vadd.f32 1.0, %v2024_v42 }
 0x15a   :  { %v2028_v51 = vpop.eup %2027  ;;  %2045 = vrcp.f32 %v862_v16  ;;  %v860_v3 = vadd.f32 1.0, %v2026_v60 }
 0x15b   :  { %v2030_v26 = vpop.eup %2029  ;;  %2047 = vrcp.f32 %v894_v28  ;;  %v892_v35 = vadd.f32 1.0, %v2028_v51 }
 0x15c   :  { %v2032_v21 = vpop.eup %2031  ;;  %2049 = vrcp.f32 %v860_v3  ;;  %v863_v11 = vadd.f32 1.0, %v2030_v26 }
 0x15d   :  { %v2034_v62 = vpop.eup %2033  ;;  %2051 = vrcp.f32 %v892_v35  ;;  %v895_v8 = vadd.f32 1.0, %v2032_v21 }
 0x15e   :  { %v2036_v9 = vpop.eup %2035  ;;  %2053 = vrcp.f32 %v863_v11  ;;  %v861_v32 = vadd.f32 1.0, %v2034_v62 }
 0x15f   :  { %2055 = vrcp.f32 %v895_v8  ;;  %v893_v0 = vadd.f32 1.0, %v2036_v9 }
 0x160   :  { %v2038_v43 = vpop.eup %2037  ;;  %2057 = vrcp.f32 %v861_v32 }
 0x161   :  { %v2040_v38 = vpop.eup %2039  ;;  %v1051_v37 = vmul.f32 %v2038_v43, %v2733_v6  ;;  %2059 = vrcp.f32 %v893_v0 }
 0x162   :  { %v2042_v48 = vpop.eup %2041  ;;  %v1083_v34 = vmul.f32 %v2040_v38, %v2736_v29 }
 0x163   :  { %v2044_v36 = vpop.eup %2043  ;;  %v1634_v55 = vpack.c.bf16 %v1051_v37, %v1051_v37  ;;  %v1049_v17 = vmul.f32 %v2042_v48, %v2739_v58 }
 0x164   :  { %v2046_v24 = vpop.eup %2045  ;;  %v1666_v25 = vpack.c.bf16 %v1083_v34, %v1083_v34  ;;  %v1081_v56 = vmul.f32 %v2044_v36, %v2742_v33 }
 0x165   :  { %v2048_v19 = vpop.eup %2047  ;;  %1372 = vst.msk [vmem:[%s2908_s3 + $0x6c] sm:$0xf] %vm1344_vm1, %v1634_v55  ;;  %v1632_v46 = vpack.c.bf16 %v1049_v17, %v1049_v17  ;;  %v1054_v6 = vmul.f32 %v2046_v24, %v2745_v13 }
 0x166   :  { %v2050_v40 = vpop.eup %2049  ;;  %1404 = vst.msk [vmem:[%s2908_s3 + $0xec] sm:$0xf] %vm1344_vm1, %v1666_v25  ;;  %v1664_v29 = vpack.c.bf16 %v1081_v56, %v1081_v56  ;;  %v1086_v58 = vmul.f32 %v2048_v19, %v2748_v57 }
 0x167   :  { %v2052_v61 = vpop.eup %2051  ;;  %1370 = vst.msk [vmem:[%s2908_s3 + $0x64] sm:$0xf] %vm1344_vm1, %v1632_v46  ;;  %v1637_v33 = vpack.c.bf16 %v1054_v6, %v1054_v6  ;;  %v1052_v27 = vmul.f32 %v2050_v40, %v2751_v39 }
 0x168   :  { %v2054_v10 = vpop.eup %2053  ;;  %1402 = vst.msk [vmem:[%s2908_s3 + $0xe4] sm:$0xf] %vm1344_vm1, %v1664_v29  ;;  %v1669_v13 = vpack.c.bf16 %v1086_v58, %v1086_v58  ;;  %v1084_v49 = vmul.f32 %v2052_v61, %v2754_v7 }
 0x169   :  { %v2056_v1 = vpop.eup %2055  ;;  %1375 = vst.msk [vmem:[%s2908_s3 + $0x78] sm:$0xf] %vm1344_vm1, %v1637_v33  ;;  %v1635_v57 = vpack.c.bf16 %v1052_v27, %v1052_v27  ;;  %v1055_v50 = vmul.f32 %v2054_v10, %v2768_v20 }
 0x16a   :  { %v2058_v31 = vpop.eup %2057  ;;  %1407 = vst.msk [vmem:[%s2908_s3 + $0xf8] sm:$0xf] %vm1344_vm1, %v1669_v13  ;;  %v1667_v39 = vpack.c.bf16 %v1084_v49, %v1084_v49  ;;  %v1087_v47 = vmul.f32 %v2056_v1, %v2772_v41 }
 0x16b   :  { %v2060_v14 = vpop.eup %2059  ;;  %1373 = vst.msk [vmem:[%s2908_s3 + $0x70] sm:$0xf] %vm1344_vm1, %v1635_v57  ;;  %v1638_v7 = vpack.c.bf16 %v1055_v50, %v1055_v50  ;;  %v1053_v63 = vmul.f32 %v2058_v31, %v2780_v44 }
 0x16c   :  { %1405 = vst.msk [vmem:[%s2908_s3 + $0xf0] sm:$0xf] %vm1344_vm1, %v1667_v39  ;;  %v1670_v20 = vpack.c.bf16 %v1087_v47, %v1087_v47  ;;  %v1085_v59 = vmul.f32 %v2060_v14, %v2788_v23 }
 0x16d   :  { %1376 = vst.msk [vmem:[%s2908_s3 + $0x7c] sm:$0xf] %vm1344_vm1, %v1638_v7  ;;  %v1636_v41 = vpack.c.bf16 %v1053_v63, %v1053_v63 }
 0x16e   :  { %1408 = vst.msk [vmem:[%s2908_s3 + $0xfc] sm:$0xf] %vm1344_vm1, %v1670_v20  ;;  %v1668_v44 = vpack.c.bf16 %v1085_v59, %v1085_v59 }
 0x16f   :  { %1374 = vst.msk [vmem:[%s2908_s3 + $0x74] sm:$0xf] %vm1344_vm1, %v1636_v41 }
 0x170   :  { %1406 = vst.msk [vmem:[%s2908_s3 + $0xf4] sm:$0xf] %vm1344_vm1, %v1668_v44 }

// kernel: sppcspc_forward.15
= control target key start
LH: loop header
LB: loop body
LE: loop exit
PB: predicated region body
PF: predicated region fallthrough
CT: control target
= control target key end

     0   :  { %vm409_vm0 = vcmask 1041408   ;;  %vm312_vm1 = vcmask 31744   ;;  %s3356_s0 = inlined_call_operand.vmem [shape: bf16[512,4], index: 0, kind: input, shape index: {}]   ;;  %s3357_s1 = inlined_call_operand.vmem [shape: bf16[512,4], index: 1, kind: input, shape index: {}]   ;;  %s3358_s2 = inlined_call_operand.vmem [shape: bf16[4,16], index: 2, kind: input, shape index: {}]   ;;  %s3359_s3 = inlined_call_operand.vmem [shape: bf16[4,16], index: 3, kind: input, shape index: {}]   ;;  %s3360_s4 = inlined_call_operand.vmem [shape: f32[1,16], index: 4, kind: input, shape index: {}]   ;;  %s3361_s5 = inlined_call_operand.hbm [shape: f32[512,16], index: 5, kind: output, shape index: {}]  }
   0x1   :  { %v151_v0 = vld [vmem:[%s3359_s3] sm:$0x3]  ;;  %v2312_v6 = vld [vmem:[%s3357_s1 + $0x8] sm:$0xff]   ;;  %v2314_v8 = vld [vmem:[%s3357_s1 + $0x10] sm:$0xff]  }
   0x2   :  { %v86_v1 = vld [vmem:[%s3358_s2] sm:$0x3]  ;;  %2305 = vmatprep.subr.msk.bf16.mxu1 %vm409_vm0, %v151_v0  ;;  %v411_v3 = vsel %vm409_vm0, %v151_v0, 0  ;;  %v2313_v7 = vld [vmem:[%s3356_s0 + $0x8] sm:$0xff]   ;;  %v2315_v9 = vld [vmem:[%s3356_s0 + $0x10] sm:$0xff]  }
   0x3   :  { %v2310_v2 = vld [vmem:[%s3357_s1] sm:$0xff]   ;;  %2306 = vmatprep.subr.msk.bf16.mxu0 %vm409_vm0, %v86_v1  ;;  %v959_v4 = vsel %vm409_vm0, %v86_v1, 0  ;;  %2110 = vmatpush3.bf16.msra.mxu1 %v411_v3  ;;  %v2316_v10 = vld [vmem:[%s3357_s1 + $0x18] sm:$0xff]   ;;  %v2320_v14 = vld [vmem:[%s3357_s1 + $0x28] sm:$0xff]  }
   0x4   :  { %2176 = vmatpush3.bf16.msra.mxu0 %v959_v4  ;;  %v2311_v5 = vld [vmem:[%s3356_s0] sm:$0xff]   ;;  %2111 = vmatprep.mubr.msk.bf16.mxu1 %vm312_vm1, %v2310_v2  ;;  %v2317_v11 = vld [vmem:[%s3356_s0 + $0x18] sm:$0xff]   ;;  %v2321_v15 = vld [vmem:[%s3356_s0 + $0x28] sm:$0xff]  }
   0x5   :  { %2177 = vmatprep.mubr.msk.bf16.mxu0 %vm312_vm1, %v2311_v5  ;;  %v2318_v12 = vld [vmem:[%s3357_s1 + $0x20] sm:$0xff]   ;;  %v2322_v16 = vld [vmem:[%s3357_s1 + $0x30] sm:$0xff]   ;;  %v2324_v18 = vld [vmem:[%s3357_s1 + $0x38] sm:$0xff]  }
   0x6   :  { %2112 = vmatmul.mubr.msk.bf16.vlgmr.msra.gmra.mrb[0].mxu1 %vm312_vm1, %v2312_v6  ;;  %v2319_v13 = vld [vmem:[%s3356_s0 + $0x20] sm:$0xff]   ;;  %v2323_v17 = vld [vmem:[%s3356_s0 + $0x30] sm:$0xff]   ;;  %v2325_v19 = vld [vmem:[%s3356_s0 + $0x38] sm:$0xff]  }
   0x7   :  { %2178 = vmatmul.mubr.msk.bf16.vlgmr.msra.gmra.mrb[0].mxu0 %vm312_vm1, %v2313_v7  ;;  %2115 = vmatprep.mubr.msk.bf16.mxu1 %vm312_vm1, %v2314_v8  ;;  %v2326_v20 = vld [vmem:[%s3357_s1 + $0x40] sm:$0xff]   ;;  %v2328_v22 = vld [vmem:[%s3357_s1 + $0x48] sm:$0xff]   ;;  %v2330_v24 = vld [vmem:[%s3357_s1 + $0x50] sm:$0xff]  }
   0x8   :  { %2181 = vmatprep.mubr.msk.bf16.mxu0 %vm312_vm1, %v2315_v9  ;;  %v2327_v21 = vld [vmem:[%s3356_s0 + $0x40] sm:$0xff]   ;;  %v2329_v23 = vld [vmem:[%s3356_s0 + $0x48] sm:$0xff]   ;;  %v2331_v25 = vld [vmem:[%s3356_s0 + $0x50] sm:$0xff]  }
   0x9   :  { %v2332_v26 = vld [vmem:[%s3357_s1 + $0x58] sm:$0xff]   ;;  %v2334_v28 = vld [vmem:[%s3357_s1 + $0x60] sm:$0xff]   ;;  %v2336_v30 = vld [vmem:[%s3357_s1 + $0x68] sm:$0xff]  }
   0xa   :  { %v2333_v27 = vld [vmem:[%s3356_s0 + $0x58] sm:$0xff]   ;;  %v2335_v29 = vld [vmem:[%s3356_s0 + $0x60] sm:$0xff]   ;;  %v2337_v31 = vld [vmem:[%s3356_s0 + $0x68] sm:$0xff]  }
   0xb   :  { %v2338_v32 = vld [vmem:[%s3357_s1 + $0x70] sm:$0xff]   ;;  %v2340_v34 = vld [vmem:[%s3357_s1 + $0x78] sm:$0xff]   ;;  %v2342_v36 = vld [vmem:[%s3357_s1 + $0x80] sm:$0xff]  }
   0xc   :  { %v2339_v33 = vld [vmem:[%s3356_s0 + $0x70] sm:$0xff]   ;;  %v2341_v35 = vld [vmem:[%s3356_s0 + $0x78] sm:$0xff]   ;;  %v2343_v37 = vld [vmem:[%s3356_s0 + $0x80] sm:$0xff]  }
   0xd   :  { %v2344_v38 = vld [vmem:[%s3357_s1 + $0x88] sm:$0xff]  }
   0xe   :  { %2116 = vmatmul.mubr.msk.bf16.gmra.mrb[4].mxu1 %vm312_vm1, %v2316_v10 }
   0xf   :  { %2182 = vmatmul.mubr.msk.bf16.gmra.mrb[4].mxu0 %vm312_vm1, %v2317_v11  ;;  %2119 = vmatprep.mubr.msk.bf16.mxu1 %vm312_vm1, %v2318_v12 }
  0x10   :  { %2185 = vmatprep.mubr.msk.bf16.mxu0 %vm312_vm1, %v2319_v13 }
  0x16   :  { %2120 = vmatmul.mubr.msk.bf16.gmra.mrb[8].mxu1 %vm312_vm1, %v2320_v14 }
  0x17   :  { %2186 = vmatmul.mubr.msk.bf16.gmra.mrb[8].mxu0 %vm312_vm1, %v2321_v15  ;;  %2123 = vmatprep.mubr.msk.bf16.mxu1 %vm312_vm1, %v2322_v16 }
  0x18   :  { %2189 = vmatprep.mubr.msk.bf16.mxu0 %vm312_vm1, %v2323_v17 }
  0x1e   :  { %2124 = vmatmul.mubr.msk.bf16.gmra.mrb[12].mxu1 %vm312_vm1, %v2324_v18 }
  0x1f   :  { %2190 = vmatmul.mubr.msk.bf16.gmra.mrb[12].mxu0 %vm312_vm1, %v2325_v19  ;;  %2127 = vmatprep.mubr.msk.bf16.mxu1 %vm312_vm1, %v2326_v20 }
  0x20   :  { %2193 = vmatprep.mubr.msk.bf16.mxu0 %vm312_vm1, %v2327_v21 }
  0x26   :  { %2128 = vmatmul.mubr.msk.bf16.gmra.mrb[16].mxu1 %vm312_vm1, %v2328_v22 }
  0x27   :  { %2194 = vmatmul.mubr.msk.bf16.gmra.mrb[16].mxu0 %vm312_vm1, %v2329_v23  ;;  %2131 = vmatprep.mubr.msk.bf16.mxu1 %vm312_vm1, %v2330_v24 }
  0x28   :  { %2197 = vmatprep.mubr.msk.bf16.mxu0 %vm312_vm1, %v2331_v25 }
  0x2e   :  { %2132 = vmatmul.mubr.msk.bf16.gmra.mrb[20].mxu1 %vm312_vm1, %v2332_v26 }
  0x2f   :  { %2198 = vmatmul.mubr.msk.bf16.gmra.mrb[20].mxu0 %vm312_vm1, %v2333_v27  ;;  %2135 = vmatprep.mubr.msk.bf16.mxu1 %vm312_vm1, %v2334_v28 }
  0x30   :  { %2201 = vmatprep.mubr.msk.bf16.mxu0 %vm312_vm1, %v2335_v29 }
  0x36   :  { %2136 = vmatmul.mubr.msk.bf16.gmra.mrb[24].mxu1 %vm312_vm1, %v2336_v30 }
  0x37   :  { %2202 = vmatmul.mubr.msk.bf16.gmra.mrb[24].mxu0 %vm312_vm1, %v2337_v31  ;;  %2139 = vmatprep.mubr.msk.bf16.mxu1 %vm312_vm1, %v2338_v32 }
  0x38   :  { %2205 = vmatprep.mubr.msk.bf16.mxu0 %vm312_vm1, %v2339_v33 }
  0x3e   :  { %2140 = vmatmul.mubr.msk.bf16.gmra.mrb[28].mxu1 %vm312_vm1, %v2340_v34 }
  0x3f   :  { %2206 = vmatmul.mubr.msk.bf16.gmra.mrb[28].mxu0 %vm312_vm1, %v2341_v35  ;;  %2143 = vmatprep.mubr.msk.bf16.mxu1 %vm312_vm1, %v2342_v36 }
  0x40   :  { %2209 = vmatprep.mubr.msk.bf16.mxu0 %vm312_vm1, %v2343_v37 }
  0x41   :  { %10 = vsyncpa [#allocation3], 0  ;;  %v2345_v39 = vld [vmem:[%s3356_s0 + $0x88] sm:$0xff]   ;;  %v2346_v40 = vld [vmem:[%s3357_s1 + $0x90] sm:$0xff]   ;;  %vm1769_vm2 = vcmask 130048  }
  0x42   :  { %v2347_v41 = vld [vmem:[%s3356_s0 + $0x90] sm:$0xff]   ;;  %v2348_v42 = vld [vmem:[%s3357_s1 + $0x98] sm:$0xff]   ;;  %v2350_v44 = vld [vmem:[%s3357_s1 + $0xa0] sm:$0xff]  }
  0x43   :  { %v2349_v43 = vld [vmem:[%s3356_s0 + $0x98] sm:$0xff]   ;;  %v2351_v45 = vld [vmem:[%s3356_s0 + $0xa0] sm:$0xff]   ;;  %v2352_v46 = vld [vmem:[%s3357_s1 + $0xa8] sm:$0xff]  }
  0x44   :  { %v2353_v47 = vld [vmem:[%s3356_s0 + $0xa8] sm:$0xff]   ;;  %v2354_v48 = vld [vmem:[%s3357_s1 + $0xb0] sm:$0xff]   ;;  %v2356_v50 = vld [vmem:[%s3357_s1 + $0xb8] sm:$0xff]  }
  0x45   :  { %v2355_v49 = vld [vmem:[%s3356_s0 + $0xb0] sm:$0xff]   ;;  %v2357_v51 = vld [vmem:[%s3356_s0 + $0xb8] sm:$0xff]   ;;  %v2358_v52 = vld [vmem:[%s3357_s1 + $0xc0] sm:$0xff]  }
  0x46   :  { %2144 = vmatmul.mubr.msk.bf16.gmra.mrb[32].mxu1 %vm312_vm1, %v2344_v38  ;;  %v2359_v53 = vld [vmem:[%s3356_s0 + $0xc0] sm:$0xff]   ;;  %v2360_v54 = vld [vmem:[%s3357_s1 + $0xc8] sm:$0xff]   ;;  %v2362_v56 = vld [vmem:[%s3357_s1 + $0xd0] sm:$0xff]  }
  0x47   :  { %2210 = vmatmul.mubr.msk.bf16.gmra.mrb[32].mxu0 %vm312_vm1, %v2345_v39  ;;  %2147 = vmatprep.mubr.msk.bf16.mxu1 %vm312_vm1, %v2346_v40  ;;  %v2361_v55 = vld [vmem:[%s3356_s0 + $0xc8] sm:$0xff]   ;;  %v2363_v57 = vld [vmem:[%s3356_s0 + $0xd0] sm:$0xff]   ;;  %v2364_v58 = vld [vmem:[%s3357_s1 + $0xd8] sm:$0xff]  }
  0x48   :  { %2213 = vmatprep.mubr.msk.bf16.mxu0 %vm312_vm1, %v2347_v41  ;;  %v2365_v59 = vld [vmem:[%s3356_s0 + $0xd8] sm:$0xff]   ;;  %v2366_v60 = vld [vmem:[%s3357_s1 + $0xe0] sm:$0xff]   ;;  %v2368_v62 = vld [vmem:[%s3357_s1 + $0xe8] sm:$0xff]  }
  0x49   :  { %v2367_v61 = vld [vmem:[%s3356_s0 + $0xe0] sm:$0xff]   ;;  %v2369_v63 = vld [vmem:[%s3356_s0 + $0xe8] sm:$0xff]   ;;  %v2370_v0 = vld [vmem:[%s3357_s1 + $0xf0] sm:$0xff]  }
  0x4a   :  { %v2371_v1 = vld [vmem:[%s3356_s0 + $0xf0] sm:$0xff]   ;;  %v2372_v2 = vld [vmem:[%s3357_s1 + $0xf8] sm:$0xff]   ;;  %v2953_v6 = vld [vmem:[%s3360_s4] ss:$0 sm:$0xff] }
  0x4b   :  { %v2373_v3 = vld [vmem:[%s3356_s0 + $0xf8] sm:$0xff]  }
  0x4e   :  { %2148 = vmatmul.mubr.msk.bf16.gmra.mrb[36].mxu1 %vm312_vm1, %v2348_v42 }
  0x4f   :  { %2214 = vmatmul.mubr.msk.bf16.gmra.mrb[36].mxu0 %vm312_vm1, %v2349_v43  ;;  %2151 = vmatprep.mubr.msk.bf16.mxu1 %vm312_vm1, %v2350_v44 }
  0x50   :  { %2217 = vmatprep.mubr.msk.bf16.mxu0 %vm312_vm1, %v2351_v45 }
  0x56   :  { %2152 = vmatmul.mubr.msk.bf16.gmra.mrb[40].mxu1 %vm312_vm1, %v2352_v46 }
  0x57   :  { %2218 = vmatmul.mubr.msk.bf16.gmra.mrb[40].mxu0 %vm312_vm1, %v2353_v47  ;;  %2155 = vmatprep.mubr.msk.bf16.mxu1 %vm312_vm1, %v2354_v48 }
  0x58   :  { %2221 = vmatprep.mubr.msk.bf16.mxu0 %vm312_vm1, %v2355_v49 }
  0x5e   :  { %2156 = vmatmul.mubr.msk.bf16.gmra.mrb[44].mxu1 %vm312_vm1, %v2356_v50 }
  0x5f   :  { %2222 = vmatmul.mubr.msk.bf16.gmra.mrb[44].mxu0 %vm312_vm1, %v2357_v51  ;;  %2159 = vmatprep.mubr.msk.bf16.mxu1 %vm312_vm1, %v2358_v52 }
  0x60   :  { %2225 = vmatprep.mubr.msk.bf16.mxu0 %vm312_vm1, %v2359_v53 }
  0x66   :  { %2160 = vmatmul.mubr.msk.bf16.gmra.mrb[48].mxu1 %vm312_vm1, %v2360_v54 }
  0x67   :  { %2226 = vmatmul.mubr.msk.bf16.gmra.mrb[48].mxu0 %vm312_vm1, %v2361_v55  ;;  %2163 = vmatprep.mubr.msk.bf16.mxu1 %vm312_vm1, %v2362_v56 }
  0x68   :  { %2229 = vmatprep.mubr.msk.bf16.mxu0 %vm312_vm1, %v2363_v57 }
  0x6e   :  { %2164 = vmatmul.mubr.msk.bf16.gmra.mrb[52].mxu1 %vm312_vm1, %v2364_v58 }
  0x6f   :  { %2230 = vmatmul.mubr.msk.bf16.gmra.mrb[52].mxu0 %vm312_vm1, %v2365_v59  ;;  %2167 = vmatprep.mubr.msk.bf16.mxu1 %vm312_vm1, %v2366_v60 }
  0x70   :  { %2233 = vmatprep.mubr.msk.bf16.mxu0 %vm312_vm1, %v2367_v61 }
  0x76   :  { %2168 = vmatmul.mubr.msk.bf16.gmra.mrb[56].mxu1 %vm312_vm1, %v2368_v62 }
  0x77   :  { %2234 = vmatmul.mubr.msk.bf16.gmra.mrb[56].mxu0 %vm312_vm1, %v2369_v63  ;;  %2171 = vmatprep.mubr.msk.bf16.mxu1 %vm312_vm1, %v2370_v0 }
  0x78   :  { %2237 = vmatprep.mubr.msk.bf16.mxu0 %vm312_vm1, %v2371_v1 }
  0x7e   :  { %2172 = vmatmul.mubr.msk.bf16.gmra.mrb[60].mxu1 %vm312_vm1, %v2372_v2 }
  0x7f   :  { %2238 = vmatmul.mubr.msk.bf16.gmra.mrb[60].mxu0 %vm312_vm1, %v2373_v3 }
  0xd9   :  { %v2113_v4 = vpop.f32.mrb[0].mxu1 }
  0xda   :  { %v2179_v5 = vpop.f32.mrb[0].mxu0  ;;  %v447_v7 = vpop.f32.mrb[1].mxu1 }
  0xdb   :  { %v1004_v8 = vadd.f32 %v2179_v5, %v2113_v4  ;;  %v995_v9 = vpop.f32.mrb[1].mxu0  ;;  %v2114_v10 = vpop.f32.mrb[2].mxu1 }
  0xdc   :  { %v996_v11 = vadd.f32 %v995_v9, %v447_v7  ;;  %v2180_v12 = vpop.f32.mrb[2].mxu0  ;;  %v450_v13 = vpop.f32.mrb[3].mxu1 }
  0xdd   :  { %v2956_v14 = vadd.f32 %v2953_v6, %v1004_v8  ;;  %v1007_v15 = vadd.f32 %v2180_v12, %v2114_v10  ;;  %v998_v16 = vpop.f32.mrb[3].mxu0 }
  0xde   :  { %v2959_v17 = vadd.f32 %v2953_v6, %v996_v11  ;;  %v999_v18 = vadd.f32 %v998_v16, %v450_v13 }
  0xdf   :  { %v1981_v19 = vmul.f32 -1.442695, %v2956_v14  ;;  %v2963_v20 = vadd.f32 %v2953_v6, %v1007_v15 }
  0xe0   :  { %v1979_v21 = vmul.f32 -1.442695, %v2959_v17  ;;  %v2967_v22 = vadd.f32 %v2953_v6, %v999_v18 }
  0xe1   :  { %2374 = vpow2.f32 %v1981_v19  ;;  %v1982_v23 = vmul.f32 -1.442695, %v2963_v20  ;;  %v2117_v24 = vpop.f32.mrb[4].mxu1 }
  0xe2   :  { %2376 = vpow2.f32 %v1979_v21  ;;  %v1980_v25 = vmul.f32 -1.442695, %v2967_v22  ;;  %v2183_v26 = vpop.f32.mrb[4].mxu0  ;;  %v463_v27 = vpop.f32.mrb[5].mxu1 }
  0xe3   :  { %2378 = vpow2.f32 %v1982_v23  ;;  %v1020_v28 = vadd.f32 %v2183_v26, %v2117_v24  ;;  %v1011_v29 = vpop.f32.mrb[5].mxu0  ;;  %v2118_v30 = vpop.f32.mrb[6].mxu1 }
  0xe4   :  { %2380 = vpow2.f32 %v1980_v25  ;;  %v1012_v31 = vadd.f32 %v1011_v29, %v463_v27  ;;  %v2184_v32 = vpop.f32.mrb[6].mxu0  ;;  %v466_v33 = vpop.f32.mrb[7].mxu1 }
  0xe5   :  { %v2972_v34 = vadd.f32 %v2953_v6, %v1020_v28  ;;  %v1023_v35 = vadd.f32 %v2184_v32, %v2118_v30  ;;  %v1014_v36 = vpop.f32.mrb[7].mxu0 }
  0xe6   :  { %v2975_v37 = vadd.f32 %v2953_v6, %v1012_v31  ;;  %v1015_v38 = vadd.f32 %v1014_v36, %v466_v33 }
  0xe7   :  { %v1985_v39 = vmul.f32 -1.442695, %v2972_v34  ;;  %v2979_v40 = vadd.f32 %v2953_v6, %v1023_v35 }
  0xe8   :  { %v1983_v41 = vmul.f32 -1.442695, %v2975_v37  ;;  %v2983_v42 = vadd.f32 %v2953_v6, %v1015_v38 }
  0xe9   :  { %2382 = vpow2.f32 %v1985_v39  ;;  %v1986_v43 = vmul.f32 -1.442695, %v2979_v40  ;;  %v2121_v44 = vpop.f32.mrb[8].mxu1 }
  0xea   :  { %2384 = vpow2.f32 %v1983_v41  ;;  %v1984_v45 = vmul.f32 -1.442695, %v2983_v42  ;;  %v2187_v46 = vpop.f32.mrb[8].mxu0  ;;  %v479_v47 = vpop.f32.mrb[9].mxu1 }
  0xeb   :  { %v2375_v48 = vpop.eup %2374  ;;  %2386 = vpow2.f32 %v1986_v43  ;;  %v1036_v49 = vadd.f32 %v2187_v46, %v2121_v44  ;;  %v1027_v50 = vpop.f32.mrb[9].mxu0 }
  0xec   :  { %v2122_v51 = vpop.f32.mrb[10].mxu1  ;;  %v2377_v52 = vpop.eup %2376  ;;  %v1515_v53 = vadd.f32 1.0, %v2375_v48  ;;  %2388 = vpow2.f32 %v1984_v45  ;;  %v1028_v54 = vadd.f32 %v1027_v50, %v479_v47 }
  0xed   :  { %v2188_v55 = vpop.f32.mrb[10].mxu0  ;;  %v482_v56 = vpop.f32.mrb[11].mxu1  ;;  %v1513_v58 = vadd.f32 1.0, %v2377_v52  ;;  %v2988_v59 = vadd.f32 %v2953_v6, %v1036_v49 }
  0xee   :  { %v2379_v57 = vpop.eup %2378  ;;  %v1039_v60 = vadd.f32 %v2188_v55, %v2122_v51  ;;  %v1030_v61 = vpop.f32.mrb[11].mxu0  ;;  %2390 = vrcp.f32 %v1515_v53  ;;  %v2991_v0 = vadd.f32 %v2953_v6, %v1028_v54 }
  0xef   :  { %v2381_v62 = vpop.eup %2380  ;;  %v1516_v63 = vadd.f32 1.0, %v2379_v57  ;;  %v1031_v1 = vadd.f32 %v1030_v61, %v482_v56  ;;  %2392 = vrcp.f32 %v1513_v58  ;;  %v1989_v3 = vmul.f32 -1.442695, %v2988_v59 }
  0xf0   :  { %v1514_v2 = vadd.f32 1.0, %v2381_v62  ;;  %v2995_v4 = vadd.f32 %v2953_v6, %v1039_v60  ;;  %v1987_v5 = vmul.f32 -1.442695, %v2991_v0 }
  0xf1   :  { %2394 = vrcp.f32 %v1516_v63  ;;  %v2999_v7 = vadd.f32 %v2953_v6, %v1031_v1  ;;  %v2125_v9 = vpop.f32.mrb[12].mxu1 }
  0xf2   :  { %2396 = vrcp.f32 %v1514_v2  ;;  %v1990_v8 = vmul.f32 -1.442695, %v2995_v4  ;;  %v2191_v11 = vpop.f32.mrb[12].mxu0  ;;  %v495_v12 = vpop.f32.mrb[13].mxu1 }
  0xf3   :  { %2398 = vpow2.f32 %v1989_v3  ;;  %v1988_v10 = vmul.f32 -1.442695, %v2999_v7  ;;  %v2383_v13 = vpop.eup %2382  ;;  %v1052_v15 = vadd.f32 %v2191_v11, %v2125_v9  ;;  %v1043_v16 = vpop.f32.mrb[13].mxu0 }
  0xf4   :  { %2400 = vpow2.f32 %v1987_v5  ;;  %v2126_v18 = vpop.f32.mrb[14].mxu1  ;;  %v2385_v19 = vpop.eup %2384  ;;  %v1519_v21 = vadd.f32 1.0, %v2383_v13  ;;  %v1044_v23 = vadd.f32 %v1043_v16, %v495_v12 }
  0xf5   :  { %2402 = vpow2.f32 %v1990_v8  ;;  %v2192_v24 = vpop.f32.mrb[14].mxu0  ;;  %v498_v25 = vpop.f32.mrb[15].mxu1  ;;  %v1517_v27 = vadd.f32 1.0, %v2385_v19  ;;  %v3004_v28 = vadd.f32 %v2953_v6, %v1052_v15 }
  0xf6   :  { %v2387_v26 = vpop.eup %2386  ;;  %2404 = vpow2.f32 %v1988_v10  ;;  %v1055_v29 = vadd.f32 %v2192_v24, %v2126_v18  ;;  %v1046_v30 = vpop.f32.mrb[15].mxu0  ;;  %v3007_v33 = vadd.f32 %v2953_v6, %v1044_v23 }
  0xf7   :  { %v2389_v31 = vpop.eup %2388  ;;  %2406 = vrcp.f32 %v1519_v21  ;;  %v1520_v32 = vadd.f32 1.0, %v2387_v26  ;;  %v1047_v35 = vadd.f32 %v1046_v30, %v498_v25  ;;  %v1993_v38 = vmul.f32 -1.442695, %v3004_v28 }
  0xf8   :  { %2408 = vrcp.f32 %v1517_v27  ;;  %v1518_v36 = vadd.f32 1.0, %v2389_v31  ;;  %v3011_v39 = vadd.f32 %v2953_v6, %v1055_v29  ;;  %v2391_v41 = vpop.eup %2390  ;;  %v1991_v43 = vmul.f32 -1.442695, %v3007_v33 }
  0xf9   :  { %2410 = vrcp.f32 %v1520_v32  ;;  %v3015_v44 = vadd.f32 %v2953_v6, %v1047_v35  ;;  %v2393_v45 = vpop.eup %2392  ;;  %v1707_v46 = vmul.f32 %v2391_v41, %v2956_v14  ;;  %v2129_v48 = vpop.f32.mrb[16].mxu1 }
  0xfa   :  { %2412 = vrcp.f32 %v1518_v36  ;;  %v1994_v47 = vmul.f32 -1.442695, %v3011_v39  ;;  %v1705_v50 = vmul.f32 %v2393_v45, %v2959_v17  ;;  %v2195_v52 = vpop.f32.mrb[16].mxu0  ;;  %v511_v53 = vpop.f32.mrb[17].mxu1 }
  0xfb   :  { %v2395_v49 = vpop.eup %2394  ;;  %2414 = vpow2.f32 %v1993_v38  ;;  %v1992_v51 = vmul.f32 -1.442695, %v3015_v44  ;;  %1772 = vst.msk [vmem:[#allocation2 + $0x10] sm:$0xff] %vm1769_vm2, %v1707_v46  ;;  %v1068_v56 = vadd.f32 %v2195_v52, %v2129_v48  ;;  %v1059_v14 = vpop.f32.mrb[17].mxu0 }
  0xfc   :  { %v2397_v54 = vpop.eup %2396  ;;  %v1708_v55 = vmul.f32 %v2395_v49, %v2963_v20  ;;  %2416 = vpow2.f32 %v1991_v43  ;;  %v2130_v57 = vpop.f32.mrb[18].mxu1  ;;  %1770 = vst.msk [vmem:[#allocation2] sm:$0xff] %vm1769_vm2, %v1705_v50  ;;  %v1060_v17 = vadd.f32 %v1059_v14, %v511_v53 }
  0xfd   :  { %v2399_v58 = vpop.eup %2398  ;;  %v1706_v60 = vmul.f32 %v2397_v54, %v2967_v22  ;;  %2418 = vpow2.f32 %v1994_v47  ;;  %v2196_v61 = vpop.f32.mrb[18].mxu0  ;;  %v3027_v20 = vadd.f32 %v2953_v6, %v1068_v56 }
  0xfe   :  { %v514_v62 = vpop.f32.mrb[19].mxu1  ;;  %v2401_v63 = vpop.eup %2400  ;;  %1773 = vst.msk [vmem:[#allocation2 + $0x18] sm:$0xff] %vm1769_vm2, %v1708_v55  ;;  %v1523_v1 = vadd.f32 1.0, %v2399_v58  ;;  %2420 = vpow2.f32 %v1992_v51  ;;  %v1071_v2 = vadd.f32 %v2196_v61, %v2130_v57  ;;  %v3031_v22 = vadd.f32 %v2953_v6, %v1060_v17 }
  0xff   :  { %v1062_v3 = vpop.f32.mrb[19].mxu0  ;;  %v2403_v5 = vpop.eup %2402  ;;  %1771 = vst.msk [vmem:[#allocation2 + $0x8] sm:$0xff] %vm1769_vm2, %v1706_v60  ;;  %v1521_v8 = vadd.f32 1.0, %v2401_v63  ;;  %v1997_v12 = vmul.f32 -1.442695, %v3027_v20 }
 0x100   :  { %v1063_v9 = vadd.f32 %v1062_v3, %v514_v62  ;;  %v2405_v10 = vpop.eup %2404  ;;  %2422 = vrcp.f32 %v1523_v1  ;;  %v1524_v11 = vadd.f32 1.0, %v2403_v5  ;;  %v3035_v13 = vadd.f32 %v2953_v6, %v1071_v2 }
 0x101   :  { %v2407_v15 = vpop.eup %2406  ;;  %2424 = vrcp.f32 %v1521_v8  ;;  %v1522_v16 = vadd.f32 1.0, %v2405_v10  ;;  %v1995_v18 = vmul.f32 -1.442695, %v3031_v22  ;;  %v2133_v25 = vpop.f32.mrb[20].mxu1 }
 0x102   :  { %v3039_v19 = vadd.f32 %v2953_v6, %v1063_v9  ;;  %v2409_v21 = vpop.eup %2408  ;;  %v1711_v23 = vmul.f32 %v2407_v15, %v2972_v34  ;;  %2426 = vrcp.f32 %v1524_v11  ;;  %v1998_v24 = vmul.f32 -1.442695, %v3035_v13  ;;  %v2199_v30 = vpop.f32.mrb[20].mxu0 }
 0x103   :  { %v2411_v26 = vpop.eup %2410  ;;  %v1709_v27 = vmul.f32 %v2409_v21, %v2975_v37  ;;  %2428 = vrcp.f32 %v1522_v16  ;;  %v527_v31 = vpop.f32.mrb[21].mxu1  ;;  %v1084_v36 = vadd.f32 %v2199_v30, %v2133_v25 }
 0x104   :  { %v1996_v29 = vmul.f32 -1.442695, %v3039_v19  ;;  %v2413_v32 = vpop.eup %2412  ;;  %1776 = vst.msk [vmem:[#allocation2 + $0x30] sm:$0xff] %vm1769_vm2, %v1711_v23  ;;  %v1712_v35 = vmul.f32 %v2411_v26, %v2979_v40  ;;  %2430 = vpow2.f32 %v1997_v12  ;;  %v1075_v34 = vpop.f32.mrb[21].mxu0 }
 0x105   :  { %v2134_v38 = vpop.f32.mrb[22].mxu1  ;;  %v2415_v41 = vpop.eup %2414  ;;  %1774 = vst.msk [vmem:[#allocation2 + $0x20] sm:$0xff] %vm1769_vm2, %v1709_v27  ;;  %v1710_v43 = vmul.f32 %v2413_v32, %v2983_v42  ;;  %2432 = vpow2.f32 %v1995_v18  ;;  %v1076_v37 = vadd.f32 %v1075_v34, %v527_v31  ;;  %v3051_v40 = vadd.f32 %v2953_v6, %v1084_v36 }
 0x106   :  { %v2200_v45 = vpop.f32.mrb[22].mxu0  ;;  %v530_v46 = vpop.f32.mrb[23].mxu1  ;;  %1777 = vst.msk [vmem:[#allocation2 + $0x38] sm:$0xff] %vm1769_vm2, %v1712_v35  ;;  %v1527_v48 = vadd.f32 1.0, %v2415_v41  ;;  %2434 = vpow2.f32 %v1998_v24 }
 0x107   :  { %v2417_v47 = vpop.eup %2416  ;;  %v1087_v49 = vadd.f32 %v2200_v45, %v2134_v38  ;;  %v1078_v50 = vpop.f32.mrb[23].mxu0  ;;  %1775 = vst.msk [vmem:[#allocation2 + $0x28] sm:$0xff] %vm1769_vm2, %v1710_v43  ;;  %2436 = vpow2.f32 %v1996_v29  ;;  %v3055_v42 = vadd.f32 %v2953_v6, %v1076_v37  ;;  %v2001_v56 = vmul.f32 -1.442695, %v3051_v40 }
 0x108   :  { %v2419_v51 = vpop.eup %2418  ;;  %v1525_v52 = vadd.f32 1.0, %v2417_v47  ;;  %v1079_v53 = vadd.f32 %v1078_v50, %v530_v46  ;;  %2438 = vrcp.f32 %v1527_v48 }
 0x109   :  { %v2421_v54 = vpop.eup %2420  ;;  %v1528_v55 = vadd.f32 1.0, %v2419_v51  ;;  %v3059_v14 = vadd.f32 %v2953_v6, %v1087_v49  ;;  %v1999_v58 = vmul.f32 -1.442695, %v3055_v42  ;;  %v2137_v62 = vpop.f32.mrb[24].mxu1 }
 0x10a   :  { %2440 = vrcp.f32 %v1525_v52  ;;  %v1526_v57 = vadd.f32 1.0, %v2421_v54  ;;  %v3063_v60 = vadd.f32 %v2953_v6, %v1079_v53  ;;  %v2423_v17 = vpop.eup %2422  ;;  %v2203_v3 = vpop.f32.mrb[24].mxu0 }
 0x10b   :  { %2442 = vrcp.f32 %v1528_v55  ;;  %v2002_v61 = vmul.f32 -1.442695, %v3059_v14  ;;  %v2425_v63 = vpop.eup %2424  ;;  %v1715_v1 = vmul.f32 %v2423_v17, %v2988_v59  ;;  %v543_v5 = vpop.f32.mrb[25].mxu1  ;;  %v1100_v10 = vadd.f32 %v2203_v3, %v2137_v62 }
 0x10c   :  { %2444 = vrcp.f32 %v1526_v57  ;;  %v2000_v2 = vmul.f32 -1.442695, %v3063_v60  ;;  %v2427_v8 = vpop.eup %2426  ;;  %v1713_v9 = vmul.f32 %v2425_v63, %v2991_v0  ;;  %v1091_v11 = vpop.f32.mrb[25].mxu0 }
 0x10d   :  { %2446 = vpow2.f32 %v2001_v56  ;;  %v2138_v12 = vpop.f32.mrb[26].mxu1  ;;  %v2429_v15 = vpop.eup %2428  ;;  %1780 = vst.msk [vmem:[#allocation2 + $0x50] sm:$0xff] %vm1769_vm2, %v1715_v1  ;;  %v1716_v16 = vmul.f32 %v2427_v8, %v2995_v4  ;;  %v1092_v18 = vadd.f32 %v1091_v11, %v543_v5  ;;  %v3074_v0 = vadd.f32 %v2953_v6, %v1100_v10 }
 0x10e   :  { %2448 = vpow2.f32 %v1999_v58  ;;  %v2204_v59 = vpop.f32.mrb[26].mxu0  ;;  %v546_v21 = vpop.f32.mrb[27].mxu1  ;;  %1778 = vst.msk [vmem:[#allocation2 + $0x40] sm:$0xff] %vm1769_vm2, %v1713_v9  ;;  %v1714_v24 = vmul.f32 %v2429_v15, %v2999_v7 }
 0x10f   :  { %v2431_v23 = vpop.eup %2430  ;;  %2450 = vpow2.f32 %v2002_v61  ;;  %v1103_v25 = vadd.f32 %v2204_v59, %v2138_v12  ;;  %v1094_v26 = vpop.f32.mrb[27].mxu0  ;;  %1781 = vst.msk [vmem:[#allocation2 + $0x58] sm:$0xff] %vm1769_vm2, %v1716_v16  ;;  %v3078_v4 = vadd.f32 %v2953_v6, %v1092_v18  ;;  %v2005_v34 = vmul.f32 -1.442695, %v3074_v0 }
 0x110   :  { %v2433_v27 = vpop.eup %2432  ;;  %v1531_v29 = vadd.f32 1.0, %v2431_v23  ;;  %2452 = vpow2.f32 %v2000_v2  ;;  %v1095_v30 = vadd.f32 %v1094_v26, %v546_v21  ;;  %1779 = vst.msk [vmem:[#allocation2 + $0x48] sm:$0xff] %vm1769_vm2, %v1714_v24 }
 0x111   :  { %v2435_v31 = vpop.eup %2434  ;;  %v1529_v32 = vadd.f32 1.0, %v2433_v27  ;;  %v3082_v7 = vadd.f32 %v2953_v6, %v1103_v25  ;;  %v2003_v37 = vmul.f32 -1.442695, %v3078_v4  ;;  %v2141_v45 = vpop.f32.mrb[28].mxu1 }
 0x112   :  { %v2437_v35 = vpop.eup %2436  ;;  %2454 = vrcp.f32 %v1531_v29  ;;  %v1532_v36 = vadd.f32 1.0, %v2435_v31  ;;  %v3086_v38 = vadd.f32 %v2953_v6, %v1095_v30  ;;  %v2207_v49 = vpop.f32.mrb[28].mxu0 }
 0x113   :  { %v2439_v41 = vpop.eup %2438  ;;  %2456 = vrcp.f32 %v1529_v32  ;;  %v1530_v43 = vadd.f32 1.0, %v2437_v35  ;;  %v2006_v48 = vmul.f32 -1.442695, %v3082_v7  ;;  %v559_v50 = vpop.f32.mrb[29].mxu1  ;;  %v1116_v54 = vadd.f32 %v2207_v49, %v2141_v45 }
 0x114   :  { %v2441_v46 = vpop.eup %2440  ;;  %v1719_v47 = vmul.f32 %v2439_v41, %v3004_v28  ;;  %2458 = vrcp.f32 %v1532_v36  ;;  %v2004_v53 = vmul.f32 -1.442695, %v3086_v38  ;;  %v1107_v55 = vpop.f32.mrb[29].mxu0 }
 0x115   :  { %v2443_v51 = vpop.eup %2442  ;;  %v1717_v52 = vmul.f32 %v2441_v46, %v3007_v33  ;;  %2460 = vrcp.f32 %v1530_v43  ;;  %v2142_v56 = vpop.f32.mrb[30].mxu1  ;;  %v1108_v28 = vadd.f32 %v1107_v55, %v559_v50  ;;  %v3098_v63 = vadd.f32 %v2953_v6, %v1116_v54 }
 0x116   :  { %v2445_v57 = vpop.eup %2444  ;;  %1784 = vst.msk [vmem:[#allocation2 + $0x70] sm:$0xff] %vm1769_vm2, %v1719_v47  ;;  %v1720_v58 = vmul.f32 %v2443_v51, %v3011_v39  ;;  %2462 = vpow2.f32 %v2005_v34  ;;  %v2208_v17 = vpop.f32.mrb[30].mxu0 }
 0x117   :  { %v562_v61 = vpop.f32.mrb[31].mxu1  ;;  %v2447_v62 = vpop.eup %2446  ;;  %1782 = vst.msk [vmem:[#allocation2 + $0x60] sm:$0xff] %vm1769_vm2, %v1717_v52  ;;  %v1718_v33 = vmul.f32 %v2445_v57, %v3015_v44  ;;  %2464 = vpow2.f32 %v2003_v37  ;;  %v1119_v1 = vadd.f32 %v2208_v17, %v2142_v56  ;;  %v3102_v39 = vadd.f32 %v2953_v6, %v1108_v28 }
 0x118   :  { %v1110_v2 = vpop.f32.mrb[31].mxu0  ;;  %v2449_v3 = vpop.eup %2448  ;;  %1785 = vst.msk [vmem:[#allocation2 + $0x78] sm:$0xff] %vm1769_vm2, %v1720_v58  ;;  %v1535_v5 = vadd.f32 1.0, %v2447_v62  ;;  %2466 = vpow2.f32 %v2006_v48  ;;  %v2009_v15 = vmul.f32 -1.442695, %v3098_v63 }
 0x119   :  { %v1111_v8 = vadd.f32 %v1110_v2, %v562_v61  ;;  %v2451_v9 = vpop.eup %2450  ;;  %1783 = vst.msk [vmem:[#allocation2 + $0x68] sm:$0xff] %vm1769_vm2, %v1718_v33  ;;  %v1533_v10 = vadd.f32 1.0, %v2449_v3  ;;  %2468 = vpow2.f32 %v2004_v53  ;;  %v3106_v44 = vadd.f32 %v2953_v6, %v1119_v1  ;;  %v2145_v21 = vpop.f32.mrb[32].mxu1 }
 0x11a   :  { %v2453_v11 = vpop.eup %2452  ;;  %2470 = vrcp.f32 %v1535_v5  ;;  %v1536_v12 = vadd.f32 1.0, %v2451_v9  ;;  %v2007_v59 = vmul.f32 -1.442695, %v3102_v39  ;;  %v2211_v25 = vpop.f32.mrb[32].mxu0 }
 0x11b   :  { %v3110_v16 = vadd.f32 %v2953_v6, %v1111_v8  ;;  %2472 = vrcp.f32 %v1533_v10  ;;  %v1534_v18 = vadd.f32 1.0, %v2453_v11  ;;  %v2010_v24 = vmul.f32 -1.442695, %v3106_v44  ;;  %v575_v26 = vpop.f32.mrb[33].mxu1  ;;  %v1123_v32 = vpop.f32.mrb[33].mxu0 }
 0x11c   :  { %v2455_v23 = vpop.eup %2454  ;;  %2474 = vrcp.f32 %v1536_v12  ;;  %v1132_v31 = vadd.f32 %v2211_v25, %v2145_v21  ;;  %v2146_v35 = vpop.f32.mrb[34].mxu1  ;;  %v1124_v41 = vadd.f32 %v1123_v32, %v575_v26 }
 0x11d   :  { %v2457_v27 = vpop.eup %2456  ;;  %v1723_v29 = vmul.f32 %v2455_v23, %v3027_v20  ;;  %2476 = vrcp.f32 %v1534_v18  ;;  %v2008_v30 = vmul.f32 -1.442695, %v3110_v16  ;;  %v2212_v43 = vpop.f32.mrb[34].mxu0 }
 0x11e   :  { %v2459_v36 = vpop.eup %2458  ;;  %v1721_v34 = vmul.f32 %v2457_v27, %v3031_v22  ;;  %2478 = vpow2.f32 %v2009_v15  ;;  %v578_v37 = vpop.f32.mrb[35].mxu1  ;;  %v3120_v20 = vadd.f32 %v2953_v6, %v1132_v31  ;;  %v1135_v47 = vadd.f32 %v2212_v43, %v2146_v35 }
 0x11f   :  { %v2461_v45 = vpop.eup %2460  ;;  %1788 = vst.msk [vmem:[#allocation2 + $0x90] sm:$0xff] %vm1769_vm2, %v1723_v29  ;;  %v1724_v46 = vmul.f32 %v2459_v36, %v3035_v13  ;;  %2480 = vpow2.f32 %v2007_v59  ;;  %v1126_v48 = vpop.f32.mrb[35].mxu0  ;;  %v3125_v50 = vadd.f32 %v2953_v6, %v1124_v41 }
 0x120   :  { %v2463_v49 = vpop.eup %2462  ;;  %1786 = vst.msk [vmem:[#allocation2 + $0x80] sm:$0xff] %vm1769_vm2, %v1721_v34  ;;  %v1722_v22 = vmul.f32 %v2461_v45, %v3039_v19  ;;  %2482 = vpow2.f32 %v2010_v24  ;;  %v1127_v51 = vadd.f32 %v1126_v48, %v578_v37  ;;  %v3129_v53 = vadd.f32 %v2953_v6, %v1135_v47 }
 0x121   :  { %v2465_v52 = vpop.eup %2464  ;;  %1789 = vst.msk [vmem:[#allocation2 + $0x98] sm:$0xff] %vm1769_vm2, %v1724_v46  ;;  %v1539_v13 = vadd.f32 1.0, %v2463_v49  ;;  %2484 = vpow2.f32 %v2008_v30  ;;  %v2013_v58 = vmul.f32 -1.442695, %v3120_v20  ;;  %v2149_v28 = vpop.f32.mrb[36].mxu1 }
 0x122   :  { %v2467_v54 = vpop.eup %2466  ;;  %1787 = vst.msk [vmem:[#allocation2 + $0x88] sm:$0xff] %vm1769_vm2, %v1722_v22  ;;  %v1537_v55 = vadd.f32 1.0, %v2465_v52  ;;  %v3133_v56 = vadd.f32 %v2953_v6, %v1127_v51  ;;  %v2011_v62 = vmul.f32 -1.442695, %v3125_v50  ;;  %v2215_v33 = vpop.f32.mrb[36].mxu0 }
 0x123   :  { %v2469_v19 = vpop.eup %2468  ;;  %2486 = vrcp.f32 %v1539_v13  ;;  %v1540_v57 = vadd.f32 1.0, %v2467_v54  ;;  %v591_v1 = vpop.f32.mrb[37].mxu1  ;;  %v2014_v5 = vmul.f32 -1.442695, %v3129_v53  ;;  %v1148_v8 = vadd.f32 %v2215_v33, %v2149_v28 }
 0x124   :  { %v2471_v17 = vpop.eup %2470  ;;  %2488 = vrcp.f32 %v1537_v55  ;;  %v1538_v61 = vadd.f32 1.0, %v2469_v19  ;;  %v1139_v9 = vpop.f32.mrb[37].mxu0  ;;  %v2012_v15 = vmul.f32 -1.442695, %v3133_v56 }
 0x125   :  { %v2473_v2 = vpop.eup %2472  ;;  %v1727_v3 = vmul.f32 %v2471_v17, %v3051_v40  ;;  %2490 = vrcp.f32 %v1540_v57  ;;  %v2150_v10 = vpop.f32.mrb[38].mxu1  ;;  %v1140_v18 = vadd.f32 %v1139_v9, %v591_v1  ;;  %v3144_v24 = vadd.f32 %v2953_v6, %v1148_v8 }
 0x126   :  { %v2475_v11 = vpop.eup %2474  ;;  %v1725_v12 = vmul.f32 %v2473_v2, %v3055_v42  ;;  %2492 = vrcp.f32 %v1538_v61  ;;  %v2216_v59 = vpop.f32.mrb[38].mxu0 }
 0x127   :  { %v594_v21 = vpop.f32.mrb[39].mxu1  ;;  %v2477_v23 = vpop.eup %2476  ;;  %1792 = vst.msk [vmem:[#allocation2 + $0xb0] sm:$0xff] %vm1769_vm2, %v1727_v3  ;;  %v1728_v40 = vmul.f32 %v2475_v11, %v3059_v14  ;;  %2494 = vpow2.f32 %v2013_v58  ;;  %v1151_v25 = vadd.f32 %v2216_v59, %v2150_v10  ;;  %v3149_v29 = vadd.f32 %v2953_v6, %v1140_v18 }
 0x128   :  { %v1142_v26 = vpop.f32.mrb[39].mxu0  ;;  %v2479_v27 = vpop.eup %2478  ;;  %1790 = vst.msk [vmem:[#allocation2 + $0xa0] sm:$0xff] %vm1769_vm2, %v1725_v12  ;;  %v1726_v42 = vmul.f32 %v2477_v23, %v3063_v60  ;;  %2496 = vpow2.f32 %v2011_v62  ;;  %v2017_v43 = vmul.f32 -1.442695, %v3144_v24 }
 0x129   :  { %v1143_v30 = vadd.f32 %v1142_v26, %v594_v21  ;;  %v2481_v31 = vpop.eup %2480  ;;  %1793 = vst.msk [vmem:[#allocation2 + $0xb8] sm:$0xff] %vm1769_vm2, %v1728_v40  ;;  %v1543_v14 = vadd.f32 1.0, %v2479_v27  ;;  %2498 = vpow2.f32 %v2014_v5  ;;  %v3153_v32 = vadd.f32 %v2953_v6, %v1151_v25  ;;  %v2153_v37 = vpop.f32.mrb[40].mxu1 }
 0x12a   :  { %v2483_v35 = vpop.eup %2482  ;;  %1791 = vst.msk [vmem:[#allocation2 + $0xa8] sm:$0xff] %vm1769_vm2, %v1726_v42  ;;  %v1541_v36 = vadd.f32 1.0, %v2481_v31  ;;  %2500 = vpow2.f32 %v2012_v15  ;;  %v2015_v46 = vmul.f32 -1.442695, %v3149_v29  ;;  %v2219_v47 = vpop.f32.mrb[40].mxu0 }
 0x12b   :  { %v3157_v60 = vadd.f32 %v2953_v6, %v1143_v30  ;;  %v2485_v34 = vpop.eup %2484  ;;  %2502 = vrcp.f32 %v1543_v14  ;;  %v1544_v41 = vadd.f32 1.0, %v2483_v35  ;;  %v607_v48 = vpop.f32.mrb[41].mxu1  ;;  %v2018_v22 = vmul.f32 -1.442695, %v3153_v32 }
 0x12c   :  { %2504 = vrcp.f32 %v1541_v36  ;;  %v1542_v45 = vadd.f32 1.0, %v2485_v34  ;;  %v1164_v51 = vadd.f32 %v2219_v47, %v2153_v37  ;;  %v1155_v52 = vpop.f32.mrb[41].mxu0  ;;  %v2154_v13 = vpop.f32.mrb[42].mxu1 }
 0x12d   :  { %v2487_v49 = vpop.eup %2486  ;;  %2506 = vrcp.f32 %v1544_v41  ;;  %v2016_v19 = vmul.f32 -1.442695, %v3157_v60  ;;  %v1156_v57 = vadd.f32 %v1155_v52, %v607_v48  ;;  %v2220_v58 = vpop.f32.mrb[42].mxu0 }
 0x12e   :  { %v2489_v54 = vpop.eup %2488  ;;  %v1731_v55 = vmul.f32 %v2487_v49, %v3074_v0  ;;  %2508 = vrcp.f32 %v1542_v45  ;;  %v610_v28 = vpop.f32.mrb[43].mxu1  ;;  %v3166_v62 = vadd.f32 %v2953_v6, %v1164_v51  ;;  %v1167_v33 = vadd.f32 %v2220_v58, %v2154_v13 }
 0x12f   :  { %v2491_v17 = vpop.eup %2490  ;;  %v1729_v61 = vmul.f32 %v2489_v54, %v3078_v4  ;;  %2510 = vpow2.f32 %v2017_v43  ;;  %v1158_v1 = vpop.f32.mrb[43].mxu0  ;;  %v3171_v3 = vadd.f32 %v2953_v6, %v1156_v57 }
 0x130   :  { %v2493_v2 = vpop.eup %2492  ;;  %1796 = vst.msk [vmem:[#allocation2 + $0xd0] sm:$0xff] %vm1769_vm2, %v1731_v55  ;;  %v1732_v0 = vmul.f32 %v2491_v17, %v3082_v7  ;;  %2512 = vpow2.f32 %v2015_v46  ;;  %v1159_v5 = vadd.f32 %v1158_v1, %v610_v28  ;;  %v2021_v9 = vmul.f32 -1.442695, %v3166_v62 }
 0x131   :  { %v2495_v8 = vpop.eup %2494  ;;  %1794 = vst.msk [vmem:[#allocation2 + $0xc0] sm:$0xff] %vm1769_vm2, %v1729_v61  ;;  %v1730_v4 = vmul.f32 %v2493_v2, %v3086_v38  ;;  %2514 = vpow2.f32 %v2018_v22  ;;  %v3177_v10 = vadd.f32 %v2953_v6, %v1167_v33  ;;  %v2157_v38 = vpop.f32.mrb[44].mxu1  ;;  %v2019_v23 = vmul.f32 -1.442695, %v3171_v3 }
 0x132   :  { %v2497_v11 = vpop.eup %2496  ;;  %1797 = vst.msk [vmem:[#allocation2 + $0xd8] sm:$0xff] %vm1769_vm2, %v1732_v0  ;;  %v1547_v7 = vadd.f32 1.0, %v2495_v8  ;;  %2516 = vpow2.f32 %v2016_v19  ;;  %v3181_v12 = vadd.f32 %v2953_v6, %v1159_v5  ;;  %v2223_v40 = vpop.f32.mrb[44].mxu0 }
 0x133   :  { %v2499_v15 = vpop.eup %2498  ;;  %1795 = vst.msk [vmem:[#allocation2 + $0xc8] sm:$0xff] %vm1769_vm2, %v1730_v4  ;;  %v1545_v18 = vadd.f32 1.0, %v2497_v11  ;;  %2518 = vpow2.f32 %v2021_v9  ;;  %v623_v25 = vpop.f32.mrb[45].mxu1  ;;  %v2022_v42 = vmul.f32 -1.442695, %v3177_v10  ;;  %v1180_v30 = vadd.f32 %v2223_v40, %v2157_v38 }
 0x134   :  { %v2501_v59 = vpop.eup %2500  ;;  %2520 = vrcp.f32 %v1547_v7  ;;  %v1548_v21 = vadd.f32 1.0, %v2499_v15  ;;  %v1171_v31 = vpop.f32.mrb[45].mxu0  ;;  %v2020_v34 = vmul.f32 -1.442695, %v3181_v12  ;;  %v3215_v40 = vld [vmem:[%s3360_s4] ss:$0 sm:$0xff] }
 0x135   :  { %v2503_v26 = vpop.eup %2502  ;;  %2522 = vrcp.f32 %v1545_v18  ;;  %v1546_v27 = vadd.f32 1.0, %v2501_v59  ;;  %v2158_v14 = vpop.f32.mrb[46].mxu1  ;;  %v1172_v41 = vadd.f32 %v1171_v31, %v623_v25  ;;  %v3190_v47 = vadd.f32 %v2953_v6, %v1180_v30  ;;  %s2655_s4 = smov [#allocation2]  }
 0x136   :  { %v2505_v35 = vpop.eup %2504  ;;  %v1735_v36 = vmul.f32 %v2503_v26, %v3098_v63  ;;  %2524 = vrcp.f32 %v1548_v21  ;;  %v2224_v43 = vpop.f32.mrb[46].mxu0  ;;  %s1839_s17 = sshll.u32 %s2655_s4, 4  ;;  %s1840_s17 = int_to_ptr.vmem [resolvable:$true] %s1839_s17 }
 0x137   :  { %v626_v37 = vpop.f32.mrb[47].mxu1  ;;  %v2507_v45 = vpop.eup %2506  ;;  %v1733_v46 = vmul.f32 %v2505_v35, %v3102_v39  ;;  %2526 = vrcp.f32 %v1546_v27  ;;  %v1183_v48 = vadd.f32 %v2224_v43, %v2158_v14  ;;  %v3195_v51 = vadd.f32 %v2953_v6, %v1172_v41  ;;  %s2631_s18 = scalar_lea.vmem %s1840_s17, 8192  ;;  %p2636_p1 = scmp.lt.s32.totalorder %s1840_s17, %s1840_s17 }
 0x138   :  { %v1174_v49 = vpop.f32.mrb[47].mxu0  ;;  %v2509_v22 = vpop.eup %2508  ;;  %1800 = vst.msk [vmem:[#allocation2 + $0xf0] sm:$0xff] %vm1769_vm2, %v1735_v36  ;;  %v1736_v63 = vmul.f32 %v2507_v45, %v3106_v44  ;;  %2528 = vpow2.f32 %v2019_v23  ;;  %v2025_v54 = vmul.f32 -1.442695, %v3190_v47  ;;  %p2632_p0 = scmp.ne.s32.totalorder %s1840_s17, %s2631_s18  ;;  %p2637_p2 = scmp.lt.s32.totalorder %s2631_s18, %s2631_s18 }
 0x139   :  { %v1175_v52 = vadd.f32 %v1174_v49, %v626_v37  ;;  %v2511_v13 = vpop.eup %2510  ;;  %1798 = vst.msk [vmem:[#allocation2 + $0xe0] sm:$0xff] %vm1769_vm2, %v1733_v46  ;;  %v1734_v39 = vmul.f32 %v2509_v22, %v3110_v16  ;;  %2530 = vpow2.f32 %v2022_v42  ;;  %v3201_v55 = vadd.f32 %v2953_v6, %v1183_v48  ;;  %v2161_v16 = vpop.f32.mrb[48].mxu1 }
 0x13a   :  { %v2513_v19 = vpop.eup %2512  ;;  %1801 = vst.msk [vmem:[#allocation2 + $0xf8] sm:$0xff] %vm1769_vm2, %v1736_v63  ;;  %v1551_v44 = vadd.f32 1.0, %v2511_v13  ;;  %2532 = vpow2.f32 %v2020_v34  ;;  %v2023_v33 = vmul.f32 -1.442695, %v3195_v51  ;;  %v2227_v1 = vpop.f32.mrb[48].mxu0  ;;  %p2638_p3 = por %p2637_p2, %p2636_p1 }
 0x13b   :  { %v3205_v57 = vadd.f32 %v2953_v6, %v1175_v52  ;;  %v2515_v58 = vpop.eup %2514  ;;  %1799 = vst.msk [vmem:[#allocation2 + $0xe8] sm:$0xff] %vm1769_vm2, %v1734_v39  ;;  %v1549_v28 = vadd.f32 1.0, %v2513_v19  ;;  %2534 = vpow2.f32 %v2025_v54  ;;  %v639_v2 = vpop.f32.mrb[49].mxu1  ;;  %v2026_v8 = vmul.f32 -1.442695, %v3201_v55 }
 0x13c   :  { %v2517_v17 = vpop.eup %2516  ;;  %2536 = vrcp.f32 %v1551_v44  ;;  %v1552_v61 = vadd.f32 1.0, %v2515_v58  ;;  %v1196_v6 = vadd.f32 %v2227_v1, %v2161_v16  ;;  %v1187_v4 = vpop.f32.mrb[49].mxu0  ;;  %p2639_p4 = pnand %p2638_p3, %p2632_p0 }
 0x13d   :  { %v2519_v0 = vpop.eup %2518  ;;  %2538 = vrcp.f32 %v1549_v28  ;;  %v1550_v5 = vadd.f32 1.0, %v2517_v17  ;;  %v2162_v9 = vpop.f32.mrb[50].mxu1  ;;  %v2024_v15 = vmul.f32 -1.442695, %v3205_v57  ;;  %v1188_v18 = vadd.f32 %v1187_v4, %v639_v2 }
 0x13e   :  { %v2521_v11 = vpop.eup %2520  ;;  %2540 = vrcp.f32 %v1552_v61  ;;  %v1555_v7 = vadd.f32 1.0, %v2519_v0  ;;  %v2228_v38 = vpop.f32.mrb[50].mxu0  ;;  %v3218_v25 = vadd.f32 %v3215_v40, %v1196_v6 }
 0x13f   :  { %v642_v59 = vpop.f32.mrb[51].mxu1  ;;  %v2523_v21 = vpop.eup %2522  ;;  %v1739_v23 = vmul.f32 %v2521_v11, %v3120_v20  ;;  %2542 = vrcp.f32 %v1550_v5  ;;  %v1199_v26 = vadd.f32 %v2228_v38, %v2162_v9  ;;  %v3222_v31 = vadd.f32 %v3215_v40, %v1188_v18 }
 0x140   :  { %v1190_v27 = vpop.f32.mrb[51].mxu0  ;;  %v2525_v42 = vpop.eup %2524  ;;  %v1737_v30 = vmul.f32 %v2523_v21, %v3125_v50  ;;  %2544 = vrcp.f32 %v1555_v7  ;;  %v2029_v36 = vmul.f32 -1.442695, %v3218_v25 }
 0x141   :  { %v1191_v14 = vadd.f32 %v1190_v27, %v642_v59  ;;  %v2527_v20 = vpop.eup %2526  ;;  %1804 = vst.msk [vmem:[#allocation2 + $0x110] sm:$0xff] %vm1769_vm2, %v1739_v23  ;;  %v1740_v35 = vmul.f32 %v2525_v42, %v3129_v53  ;;  %2546 = vpow2.f32 %v2023_v33  ;;  %v3228_v34 = vadd.f32 %v3215_v40, %v1199_v26  ;;  %v2165_v53 = vpop.f32.mrb[52].mxu1 }
 0x142   :  { %v2529_v41 = vpop.eup %2528  ;;  %1802 = vst.msk [vmem:[#allocation2 + $0x100] sm:$0xff] %vm1769_vm2, %v1737_v30  ;;  %v1738_v50 = vmul.f32 %v2527_v20, %v3133_v56  ;;  %2548 = vpow2.f32 %v2026_v8  ;;  %v2027_v49 = vmul.f32 -1.442695, %v3222_v31  ;;  %v2231_v22 = vpop.f32.mrb[52].mxu0 }
 0x143   :  { %v3233_v43 = vadd.f32 %v3215_v40, %v1191_v14  ;;  %v2531_v37 = vpop.eup %2530  ;;  %1805 = vst.msk [vmem:[#allocation2 + $0x118] sm:$0xff] %vm1769_vm2, %v1740_v35  ;;  %v1553_v45 = vadd.f32 1.0, %v2529_v41  ;;  %2550 = vpow2.f32 %v2024_v15  ;;  %v655_v63 = vpop.f32.mrb[53].mxu1  ;;  %v2030_v13 = vmul.f32 -1.442695, %v3228_v34 }
 0x144   :  { %v2533_v46 = vpop.eup %2532  ;;  %1803 = vst.msk [vmem:[#allocation2 + $0x108] sm:$0xff] %vm1769_vm2, %v1738_v50  ;;  %v1556_v48 = vadd.f32 1.0, %v2531_v37  ;;  %2552 = vpow2.f32 %v2029_v36  ;;  %v1212_v39 = vadd.f32 %v2231_v22, %v2165_v53  ;;  %v1203_v54 = vpop.f32.mrb[53].mxu0 }
 0x145   :  { %v2535_v56 = vpop.eup %2534  ;;  %2554 = vrcp.f32 %v1553_v45  ;;  %v1554_v52 = vadd.f32 1.0, %v2533_v46  ;;  %v2166_v19 = vpop.f32.mrb[54].mxu1  ;;  %v2028_v28 = vmul.f32 -1.442695, %v3233_v43  ;;  %v1204_v16 = vadd.f32 %v1203_v54, %v655_v63 }
 0x146   :  { %v2537_v44 = vpop.eup %2536  ;;  %2556 = vrcp.f32 %v1556_v48  ;;  %v1559_v58 = vadd.f32 1.0, %v2535_v56  ;;  %v2232_v17 = vpop.f32.mrb[54].mxu0  ;;  %v3242_v2 = vadd.f32 %v3215_v40, %v1212_v39 }
 0x147   :  { %v658_v61 = vpop.f32.mrb[55].mxu1  ;;  %v2539_v33 = vpop.eup %2538  ;;  %v1743_v1 = vmul.f32 %v2537_v44, %v3144_v24  ;;  %2558 = vrcp.f32 %v1554_v52  ;;  %v1215_v0 = vadd.f32 %v2232_v17, %v2166_v19  ;;  %v3246_v4 = vadd.f32 %v3215_v40, %v1204_v16 }
 0x148   :  { %v1206_v5 = vpop.f32.mrb[55].mxu0  ;;  %v2541_v8 = vpop.eup %2540  ;;  %v1741_v6 = vmul.f32 %v2539_v33, %v3149_v29  ;;  %2560 = vrcp.f32 %v1559_v58  ;;  %v2033_v24 = vmul.f32 -1.442695, %v3242_v2 }
 0x149   :  { %v1207_v9 = vadd.f32 %v1206_v5, %v658_v61  ;;  %v2543_v11 = vpop.eup %2542  ;;  %1808 = vst.msk [vmem:[#allocation2 + $0x130] sm:$0xff] %vm1769_vm2, %v1743_v1  ;;  %v1744_v7 = vmul.f32 %v2541_v8, %v3153_v32  ;;  %2562 = vpow2.f32 %v2027_v49  ;;  %v3252_v15 = vadd.f32 %v3215_v40, %v1215_v0  ;;  %v2169_v23 = vpop.f32.mrb[56].mxu1 }
 0x14a   :  { %v2545_v18 = vpop.eup %2544  ;;  %1806 = vst.msk [vmem:[#allocation2 + $0x120] sm:$0xff] %vm1769_vm2, %v1741_v6  ;;  %v1742_v29 = vmul.f32 %v2543_v11, %v3157_v60  ;;  %2564 = vpow2.f32 %v2030_v13  ;;  %v2031_v38 = vmul.f32 -1.442695, %v3246_v4  ;;  %v2235_v42 = vpop.f32.mrb[56].mxu0 }
 0x14b   :  { %v3258_v59 = vadd.f32 %v3215_v40, %v1207_v9  ;;  %v2547_v21 = vpop.eup %2546  ;;  %1809 = vst.msk [vmem:[#allocation2 + $0x138] sm:$0xff] %vm1769_vm2, %v1744_v7  ;;  %v1747_v32 = vmul.f32 %v2545_v18, %v3166_v62  ;;  %2566 = vpow2.f32 %v2028_v28  ;;  %v671_v60 = vpop.f32.mrb[57].mxu1  ;;  %v2034_v20 = vmul.f32 -1.442695, %v3252_v15 }
 0x14c   :  { %v2549_v26 = vpop.eup %2548  ;;  %1807 = vst.msk [vmem:[#allocation2 + $0x128] sm:$0xff] %vm1769_vm2, %v1742_v29  ;;  %v1557_v27 = vadd.f32 1.0, %v2547_v21  ;;  %2568 = vpow2.f32 %v2033_v24  ;;  %v1228_v35 = vadd.f32 %v2235_v42, %v2169_v23  ;;  %v1219_v36 = vpop.f32.mrb[57].mxu0 }
 0x14d   :  { %v2551_v30 = vpop.eup %2550  ;;  %1812 = vst.msk [vmem:[#allocation2 + $0x150] sm:$0xff] %vm1769_vm2, %v1747_v32  ;;  %v1560_v14 = vadd.f32 1.0, %v2549_v26  ;;  %2570 = vpow2.f32 %v2031_v38  ;;  %v2170_v41 = vpop.f32.mrb[58].mxu1  ;;  %v2032_v37 = vmul.f32 -1.442695, %v3258_v59  ;;  %v1220_v45 = vadd.f32 %v1219_v36, %v671_v60 }
 0x14e   :  { %v2553_v62 = vpop.eup %2552  ;;  %2572 = vrcp.f32 %v1557_v27  ;;  %v1558_v50 = vadd.f32 1.0, %v2551_v30  ;;  %v2236_v53 = vpop.f32.mrb[58].mxu0  ;;  %v3267_v22 = vadd.f32 %v3215_v40, %v1228_v35 }
 0x14f   :  { %v674_v46 = vpop.f32.mrb[59].mxu1  ;;  %v2555_v48 = vpop.eup %2554  ;;  %2574 = vrcp.f32 %v1560_v14  ;;  %v1563_v49 = vadd.f32 1.0, %v2553_v62  ;;  %v1231_v63 = vadd.f32 %v2236_v53, %v2170_v41  ;;  %v3271_v39 = vadd.f32 %v3215_v40, %v1220_v45 }
 0x150   :  { %v1222_v56 = vpop.f32.mrb[59].mxu0  ;;  %v2557_v52 = vpop.eup %2556  ;;  %v1745_v13 = vmul.f32 %v2555_v48, %v3171_v3  ;;  %2576 = vrcp.f32 %v1558_v50  ;;  %v2037_v58 = vmul.f32 -1.442695, %v3267_v22 }
 0x151   :  { %v1223_v54 = vadd.f32 %v1222_v56, %v674_v46  ;;  %v2559_v19 = vpop.eup %2558  ;;  %v1748_v44 = vmul.f32 %v2557_v52, %v3177_v10  ;;  %2578 = vrcp.f32 %v1563_v49  ;;  %v3276_v28 = vadd.f32 %v3215_v40, %v1231_v63  ;;  %v2173_v1 = vpop.f32.mrb[60].mxu1 }
 0x152   :  { %v2561_v16 = vpop.eup %2560  ;;  %1810 = vst.msk [vmem:[#allocation2 + $0x140] sm:$0xff] %vm1769_vm2, %v1745_v13  ;;  %v1746_v17 = vmul.f32 %v2559_v19, %v3181_v12  ;;  %2580 = vpow2.f32 %v2034_v20  ;;  %v2035_v3 = vmul.f32 -1.442695, %v3271_v39  ;;  %v2239_v8 = vpop.f32.mrb[60].mxu0 }
 0x153   :  { %v3282_v61 = vadd.f32 %v3215_v40, %v1223_v54  ;;  %v2563_v33 = vpop.eup %2562  ;;  %1813 = vst.msk [vmem:[#allocation2 + $0x158] sm:$0xff] %vm1769_vm2, %v1748_v44  ;;  %v1751_v10 = vmul.f32 %v2561_v16, %v3190_v47  ;;  %2582 = vpow2.f32 %v2032_v37  ;;  %v687_v12 = vpop.f32.mrb[61].mxu1  ;;  %v2038_v11 = vmul.f32 -1.442695, %v3276_v28 }
 0x154   :  { %v2565_v0 = vpop.eup %2564  ;;  %1811 = vst.msk [vmem:[#allocation2 + $0x148] sm:$0xff] %vm1769_vm2, %v1746_v17  ;;  %v1561_v5 = vadd.f32 1.0, %v2563_v33  ;;  %2584 = vpow2.f32 %v2037_v58  ;;  %v1244_v7 = vadd.f32 %v2239_v8, %v2173_v1  ;;  %v1235_v24 = vpop.f32.mrb[61].mxu0 }
 0x155   :  { %v2567_v6 = vpop.eup %2566  ;;  %1816 = vst.msk [vmem:[#allocation2 + $0x170] sm:$0xff] %vm1769_vm2, %v1751_v10  ;;  %v1564_v9 = vadd.f32 1.0, %v2565_v0  ;;  %2586 = vpow2.f32 %v2035_v3  ;;  %v2174_v18 = vpop.f32.mrb[62].mxu1  ;;  %v2036_v38 = vmul.f32 -1.442695, %v3282_v61  ;;  %v1236_v21 = vadd.f32 %v1235_v24, %v687_v12 }
 0x156   :  { %v2569_v47 = vpop.eup %2568  ;;  %2588 = vrcp.f32 %v1561_v5  ;;  %v1562_v29 = vadd.f32 1.0, %v2567_v6  ;;  %v2240_v32 = vpop.f32.mrb[62].mxu0  ;;  %v3291_v42 = vadd.f32 %v3215_v40, %v1244_v7 }
 0x157   :  { %v690_v23 = vpop.f32.mrb[63].mxu1  ;;  %v2571_v26 = vpop.eup %2570  ;;  %2590 = vrcp.f32 %v1564_v9  ;;  %v1567_v27 = vadd.f32 1.0, %v2569_v47  ;;  %v1247_v60 = vadd.f32 %v2240_v32, %v2174_v18  ;;  %v3294_v35 = vadd.f32 %v3215_v40, %v1236_v21 }
 0x158   :  { %v1238_v30 = vpop.f32.mrb[63].mxu0  ;;  %v2573_v14 = vpop.eup %2572  ;;  %2592 = vrcp.f32 %v1562_v29  ;;  %v1565_v20 = vadd.f32 1.0, %v2571_v26  ;;  %v2041_v50 = vmul.f32 -1.442695, %v3291_v42 }
 0x159   :  { %v1239_v36 = vadd.f32 %v1238_v30, %v690_v23  ;;  %v2575_v41 = vpop.eup %2574  ;;  %v1749_v62 = vmul.f32 %v2573_v14, %v3195_v51  ;;  %2594 = vrcp.f32 %v1567_v27  ;;  %v2039_v53 = vmul.f32 -1.442695, %v3294_v35 }
 0x15a   :  { %v2577_v37 = vpop.eup %2576  ;;  %v1752_v45 = vmul.f32 %v2575_v41, %v3201_v55  ;;  %2596 = vrcp.f32 %v1565_v20  ;;  %v3303_v49 = vadd.f32 %v3215_v40, %v1247_v60 }
 0x15b   :  { %v2579_v46 = vpop.eup %2578  ;;  %1814 = vst.msk [vmem:[#allocation2 + $0x160] sm:$0xff] %vm1769_vm2, %v1749_v62  ;;  %v1750_v48 = vmul.f32 %v2577_v37, %v3205_v57  ;;  %2598 = vpow2.f32 %v2038_v11  ;;  %v3308_v55 = vadd.f32 %v3215_v40, %v1239_v36 }
 0x15c   :  { %v2581_v63 = vpop.eup %2580  ;;  %1817 = vst.msk [vmem:[#allocation2 + $0x178] sm:$0xff] %vm1769_vm2, %v1752_v45  ;;  %v1755_v51 = vmul.f32 %v2579_v46, %v3218_v25  ;;  %2600 = vpow2.f32 %v2036_v38  ;;  %v2042_v44 = vmul.f32 -1.442695, %v3303_v49 }
 0x15d   :  { %v2583_v56 = vpop.eup %2582  ;;  %1815 = vst.msk [vmem:[#allocation2 + $0x168] sm:$0xff] %vm1769_vm2, %v1750_v48  ;;  %v1568_v52 = vadd.f32 1.0, %v2581_v63  ;;  %2602 = vpow2.f32 %v2041_v50  ;;  %v2040_v40 = vmul.f32 -1.442695, %v3308_v55 }
 0x15e   :  { %v2585_v13 = vpop.eup %2584  ;;  %1820 = vst.msk [vmem:[#allocation2 + $0x190] sm:$0xff] %vm1769_vm2, %v1755_v51  ;;  %v1566_v57 = vadd.f32 1.0, %v2583_v56  ;;  %2604 = vpow2.f32 %v2039_v53 }
 0x15f   :  { %v2587_v54 = vpop.eup %2586  ;;  %2606 = vrcp.f32 %v1568_v52  ;;  %v1571_v19 = vadd.f32 1.0, %v2585_v13 }
 0x160   :  { %v2589_v25 = vpop.eup %2588  ;;  %2608 = vrcp.f32 %v1566_v57  ;;  %v1569_v58 = vadd.f32 1.0, %v2587_v54 }
 0x161   :  { %v2591_v16 = vpop.eup %2590  ;;  %v1753_v17 = vmul.f32 %v2589_v25, %v3222_v31  ;;  %2610 = vrcp.f32 %v1571_v19 }
 0x162   :  { %v2593_v3 = vpop.eup %2592  ;;  %v1756_v33 = vmul.f32 %v2591_v16, %v3228_v34  ;;  %2612 = vrcp.f32 %v1569_v58 }
 0x163   :  { %v2595_v10 = vpop.eup %2594  ;;  %1818 = vst.msk [vmem:[#allocation2 + $0x180] sm:$0xff] %vm1769_vm2, %v1753_v17  ;;  %v1754_v1 = vmul.f32 %v2593_v3, %v3233_v43  ;;  %2614 = vpow2.f32 %v2042_v44 }
 0x164   :  { %v2597_v0 = vpop.eup %2596  ;;  %1821 = vst.msk [vmem:[#allocation2 + $0x198] sm:$0xff] %vm1769_vm2, %v1756_v33  ;;  %v1759_v5 = vmul.f32 %v2595_v10, %v3242_v2  ;;  %2616 = vpow2.f32 %v2040_v40 }
 0x165   :  { %v2599_v8 = vpop.eup %2598  ;;  %1819 = vst.msk [vmem:[#allocation2 + $0x188] sm:$0xff] %vm1769_vm2, %v1754_v1  ;;  %v1757_v31 = vmul.f32 %v2597_v0, %v3246_v4 }
 0x166   :  { %v2601_v12 = vpop.eup %2600  ;;  %1824 = vst.msk [vmem:[#allocation2 + $0x1b0] sm:$0xff] %vm1769_vm2, %v1759_v5  ;;  %v1572_v34 = vadd.f32 1.0, %v2599_v8 }
 0x167   :  { %v2603_v6 = vpop.eup %2602  ;;  %1822 = vst.msk [vmem:[#allocation2 + $0x1a0] sm:$0xff] %vm1769_vm2, %v1757_v31  ;;  %v1570_v43 = vadd.f32 1.0, %v2601_v12 }
 0x168   :  { %v2605_v9 = vpop.eup %2604  ;;  %2618 = vrcp.f32 %v1572_v34  ;;  %v1575_v11 = vadd.f32 1.0, %v2603_v6 }
 0x169   :  { %v2607_v7 = vpop.eup %2606  ;;  %2620 = vrcp.f32 %v1570_v43  ;;  %v1573_v2 = vadd.f32 1.0, %v2605_v9 }
 0x16a   :  { %v2609_v24 = vpop.eup %2608  ;;  %v1760_v18 = vmul.f32 %v2607_v7, %v3252_v15  ;;  %2622 = vrcp.f32 %v1575_v11 }
 0x16b   :  { %v2611_v47 = vpop.eup %2610  ;;  %v1758_v4 = vmul.f32 %v2609_v24, %v3258_v59  ;;  %2624 = vrcp.f32 %v1573_v2 }
 0x16c   :  { %v2613_v29 = vpop.eup %2612  ;;  %1825 = vst.msk [vmem:[#allocation2 + $0x1b8] sm:$0xff] %vm1769_vm2, %v1760_v18  ;;  %v1763_v38 = vmul.f32 %v2611_v47, %v3267_v22 }
 0x16d   :  { %v2615_v21 = vpop.eup %2614  ;;  %1823 = vst.msk [vmem:[#allocation2 + $0x1a8] sm:$0xff] %vm1769_vm2, %v1758_v4  ;;  %v1761_v32 = vmul.f32 %v2613_v29, %v3271_v39 }
 0x16e   :  { %v2617_v23 = vpop.eup %2616  ;;  %1828 = vst.msk [vmem:[#allocation2 + $0x1d0] sm:$0xff] %vm1769_vm2, %v1763_v38  ;;  %v1576_v26 = vadd.f32 1.0, %v2615_v21 }
 0x16f   :  { %1826 = vst.msk [vmem:[#allocation2 + $0x1c0] sm:$0xff] %vm1769_vm2, %v1761_v32  ;;  %v1574_v15 = vadd.f32 1.0, %v2617_v23 }
 0x170   :  { %2626 = vrcp.f32 %v1576_v26 }
 0x171   :  { %2628 = vrcp.f32 %v1574_v15 }
 0x172   :  { %v2619_v59 = vpop.eup %2618 }
 0x173   :  { %v2621_v27 = vpop.eup %2620  ;;  %v1764_v60 = vmul.f32 %v2619_v59, %v3276_v28 }
 0x174   :  { %v2623_v30 = vpop.eup %2622  ;;  %v1762_v22 = vmul.f32 %v2621_v27, %v3282_v61 }
 0x175   :  { %v2625_v14 = vpop.eup %2624  ;;  %1829 = vst.msk [vmem:[#allocation2 + $0x1d8] sm:$0xff] %vm1769_vm2, %v1764_v60  ;;  %v1767_v39 = vmul.f32 %v2623_v30, %v3291_v42 }
 0x176   :  { %1827 = vst.msk [vmem:[#allocation2 + $0x1c8] sm:$0xff] %vm1769_vm2, %v1762_v22  ;;  %v1765_v20 = vmul.f32 %v2625_v14, %v3294_v35 }
 0x177   :  { %1832 = vst.msk [vmem:[#allocation2 + $0x1f0] sm:$0xff] %vm1769_vm2, %v1767_v39 }
 0x178   :  { %1830 = vst.msk [vmem:[#allocation2 + $0x1e0] sm:$0xff] %vm1769_vm2, %v1765_v20 }
 0x17a   :  { %v2627_v36 = vpop.eup %2626 }
 0x17b   :  { %v2629_v28 = vpop.eup %2628  ;;  %v1768_v41 = vmul.f32 %v2627_v36, %v3303_v49 }
 0x17c   :  { %v1766_v61 = vmul.f32 %v2629_v28, %v3308_v55 }
 0x17d   :  { %1833 = vst.msk [vmem:[#allocation2 + $0x1f8] sm:$0xff] %vm1769_vm2, %v1768_v41 }
 0x17e   :  { %1831 = vst.msk [vmem:[#allocation2 + $0x1e8] sm:$0xff] %vm1769_vm2, %v1766_v61 }
 0x17f   :  { %2642 = shalt.err (!%p2639_p4)
}
 0x180   :  { %s2643_s21 = scalar_lea.hbm %s3361_s5, 8192 }
 0x181   :  { %p2644_p5 = scmp.ne.s32.totalorder %s3361_s5, %s2643_s21  ;;  %p2647_p6 = scmp.lt.u32.totalorder %s2643_s21, %s3361_s5 }
 0x183   :  { %p2649_p7 = pnand %p2647_p6, %p2644_p5 }
 0x185   :  { %2652 = shalt.err (!%p2649_p7)
}
 0x186   :  { %s2656_s3 = smov 128   ;;  %s2657_s26 = smov 8  }
 0x187   :  { %1845 = dma.vmem_to_hbm [thread:$0]  %s1840_s17, 8192, %s3361_s5, [#allocation3], %s2656_s3, %s2656_s3, %s2657_s26  }
 0x188   :  { %2653 = dma.done.wait [#allocation3], 8192  }
 0x189   :  { %2654 = vsyncadd [#allocation3], 4294959104 }
 0x18a   :  { %1849 = vsyncpa [#allocation3], 1 }

// kernel: sppcspc_forward.12
= control target key start
LH: loop header
LB: loop body
LE: loop exit
PB: predicated region body
PF: predicated region fallthrough
CT: control target
= control target key end

     0   :  { %s4380_s6 = smov 0   ;;  %s6537_s0 = inlined_call_operand.vmem [shape: bf16[2,16,16,4], index: 0, kind: input, shape index: {}]   ;;  %s6538_s1 = inlined_call_operand.vmem [shape: bf16[2,16,16,16], index: 1, kind: output, shape index: {}]  }
   0x1 LB: > { %s4141_s7 = sadd.s32 4294967295, %s4364_s6   ;;  %p4145_p0 = scmp.ge.s32.totalorder %s4364_s6, 1  ;;  %s4364_s6 = sphi %s4380_s6, %s11_s6  }
   0x2   : > { %p87_p1 = scmp.lt.s32.totalorder %s4364_s6, 3 }
   0x4   : > { %p88_p2 = pnand %p4145_p0, %p87_p1 }
   0x6   : > { %91 = sbr.rel (%p88_p2) target bundleno = 731 (0x2db), region = 24 }
   0xd   : > { %p107_p3 = scmp.lt.s32.totalorder %s4141_s7, 1  ;;  %v4366_v0 = vmov 4286644096   ;;  %vm248_vm0 = vcmask 1042432   ;;  %vm888_vm1 = vcmask 1046528   ;;  %vm1178_vm2 = vcmask 1045504  }
   0xe   : > { %v231_v1 = vrot.slane %v4366_v0, 5  ;;  %vm551_vm3 = vsmask.f32 7424  ;;  %vm1001_vm4 = vsmask.f32 6400  ;;  %vm3261_vm5 = vcmask 1041408  }
   0xf   : > { %s6819_s7 = smov (!%p107_p3, %s4141_s7), 1  ;;  %vm3262_vm6 = vcmask 1045508   ;;  %s4367_s12 = smov 4   ;;  %vm3634_vm8 = vcmask 1046532   ;;  %vm3100_vm10 = vcmask 27648   ;;  %vm3472_vm11 = vcmask 60448  }
  0x10   : > { %s4328_s8 = sshll.u32 %s6819_s7, 7  ;;  %v4399_v2 = vsel %vm248_vm0, 4286644096, %v231_v1  ;;  %v4402_v3 = vsel %vm248_vm0, %v231_v1, 4286644096  ;;  %vm4572_vm7 = vmor %vm3261_vm5, %vm3262_vm6  ;;  %s4368_s13 = smov 8  }
  0x11   : > { %s4396_s11 = scalar_lea.vmem %s6537_s0, %s4328_s8  ;;  %vm5303_vm9 = vmor %vm248_vm0, %vm3634_vm8  ;;  %s5651_s16 = scalar_lea.vmem %s6538_s1, %s4328_s8  ;;  %vm3019_vm12 = vcmask 1043456   ;;  %vm3844_vm13 = vcmask 93248   ;;  %vm4053_vm14 = vcmask 126048  }
  0x12   : > { %v4405_v4 = vld [vmem:[%s4396_s11] sm:$0xf]  ;;  %v4408_v5 = vld [vmem:[%s4396_s11 + $0x4] sm:$0xf]  ;;  %v4411_v6 = vld [vmem:[%s4396_s11 + $0x8] sm:$0xf] }
  0x13   : > { %6635 = vst [vmem:[#allocation2_spill] sm:$0xff] %v4405_v4  ;;  %6636 = vst [vmem:[#allocation3_spill] sm:$0xff] %v4408_v5  ;;  %v4414_v7 = vld [vmem:[%s4396_s11 + $0xc] sm:$0xf]  ;;  %v4417_v8 = vld [vmem:[%s4396_s11 + $0x10] sm:$0xf]  ;;  %v4150_v10 = vcombine.low %v4405_v4, %v4408_v5 }
  0x14   : > { %6637 = vst [vmem:[#allocation4_spill] sm:$0xff] %v4411_v6  ;;  %6638 = vst [vmem:[#allocation5_spill] sm:$0xff] %v4414_v7  ;;  %v4420_v9 = vld [vmem:[%s4396_s11 + $0x14] sm:$0xf]  ;;  %v4151_v11 = vcombine.low %v4411_v6, %v4414_v7  ;;  %v4429_v13 = vld [vmem:[%s4396_s11 + $0x18] sm:$0xf] }
  0x15   : > { %6639 = vst [vmem:[#allocation6_spill] sm:$0xff] %v4417_v8  ;;  %6640 = vst [vmem:[#allocation7_spill] sm:$0xff] %v4420_v9  ;;  %v4152_v12 = vcombine.low %v4417_v8, %v4420_v9  ;;  %v4432_v14 = vld [vmem:[%s4396_s11 + $0x1c] sm:$0xf]  ;;  %v4435_v15 = vld [vmem:[%s4396_s11 + $0x20] sm:$0xf] }
  0x16   : > { %6641 = vst [vmem:[#allocation8_spill] sm:$0xff] %v4429_v13  ;;  %6642 = vst [vmem:[#allocation9_spill] sm:$0xff] %v4432_v14  ;;  %v232_v16 = vrot.slane %v4150_v10, 5  ;;  %v4153_v17 = vcombine.low %v4429_v13, %v4432_v14  ;;  %v4440_v18 = vld [vmem:[%s4396_s11 + $0x24] sm:$0xf]  ;;  %v233_v20 = vrot.slane %v4151_v11, 5 }
  0x17   : > { %6643 = vst [vmem:[#allocation10_spill] sm:$0xff] %v4435_v15  ;;  %6644 = vst [vmem:[#allocation11_spill] sm:$0xff] %v4440_v18  ;;  %v4443_v19 = vld [vmem:[%s4396_s11 + $0x28] sm:$0xf]  ;;  %v234_v21 = vrot.slane %v4152_v12, 5  ;;  %v4154_v22 = vcombine.low %v4435_v15, %v4440_v18  ;;  %s4369_s17 = smov 12  }
  0x18   : > { %6645 = vst [vmem:[#allocation12_spill] sm:$0xff] %v4443_v19  ;;  %v4448_v23 = vld [vmem:[%s4396_s11 + $0x2c] sm:$0xf]  ;;  %v4451_v24 = vld [vmem:[%s4396_s11 + $0x30] sm:$0xf]  ;;  %v235_v27 = vrot.slane %v4153_v17, 5 }
  0x19   : > { %6646 = vst [vmem:[#allocation13_spill] sm:$0xff] %v4448_v23  ;;  %6647 = vst [vmem:[#allocation14_spill] sm:$0xff] %v4451_v24  ;;  %v4454_v25 = vsel %vm248_vm0, 4286644096, %v232_v16  ;;  %v4457_v26 = vsel %vm248_vm0, %v232_v16, 4286644096  ;;  %v4155_v28 = vcombine.low %v4443_v19, %v4448_v23 }
  0x1a   : > { %v4462_v29 = vsel %vm248_vm0, 4286644096, %v233_v20  ;;  %v4465_v30 = vsel %vm248_vm0, 4286644096, %v234_v21  ;;  %v4468_v31 = vsel %vm248_vm0, %v233_v20, 4286644096  ;;  %v335_v32 = vmax.bf16 %v4454_v25, %v4399_v2 }
  0x1b   : > { %v4473_v33 = vsel %vm248_vm0, %v234_v21, 4286644096  ;;  %v336_v34 = vmax.bf16 %v4457_v26, %v4402_v3  ;;  %v4478_v35 = vsel %vm248_vm0, 4286644096, %v235_v27  ;;  %v4481_v36 = vsel %vm248_vm0, %v235_v27, 4286644096 }
  0x1c   : > { %v371_v37 = vmax.bf16 %v335_v32, %v4462_v29  ;;  %v236_v40 = vrot.slane %v4154_v22, 5  ;;  %v4489_v41 = vld [vmem:[%s4396_s11 + $0x34] sm:$0xf]  ;;  %v337_v43 = vmax.bf16 %v4462_v29, %v4454_v25  ;;  %v338_v44 = vmax.bf16 %v4468_v31, %v4457_v26 }
  0x1d   : > { %6648 = vst [vmem:[#allocation15_spill] sm:$0xff] %v4489_v41  ;;  %v372_v42 = vmax.bf16 %v336_v34, %v4468_v31  ;;  %v4507_v49 = vrot.slane %v4155_v28, 5 }
  0x1e   : > { %v4499_v46 = vmax.bf16 %v371_v37, %v4465_v30  ;;  %v4502_v47 = vsel %vm248_vm0, 4286644096, %v236_v40  ;;  %v4505_v48 = vsel %vm248_vm0, %v236_v40, 4286644096  ;;  %v4517_v53 = vmax.bf16 %v337_v43, %v4465_v30 }
  0x1f   : > { %v4510_v50 = vmax.bf16 %v372_v42, %v4473_v33  ;;  %v374_v23 = vmax.bf16 %v338_v44, %v4473_v33  ;;  %v6652_v44 = vcombine.low %v4451_v24, %v4489_v41 }
  0x20   : > { %v553_v54 = vshrl.u32 %v4499_v46, 16  ;;  %v555_v55 = vshll.u32 %v4499_v46, 16  ;;  %v889_v56 = vrot.slane %v4499_v46, 1  ;;  %v1179_v57 = vrot.slane %v4499_v46, 2 }
  0x21   : > { %6649 = vst [vmem:[#allocation16_spill] sm:$0xff] %v4510_v50  ;;  %v560_v58 = vshll.u32 %v4510_v50, 16  ;;  %v564_v59 = vshrl.u32 %v4510_v50, 16  ;;  %v890_v60 = vrot.slane %v4510_v50, 1  ;;  %v6539_v61 = vrot.slane %v4510_v50, 2 }
  0x22   : > { %v557_v62 = vrot.slane %v555_v55, 1  ;;  %v1002_v63 = vrot.slane %v553_v54, 1  ;;  %v1003_v0 = vrot.slane %v555_v55, 2  ;;  %v4529_v1 = vmax.bf16 %v4499_v46, %v4478_v35 }
  0x23   : > { %v562_v10 = vrot.slane %v560_v58, 1  ;;  %v891_v11 = vsel %vm888_vm1, %v889_v56, %v890_v60  ;;  %v1005_v12 = vrot.slane %v564_v59, 1  ;;  %v1006_v16 = vrot.slane %v560_v58, 2 }
  0x24   : > { %6650 = vst [vmem:[#allocation17_spill] sm:$0xff] %v4529_v1  ;;  %v558_v17 = vor.u32 %v557_v62, %v553_v54  ;;  %v1004_v20 = vor.u32 %v1003_v0, %v1002_v63  ;;  %v1181_v21 = vsel %vm1178_vm2, %v1179_v57, %v6539_v61  ;;  %v4537_v22 = vmax.bf16 %v4510_v50, %v4481_v36 }
  0x25   : > { %v1007_v27 = vor.u32 %v1006_v16, %v1005_v12  ;;  %v568_v28 = vshrl.u32 %v4529_v1, 16  ;;  %v570_v32 = vshll.u32 %v4529_v1, 16  ;;  %v892_v34 = vrot.slane %v4529_v1, 1 }
  0x26   : > { %6651 = vst [vmem:[#allocation18_spill] sm:$0xff] %v4537_v22  ;;  %v563_v37 = vsel %vm551_vm3, %v558_v17, %v562_v10  ;;  %v575_v40 = vshll.u32 %v4537_v22, 16  ;;  %v579_v42 = vshrl.u32 %v4537_v22, 16  ;;  %v893_v43 = vrot.slane %v4537_v22, 1 }
  0x27   : > { %v824_v54 = vmax.bf16 %v563_v37, %v4499_v46  ;;  %v1008_v55 = vsel %vm1001_vm4, %v1004_v20, %v1007_v27  ;;  %v572_v56 = vrot.slane %v570_v32, 1  ;;  %v1009_v57 = vrot.slane %v568_v28, 1 }
  0x28   : > { %v577_v58 = vrot.slane %v575_v40, 1  ;;  %v894_v62 = vsel %vm888_vm1, %v892_v34, %v893_v43  ;;  %v1010_v63 = vrot.slane %v570_v32, 2  ;;  %v1012_v0 = vrot.slane %v579_v42, 1 }
  0x29   : > { %v969_v12 = vmax.bf16 %v891_v11, %v824_v54  ;;  %v573_v16 = vor.u32 %v572_v56, %v568_v28  ;;  %v1013_v17 = vrot.slane %v575_v40, 2  ;;  %v1182_v52 = vrot.slane %v4529_v1, 2 }
  0x2a   : > { %v1011_v51 = vor.u32 %v1010_v63, %v1009_v57  ;;  %v1183_v39 = vrot.slane %v4537_v22, 2  ;;  %v566_v38 = vor.u32 %v564_v59, %v562_v10  ;;  %v581_v61 = vor.u32 %v579_v42, %v577_v58 }
  0x2b   : > { %v1146_v37 = vmax.bf16 %v1008_v55, %v969_v12  ;;  %v578_v20 = vsel %vm551_vm3, %v573_v16, %v577_v58  ;;  %v1014_v45 = vor.u32 %v1013_v17, %v1012_v0  ;;  %v411_v59 = vmax.bf16 %v4517_v53, %v4478_v35 }
  0x2c   : > { %v826_v34 = vmax.bf16 %v578_v20, %v4529_v1  ;;  %v1184_v32 = vsel %vm1178_vm2, %v1182_v52, %v1183_v39  ;;  %v825_v11 = vmax.bf16 %v566_v38, %v4510_v50  ;;  %v827_v28 = vmax.bf16 %v581_v61, %v4537_v22 }
  0x2d   : > { %v1259_v40 = vmax.bf16 %v1181_v21, %v1146_v37  ;;  %v1015_v54 = vsel %vm1001_vm4, %v1011_v51, %v1014_v45  ;;  %v412_v10 = vmax.bf16 %v374_v23, %v4481_v36  ;;  %v238_v57 = vrot.slane %v6652_v44, 5 }
  0x2e   : > { %v971_v42 = vmax.bf16 %v894_v62, %v826_v34  ;;  %v970_v55 = vmax.bf16 %v890_v60, %v825_v11  ;;  %v972_v56 = vmax.bf16 %v893_v43, %v827_v28  ;;  %v4565_v38 = vmax.bf16 %v411_v59, %v4502_v47 }
  0x2f   : > { %v4166_v52 = vcombine.low %v1259_v40, %v1259_v40  ;;  %v4167_v58 = vcombine.high %v1259_v40, %v1259_v40  ;;  %v4568_v61 = vmax.bf16 %v412_v10, %v4505_v48  ;;  %v4578_v21 = vsel %vm248_vm0, 4286644096, %v4507_v49 }
  0x30   : > { %v1148_v23 = vmax.bf16 %v1015_v54, %v971_v42  ;;  %v1147_v53 = vmax.bf16 %v1007_v27, %v970_v55  ;;  %v1149_v60 = vmax.bf16 %v1014_v45, %v972_v56  ;;  %v583_v63 = vshrl.u32 %v4565_v38, 16 }
  0x31   : > { %v4214_v43 = vrot.slane %v4166_v52, 10  ;;  %v3266_v62 = vrot.slane %v4167_v58, 6  ;;  %v585_v0 = vshll.u32 %v4565_v38, 16  ;;  %v6655_v16 = vrot.slane %v4510_v50, 2 }
  0x32   : > { %v1261_v12 = vmax.bf16 %v1184_v32, %v1148_v23  ;;  %v1262_v37 = vmax.bf16 %v1183_v39, %v1149_v60  ;;  %v590_v20 = vshll.u32 %v4568_v61, 16  ;;  %v594_v11 = vshrl.u32 %v4568_v61, 16 }
  0x33   : > { %v1260_v17 = vmax.bf16 %v6655_v16, %v1147_v53  ;;  %v3267_v45 = vsel %vm4572_vm7, %v4214_v43, %v3266_v62  ;;  %v3268_v27 = vrot.slane %v3266_v62, 4  ;;  %v587_v34 = vrot.slane %v585_v0, 1 }
  0x34   : > { %3376 = vrot.lane.b32.xlu0 %v3267_v45, %s4367_s12  ;;  %v4169_v28 = vcombine.low %v1261_v12, %v1261_v12  ;;  %v4170_v40 = vcombine.high %v1261_v12, %v1261_v12  ;;  %v4171_v32 = vcombine.low %v1262_v37, %v1262_v37  ;;  %v592_v10 = vrot.slane %v590_v20, 1 }
  0x35   : > { %v4168_v54 = vcombine.low %v1260_v17, %v1260_v17  ;;  %v588_v59 = vor.u32 %v587_v34, %v583_v63  ;;  %v895_v39 = vrot.slane %v4565_v38, 1  ;;  %v896_v42 = vrot.slane %v4568_v61, 1 }
  0x36   : > { %v4215_v55 = vrot.slane %v4169_v28, 10  ;;  %v3273_v56 = vrot.slane %v4170_v40, 6  ;;  %v3276_v52 = vrot.slane %v4171_v32, 6  ;;  %v1016_v53 = vrot.slane %v583_v63, 1 }
  0x37   : > { %v3269_v44 = vrot.slane %v4168_v54, 6  ;;  %v593_v58 = vsel %vm551_vm3, %v588_v59, %v592_v10  ;;  %v897_v23 = vsel %vm888_vm1, %v895_v39, %v896_v42  ;;  %v1017_v60 = vrot.slane %v585_v0, 2 }
  0x38   : > { %v3274_v43 = vsel %vm4572_vm7, %v4215_v55, %v3273_v56  ;;  %v3275_v12 = vrot.slane %v3273_v56, 4  ;;  %v828_v16 = vmax.bf16 %v593_v58, %v4565_v38  ;;  %v1019_v37 = vrot.slane %v594_v11, 1  ;;  %v4624_v56 = vld [vmem:[%s4396_s11 + $0x3c] sm:$0xf] }
  0x39   : > { %v3270_v62 = vsel %vm4572_vm7, %v3268_v27, %v3269_v44  ;;  %3380 = vrot.lane.b32.xlu1 %v3274_v43, %s4367_s12  ;;  %v1018_v17 = vor.u32 %v1017_v60, %v1016_v53  ;;  %v1020_v45 = vrot.slane %v590_v20, 2  ;;  %v1185_v63 = vrot.slane %v4565_v38, 2  ;;  %6657 = vst [vmem:[#allocation20_spill] sm:$0xff] %v4624_v56 }
  0x3a   : > { %3378 = vrot.lane.b32.xlu0 %v3270_v62, %s4367_s12  ;;  %v3277_v0 = vsel %vm4572_vm7, %v3275_v12, %v3276_v52  ;;  %v973_v34 = vmax.bf16 %v897_v23, %v828_v16  ;;  %v1186_v27 = vrot.slane %v4568_v61, 2  ;;  %v596_v28 = vor.u32 %v594_v11, %v592_v10  ;;  %v4621_v10 = vld [vmem:[%s4396_s11 + $0x38] sm:$0xf] }
  0x3b   : > { %v1021_v40 = vor.u32 %v1020_v45, %v1019_v37  ;;  %v4605_v54 = vsel %vm248_vm0, 4286644096, %v238_v57  ;;  %v4609_v32 = vsel %vm248_vm0, %v4507_v49, 4286644096  ;;  %v4612_v59 = vsel %vm248_vm0, %v238_v57, 4286644096 }
  0x3c   : > { %v1187_v20 = vsel %vm1178_vm2, %v1185_v63, %v1186_v27  ;;  %v829_v39 = vmax.bf16 %v596_v28, %v4568_v61  ;;  %v339_v55 = vmax.bf16 %v4465_v30, %v4462_v29  ;;  %v340_v11 = vmax.bf16 %v4473_v33, %v4468_v31  ;;  %6656 = vst [vmem:[#allocation19_spill] sm:$0xff] %v4621_v10 }
  0x3d   : > { %3382 = vrot.lane.b32.xlu1 %v3277_v0, %s4367_s12  ;;  %v1022_v49 = vsel %vm1001_vm4, %v1018_v17, %v1021_v40  ;;  %v6658_v62 = vmax.bf16 %v4478_v35, %v4465_v30  ;;  %v6659_v16 = vmax.bf16 %v4481_v36, %v4473_v33  ;;  %v6660_v0 = vmax.bf16 %v4502_v47, %v4478_v35 }
  0x3e   : > { %v1150_v58 = vmax.bf16 %v1022_v49, %v973_v34  ;;  %v974_v23 = vmax.bf16 %v896_v42, %v829_v39  ;;  %v375_v60 = vmax.bf16 %v339_v55, %v4478_v35  ;;  %v376_v43 = vmax.bf16 %v340_v11, %v4481_v36 }
  0x3f   : > { %v377_v12 = vmax.bf16 %v6658_v62, %v4502_v47  ;;  %v378_v17 = vmax.bf16 %v6659_v16, %v4505_v48  ;;  %v4157_v42 = vcombine.low %v4621_v10, %v4624_v56  ;;  %v4653_v34 = vmax.bf16 %v6660_v0, %v4578_v21 }
  0x40   : > { %v1263_v37 = vmax.bf16 %v1187_v20, %v1150_v58  ;;  %v1151_v45 = vmax.bf16 %v1021_v40, %v974_v23  ;;  %v413_v63 = vmax.bf16 %v375_v60, %v4502_v47  ;;  %v414_v30 = vmax.bf16 %v376_v43, %v4505_v48 }
  0x41   : > { %v415_v28 = vmax.bf16 %v377_v12, %v4578_v21  ;;  %v416_v33 = vmax.bf16 %v378_v17, %v4609_v32  ;;  %v4658_v39 = vrot.slane %v4157_v42, 5 }
  0x42   : > { %v4172_v55 = vcombine.low %v1263_v37, %v1263_v37  ;;  %v4173_v11 = vcombine.high %v1263_v37, %v1263_v37  ;;  %v1264_v20 = vmax.bf16 %v1186_v27, %v1151_v45  ;;  %v4661_v40 = vmax.bf16 %v413_v63, %v4578_v21 }
  0x43   : > { %v4664_v49 = vmax.bf16 %v414_v30, %v4609_v32  ;;  %v4667_v35 = vmax.bf16 %v415_v28, %v4605_v54  ;;  %v4670_v58 = vmax.bf16 %v416_v33, %v4612_v59  ;;  %v4674_v23 = vsel %vm248_vm0, 4286644096, %v4658_v39 }
  0x44   : > { %v4216_v60 = vrot.slane %v4172_v55, 10  ;;  %v3280_v43 = vrot.slane %v4173_v11, 6  ;;  %v4174_v62 = vcombine.low %v1264_v20, %v1264_v20  ;;  %v598_v27 = vshrl.u32 %v4661_v40, 16 }
  0x45   : > { %v600_v12 = vshll.u32 %v4661_v40, 16  ;;  %v605_v16 = vshll.u32 %v4664_v49, 16  ;;  %v609_v17 = vshrl.u32 %v4664_v49, 16  ;;  %v898_v42 = vrot.slane %v4661_v40, 1 }
  0x46   : > { %v3281_v37 = vsel %vm4572_vm7, %v4216_v60, %v3280_v43  ;;  %v3282_v45 = vrot.slane %v3280_v43, 4  ;;  %v3283_v63 = vrot.slane %v4174_v62, 6  ;;  %v899_v0 = vrot.slane %v4664_v49, 1 }
  0x47   : > { %3384 = vrot.lane.b32.xlu0 %v3281_v37, %s4367_s12  ;;  %v602_v30 = vrot.slane %v600_v12, 1  ;;  %v607_v28 = vrot.slane %v605_v16, 1  ;;  %v1023_v33 = vrot.slane %v598_v27, 1  ;;  %v1024_v55 = vrot.slane %v600_v12, 2 }
  0x48   : > { %v3284_v11 = vsel %vm4572_vm7, %v3282_v45, %v3283_v63  ;;  %v900_v20 = vsel %vm888_vm1, %v898_v42, %v899_v0  ;;  %v1026_v53 = vrot.slane %v609_v17, 1  ;;  %v1027_v52 = vrot.slane %v605_v16, 2 }
  0x49   : > { %3386 = vrot.lane.b32.xlu1 %v3284_v11, %s4367_s12  ;;  %v603_v60 = vor.u32 %v602_v30, %v598_v27  ;;  %v1025_v43 = vor.u32 %v1024_v55, %v1023_v33  ;;  %v1188_v62 = vrot.slane %v4661_v40, 2  ;;  %v1189_v44 = vrot.slane %v4664_v49, 2 }
  0x4a   : > { %v1028_v37 = vor.u32 %v1027_v52, %v1026_v53  ;;  %v611_v57 = vor.u32 %v609_v17, %v607_v28  ;;  %v613_v56 = vshrl.u32 %v4667_v35, 16  ;;  %v615_v12 = vshll.u32 %v4667_v35, 16 }
  0x4b   : > { %v608_v45 = vsel %vm551_vm3, %v603_v60, %v607_v28  ;;  %v1190_v42 = vsel %vm1178_vm2, %v1188_v62, %v1189_v44  ;;  %v620_v16 = vshll.u32 %v4670_v58, 16  ;;  %v624_v63 = vshrl.u32 %v4670_v58, 16 }
  0x4c   : > { %v830_v27 = vmax.bf16 %v608_v45, %v4661_v40  ;;  %v1029_v30 = vsel %vm1001_vm4, %v1025_v43, %v1028_v37  ;;  %v831_v33 = vmax.bf16 %v611_v57, %v4664_v49  ;;  %v617_v52 = vrot.slane %v615_v12, 1 }
  0x4d   : > { %v622_v53 = vrot.slane %v620_v16, 1  ;;  %v901_v17 = vrot.slane %v4667_v35, 1  ;;  %v902_v55 = vrot.slane %v4670_v58, 1  ;;  %v1030_v11 = vrot.slane %v613_v56, 1 }
  0x4e   : > { %v975_v28 = vmax.bf16 %v900_v20, %v830_v27  ;;  %v976_v60 = vmax.bf16 %v899_v0, %v831_v33  ;;  %v618_v62 = vor.u32 %v617_v52, %v613_v56  ;;  %v1031_v10 = vrot.slane %v615_v12, 2 }
  0x4f   : > { %v903_v41 = vsel %vm888_vm1, %v901_v17, %v902_v55  ;;  %v1033_v24 = vrot.slane %v624_v63, 1  ;;  %v1034_v45 = vrot.slane %v620_v16, 2  ;;  %v1191_v43 = vrot.slane %v4667_v35, 2 }
  0x50   : > { %v1152_v57 = vmax.bf16 %v1029_v30, %v975_v28  ;;  %v1153_v19 = vmax.bf16 %v1028_v37, %v976_v60  ;;  %v623_v18 = vsel %vm551_vm3, %v618_v62, %v622_v53  ;;  %v1032_v15 = vor.u32 %v1031_v10, %v1030_v11  ;;  %v4716_v30 = vld [vmem:[%s4396_s11 + $0x40] sm:$0xf]  ;;  %v4719_v10 = vld [vmem:[%s4396_s11 + $0x44] sm:$0xf] }
  0x51   : > { %v832_v14 = vmax.bf16 %v623_v18, %v4667_v35  ;;  %v1035_v13 = vor.u32 %v1034_v45, %v1033_v24  ;;  %v1192_v0 = vrot.slane %v4670_v58, 2  ;;  %v626_v56 = vor.u32 %v624_v63, %v622_v53  ;;  %6662 = vst [vmem:[#allocation21_spill] sm:$0xff] %v4716_v30  ;;  %6663 = vst [vmem:[#allocation22_spill] sm:$0xff] %v4719_v10 }
  0x52   : > { %v1265_v20 = vmax.bf16 %v1190_v42, %v1152_v57  ;;  %v1266_v12 = vmax.bf16 %v1189_v44, %v1153_v19  ;;  %v4709_v27 = vsel %vm248_vm0, %v4658_v39, 4286644096  ;;  %v6661_v16 = vmax.bf16 %v4505_v48, %v4481_v36 }
  0x53   : > { %v977_v18 = vmax.bf16 %v903_v41, %v832_v14  ;;  %v1036_v24 = vsel %vm1001_vm4, %v1032_v15, %v1035_v13  ;;  %v1193_v63 = vsel %vm1178_vm2, %v1191_v43, %v1192_v0  ;;  %v833_v19 = vmax.bf16 %v626_v56, %v4670_v58 }
  0x54   : > { %v380_v37 = vmax.bf16 %v6661_v16, %v4609_v32  ;;  %v4175_v44 = vcombine.low %v1265_v20, %v1265_v20  ;;  %v4176_v42 = vcombine.high %v1265_v20, %v1265_v20  ;;  %v4177_v39 = vcombine.low %v1266_v12, %v1266_v12 }
  0x55   : > { %v417_v33 = vmax.bf16 %v4653_v34, %v4605_v54  ;;  %v1154_v52 = vmax.bf16 %v1036_v24, %v977_v18  ;;  %v978_v36 = vmax.bf16 %v902_v55, %v833_v19  ;;  %v4158_v17 = vcombine.low %v4716_v30, %v4719_v10 }
  0x56   : > { %v418_v53 = vmax.bf16 %v380_v37, %v4612_v59  ;;  %v4217_v14 = vrot.slane %v4175_v44, 10  ;;  %v3287_v41 = vrot.slane %v4176_v42, 6  ;;  %v3290_v15 = vrot.slane %v4177_v39, 6 }
  0x57   : > { %v4730_v11 = vmax.bf16 %v417_v33, %v4674_v23  ;;  %v1267_v28 = vmax.bf16 %v1193_v63, %v1154_v52  ;;  %v1155_v60 = vmax.bf16 %v1035_v13, %v978_v36  ;;  %v240_v45 = vrot.slane %v4158_v17, 5 }
  0x58   : > { %v4733_v62 = vmax.bf16 %v418_v53, %v4709_v27  ;;  %v3288_v34 = vsel %vm4572_vm7, %v4217_v14, %v3287_v41  ;;  %v3289_v55 = vrot.slane %v3287_v41, 4 }
  0x59   : > { %6664 = vst [vmem:[#allocation23_spill] sm:$0xff] %v4730_v11  ;;  %v628_v43 = vshrl.u32 %v4730_v11, 16  ;;  %v630_v57 = vshll.u32 %v4730_v11, 16  ;;  %3388 = vrot.lane.b32.xlu0 %v3288_v34, %s4367_s12  ;;  %v4178_v56 = vcombine.low %v1267_v28, %v1267_v28  ;;  %v4179_v20 = vcombine.high %v1267_v28, %v1267_v28 }
  0x5a   : > { %6665 = vst [vmem:[#allocation24_spill] sm:$0xff] %v4733_v62  ;;  %v1268_v12 = vmax.bf16 %v1192_v0, %v1155_v60  ;;  %v635_v16 = vshll.u32 %v4733_v62, 16  ;;  %v3291_v13 = vsel %vm4572_vm7, %v3289_v55, %v3290_v15  ;;  %v639_v18 = vshrl.u32 %v4733_v62, 16 }
  0x5b   : > { %v632_v37 = vrot.slane %v630_v57, 1  ;;  %v904_v24 = vrot.slane %v4730_v11, 1  ;;  %3390 = vrot.lane.b32.xlu1 %v3291_v13, %s4367_s12  ;;  %v4218_v63 = vrot.slane %v4178_v56, 10  ;;  %v3294_v19 = vrot.slane %v4179_v20, 6  ;;  %v4758_v56 = vld [vmem:[%s4396_s11 + $0x48] sm:$0xf] }
  0x5c   : > { %v4180_v44 = vcombine.low %v1268_v12, %v1268_v12  ;;  %v637_v42 = vrot.slane %v635_v16, 1  ;;  %v905_v33 = vrot.slane %v4733_v62, 1  ;;  %v1037_v0 = vrot.slane %v628_v43, 1  ;;  %6666 = vst [vmem:[#allocation25_spill] sm:$0xff] %v4758_v56  ;;  %v4761_v20 = vld [vmem:[%s4396_s11 + $0x4c] sm:$0xf] }
  0x5d   : > { %v633_v39 = vor.u32 %v632_v37, %v628_v43  ;;  %v1038_v52 = vrot.slane %v630_v57, 2  ;;  %v3295_v36 = vsel %vm4572_vm7, %v4218_v63, %v3294_v19  ;;  %v3296_v53 = vrot.slane %v3294_v19, 4  ;;  %6667 = vst [vmem:[#allocation26_spill] sm:$0xff] %v4761_v20 }
  0x5e   : > { %v3297_v17 = vrot.slane %v4180_v44, 6  ;;  %v1040_v14 = vrot.slane %v639_v18, 1  ;;  %3392 = vrot.lane.b32.xlu0 %v3295_v36, %s4367_s12  ;;  %v906_v15 = vsel %vm888_vm1, %v904_v24, %v905_v33  ;;  %v1041_v60 = vrot.slane %v635_v16, 2 }
  0x5f   : > { %v638_v41 = vsel %vm551_vm3, %v633_v39, %v637_v42  ;;  %v1039_v28 = vor.u32 %v1038_v52, %v1037_v0  ;;  %v1194_v43 = vrot.slane %v4730_v11, 2  ;;  %v1195_v57 = vrot.slane %v4733_v62, 2 }
  0x60   : > { %v3298_v34 = vsel %vm4572_vm7, %v3296_v53, %v3297_v17  ;;  %v834_v55 = vmax.bf16 %v638_v41, %v4730_v11  ;;  %v1042_v12 = vor.u32 %v1041_v60, %v1040_v14  ;;  %v641_v13 = vor.u32 %v639_v18, %v637_v42  ;;  %v4780_v18 = vld [vmem:[%s4396_s11 + $0x50] sm:$0xf]  ;;  %v4783_v42 = vld [vmem:[%s4396_s11 + $0x54] sm:$0xf] }
  0x61   : > { %3394 = vrot.lane.b32.xlu1 %v3298_v34, %s4367_s12  ;;  %v4765_v16 = vsel %vm248_vm0, 4286644096, %v240_v45  ;;  %v4768_v37 = vsel %vm248_vm0, %v240_v45, 4286644096  ;;  %v1196_v63 = vsel %vm1178_vm2, %v1194_v43, %v1195_v57  ;;  %v6668_v19 = vmax.bf16 %v4578_v21, %v4502_v47  ;;  %6670 = vst [vmem:[#allocation27_spill] sm:$0xff] %v4780_v18  ;;  %6671 = vst [vmem:[#allocation28_spill] sm:$0xff] %v4783_v42 }
  0x62   : > { %v979_v24 = vmax.bf16 %v906_v15, %v834_v55  ;;  %v6669_v39 = vmax.bf16 %v4609_v32, %v4505_v48  ;;  %v1043_v45 = vsel %vm1001_vm4, %v1039_v28, %v1042_v12  ;;  %v835_v52 = vmax.bf16 %v641_v13, %v4733_v62 }
  0x63   : > { %v381_v44 = vmax.bf16 %v6668_v19, %v4605_v54  ;;  %v4159_v36 = vcombine.low %v4758_v56, %v4761_v20  ;;  %v6672_v47 = vmax.bf16 %v4605_v54, %v4578_v21  ;;  %v6673_v41 = vmax.bf16 %v4612_v59, %v4609_v32 }
  0x64   : > { %v382_v0 = vmax.bf16 %v6669_v39, %v4612_v59  ;;  %v1156_v17 = vmax.bf16 %v1043_v45, %v979_v24  ;;  %v980_v28 = vmax.bf16 %v905_v33, %v835_v52  ;;  %v4160_v55 = vcombine.low %v4780_v18, %v4783_v42 }
  0x65   : > { %v383_v53 = vmax.bf16 %v6672_v47, %v4674_v23  ;;  %v419_v48 = vmax.bf16 %v381_v44, %v4674_v23  ;;  %v384_v15 = vmax.bf16 %v6673_v41, %v4709_v27  ;;  %v241_v60 = vrot.slane %v4159_v36, 5 }
  0x66   : > { %v420_v14 = vmax.bf16 %v382_v0, %v4709_v27  ;;  %v1269_v43 = vmax.bf16 %v1196_v63, %v1156_v17  ;;  %v1157_v19 = vmax.bf16 %v1042_v12, %v980_v28  ;;  %v4815_v44 = vrot.slane %v4160_v55, 5 }
  0x67   : > { %v421_v34 = vmax.bf16 %v383_v53, %v4765_v16  ;;  %v4803_v21 = vmax.bf16 %v419_v48, %v4765_v16  ;;  %v422_v24 = vmax.bf16 %v384_v15, %v4768_v37  ;;  %v4810_v32 = vsel %vm248_vm0, 4286644096, %v241_v60 }
  0x68   : > { %v4806_v13 = vmax.bf16 %v420_v14, %v4768_v37  ;;  %v4813_v33 = vsel %vm248_vm0, %v241_v60, 4286644096  ;;  %v4181_v39 = vcombine.low %v1269_v43, %v1269_v43  ;;  %v4182_v0 = vcombine.high %v1269_v43, %v1269_v43 }
  0x69   : > { %6674 = vst [vmem:[#allocation29_spill] sm:$0xff] %v4803_v21  ;;  %v643_v63 = vshrl.u32 %v4803_v21, 16  ;;  %v645_v45 = vshll.u32 %v4803_v21, 16  ;;  %v1270_v52 = vmax.bf16 %v1195_v57, %v1157_v19  ;;  %v907_v12 = vrot.slane %v4803_v21, 1 }
  0x6a   : > { %6675 = vst [vmem:[#allocation30_spill] sm:$0xff] %v4806_v13  ;;  %v650_v36 = vshll.u32 %v4806_v13, 16  ;;  %v654_v47 = vshrl.u32 %v4806_v13, 16  ;;  %v4219_v53 = vrot.slane %v4181_v39, 10  ;;  %v3301_v17 = vrot.slane %v4182_v0, 6 }
  0x6b   : > { %v647_v48 = vrot.slane %v645_v45, 1  ;;  %v908_v14 = vrot.slane %v4806_v13, 1  ;;  %v4183_v41 = vcombine.low %v1270_v52, %v1270_v52  ;;  %v1044_v28 = vrot.slane %v643_v63, 1 }
  0x6c   : > { %v652_v15 = vrot.slane %v650_v36, 1  ;;  %v1045_v60 = vrot.slane %v645_v45, 2  ;;  %v3302_v55 = vsel %vm4572_vm7, %v4219_v53, %v3301_v17  ;;  %v3303_v43 = vrot.slane %v3301_v17, 4 }
  0x6d   : > { %v648_v57 = vor.u32 %v647_v48, %v643_v63  ;;  %v909_v19 = vsel %vm888_vm1, %v907_v12, %v908_v14  ;;  %3396 = vrot.lane.b32.xlu0 %v3302_v55, %s4367_s12  ;;  %v3304_v42 = vrot.slane %v4183_v41, 6  ;;  %v1047_v39 = vrot.slane %v654_v47, 1 }
  0x6e   : > { %v1046_v18 = vor.u32 %v1045_v60, %v1044_v28  ;;  %v1048_v0 = vrot.slane %v650_v36, 2  ;;  %v1197_v52 = vrot.slane %v4803_v21, 2  ;;  %v1198_v56 = vrot.slane %v4806_v13, 2 }
  0x6f   : > { %v653_v20 = vsel %vm551_vm3, %v648_v57, %v652_v15  ;;  %v656_v45 = vor.u32 %v654_v47, %v652_v15  ;;  %v3305_v53 = vsel %vm4572_vm7, %v3303_v43, %v3304_v42  ;;  %v4834_v12 = vmax.bf16 %v421_v34, %v4810_v32 }
  0x70   : > { %v836_v63 = vmax.bf16 %v653_v20, %v4803_v21  ;;  %v1049_v17 = vor.u32 %v1048_v0, %v1047_v39  ;;  %3398 = vrot.lane.b32.xlu1 %v3305_v53, %s4367_s12  ;;  %v1199_v36 = vsel %vm1178_vm2, %v1197_v52, %v1198_v56  ;;  %v4840_v41 = vmax.bf16 %v422_v24, %v4813_v33 }
  0x71   : > { %6676 = vst [vmem:[#allocation31_spill] sm:$0xff] %v4834_v12  ;;  %v837_v48 = vmax.bf16 %v656_v45, %v4806_v13  ;;  %v4844_v47 = vsel %vm248_vm0, 4286644096, %v4815_v44  ;;  %v658_v15 = vshrl.u32 %v4834_v12, 16  ;;  %v660_v34 = vshll.u32 %v4834_v12, 16 }
  0x72   : > { %6677 = vst [vmem:[#allocation32_spill] sm:$0xff] %v4840_v41  ;;  %v981_v42 = vmax.bf16 %v909_v19, %v836_v63  ;;  %v1050_v20 = vsel %vm1001_vm4, %v1046_v18, %v1049_v17  ;;  %v665_v60 = vshll.u32 %v4840_v41, 16  ;;  %v669_v55 = vshrl.u32 %v4840_v41, 16 }
  0x73   : > { %v982_v28 = vmax.bf16 %v908_v14, %v837_v48  ;;  %v910_v43 = vrot.slane %v4834_v12, 1  ;;  %v662_v57 = vrot.slane %v660_v34, 1  ;;  %v911_v39 = vrot.slane %v4840_v41, 1 }
  0x74   : > { %v1158_v24 = vmax.bf16 %v1050_v20, %v981_v42  ;;  %v1051_v0 = vrot.slane %v658_v15, 1  ;;  %v667_v19 = vrot.slane %v665_v60, 1  ;;  %v1052_v45 = vrot.slane %v660_v34, 2 }
  0x75   : > { %v1159_v52 = vmax.bf16 %v1049_v17, %v982_v28  ;;  %v1054_v18 = vrot.slane %v669_v55, 1  ;;  %v663_v63 = vor.u32 %v662_v57, %v658_v15  ;;  %v912_v14 = vsel %vm888_vm1, %v910_v43, %v911_v39  ;;  %v4860_v57 = vld [vmem:[%s4396_s11 + $0x58] sm:$0xf] }
  0x76   : > { %v1271_v53 = vmax.bf16 %v1199_v36, %v1158_v24  ;;  %v1055_v48 = vrot.slane %v665_v60, 2  ;;  %v1053_v30 = vor.u32 %v1052_v45, %v1051_v0  ;;  %v1200_v9 = vrot.slane %v4834_v12, 2  ;;  %6678 = vst [vmem:[#allocation33_spill] sm:$0xff] %v4860_v57  ;;  %v4863_v60 = vld [vmem:[%s4396_s11 + $0x5c] sm:$0xf] }
  0x77   : > { %v1272_v10 = vmax.bf16 %v1198_v56, %v1159_v52  ;;  %v1201_v42 = vrot.slane %v4840_v41, 2  ;;  %v668_v17 = vsel %vm551_vm3, %v663_v63, %v667_v19  ;;  %v671_v24 = vor.u32 %v669_v55, %v667_v19  ;;  %6679 = vst [vmem:[#allocation34_spill] sm:$0xff] %v4863_v60 }
  0x78   : > { %v4184_v20 = vcombine.low %v1271_v53, %v1271_v53  ;;  %v4185_v8 = vcombine.high %v1271_v53, %v1271_v53  ;;  %v1056_v28 = vor.u32 %v1055_v48, %v1054_v18  ;;  %v838_v36 = vmax.bf16 %v668_v17, %v4834_v12 }
  0x79   : > { %v4186_v34 = vcombine.low %v1272_v10, %v1272_v10  ;;  %v1202_v15 = vsel %vm1178_vm2, %v1200_v9, %v1201_v42  ;;  %v4868_v52 = vsel %vm248_vm0, %v4815_v44, 4286644096  ;;  %v839_v10 = vmax.bf16 %v671_v24, %v4840_v41  ;;  %v4892_v24 = vld [vmem:[%s4396_s11 + $0x60] sm:$0xf] }
  0x7a   : > { %v4220_v56 = vrot.slane %v4184_v20, 10  ;;  %v3308_v43 = vrot.slane %v4185_v8, 6  ;;  %v1057_v0 = vsel %vm1001_vm4, %v1053_v30, %v1056_v28  ;;  %v983_v18 = vmax.bf16 %v912_v14, %v838_v36  ;;  %6680 = vst [vmem:[#allocation35_spill] sm:$0xff] %v4892_v24 }
  0x7b   : > { %v3311_v45 = vrot.slane %v4186_v34, 6  ;;  %v349_v9 = vmax.bf16 %v4674_v23, %v4605_v54  ;;  %v350_v8 = vmax.bf16 %v4709_v27, %v4612_v59  ;;  %v4161_v30 = vcombine.low %v4860_v57, %v4863_v60 }
  0x7c   : > { %v3309_v55 = vsel %vm4572_vm7, %v4220_v56, %v3308_v43  ;;  %v3310_v19 = vrot.slane %v3308_v43, 4  ;;  %v1160_v44 = vmax.bf16 %v1057_v0, %v983_v18  ;;  %v984_v53 = vmax.bf16 %v911_v39, %v839_v10 }
  0x7d   : > { %3400 = vrot.lane.b32.xlu0 %v3309_v55, %s4367_s12  ;;  %v385_v63 = vmax.bf16 %v349_v9, %v4765_v16  ;;  %v351_v54 = vmax.bf16 %v4765_v16, %v4674_v23  ;;  %v386_v48 = vmax.bf16 %v350_v8, %v4768_v37  ;;  %v243_v59 = vrot.slane %v4161_v30, 5  ;;  %v4895_v23 = vld [vmem:[%s4396_s11 + $0x64] sm:$0xf] }
  0x7e   : > { %v3312_v14 = vsel %vm4572_vm7, %v3310_v19, %v3311_v45  ;;  %v352_v20 = vmax.bf16 %v4768_v37, %v4709_v27  ;;  %v1273_v17 = vmax.bf16 %v1202_v15, %v1160_v44  ;;  %v1161_v34 = vmax.bf16 %v1056_v28, %v984_v53  ;;  %6681 = vst [vmem:[#allocation36_spill] sm:$0xff] %v4895_v23 }
  0x7f   : > { %3402 = vrot.lane.b32.xlu1 %v3312_v14, %s4367_s12  ;;  %v423_v39 = vmax.bf16 %v385_v63, %v4810_v32  ;;  %v387_v36 = vmax.bf16 %v351_v54, %v4810_v32  ;;  %v424_v56 = vmax.bf16 %v386_v48, %v4813_v33  ;;  %v4899_v43 = vsel %vm248_vm0, 4286644096, %v243_v59 }
  0x80   : > { %v4902_v0 = vsel %vm248_vm0, %v243_v59, 4286644096  ;;  %v388_v27 = vmax.bf16 %v352_v20, %v4813_v33  ;;  %v4187_v15 = vcombine.low %v1273_v17, %v1273_v17  ;;  %v4188_v28 = vcombine.high %v1273_v17, %v1273_v17 }
  0x81   : > { %v1274_v45 = vmax.bf16 %v1201_v42, %v1161_v34  ;;  %v4906_v18 = vmax.bf16 %v423_v39, %v4844_v47  ;;  %v4909_v10 = vmax.bf16 %v424_v56, %v4868_v52  ;;  %v425_v9 = vmax.bf16 %v387_v36, %v4844_v47 }
  0x82   : > { %v426_v55 = vmax.bf16 %v388_v27, %v4868_v52  ;;  %v4162_v19 = vcombine.low %v4892_v24, %v4895_v23  ;;  %v4221_v8 = vrot.slane %v4187_v15, 10  ;;  %v3315_v30 = vrot.slane %v4188_v28, 6 }
  0x83   : > { %6682 = vst [vmem:[#allocation37_spill] sm:$0xff] %v4906_v18  ;;  %6683 = vst [vmem:[#allocation38_spill] sm:$0xff] %v4909_v10  ;;  %v4189_v44 = vcombine.low %v1274_v45, %v1274_v45  ;;  %v673_v53 = vshrl.u32 %v4906_v18, 16  ;;  %v675_v42 = vshll.u32 %v4906_v18, 16  ;;  %v680_v63 = vshll.u32 %v4909_v10, 16 }
  0x84   : > { %v684_v54 = vshrl.u32 %v4909_v10, 16  ;;  %v913_v14 = vrot.slane %v4906_v18, 1  ;;  %v3316_v48 = vsel %vm4572_vm7, %v4221_v8, %v3315_v30  ;;  %v3317_v59 = vrot.slane %v3315_v30, 4 }
  0x85   : > { %v3318_v20 = vrot.slane %v4189_v44, 6  ;;  %v914_v17 = vrot.slane %v4909_v10, 1  ;;  %3404 = vrot.lane.b32.xlu0 %v3316_v48, %s4367_s12  ;;  %v677_v34 = vrot.slane %v675_v42, 1  ;;  %v682_v39 = vrot.slane %v680_v63, 1 }
  0x86   : > { %v1058_v36 = vrot.slane %v673_v53, 1  ;;  %v1059_v56 = vrot.slane %v675_v42, 2  ;;  %v1061_v28 = vrot.slane %v684_v54, 1  ;;  %v1062_v45 = vrot.slane %v680_v63, 2 }
  0x87   : > { %v3319_v27 = vsel %vm4572_vm7, %v3317_v59, %v3318_v20  ;;  %v915_v15 = vsel %vm888_vm1, %v913_v14, %v914_v17  ;;  %v678_v8 = vor.u32 %v677_v34, %v673_v53  ;;  %v1203_v44 = vrot.slane %v4906_v18, 2 }
  0x88   : > { %3406 = vrot.lane.b32.xlu1 %v3319_v27, %s4367_s12  ;;  %v1060_v30 = vor.u32 %v1059_v56, %v1058_v36  ;;  %v1204_v23 = vrot.slane %v4909_v10, 2  ;;  %v1063_v48 = vor.u32 %v1062_v45, %v1061_v28  ;;  %v686_v24 = vor.u32 %v684_v54, %v682_v39 }
  0x89   : > { %v4931_v60 = vmax.bf16 %v425_v9, %v4899_v43  ;;  %v4934_v42 = vmax.bf16 %v426_v55, %v4902_v0  ;;  %v683_v14 = vsel %vm551_vm3, %v678_v8, %v682_v39  ;;  %v244_v59 = vrot.slane %v4162_v19, 5 }
  0x8a   : > { %v1205_v63 = vsel %vm1178_vm2, %v1203_v44, %v1204_v23  ;;  %v353_v53 = vmax.bf16 %v4810_v32, %v4765_v16  ;;  %v840_v20 = vmax.bf16 %v683_v14, %v4906_v18  ;;  %v1064_v34 = vsel %vm1001_vm4, %v1060_v30, %v1063_v48 }
  0x8b   : > { %6684 = vst [vmem:[#allocation39_spill] sm:$0xff] %v4931_v60  ;;  %6685 = vst [vmem:[#allocation40_spill] sm:$0xff] %v4934_v42  ;;  %v841_v54 = vmax.bf16 %v686_v24, %v4909_v10  ;;  %v688_v9 = vshrl.u32 %v4931_v60, 16  ;;  %v690_v36 = vshll.u32 %v4931_v60, 16  ;;  %v695_v55 = vshll.u32 %v4934_v42, 16 }
  0x8c   : > { %v699_v39 = vshrl.u32 %v4934_v42, 16  ;;  %v916_v56 = vrot.slane %v4931_v60, 1  ;;  %v985_v19 = vmax.bf16 %v915_v15, %v840_v20  ;;  %v917_v16 = vrot.slane %v4934_v42, 1 }
  0x8d   : > { %v986_v27 = vmax.bf16 %v914_v17, %v841_v54  ;;  %v1065_v28 = vrot.slane %v688_v9, 1  ;;  %v692_v45 = vrot.slane %v690_v36, 1  ;;  %v697_v8 = vrot.slane %v695_v55, 1 }
  0x8e   : > { %v1066_v30 = vrot.slane %v690_v36, 2  ;;  %v1068_v44 = vrot.slane %v699_v39, 1  ;;  %v1162_v24 = vmax.bf16 %v1064_v34, %v985_v19  ;;  %v918_v57 = vsel %vm888_vm1, %v916_v56, %v917_v16 }
  0x8f   : > { %v1163_v14 = vmax.bf16 %v1063_v48, %v986_v27  ;;  %v1069_v7 = vrot.slane %v695_v55, 2  ;;  %v693_v6 = vor.u32 %v692_v45, %v688_v9  ;;  %v1206_v4 = vrot.slane %v4931_v60, 2 }
  0x90   : > { %v1067_v5 = vor.u32 %v1066_v30, %v1065_v28  ;;  %v1207_v17 = vrot.slane %v4934_v42, 2  ;;  %v1275_v15 = vmax.bf16 %v1205_v63, %v1162_v24  ;;  %v701_v10 = vor.u32 %v699_v39, %v697_v8  ;;  %v4962_v28 = vld [vmem:[%s4396_s11 + $0x68] sm:$0xf] }
  0x91   : > { %v1276_v20 = vmax.bf16 %v1204_v23, %v1163_v14  ;;  %v1070_v54 = vor.u32 %v1069_v7, %v1068_v44  ;;  %v698_v36 = vsel %vm551_vm3, %v693_v6, %v697_v8  ;;  %v4955_v48 = vsel %vm248_vm0, 4286644096, %v244_v59  ;;  %6686 = vst [vmem:[#allocation41_spill] sm:$0xff] %v4962_v28  ;;  %v4965_v23 = vld [vmem:[%s4396_s11 + $0x6c] sm:$0xf] }
  0x92   : > { %v1208_v34 = vsel %vm1178_vm2, %v1206_v4, %v1207_v17  ;;  %v4958_v9 = vsel %vm248_vm0, %v244_v59, 4286644096  ;;  %v4190_v55 = vcombine.low %v1275_v15, %v1275_v15  ;;  %v4191_v56 = vcombine.high %v1275_v15, %v1275_v15  ;;  %6687 = vst [vmem:[#allocation42_spill] sm:$0xff] %v4965_v23 }
  0x93   : > { %v4192_v19 = vcombine.low %v1276_v20, %v1276_v20  ;;  %v842_v27 = vmax.bf16 %v698_v36, %v4931_v60  ;;  %v1071_v7 = vsel %vm1001_vm4, %v1067_v5, %v1070_v54  ;;  %v843_v6 = vmax.bf16 %v701_v10, %v4934_v42 }
  0x94   : > { %v354_v4 = vmax.bf16 %v4813_v33, %v4768_v37  ;;  %v389_v63 = vmax.bf16 %v353_v53, %v4844_v47  ;;  %v4222_v59 = vrot.slane %v4190_v55, 10  ;;  %v3322_v39 = vrot.slane %v4191_v56, 6 }
  0x95   : > { %v3325_v45 = vrot.slane %v4192_v19, 6  ;;  %v987_v8 = vmax.bf16 %v918_v57, %v842_v27  ;;  %v988_v30 = vmax.bf16 %v917_v16, %v843_v6  ;;  %v4163_v14 = vcombine.low %v4962_v28, %v4965_v23 }
  0x96   : > { %v390_v44 = vmax.bf16 %v354_v4, %v4868_v52  ;;  %v427_v24 = vmax.bf16 %v389_v63, %v4899_v43  ;;  %v3323_v5 = vsel %vm4572_vm7, %v4222_v59, %v3322_v39  ;;  %v3324_v10 = vrot.slane %v3322_v39, 4 }
  0x97   : > { %v1164_v15 = vmax.bf16 %v1071_v7, %v987_v8  ;;  %v355_v37 = vmax.bf16 %v4844_v47, %v4810_v32  ;;  %3408 = vrot.lane.b32.xlu0 %v3323_v5, %s4367_s12  ;;  %v1165_v53 = vmax.bf16 %v1070_v54, %v988_v30  ;;  %v245_v20 = vrot.slane %v4163_v14, 5 }
  0x98   : > { %v428_v57 = vmax.bf16 %v390_v44, %v4902_v0  ;;  %v4983_v16 = vmax.bf16 %v427_v24, %v4955_v48  ;;  %v3326_v36 = vsel %vm4572_vm7, %v3324_v10, %v3325_v45  ;;  %v356_v56 = vmax.bf16 %v4868_v52, %v4813_v33 }
  0x99   : > { %v1277_v55 = vmax.bf16 %v1208_v34, %v1164_v15  ;;  %v391_v19 = vmax.bf16 %v355_v37, %v4899_v43  ;;  %3410 = vrot.lane.b32.xlu1 %v3326_v36, %s4367_s12  ;;  %v1278_v32 = vmax.bf16 %v1207_v17, %v1165_v53 }
  0x9a   : > { %6688 = vst [vmem:[#allocation43_spill] sm:$0xff] %v4983_v16  ;;  %v4992_v54 = vmax.bf16 %v428_v57, %v4958_v9  ;;  %v703_v27 = vshrl.u32 %v4983_v16, 16  ;;  %v705_v7 = vshll.u32 %v4983_v16, 16  ;;  %v919_v63 = vrot.slane %v4983_v16, 1 }
  0x9b   : > { %v4193_v6 = vcombine.low %v1277_v55, %v1277_v55  ;;  %v4194_v4 = vcombine.high %v1277_v55, %v1277_v55  ;;  %v1209_v34 = vrot.slane %v4983_v16, 2  ;;  %v4195_v59 = vcombine.low %v1278_v32, %v1278_v32 }
  0x9c   : > { %6689 = vst [vmem:[#allocation44_spill] sm:$0xff] %v4992_v54  ;;  %v707_v33 = vrot.slane %v705_v7, 1  ;;  %v710_v39 = vshll.u32 %v4992_v54, 16  ;;  %v714_v45 = vshrl.u32 %v4992_v54, 16  ;;  %v920_v30 = vrot.slane %v4992_v54, 1 }
  0x9d   : > { %v4223_v17 = vrot.slane %v4193_v6, 10  ;;  %v3329_v8 = vrot.slane %v4194_v4, 6  ;;  %v1072_v44 = vrot.slane %v703_v27, 1  ;;  %v3332_v24 = vrot.slane %v4195_v59, 6  ;;  %v5008_v4 = vld [vmem:[%s4396_s11 + $0x70] sm:$0xf] }
  0x9e   : > { %v708_v14 = vor.u32 %v707_v33, %v703_v27  ;;  %v712_v5 = vrot.slane %v710_v39, 1  ;;  %v1073_v10 = vrot.slane %v705_v7, 2  ;;  %v921_v53 = vsel %vm888_vm1, %v919_v63, %v920_v30  ;;  %6690 = vst [vmem:[#allocation45_spill] sm:$0xff] %v5008_v4  ;;  %v5011_v27 = vld [vmem:[%s4396_s11 + $0x74] sm:$0xf] }
  0x9f   : > { %v3330_v15 = vsel %vm4572_vm7, %v4223_v17, %v3329_v8  ;;  %v3331_v37 = vrot.slane %v3329_v8, 4  ;;  %v1075_v57 = vrot.slane %v714_v45, 1  ;;  %v1076_v32 = vrot.slane %v710_v39, 2  ;;  %6691 = vst [vmem:[#allocation46_spill] sm:$0xff] %v5011_v27 }
  0xa0   : > { %3412 = vrot.lane.b32.xlu0 %v3330_v15, %s4367_s12  ;;  %v713_v36 = vsel %vm551_vm3, %v708_v14, %v712_v5  ;;  %v1074_v55 = vor.u32 %v1073_v10, %v1072_v44  ;;  %v1210_v6 = vrot.slane %v4992_v54, 2  ;;  %v716_v59 = vor.u32 %v714_v45, %v712_v5  ;;  %v5030_v5 = vld [vmem:[%s4396_s11 + $0x78] sm:$0xf]  ;;  %v5033_v15 = vld [vmem:[%s4396_s11 + $0x7c] sm:$0xf] }
  0xa1   : > { %v3333_v7 = vsel %vm4572_vm7, %v3331_v37, %v3332_v24  ;;  %v844_v63 = vmax.bf16 %v713_v36, %v4983_v16  ;;  %v5017_v33 = vsel %vm248_vm0, 4286644096, %v245_v20  ;;  %v1077_v39 = vor.u32 %v1076_v32, %v1075_v57  ;;  %6692 = vst [vmem:[#allocation47_spill] sm:$0xff] %v5030_v5  ;;  %6693 = vst [vmem:[#allocation48_spill] sm:$0xff] %v5033_v15 }
  0xa2   : > { %3414 = vrot.lane.b32.xlu1 %v3333_v7, %s4367_s12  ;;  %v1211_v17 = vsel %vm1178_vm2, %v1209_v34, %v1210_v6  ;;  %v5022_v8 = vsel %vm248_vm0, %v245_v20, 4286644096  ;;  %v392_v44 = vmax.bf16 %v356_v56, %v4902_v0  ;;  %v845_v10 = vmax.bf16 %v716_v59, %v4992_v54 }
  0xa3   : > { %v989_v14 = vmax.bf16 %v921_v53, %v844_v63  ;;  %v429_v24 = vmax.bf16 %v391_v19, %v4955_v48  ;;  %v4164_v45 = vcombine.low %v5008_v4, %v5011_v27  ;;  %v1078_v37 = vsel %vm1001_vm4, %v1074_v55, %v1077_v39 }
  0xa4   : > { %v430_v34 = vmax.bf16 %v392_v44, %v4958_v9  ;;  %v357_v20 = vmax.bf16 %v4899_v43, %v4844_v47  ;;  %v358_v56 = vmax.bf16 %v4902_v0, %v4868_v52  ;;  %v990_v57 = vmax.bf16 %v920_v30, %v845_v10 }
  0xa5   : > { %v1166_v53 = vmax.bf16 %v1078_v37, %v989_v14  ;;  %v5042_v19 = vmax.bf16 %v429_v24, %v5017_v33  ;;  %v246_v36 = vrot.slane %v4164_v45, 5  ;;  %v4165_v63 = vcombine.low %v5030_v5, %v5033_v15 }
  0xa6   : > { %v5045_v32 = vmax.bf16 %v430_v34, %v5022_v8  ;;  %v393_v7 = vmax.bf16 %v357_v20, %v4955_v48  ;;  %v394_v55 = vmax.bf16 %v358_v56, %v4958_v9  ;;  %v1167_v59 = vmax.bf16 %v1077_v39, %v990_v57 }
  0xa7   : > { %6694 = vst [vmem:[#allocation49_spill] sm:$0xff] %v5042_v19  ;;  %v1279_v47 = vmax.bf16 %v1211_v17, %v1166_v53  ;;  %v718_v52 = vshrl.u32 %v5042_v19, 16  ;;  %v720_v30 = vshll.u32 %v5042_v19, 16  ;;  %v922_v10 = vrot.slane %v5042_v19, 1 }
  0xa8   : > { %6695 = vst [vmem:[#allocation50_spill] sm:$0xff] %v5045_v32  ;;  %v725_v44 = vshll.u32 %v5045_v32, 16  ;;  %v729_v14 = vshrl.u32 %v5045_v32, 16  ;;  %v923_v24 = vrot.slane %v5045_v32, 1  ;;  %v1280_v34 = vmax.bf16 %v1210_v6, %v1167_v59 }
  0xa9   : > { %v4196_v45 = vcombine.low %v1279_v47, %v1279_v47  ;;  %v4197_v37 = vcombine.high %v1279_v47, %v1279_v47  ;;  %v722_v20 = vrot.slane %v720_v30, 1  ;;  %v1079_v39 = vrot.slane %v718_v52, 1 }
  0xaa   : > { %v727_v56 = vrot.slane %v725_v44, 1  ;;  %v924_v17 = vsel %vm888_vm1, %v922_v10, %v923_v24  ;;  %v1080_v53 = vrot.slane %v720_v30, 2  ;;  %v4198_v5 = vcombine.low %v1280_v34, %v1280_v34 }
  0xab   : > { %v4224_v57 = vrot.slane %v4196_v45, 10  ;;  %v3336_v15 = vrot.slane %v4197_v37, 6  ;;  %v723_v27 = vor.u32 %v722_v20, %v718_v52  ;;  %v1082_v23 = vrot.slane %v729_v14, 1 }
  0xac   : > { %v1081_v4 = vor.u32 %v1080_v53, %v1079_v39  ;;  %v1083_v28 = vrot.slane %v725_v44, 2  ;;  %v1212_v54 = vrot.slane %v5042_v19, 2  ;;  %v3339_v6 = vrot.slane %v4198_v5, 6 }
  0xad   : > { %v3337_v16 = vsel %vm4572_vm7, %v4224_v57, %v3336_v15  ;;  %v3338_v47 = vrot.slane %v3336_v15, 4  ;;  %v728_v59 = vsel %vm551_vm3, %v723_v27, %v727_v56  ;;  %v1213_v45 = vrot.slane %v5045_v32, 2 }
  0xae   : > { %3416 = vrot.lane.b32.xlu0 %v3337_v16, %s4367_s12  ;;  %v846_v30 = vmax.bf16 %v728_v59, %v5042_v19  ;;  %v1084_v10 = vor.u32 %v1083_v28, %v1082_v23  ;;  %v731_v52 = vor.u32 %v729_v14, %v727_v56  ;;  %v5068_v37 = vsel %vm248_vm0, 4286644096, %v246_v36 }
  0xaf   : > { %v3340_v44 = vsel %vm4572_vm7, %v3338_v47, %v3339_v6  ;;  %v5071_v34 = vsel %vm248_vm0, %v246_v36, 4286644096  ;;  %v431_v5 = vmax.bf16 %v393_v7, %v5017_v33  ;;  %v1214_v28 = vsel %vm1178_vm2, %v1212_v54, %v1213_v45 }
  0xb0   : > { %6696 = vst [vmem:[#allocation51_spill] sm:$0xff] %v5071_v34  ;;  %3418 = vrot.lane.b32.xlu1 %v3340_v44, %s4367_s12  ;;  %v991_v16 = vmax.bf16 %v924_v17, %v846_v30  ;;  %v1085_v27 = vsel %vm1001_vm4, %v1081_v4, %v1084_v10  ;;  %v847_v23 = vmax.bf16 %v731_v52, %v5045_v32  ;;  %v247_v20 = vrot.slane %v4165_v63, 5 }
  0xb1   : > { %v432_v15 = vmax.bf16 %v394_v55, %v5022_v8  ;;  %v5080_v14 = vmax.bf16 %v431_v5, %v5068_v37  ;;  %v359_v36 = vmax.bf16 %v4955_v48, %v4899_v43  ;;  %v360_v17 = vmax.bf16 %v4958_v9, %v4902_v0 }
  0xb2   : > { %v1168_v56 = vmax.bf16 %v1085_v27, %v991_v16  ;;  %v992_v7 = vmax.bf16 %v923_v24, %v847_v23  ;;  %v361_v4 = vmax.bf16 %v5017_v33, %v4955_v48  ;;  %v5096_v24 = vsel %vm248_vm0, 4286644096, %v247_v20 }
  0xb3   : > { %v5089_v54 = vmax.bf16 %v432_v15, %v5071_v34  ;;  %v733_v55 = vshrl.u32 %v5080_v14, 16  ;;  %v735_v39 = vshll.u32 %v5080_v14, 16  ;;  %v925_v63 = vrot.slane %v5080_v14, 1 }
  0xb4   : > { %v1281_v53 = vmax.bf16 %v1214_v28, %v1168_v56  ;;  %v1169_v57 = vmax.bf16 %v1084_v10, %v992_v7  ;;  %v1215_v43 = vrot.slane %v5080_v14, 2 }
  0xb5   : > { %v737_v0 = vrot.slane %v735_v39, 1  ;;  %v740_v47 = vshll.u32 %v5089_v54, 16  ;;  %v744_v48 = vshrl.u32 %v5089_v54, 16  ;;  %v926_v6 = vrot.slane %v5089_v54, 1 }
  0xb6   : > { %v4199_v59 = vcombine.low %v1281_v53, %v1281_v53  ;;  %v4200_v30 = vcombine.high %v1281_v53, %v1281_v53  ;;  %v1282_v52 = vmax.bf16 %v1213_v45, %v1169_v57  ;;  %v1086_v44 = vrot.slane %v733_v55, 1 }
  0xb7   : > { %v738_v5 = vor.u32 %v737_v0, %v733_v55  ;;  %v742_v16 = vrot.slane %v740_v47, 1  ;;  %v927_v10 = vsel %vm888_vm1, %v925_v63, %v926_v6  ;;  %v1087_v27 = vrot.slane %v735_v39, 2 }
  0xb8   : > { %v4225_v28 = vrot.slane %v4199_v59, 10  ;;  %v3343_v23 = vrot.slane %v4200_v30, 6  ;;  %v4201_v15 = vcombine.low %v1282_v52, %v1282_v52  ;;  %v1089_v56 = vrot.slane %v744_v48, 1 }
  0xb9   : > { %v743_v7 = vsel %vm551_vm3, %v738_v5, %v742_v16  ;;  %v1088_v32 = vor.u32 %v1087_v27, %v1086_v44  ;;  %v1090_v19 = vrot.slane %v740_v47, 2  ;;  %v1216_v42 = vrot.slane %v5089_v54, 2 }
  0xba   : > { %v3344_v53 = vsel %vm4572_vm7, %v4225_v28, %v3343_v23  ;;  %v3345_v45 = vrot.slane %v3343_v23, 4  ;;  %v3346_v57 = vrot.slane %v4201_v15, 6  ;;  %v848_v55 = vmax.bf16 %v743_v7, %v5080_v14 }
  0xbb   : > { %3420 = vrot.lane.b32.xlu0 %v3344_v53, %s4367_s12  ;;  %v1091_v39 = vor.u32 %v1090_v19, %v1089_v56  ;;  %v1217_v63 = vsel %vm1178_vm2, %v1215_v43, %v1216_v42  ;;  %v746_v0 = vor.u32 %v744_v48, %v742_v16  ;;  %v5110_v59 = vsel %vm248_vm0, %v247_v20, 4286644096 }
  0xbc   : > { %6697 = vst [vmem:[#allocation52_spill] sm:$0xff] %v5110_v59  ;;  %v3347_v47 = vsel %vm4572_vm7, %v3345_v45, %v3346_v57  ;;  %v993_v30 = vmax.bf16 %v927_v10, %v848_v55  ;;  %v395_v52 = vmax.bf16 %v359_v36, %v5017_v33  ;;  %v396_v44 = vmax.bf16 %v360_v17, %v5022_v8 }
  0xbd   : > { %3422 = vrot.lane.b32.xlu1 %v3347_v47, %s4367_s12  ;;  %v1092_v5 = vsel %vm1001_vm4, %v1088_v32, %v1091_v39  ;;  %v849_v19 = vmax.bf16 %v746_v0, %v5089_v54  ;;  %v362_v43 = vmax.bf16 %v5022_v8, %v4958_v9  ;;  %v397_v20 = vmax.bf16 %v361_v4, %v5068_v37 }
  0xbe   : > { %v1170_v48 = vmax.bf16 %v1092_v5, %v993_v30  ;;  %v433_v16 = vmax.bf16 %v395_v52, %v5068_v37  ;;  %v434_v10 = vmax.bf16 %v396_v44, %v5071_v34  ;;  %v363_v36 = vmax.bf16 %v5068_v37, %v5017_v33 }
  0xbf   : > { %v994_v17 = vmax.bf16 %v926_v6, %v849_v19  ;;  %v398_v27 = vmax.bf16 %v362_v43, %v5071_v34  ;;  %v435_v32 = vmax.bf16 %v397_v20, %v5096_v24  ;;  %v364_v28 = vmax.bf16 %v5071_v34, %v5022_v8 }
  0xc0   : > { %v1283_v23 = vmax.bf16 %v1217_v63, %v1170_v48  ;;  %v5131_v9 = vmax.bf16 %v433_v16, %v5096_v24  ;;  %v5134_v4 = vmax.bf16 %v434_v10, %v5110_v59  ;;  %v5137_v15 = vmax.bf16 %v363_v36, %v5096_v24 }
  0xc1   : > { %v1171_v56 = vmax.bf16 %v1091_v39, %v994_v17  ;;  %v436_v33 = vmax.bf16 %v398_v27, %v5110_v59  ;;  %v5141_v6 = vmax.bf16 %v435_v32, %v4399_v2  ;;  %v5144_v7 = vmax.bf16 %v364_v28, %v5110_v59 }
  0xc2   : > { %6698 = vst [vmem:[#allocation53_spill] sm:$0xff] %v5131_v9  ;;  %6699 = vst [vmem:[#allocation54_spill] sm:$0xff] %v5134_v4  ;;  %v4202_v8 = vcombine.low %v1283_v23, %v1283_v23  ;;  %v4203_v53 = vcombine.high %v1283_v23, %v1283_v23  ;;  %v748_v45 = vshrl.u32 %v5131_v9, 16  ;;  %v750_v57 = vshll.u32 %v5131_v9, 16 }
  0xc3   : > { %6700 = vst [vmem:[#allocation55_spill] sm:$0xff] %v5141_v6  ;;  %v1284_v55 = vmax.bf16 %v1216_v42, %v1171_v56  ;;  %v755_v63 = vshll.u32 %v5134_v4, 16  ;;  %v759_v0 = vshrl.u32 %v5134_v4, 16  ;;  %v928_v39 = vrot.slane %v5131_v9, 1 }
  0xc4   : > { %v4226_v47 = vrot.slane %v4202_v8, 10  ;;  %v3350_v30 = vrot.slane %v4203_v53, 6  ;;  %v752_v52 = vrot.slane %v750_v57, 1  ;;  %v929_v44 = vrot.slane %v5134_v4, 1 }
  0xc5   : > { %v4204_v5 = vcombine.low %v1284_v55, %v1284_v55  ;;  %v757_v19 = vrot.slane %v755_v63, 1  ;;  %v1093_v43 = vrot.slane %v748_v45, 1  ;;  %v1094_v20 = vrot.slane %v750_v57, 2 }
  0xc6   : > { %v3351_v48 = vsel %vm4572_vm7, %v4226_v47, %v3350_v30  ;;  %v3352_v16 = vrot.slane %v3350_v30, 4  ;;  %v753_v42 = vor.u32 %v752_v52, %v748_v45  ;;  %v930_v10 = vsel %vm888_vm1, %v928_v39, %v929_v44 }
  0xc7   : > { %3424 = vrot.lane.b32.xlu0 %v3351_v48, %s4367_s12  ;;  %v3353_v36 = vrot.slane %v4204_v5, 6  ;;  %v1095_v17 = vor.u32 %v1094_v20, %v1093_v43  ;;  %v1096_v27 = vrot.slane %v759_v0, 1  ;;  %v1097_v32 = vrot.slane %v755_v63, 2 }
  0xc8   : > { %v758_v28 = vsel %vm551_vm3, %v753_v42, %v757_v19  ;;  %v1218_v23 = vrot.slane %v5131_v9, 2  ;;  %v1219_v56 = vrot.slane %v5134_v4, 2  ;;  %v761_v8 = vor.u32 %v759_v0, %v757_v19 }
  0xc9   : > { %v3354_v53 = vsel %vm4572_vm7, %v3352_v16, %v3353_v36  ;;  %v850_v45 = vmax.bf16 %v758_v28, %v5131_v9  ;;  %v1098_v57 = vor.u32 %v1097_v32, %v1096_v27  ;;  %v5163_v55 = vmax.bf16 %v436_v33, %v4402_v3 }
  0xca   : > { %3426 = vrot.lane.b32.xlu1 %v3354_v53, %s4367_s12  ;;  %v1220_v63 = vsel %vm1178_vm2, %v1218_v23, %v1219_v56  ;;  %v851_v39 = vmax.bf16 %v761_v8, %v5134_v4  ;;  %v763_v47 = vshrl.u32 %v5141_v6, 16  ;;  %v765_v30 = vshll.u32 %v5141_v6, 16 }
  0xcb   : > { %6701 = vst [vmem:[#allocation56_spill] sm:$0xff] %v5163_v55  ;;  %v995_v0 = vmax.bf16 %v930_v10, %v850_v45  ;;  %v1099_v52 = vsel %vm1001_vm4, %v1095_v17, %v1098_v57  ;;  %v770_v5 = vshll.u32 %v5163_v55, 16  ;;  %v774_v19 = vshrl.u32 %v5163_v55, 16 }
  0xcc   : > { %v996_v43 = vmax.bf16 %v929_v44, %v851_v39  ;;  %v767_v33 = vrot.slane %v765_v30, 1  ;;  %v931_v20 = vrot.slane %v5141_v6, 1  ;;  %v932_v48 = vrot.slane %v5163_v55, 1 }
  0xcd   : > { %v1172_v16 = vmax.bf16 %v1099_v52, %v995_v0  ;;  %v772_v42 = vrot.slane %v770_v5, 1  ;;  %v1100_v36 = vrot.slane %v763_v47, 1  ;;  %v1101_v27 = vrot.slane %v765_v30, 2 }
  0xce   : > { %v1173_v32 = vmax.bf16 %v1098_v57, %v996_v43  ;;  %v768_v28 = vor.u32 %v767_v33, %v763_v47  ;;  %v933_v10 = vsel %vm888_vm1, %v931_v20, %v932_v48  ;;  %v1103_v23 = vrot.slane %v774_v19, 1 }
  0xcf   : > { %v1285_v17 = vmax.bf16 %v1220_v63, %v1172_v16  ;;  %v1102_v8 = vor.u32 %v1101_v27, %v1100_v36  ;;  %v1104_v53 = vrot.slane %v770_v5, 2  ;;  %v1221_v45 = vrot.slane %v5141_v6, 2 }
  0xd0   : > { %v1286_v44 = vmax.bf16 %v1219_v56, %v1173_v32  ;;  %v773_v39 = vsel %vm551_vm3, %v768_v28, %v772_v42  ;;  %v1222_v59 = vrot.slane %v5163_v55, 2  ;;  %v776_v34 = vor.u32 %v774_v19, %v772_v42 }
  0xd1   : > { %v4205_v0 = vcombine.low %v1285_v17, %v1285_v17  ;;  %v4206_v52 = vcombine.high %v1285_v17, %v1285_v17  ;;  %v852_v30 = vmax.bf16 %v773_v39, %v5141_v6  ;;  %v1105_v57 = vor.u32 %v1104_v53, %v1103_v23 }
  0xd2   : > { %v4207_v47 = vcombine.low %v1286_v44, %v1286_v44  ;;  %v1223_v43 = vsel %vm1178_vm2, %v1221_v45, %v1222_v59  ;;  %v853_v63 = vmax.bf16 %v776_v34, %v5163_v55  ;;  %v437_v5 = vmax.bf16 %v5137_v15, %v4399_v2 }
  0xd3   : > { %v4227_v33 = vrot.slane %v4205_v0, 10  ;;  %v3357_v56 = vrot.slane %v4206_v52, 6  ;;  %v997_v20 = vmax.bf16 %v933_v10, %v852_v30  ;;  %v1106_v16 = vsel %vm1001_vm4, %v1102_v8, %v1105_v57 }
  0xd4   : > { %v3360_v36 = vrot.slane %v4207_v47, 6  ;;  %v998_v19 = vmax.bf16 %v932_v48, %v853_v63  ;;  %v438_v42 = vmax.bf16 %v5144_v7, %v4402_v3  ;;  %v5188_v27 = vmax.bf16 %v437_v5, %v4399_v2 }
  0xd5   : > { %v3358_v32 = vsel %vm4572_vm7, %v4227_v33, %v3357_v56  ;;  %v3359_v34 = vrot.slane %v3357_v56, 4  ;;  %v1174_v28 = vmax.bf16 %v1106_v16, %v997_v20  ;;  %v369_v15 = vmax.bf16 %v4399_v2, %v4399_v2 }
  0xd6   : > { %3428 = vrot.lane.b32.xlu0 %v3358_v32, %s4367_s12  ;;  %v1175_v10 = vmax.bf16 %v1105_v57, %v998_v19  ;;  %v5196_v23 = vmax.bf16 %v438_v42, %v4402_v3  ;;  %v778_v48 = vshrl.u32 %v5188_v27, 16  ;;  %v780_v7 = vshll.u32 %v5188_v27, 16 }
  0xd7   : > { %v3361_v17 = vsel %vm4572_vm7, %v3359_v34, %v3360_v36  ;;  %v1287_v8 = vmax.bf16 %v1223_v43, %v1174_v28  ;;  %v934_v53 = vrot.slane %v5188_v27, 1  ;;  %v1224_v45 = vrot.slane %v5188_v27, 2 }
  0xd8   : > { %3430 = vrot.lane.b32.xlu1 %v3361_v17, %s4367_s12  ;;  %v1288_v44 = vmax.bf16 %v1222_v59, %v1175_v10  ;;  %v782_v39 = vrot.slane %v780_v7, 1  ;;  %v785_v0 = vshll.u32 %v5196_v23, 16  ;;  %v789_v52 = vshrl.u32 %v5196_v23, 16 }
  0xd9   : > { %v4208_v30 = vcombine.low %v1287_v8, %v1287_v8  ;;  %v4209_v57 = vcombine.high %v1287_v8, %v1287_v8  ;;  %v935_v47 = vrot.slane %v5196_v23, 1  ;;  %v1107_v63 = vrot.slane %v778_v48, 1 }
  0xda   : > { %v4210_v5 = vcombine.low %v1288_v44, %v1288_v44  ;;  %v783_v33 = vor.u32 %v782_v39, %v778_v48  ;;  %v787_v43 = vrot.slane %v785_v0, 1  ;;  %v1108_v56 = vrot.slane %v780_v7, 2 }
  0xdb   : > { %v4228_v20 = vrot.slane %v4208_v30, 10  ;;  %v3364_v16 = vrot.slane %v4209_v57, 6  ;;  %v936_v36 = vsel %vm888_vm1, %v934_v53, %v935_v47  ;;  %v1110_v19 = vrot.slane %v789_v52, 1 }
  0xdc   : > { %v3367_v59 = vrot.slane %v4210_v5, 6  ;;  %v788_v42 = vsel %vm551_vm3, %v783_v33, %v787_v43  ;;  %v1109_v32 = vor.u32 %v1108_v56, %v1107_v63  ;;  %v1111_v34 = vrot.slane %v785_v0, 2 }
  0xdd   : > { %v3365_v28 = vsel %vm4572_vm7, %v4228_v20, %v3364_v16  ;;  %v3366_v10 = vrot.slane %v3364_v16, 4  ;;  %v854_v17 = vmax.bf16 %v788_v42, %v5188_v27  ;;  %v1225_v48 = vrot.slane %v5196_v23, 2 }
  0xde   : > { %3432 = vrot.lane.b32.xlu0 %v3365_v28, %s4367_s12  ;;  %v1112_v7 = vor.u32 %v1111_v34, %v1110_v19  ;;  %v791_v8 = vor.u32 %v789_v52, %v787_v43  ;;  %v370_v53 = vmax.bf16 %v4402_v3, %v4402_v3  ;;  %v405_v44 = vmax.bf16 %v369_v15, %v4399_v2 }
  0xdf   : > { %v3368_v39 = vsel %vm4572_vm7, %v3366_v10, %v3367_v59  ;;  %v999_v0 = vmax.bf16 %v936_v36, %v854_v17  ;;  %v1226_v30 = vsel %vm1178_vm2, %v1224_v45, %v1225_v48  ;;  %v407_v56 = vmax.bf16 %v369_v15, %v4454_v25 }
  0xe0   : > { %3434 = vrot.lane.b32.xlu1 %v3368_v39, %s4367_s12  ;;  %v1113_v57 = vsel %vm1001_vm4, %v1109_v32, %v1112_v7  ;;  %v855_v63 = vmax.bf16 %v791_v8, %v5196_v23  ;;  %v5225_v5 = vmax.bf16 %v370_v53, %v4402_v3  ;;  %v5228_v52 = vmax.bf16 %v405_v44, %v4399_v2 }
  0xe1   : > { %v1176_v33 = vmax.bf16 %v1113_v57, %v999_v0  ;;  %v445_v43 = vmax.bf16 %v405_v44, %v4454_v25  ;;  %v408_v20 = vmax.bf16 %v370_v53, %v4457_v26  ;;  %v5237_v36 = vmax.bf16 %v4667_v35, %v4499_v46 }
  0xe2   : > { %v1000_v45 = vmax.bf16 %v935_v47, %v855_v63  ;;  %v446_v16 = vmax.bf16 %v5225_v5, %v4457_v26  ;;  %v5241_v19 = vmax.bf16 %v4670_v58, %v4510_v50  ;;  %v447_v25 = vmax.bf16 %v407_v56, %v4462_v29 }
  0xe3   : > { %6702 = vst [vmem:[#allocation57_spill] sm:$0xff] %v5237_v36  ;;  %v1289_v59 = vmax.bf16 %v1226_v30, %v1176_v33  ;;  %v5244_v42 = vmax.bf16 %v4565_v38, %v445_v43  ;;  %v448_v15 = vmax.bf16 %v408_v20, %v4468_v31  ;;  %v6587_v34 = vshll.u32 %v5237_v36, 16 }
  0xe4   : > { %6703 = vst [vmem:[#allocation58_spill] sm:$0xff] %v5241_v19  ;;  %v1177_v47 = vmax.bf16 %v1112_v7, %v1000_v45  ;;  %v5249_v32 = vmax.bf16 %v4568_v61, %v446_v16 }
  0xe5   : > { %6704 = vst [vmem:[#allocation59_spill] sm:$0xff] %v5244_v42  ;;  %v4211_v28 = vcombine.low %v1289_v59, %v1289_v59  ;;  %v4212_v10 = vcombine.high %v1289_v59, %v1289_v59  ;;  %v1292_v17 = vshrl.u32 %v5244_v42, 16  ;;  %v1294_v8 = vshll.u32 %v5244_v42, 16 }
  0xe6   : > { %6705 = vst [vmem:[#allocation60_spill] sm:$0xff] %v5249_v32  ;;  %v1290_v53 = vmax.bf16 %v1225_v48, %v1177_v47  ;;  %v1299_v44 = vshll.u32 %v5249_v32, 16  ;;  %v1303_v29 = vshrl.u32 %v5249_v32, 16  ;;  %v1627_v31 = vrot.slane %v5244_v42, 1 }
  0xe7   : > { %v4229_v7 = vrot.slane %v4211_v28, 10  ;;  %v3371_v39 = vrot.slane %v4212_v10, 6  ;;  %v1296_v0 = vrot.slane %v1294_v8, 1  ;;  %v1628_v30 = vrot.slane %v5249_v32, 1 }
  0xe8   : > { %v4213_v57 = vcombine.low %v1290_v53, %v1290_v53  ;;  %v1301_v63 = vrot.slane %v1299_v44, 1  ;;  %v1739_v33 = vrot.slane %v1292_v17, 1  ;;  %v1740_v43 = vrot.slane %v1294_v8, 2 }
  0xe9   : > { %v3372_v56 = vsel %vm4572_vm7, %v4229_v7, %v3371_v39  ;;  %v3373_v20 = vrot.slane %v3371_v39, 4  ;;  %v1297_v48 = vor.u32 %v1296_v0, %v1292_v17  ;;  %v1629_v45 = vsel %vm888_vm1, %v1627_v31, %v1628_v30 }
  0xea   : > { %3436 = vrot.lane.b32.xlu0 %v3372_v56, %s4367_s12  ;;  %v3374_v16 = vrot.slane %v4213_v57, 6  ;;  %v1305_v59 = vor.u32 %v1303_v29, %v1301_v63  ;;  %v1741_v47 = vor.u32 %v1740_v43, %v1739_v33  ;;  %v1742_v28 = vrot.slane %v1303_v29, 1 }
  0xeb   : > { %v1302_v10 = vsel %vm551_vm3, %v1297_v48, %v1301_v63  ;;  %v1743_v26 = vrot.slane %v1299_v44, 2  ;;  %v1915_v53 = vrot.slane %v5244_v42, 2  ;;  %v1916_v8 = vrot.slane %v5249_v32, 2 }
  0xec   : > { %v3375_v7 = vsel %vm4572_vm7, %v3373_v20, %v3374_v16  ;;  %v1563_v17 = vmax.bf16 %v1302_v10, %v5244_v42  ;;  %v1564_v31 = vmax.bf16 %v1305_v59, %v5249_v32  ;;  %v5271_v39 = vmax.bf16 %v4661_v40, %v447_v25 }
  0xed   : > { %3438 = vrot.lane.b32.xlu1 %v3375_v7, %s4367_s12  ;;  %v1744_v29 = vor.u32 %v1743_v26, %v1742_v28  ;;  %v1917_v0 = vsel %vm1178_vm2, %v1915_v53, %v1916_v8  ;;  %v5276_v44 = vmax.bf16 %v4664_v49, %v448_v15  ;;  %v1326_v57 = vrot.slane %v6587_v34, 1 }
  0xee   : > { %6706 = vst [vmem:[#allocation61_spill] sm:$0xff] %v5271_v39  ;;  %v1707_v51 = vmax.bf16 %v1629_v45, %v1563_v17  ;;  %v1708_v63 = vmax.bf16 %v1628_v30, %v1564_v31  ;;  %v1307_v33 = vshrl.u32 %v5271_v39, 16  ;;  %v1309_v43 = vshll.u32 %v5271_v39, 16 }
  0xef   : > { %6707 = vst [vmem:[#allocation62_spill] sm:$0xff] %v5276_v44  ;;  %v1745_v25 = vsel %vm1001_vm4, %v1741_v47, %v1744_v29  ;;  %v1314_v56 = vshll.u32 %v5276_v44, 16  ;;  %v1318_v26 = vshrl.u32 %v5276_v44, 16  ;;  %v1630_v20 = vrot.slane %v5271_v39, 1 }
  0xf0   : > { %v1883_v15 = vmax.bf16 %v1745_v25, %v1707_v51  ;;  %v1884_v48 = vmax.bf16 %v1744_v29, %v1708_v63  ;;  %v1311_v16 = vrot.slane %v1309_v43, 1  ;;  %v1631_v59 = vrot.slane %v5276_v44, 1 }
  0xf1   : > { %v1316_v45 = vrot.slane %v1314_v56, 1  ;;  %v1746_v30 = vrot.slane %v1307_v33, 1  ;;  %v1747_v28 = vrot.slane %v1309_v43, 2  ;;  %v1749_v10 = vrot.slane %v1318_v26, 1 }
  0xf2   : > { %v1995_v53 = vmax.bf16 %v1917_v0, %v1883_v15  ;;  %v1996_v7 = vmax.bf16 %v1916_v8, %v1884_v48  ;;  %v1312_v17 = vor.u32 %v1311_v16, %v1307_v33  ;;  %v1632_v47 = vsel %vm888_vm1, %v1630_v20, %v1631_v59 }
  0xf3   : > { %v1320_v31 = vor.u32 %v1318_v26, %v1316_v45  ;;  %v1748_v34 = vor.u32 %v1747_v28, %v1746_v30  ;;  %v1750_v32 = vrot.slane %v1314_v56, 2  ;;  %v1918_v42 = vrot.slane %v5271_v39, 2 }
  0xf4   : > { %v2795_v50 = vrot.slane %v1995_v53, 2  ;;  %v2796_v51 = vrot.slane %v1996_v7, 2  ;;  %v1317_v29 = vsel %vm551_vm3, %v1312_v17, %v1316_v45  ;;  %v1919_v63 = vrot.slane %v5276_v44, 2 }
  0xf5   : > { %v1565_v25 = vmax.bf16 %v1317_v29, %v5271_v39  ;;  %v1566_v43 = vmax.bf16 %v1320_v31, %v5276_v44  ;;  %v1751_v0 = vor.u32 %v1750_v32, %v1749_v10  ;;  %v6708_v8 = vshrl.u32 %v5237_v36, 16 }
  0xf6   : > { %v2797_v26 = vsel %vm1178_vm2, %v2795_v50, %v2796_v51  ;;  %v2876_v20 = vmax.bf16 %v2796_v51, %v1996_v7  ;;  %v1920_v56 = vsel %vm1178_vm2, %v1918_v42, %v1919_v63  ;;  %v1329_v15 = vshll.u32 %v5241_v19, 16 }
  0xf7   : > { %v1327_v33 = vor.u32 %v1326_v57, %v6708_v8  ;;  %v2875_v48 = vmax.bf16 %v2797_v26, %v1995_v53  ;;  %v1709_v16 = vmax.bf16 %v1632_v47, %v1565_v25  ;;  %v1710_v45 = vmax.bf16 %v1631_v59, %v1566_v43 }
  0xf8   : > { %v1752_v30 = vsel %vm1001_vm4, %v1748_v34, %v1751_v0  ;;  %v4232_v28 = vcombine.low %v2876_v20, %v2876_v20  ;;  %v1331_v17 = vrot.slane %v1329_v15, 1  ;;  %v1333_v31 = vshrl.u32 %v5241_v19, 16 }
  0xf9   : > { %v1633_v32 = vrot.slane %v5237_v36, 1  ;;  %v4230_v10 = vcombine.low %v2875_v48, %v2875_v48  ;;  %v4231_v57 = vcombine.high %v2875_v48, %v2875_v48  ;;  %v1885_v29 = vmax.bf16 %v1752_v30, %v1709_v16 }
  0xfa   : > { %v1886_v50 = vmax.bf16 %v1751_v0, %v1710_v45  ;;  %v3641_v53 = vrot.slane %v4232_v28, 5  ;;  %v1332_v59 = vsel %vm551_vm3, %v1327_v33, %v1331_v17  ;;  %v1335_v34 = vor.u32 %v1333_v31, %v1331_v17 }
  0xfb   : > { %v1634_v7 = vrot.slane %v5241_v19, 1  ;;  %v4278_v47 = vrot.slane %v4230_v10, 9  ;;  %v3638_v51 = vrot.slane %v4231_v57, 5  ;;  %v1997_v25 = vmax.bf16 %v1920_v56, %v1885_v29 }
  0xfc   : > { %v1998_v43 = vmax.bf16 %v1919_v63, %v1886_v50  ;;  %v1567_v8 = vmax.bf16 %v1332_v59, %v5237_v36  ;;  %v1568_v0 = vmax.bf16 %v1335_v34, %v5241_v19  ;;  %v6711_v20 = vshrl.u32 %v5237_v36, 16 }
  0xfd   : > { %v1635_v26 = vsel %vm888_vm1, %v1633_v32, %v1634_v7  ;;  %v3639_v16 = vsel %vm5303_vm9, %v4278_v47, %v3638_v51  ;;  %v3640_v33 = vrot.slane %v3638_v51, 4  ;;  %v2798_v45 = vrot.slane %v1997_v25, 2 }
  0xfe   : > { %v1753_v48 = vrot.slane %v6711_v20, 1  ;;  %v2799_v30 = vrot.slane %v1998_v43, 2  ;;  %3748 = vrot.lane.b32.xlu0 %v3639_v16, %s4368_s13  ;;  %v1711_v56 = vmax.bf16 %v1635_v26, %v1567_v8  ;;  %v1712_v63 = vmax.bf16 %v1634_v7, %v1568_v0 }
  0xff   : > { %v6712_v28 = vshll.u32 %v5237_v36, 16  ;;  %v1756_v10 = vrot.slane %v1333_v31, 1  ;;  %v3642_v32 = vsel %vm5303_vm9, %v3640_v33, %v3641_v53  ;;  %v1757_v50 = vrot.slane %v1329_v15, 2 }
 0x100   : > { %v2800_v57 = vsel %vm1178_vm2, %v2798_v45, %v2799_v30  ;;  %v2878_v29 = vmax.bf16 %v2799_v30, %v1998_v43  ;;  %3750 = vrot.lane.b32.xlu1 %v3642_v32, %s4368_s13  ;;  %v1921_v47 = vrot.slane %v5237_v36, 2  ;;  %v1922_v51 = vrot.slane %v5241_v19, 2 }
 0x101   : > { %v1754_v17 = vrot.slane %v6712_v28, 2  ;;  %v2877_v59 = vmax.bf16 %v2800_v57, %v1997_v25  ;;  %v1758_v8 = vor.u32 %v1757_v50, %v1756_v10  ;;  %v5327_v31 = vmax.bf16 %v4730_v11, %v4529_v1 }
 0x102   : > { %v4235_v7 = vcombine.low %v2878_v29, %v2878_v29  ;;  %v5331_v53 = vmax.bf16 %v4733_v62, %v4537_v22  ;;  %v1923_v0 = vsel %vm1178_vm2, %v1921_v47, %v1922_v51  ;;  %v5336_v25 = vmax.bf16 %v4803_v21, %v4565_v38 }
 0x103   : > { %v1755_v34 = vor.u32 %v1754_v17, %v1753_v48  ;;  %6713 = vst [vmem:[#allocation63_spill] sm:$0xff] %v5327_v31  ;;  %v4233_v43 = vcombine.low %v2877_v59, %v2877_v59  ;;  %v4234_v15 = vcombine.high %v2877_v59, %v2877_v59  ;;  %v1888_v48 = vmax.bf16 %v1758_v8, %v1712_v63 }
 0x104   : > { %6714 = vst [vmem:[#allocation64_spill] sm:$0xff] %v5331_v53  ;;  %6715 = vst [vmem:[#allocation65_spill] sm:$0xff] %v5336_v25  ;;  %v3648_v26 = vrot.slane %v4235_v7, 5  ;;  %v1337_v16 = vshrl.u32 %v5327_v31, 16  ;;  %v1339_v28 = vshll.u32 %v5327_v31, 16  ;;  %v1344_v10 = vshll.u32 %v5331_v53, 16 }
 0x105   : > { %v1759_v20 = vsel %vm1001_vm4, %v1755_v34, %v1758_v8  ;;  %v4279_v33 = vrot.slane %v4233_v43, 9  ;;  %v3645_v45 = vrot.slane %v4234_v15, 5  ;;  %v2000_v17 = vmax.bf16 %v1922_v51, %v1888_v48 }
 0x106   : > { %v1887_v30 = vmax.bf16 %v1759_v20, %v1711_v56  ;;  %v1348_v32 = vshrl.u32 %v5331_v53, 16  ;;  %v1636_v57 = vrot.slane %v5327_v31, 1  ;;  %v1341_v63 = vrot.slane %v1339_v28, 1 }
 0x107   : > { %v3646_v38 = vsel %vm5303_vm9, %v4279_v33, %v3645_v45  ;;  %v3647_v29 = vrot.slane %v3645_v45, 4  ;;  %v2802_v59 = vrot.slane %v2000_v17, 2  ;;  %v1346_v34 = vrot.slane %v1344_v10, 1 }
 0x108   : > { %v1999_v50 = vmax.bf16 %v1923_v0, %v1887_v30  ;;  %3752 = vrot.lane.b32.xlu0 %v3646_v38, %s4368_s13  ;;  %v1637_v56 = vrot.slane %v5331_v53, 1  ;;  %v1760_v47 = vrot.slane %v1337_v16, 1  ;;  %v1342_v8 = vor.u32 %v1341_v63, %v1337_v16 }
 0x109   : > { %v3649_v51 = vsel %vm5303_vm9, %v3647_v29, %v3648_v26  ;;  %v1761_v43 = vrot.slane %v1339_v28, 2  ;;  %v2880_v15 = vmax.bf16 %v2802_v59, %v2000_v17  ;;  %v1350_v20 = vor.u32 %v1348_v32, %v1346_v34 }
 0x10a   : > { %v2801_v7 = vrot.slane %v1999_v50, 2  ;;  %3754 = vrot.lane.b32.xlu1 %v3649_v51, %s4368_s13  ;;  %v1638_v0 = vsel %vm888_vm1, %v1636_v57, %v1637_v56  ;;  %v1763_v48 = vrot.slane %v1348_v32, 1  ;;  %v1347_v45 = vsel %vm551_vm3, %v1342_v8, %v1346_v34 }
 0x10b   : > { %v1762_v30 = vor.u32 %v1761_v43, %v1760_v47  ;;  %v1764_v38 = vrot.slane %v1344_v10, 2  ;;  %v4238_v36 = vcombine.low %v2880_v15, %v2880_v15  ;;  %v1569_v26 = vmax.bf16 %v1347_v45, %v5327_v31 }
 0x10c   : > { %v2803_v33 = vsel %vm1178_vm2, %v2801_v7, %v2802_v59  ;;  %v1570_v16 = vmax.bf16 %v1350_v20, %v5331_v53  ;;  %v1924_v29 = vrot.slane %v5327_v31, 2  ;;  %v1925_v17 = vrot.slane %v5331_v53, 2 }
 0x10d   : > { %v2879_v19 = vmax.bf16 %v2803_v33, %v1999_v50  ;;  %v1765_v28 = vor.u32 %v1764_v38, %v1763_v48  ;;  %v5360_v32 = vmax.bf16 %v4806_v13, %v4568_v61  ;;  %v3655_v59 = vrot.slane %v4238_v36, 5 }
 0x10e   : > { %v1713_v34 = vmax.bf16 %v1638_v0, %v1569_v26  ;;  %v1714_v10 = vmax.bf16 %v1637_v56, %v1570_v16  ;;  %v1926_v47 = vsel %vm1178_vm2, %v1924_v29, %v1925_v17  ;;  %v1352_v51 = vshrl.u32 %v5336_v25, 16 }
 0x10f   : > { %6716 = vst [vmem:[#allocation66_spill] sm:$0xff] %v5360_v32  ;;  %v4236_v57 = vcombine.low %v2879_v19, %v2879_v19  ;;  %v4237_v63 = vcombine.high %v2879_v19, %v2879_v19  ;;  %v1766_v50 = vsel %vm1001_vm4, %v1762_v30, %v1765_v28  ;;  %v1354_v15 = vshll.u32 %v5336_v25, 16 }
 0x110   : > { %v1889_v43 = vmax.bf16 %v1766_v50, %v1713_v34  ;;  %v1890_v20 = vmax.bf16 %v1765_v28, %v1714_v10  ;;  %v1359_v61 = vshll.u32 %v5360_v32, 16  ;;  %v1363_v48 = vshrl.u32 %v5360_v32, 16 }
 0x111   : > { %v4280_v7 = vrot.slane %v4236_v57, 9  ;;  %v3652_v8 = vrot.slane %v4237_v63, 5  ;;  %v1639_v36 = vrot.slane %v5336_v25, 1  ;;  %v1356_v33 = vrot.slane %v1354_v15, 1 }
 0x112   : > { %v2001_v0 = vmax.bf16 %v1926_v47, %v1889_v43  ;;  %v2002_v45 = vmax.bf16 %v1925_v17, %v1890_v20  ;;  %v1361_v30 = vrot.slane %v1359_v61, 1  ;;  %v1640_v38 = vrot.slane %v5360_v32, 1 }
 0x113   : > { %v3653_v19 = vsel %vm5303_vm9, %v4280_v7, %v3652_v8  ;;  %v3654_v56 = vrot.slane %v3652_v8, 4  ;;  %v1767_v26 = vrot.slane %v1352_v51, 1  ;;  %v1357_v29 = vor.u32 %v1356_v33, %v1352_v51 }
 0x114   : > { %3756 = vrot.lane.b32.xlu0 %v3653_v19, %s4368_s13  ;;  %v2804_v28 = vrot.slane %v2001_v0, 2  ;;  %v1768_v57 = vrot.slane %v1354_v15, 2  ;;  %v2805_v63 = vrot.slane %v2002_v45, 2  ;;  %v1365_v34 = vor.u32 %v1363_v48, %v1361_v30 }
 0x115   : > { %v3656_v16 = vsel %vm5303_vm9, %v3654_v56, %v3655_v59  ;;  %v1641_v10 = vsel %vm888_vm1, %v1639_v36, %v1640_v38  ;;  %v1770_v50 = vrot.slane %v1363_v48, 1  ;;  %v1362_v47 = vsel %vm551_vm3, %v1357_v29, %v1361_v30 }
 0x116   : > { %3758 = vrot.lane.b32.xlu1 %v3656_v16, %s4368_s13  ;;  %v1769_v17 = vor.u32 %v1768_v57, %v1767_v26  ;;  %v1771_v7 = vrot.slane %v1359_v61, 2  ;;  %v1927_v8 = vrot.slane %v5336_v25, 2  ;;  %v2806_v43 = vsel %vm1178_vm2, %v2804_v28, %v2805_v63 }
 0x117   : > { %v2882_v20 = vmax.bf16 %v2805_v63, %v2002_v45  ;;  %v1571_v59 = vmax.bf16 %v1362_v47, %v5336_v25  ;;  %v1572_v51 = vmax.bf16 %v1365_v34, %v5360_v32  ;;  %v2881_v15 = vmax.bf16 %v2806_v43, %v2001_v0 }
 0x118   : > { %v1772_v19 = vor.u32 %v1771_v7, %v1770_v50  ;;  %v1928_v56 = vrot.slane %v5360_v32, 2  ;;  %v5385_v48 = vmax.bf16 %v4834_v12, %v4661_v40  ;;  %v5389_v30 = vmax.bf16 %v4840_v41, %v4664_v49 }
 0x119   : > { %v4241_v36 = vcombine.low %v2882_v20, %v2882_v20  ;;  %v1715_v33 = vmax.bf16 %v1641_v10, %v1571_v59  ;;  %v1716_v61 = vmax.bf16 %v1640_v38, %v1572_v51  ;;  %v4240_v45 = vcombine.high %v2881_v15, %v2881_v15 }
 0x11a   : > { %6717 = vst [vmem:[#allocation67_spill] sm:$0xff] %v5385_v48  ;;  %6718 = vst [vmem:[#allocation68_spill] sm:$0xff] %v5389_v30  ;;  %v4239_v26 = vcombine.low %v2881_v15, %v2881_v15  ;;  %v1773_v16 = vsel %vm1001_vm4, %v1769_v17, %v1772_v19  ;;  %v1929_v0 = vsel %vm1178_vm2, %v1927_v8, %v1928_v56  ;;  %v1367_v63 = vshrl.u32 %v5385_v48, 16 }
 0x11b   : > { %v3662_v28 = vrot.slane %v4241_v36, 5  ;;  %v1891_v29 = vmax.bf16 %v1773_v16, %v1715_v33  ;;  %v1892_v57 = vmax.bf16 %v1772_v19, %v1716_v61  ;;  %v3659_v40 = vrot.slane %v4240_v45, 5 }
 0x11c   : > { %v4281_v34 = vrot.slane %v4239_v26, 9  ;;  %v1369_v10 = vshll.u32 %v5385_v48, 16  ;;  %v1374_v38 = vshll.u32 %v5389_v30, 16  ;;  %v1378_v47 = vshrl.u32 %v5389_v30, 16 }
 0x11d   : > { %v2003_v50 = vmax.bf16 %v1929_v0, %v1891_v29  ;;  %v2004_v49 = vmax.bf16 %v1928_v56, %v1892_v57  ;;  %v1642_v7 = vrot.slane %v5385_v48, 1  ;;  %v3661_v17 = vrot.slane %v3659_v40, 4 }
 0x11e   : > { %v3660_v8 = vsel %vm5303_vm9, %v4281_v34, %v3659_v40  ;;  %v1371_v43 = vrot.slane %v1369_v10, 1  ;;  %v1376_v20 = vrot.slane %v1374_v38, 1  ;;  %v1643_v15 = vrot.slane %v5389_v30, 1 }
 0x11f   : > { %3760 = vrot.lane.b32.xlu0 %v3660_v8, %s4368_s13  ;;  %v2807_v59 = vrot.slane %v2003_v50, 2  ;;  %v2808_v51 = vrot.slane %v2004_v49, 2  ;;  %v1774_v19 = vrot.slane %v1367_v63, 1  ;;  %v3663_v56 = vsel %vm5303_vm9, %v3661_v17, %v3662_v28 }
 0x120   : > { %v1372_v36 = vor.u32 %v1371_v43, %v1367_v63  ;;  %v1380_v33 = vor.u32 %v1378_v47, %v1376_v20  ;;  %v1775_v61 = vrot.slane %v1369_v10, 2  ;;  %3762 = vrot.lane.b32.xlu1 %v3663_v56, %s4368_s13  ;;  %v1644_v16 = vsel %vm888_vm1, %v1642_v7, %v1643_v15 }
 0x121   : > { %v2809_v45 = vsel %vm1178_vm2, %v2807_v59, %v2808_v51  ;;  %v2884_v26 = vmax.bf16 %v2808_v51, %v2004_v49  ;;  %v1777_v0 = vrot.slane %v1378_v47, 1  ;;  %v1778_v63 = vrot.slane %v1374_v38, 2  ;;  %v6720_v38 = vld [vmem:[#allocation38_spill] sm:$0xff] }
 0x122   : > { %v2883_v29 = vmax.bf16 %v2809_v45, %v2003_v50  ;;  %v1377_v57 = vsel %vm551_vm3, %v1372_v36, %v1376_v20  ;;  %v1574_v40 = vmax.bf16 %v1380_v33, %v5389_v30  ;;  %v1776_v34 = vor.u32 %v1775_v61, %v1774_v19 }
 0x123   : > { %v4244_v8 = vcombine.low %v2884_v26, %v2884_v26  ;;  %v1573_v28 = vmax.bf16 %v1377_v57, %v5385_v48  ;;  %v1930_v10 = vrot.slane %v5385_v48, 2  ;;  %v1931_v49 = vrot.slane %v5389_v30, 2 }
 0x124   : > { %v4243_v17 = vcombine.high %v2883_v29, %v2883_v29  ;;  %v4242_v43 = vcombine.low %v2883_v29, %v2883_v29  ;;  %v1718_v56 = vmax.bf16 %v1643_v15, %v1574_v40  ;;  %v1779_v47 = vor.u32 %v1778_v63, %v1777_v0 }
 0x125   : > { %v3669_v59 = vrot.slane %v4244_v8, 5  ;;  %v1717_v7 = vmax.bf16 %v1644_v16, %v1573_v28  ;;  %v5414_v50 = vmax.bf16 %v4906_v18, %v4667_v35  ;;  %v1932_v19 = vsel %vm1178_vm2, %v1930_v10, %v1931_v49 }
 0x126   : > { %v3666_v20 = vrot.slane %v4243_v17, 5  ;;  %v4282_v51 = vrot.slane %v4242_v43, 9  ;;  %v5419_v36 = vmax.bf16 %v6720_v38, %v4670_v58  ;;  %v1780_v33 = vsel %vm1001_vm4, %v1776_v34, %v1779_v47 }
 0x127   : > { %6719 = vst [vmem:[#allocation69_spill] sm:$0xff] %v5414_v50  ;;  %v1894_v15 = vmax.bf16 %v1779_v47, %v1718_v56  ;;  %v1382_v61 = vshrl.u32 %v5414_v50, 16  ;;  %v1384_v45 = vshll.u32 %v5414_v50, 16  ;;  %v1893_v0 = vmax.bf16 %v1780_v33, %v1717_v7 }
 0x128   : > { %6721 = vst [vmem:[#allocation70_spill] sm:$0xff] %v5419_v36  ;;  %v3668_v26 = vrot.slane %v3666_v20, 4  ;;  %v3667_v16 = vsel %vm5303_vm9, %v4282_v51, %v3666_v20  ;;  %v1389_v29 = vshll.u32 %v5419_v36, 16  ;;  %v1393_v8 = vshrl.u32 %v5419_v36, 16 }
 0x129   : > { %3764 = vrot.lane.b32.xlu0 %v3667_v16, %s4368_s13  ;;  %v2006_v57 = vmax.bf16 %v1931_v49, %v1894_v15  ;;  %v1386_v40 = vrot.slane %v1384_v45, 1  ;;  %v1645_v34 = vrot.slane %v5414_v50, 1  ;;  %v2005_v63 = vmax.bf16 %v1932_v19, %v1893_v0 }
 0x12a   : > { %v3670_v28 = vsel %vm5303_vm9, %v3668_v26, %v3669_v59  ;;  %v1391_v10 = vrot.slane %v1389_v29, 1  ;;  %v1646_v17 = vrot.slane %v5419_v36, 1  ;;  %v1781_v7 = vrot.slane %v1382_v61, 1 }
 0x12b   : > { %3766 = vrot.lane.b32.xlu1 %v3670_v28, %s4368_s13  ;;  %v2811_v43 = vrot.slane %v2006_v57, 2  ;;  %v1387_v56 = vor.u32 %v1386_v40, %v1382_v61  ;;  %v1782_v47 = vrot.slane %v1384_v45, 2  ;;  %v2810_v20 = vrot.slane %v2005_v63, 2 }
 0x12c   : > { %v1395_v49 = vor.u32 %v1393_v8, %v1391_v10  ;;  %v1647_v51 = vsel %vm888_vm1, %v1645_v34, %v1646_v17  ;;  %v1784_v33 = vrot.slane %v1393_v8, 1  ;;  %v1785_v59 = vrot.slane %v1389_v29, 2  ;;  %v6723_v29 = vld [vmem:[#allocation40_spill] sm:$0xff] }
 0x12d   : > { %v2886_v15 = vmax.bf16 %v2811_v43, %v2006_v57  ;;  %v1392_v16 = vsel %vm551_vm3, %v1387_v56, %v1391_v10  ;;  %v1783_v30 = vor.u32 %v1782_v47, %v1781_v7  ;;  %v2812_v19 = vsel %vm1178_vm2, %v2810_v20, %v2811_v43 }
 0x12e   : > { %v1575_v26 = vmax.bf16 %v1392_v16, %v5414_v50  ;;  %v1576_v0 = vmax.bf16 %v1395_v49, %v5419_v36  ;;  %v1933_v40 = vrot.slane %v5414_v50, 2  ;;  %v2885_v61 = vmax.bf16 %v2812_v19, %v2005_v63 }
 0x12f   : > { %v4247_v45 = vcombine.low %v2886_v15, %v2886_v15  ;;  %v1786_v28 = vor.u32 %v1785_v59, %v1784_v33  ;;  %v1934_v48 = vrot.slane %v5419_v36, 2  ;;  %v5443_v57 = vmax.bf16 %v4931_v60, %v4730_v11 }
 0x130   : > { %v1719_v34 = vmax.bf16 %v1647_v51, %v1575_v26  ;;  %v1720_v8 = vmax.bf16 %v1646_v17, %v1576_v0  ;;  %v5447_v10 = vmax.bf16 %v6723_v29, %v4733_v62  ;;  %v4246_v43 = vcombine.high %v2885_v61, %v2885_v61 }
 0x131   : > { %6722 = vst [vmem:[#allocation71_spill] sm:$0xff] %v5443_v57  ;;  %v3676_v56 = vrot.slane %v4247_v45, 5  ;;  %v4245_v7 = vcombine.low %v2885_v61, %v2885_v61  ;;  %v1787_v47 = vsel %vm1001_vm4, %v1783_v30, %v1786_v28  ;;  %v1935_v49 = vsel %vm1178_vm2, %v1933_v40, %v1934_v48 }
 0x132   : > { %6724 = vst [vmem:[#allocation72_spill] sm:$0xff] %v5447_v10  ;;  %v1895_v63 = vmax.bf16 %v1787_v47, %v1719_v34  ;;  %v1896_v20 = vmax.bf16 %v1786_v28, %v1720_v8  ;;  %v1397_v51 = vshrl.u32 %v5443_v57, 16  ;;  %v3673_v17 = vrot.slane %v4246_v43, 5 }
 0x133   : > { %v4283_v33 = vrot.slane %v4245_v7, 9  ;;  %v1399_v15 = vshll.u32 %v5443_v57, 16  ;;  %v1404_v16 = vshll.u32 %v5447_v10, 16  ;;  %v1408_v26 = vshrl.u32 %v5447_v10, 16 }
 0x134   : > { %v2007_v59 = vmax.bf16 %v1935_v49, %v1895_v63  ;;  %v2008_v19 = vmax.bf16 %v1934_v48, %v1896_v20  ;;  %v1648_v0 = vrot.slane %v5443_v57, 1  ;;  %v3675_v61 = vrot.slane %v3673_v17, 4 }
 0x135   : > { %v3674_v30 = vsel %vm5303_vm9, %v4283_v33, %v3673_v17  ;;  %v1401_v45 = vrot.slane %v1399_v15, 1  ;;  %v1406_v40 = vrot.slane %v1404_v16, 1  ;;  %v1649_v8 = vrot.slane %v5447_v10, 1 }
 0x136   : > { %3768 = vrot.lane.b32.xlu0 %v3674_v30, %s4368_s13  ;;  %v2813_v28 = vrot.slane %v2007_v59, 2  ;;  %v2814_v34 = vrot.slane %v2008_v19, 2  ;;  %v1788_v43 = vrot.slane %v1397_v51, 1  ;;  %v3677_v48 = vsel %vm5303_vm9, %v3675_v61, %v3676_v56 }
 0x137   : > { %v1402_v7 = vor.u32 %v1401_v45, %v1397_v51  ;;  %v1410_v47 = vor.u32 %v1408_v26, %v1406_v40  ;;  %v1789_v63 = vrot.slane %v1399_v15, 2  ;;  %3770 = vrot.lane.b32.xlu1 %v3677_v48, %s4368_s13  ;;  %v1650_v17 = vsel %vm888_vm1, %v1648_v0, %v1649_v8 }
 0x138   : > { %v2815_v20 = vsel %vm1178_vm2, %v2813_v28, %v2814_v34  ;;  %v2888_v49 = vmax.bf16 %v2814_v34, %v2008_v19  ;;  %v1791_v33 = vrot.slane %v1408_v26, 1  ;;  %v1792_v51 = vrot.slane %v1404_v16, 2 }
 0x139   : > { %v2887_v30 = vmax.bf16 %v2815_v20, %v2007_v59  ;;  %v1407_v36 = vsel %vm551_vm3, %v1402_v7, %v1406_v40  ;;  %v1578_v50 = vmax.bf16 %v1410_v47, %v5447_v10  ;;  %v1790_v32 = vor.u32 %v1789_v63, %v1788_v43  ;;  %v6725_v59 = vld [vmem:[#allocation43_spill] sm:$0xff]  ;;  %v5482_v63 = vpop.permute.xlu0 %3376  ;;  %v5484_v20 = vpop.permute.xlu1 %3380 }
 0x13a   : > { %v4250_v25 = vcombine.low %v2888_v49, %v2888_v49  ;;  %v1577_v56 = vmax.bf16 %v1407_v36, %v5443_v57  ;;  %v1936_v15 = vrot.slane %v5443_v57, 2  ;;  %v1937_v19 = vrot.slane %v5447_v10, 2  ;;  %v6727_v36 = vld [vmem:[#allocation44_spill] sm:$0xff] }
 0x13b   : > { %v4249_v61 = vcombine.high %v2887_v30, %v2887_v30  ;;  %v4248_v45 = vcombine.low %v2887_v30, %v2887_v30  ;;  %v1722_v48 = vmax.bf16 %v1649_v8, %v1578_v50  ;;  %v1793_v26 = vor.u32 %v1792_v51, %v1791_v33 }
 0x13c   : > { %v3683_v28 = vrot.slane %v4250_v25, 5  ;;  %v1721_v0 = vmax.bf16 %v1650_v17, %v1577_v56  ;;  %v5472_v40 = vmax.bf16 %v6725_v59, %v4803_v21  ;;  %v1938_v7 = vsel %vm1178_vm2, %v1936_v15, %v1937_v19 }
 0x13d   : > { %v3680_v34 = vrot.slane %v4249_v61, 5  ;;  %v4284_v43 = vrot.slane %v4248_v45, 9  ;;  %v5477_v16 = vmax.bf16 %v6727_v36, %v4806_v13  ;;  %v1794_v47 = vsel %vm1001_vm4, %v1790_v32, %v1793_v26 }
 0x13e   : > { %6726 = vst [vmem:[#allocation43_spill] sm:$0xff] %v5472_v40  ;;  %v1898_v50 = vmax.bf16 %v1793_v26, %v1722_v48  ;;  %v1412_v8 = vshrl.u32 %v5472_v40, 16  ;;  %v1414_v25 = vshll.u32 %v5472_v40, 16  ;;  %v1897_v33 = vmax.bf16 %v1794_v47, %v1721_v0 }
 0x13f   : > { %6728 = vst [vmem:[#allocation44_spill] sm:$0xff] %v5477_v16  ;;  %v3682_v49 = vrot.slane %v3680_v34, 4  ;;  %v3681_v17 = vsel %vm5303_vm9, %v4284_v43, %v3680_v34  ;;  %v1419_v30 = vshll.u32 %v5477_v16, 16  ;;  %v1423_v51 = vshrl.u32 %v5477_v16, 16 }
 0x140   : > { %3772 = vrot.lane.b32.xlu0 %v3681_v17, %s4368_s13  ;;  %v2010_v56 = vmax.bf16 %v1937_v19, %v1898_v50  ;;  %v1416_v32 = vrot.slane %v1414_v25, 1  ;;  %v1651_v15 = vrot.slane %v5472_v40, 1  ;;  %v2009_v45 = vmax.bf16 %v1938_v7, %v1897_v33  ;;  %v5498_v7 = vpop.permute.xlu0 %3378 }
 0x141   : > { %v3684_v61 = vsel %vm5303_vm9, %v3682_v49, %v3683_v28  ;;  %v1421_v48 = vrot.slane %v1419_v30, 1  ;;  %v1652_v26 = vrot.slane %v5477_v16, 1  ;;  %v1795_v43 = vrot.slane %v1412_v8, 1  ;;  %v5500_v49 = vpop.permute.xlu1 %3382 }
 0x142   : > { %3774 = vrot.lane.b32.xlu1 %v3684_v61, %s4368_s13  ;;  %v2817_v0 = vrot.slane %v2010_v56, 2  ;;  %v1417_v34 = vor.u32 %v1416_v32, %v1412_v8  ;;  %v1796_v47 = vrot.slane %v1414_v25, 2  ;;  %v2816_v17 = vrot.slane %v2009_v45, 2 }
 0x143   : > { %v1425_v19 = vor.u32 %v1423_v51, %v1421_v48  ;;  %v1653_v50 = vsel %vm888_vm1, %v1651_v15, %v1652_v26  ;;  %v1798_v10 = vrot.slane %v1423_v51, 1  ;;  %v1799_v28 = vrot.slane %v1419_v30, 2  ;;  %v6729_v30 = vld [vmem:[#allocation49_spill] sm:$0xff] }
 0x144   : > { %v2890_v57 = vmax.bf16 %v2817_v0, %v2010_v56  ;;  %v1422_v53 = vsel %vm551_vm3, %v1417_v34, %v1421_v48  ;;  %v1797_v31 = vor.u32 %v1796_v47, %v1795_v43  ;;  %v2818_v33 = vsel %vm1178_vm2, %v2816_v17, %v2817_v0  ;;  %v6731_v47 = vld [vmem:[#allocation50_spill] sm:$0xff] }
 0x145   : > { %v1579_v32 = vmax.bf16 %v1422_v53, %v5472_v40  ;;  %v1580_v8 = vmax.bf16 %v1425_v19, %v5477_v16  ;;  %v1939_v25 = vrot.slane %v5472_v40, 2  ;;  %v2889_v61 = vmax.bf16 %v2818_v33, %v2009_v45 }
 0x146   : > { %v4253_v15 = vcombine.low %v2890_v57, %v2890_v57  ;;  %v1800_v51 = vor.u32 %v1799_v28, %v1798_v10  ;;  %v1940_v56 = vrot.slane %v5477_v16, 2  ;;  %v5509_v43 = vmax.bf16 %v6729_v30, %v4834_v12  ;;  %v5522_v16 = vpop.permute.xlu1 %3386 }
 0x147   : > { %v1723_v48 = vmax.bf16 %v1653_v50, %v1579_v32  ;;  %v1724_v34 = vmax.bf16 %v1652_v26, %v1580_v8  ;;  %v5513_v0 = vmax.bf16 %v6731_v47, %v4840_v41  ;;  %v4252_v53 = vcombine.high %v2889_v61, %v2889_v61  ;;  %v5520_v8 = vpop.permute.xlu0 %3384 }
 0x148   : > { %6730 = vst [vmem:[#allocation49_spill] sm:$0xff] %v5509_v43  ;;  %v3690_v17 = vrot.slane %v4253_v15, 5  ;;  %v4251_v19 = vcombine.low %v2889_v61, %v2889_v61  ;;  %v1801_v40 = vsel %vm1001_vm4, %v1797_v31, %v1800_v51  ;;  %v1941_v10 = vsel %vm1178_vm2, %v1939_v25, %v1940_v56 }
 0x149   : > { %6732 = vst [vmem:[#allocation50_spill] sm:$0xff] %v5513_v0  ;;  %v1899_v45 = vmax.bf16 %v1801_v40, %v1723_v48  ;;  %v1900_v57 = vmax.bf16 %v1800_v51, %v1724_v34  ;;  %v1427_v50 = vshrl.u32 %v5509_v43, 16  ;;  %v3687_v26 = vrot.slane %v4252_v53, 5 }
 0x14a   : > { %v4285_v28 = vrot.slane %v4251_v19, 9  ;;  %v1429_v33 = vshll.u32 %v5509_v43, 16  ;;  %v1434_v32 = vshll.u32 %v5513_v0, 16  ;;  %v1438_v31 = vshrl.u32 %v5513_v0, 16 }
 0x14b   : > { %v2011_v15 = vmax.bf16 %v1941_v10, %v1899_v45  ;;  %v2012_v61 = vmax.bf16 %v1940_v56, %v1900_v57  ;;  %v1654_v40 = vrot.slane %v5509_v43, 1  ;;  %v3689_v51 = vrot.slane %v3687_v26, 4  ;;  %v5537_v21 = vpop.permute.xlu0 %3388 }
 0x14c   : > { %v3688_v25 = vsel %vm5303_vm9, %v4285_v28, %v3687_v26  ;;  %v1431_v48 = vrot.slane %v1429_v33, 1  ;;  %v1436_v34 = vrot.slane %v1434_v32, 1  ;;  %v1655_v44 = vrot.slane %v5513_v0, 1 }
 0x14d   : > { %3776 = vrot.lane.b32.xlu0 %v3688_v25, %s4368_s13  ;;  %v2819_v53 = vrot.slane %v2011_v15, 2  ;;  %v2820_v19 = vrot.slane %v2012_v61, 2  ;;  %v1802_v41 = vrot.slane %v1427_v50, 1  ;;  %v3691_v56 = vsel %vm5303_vm9, %v3689_v51, %v3690_v17  ;;  %v5539_v17 = vpop.permute.xlu1 %3390 }
 0x14e   : > { %v1432_v45 = vor.u32 %v1431_v48, %v1427_v50  ;;  %v1440_v57 = vor.u32 %v1438_v31, %v1436_v34  ;;  %v1803_v10 = vrot.slane %v1429_v33, 2  ;;  %3778 = vrot.lane.b32.xlu1 %v3691_v56, %s4368_s13  ;;  %v1656_v28 = vsel %vm888_vm1, %v1654_v40, %v1655_v44 }
 0x14f   : > { %v2821_v39 = vsel %vm1178_vm2, %v2819_v53, %v2820_v19  ;;  %v2892_v26 = vmax.bf16 %v2820_v19, %v2012_v61  ;;  %v1805_v12 = vrot.slane %v1438_v31, 1  ;;  %v1806_v51 = vrot.slane %v1434_v32, 2 }
 0x150   : > { %v2891_v25 = vmax.bf16 %v2821_v39, %v2011_v15  ;;  %v1437_v13 = vsel %vm551_vm3, %v1432_v45, %v1436_v34  ;;  %v1582_v62 = vmax.bf16 %v1440_v57, %v5513_v0  ;;  %v1804_v11 = vor.u32 %v1803_v10, %v1802_v41 }
 0x151   : > { %v4256_v50 = vcombine.low %v2892_v26, %v2892_v26  ;;  %v1581_v33 = vmax.bf16 %v1437_v13, %v5509_v43  ;;  %v1942_v48 = vrot.slane %v5509_v43, 2  ;;  %v1943_v39 = vrot.slane %v5513_v0, 2 }
 0x152   : > { %v4255_v61 = vcombine.high %v2891_v25, %v2891_v25  ;;  %v4254_v53 = vcombine.low %v2891_v25, %v2891_v25  ;;  %v1726_v40 = vmax.bf16 %v1655_v44, %v1582_v62  ;;  %v1807_v34 = vor.u32 %v1806_v51, %v1805_v12  ;;  %v5559_v25 = vpop.permute.xlu0 %3392 }
 0x153   : > { %v3697_v15 = vrot.slane %v4256_v50, 5  ;;  %v1725_v31 = vmax.bf16 %v1656_v28, %v1581_v33  ;;  %v5546_v41 = vmax.bf16 %v5080_v14, %v4906_v18  ;;  %v1944_v45 = vsel %vm1178_vm2, %v1942_v48, %v1943_v39  ;;  %v5561_v50 = vpop.permute.xlu1 %3394 }
 0x154   : > { %v3694_v19 = vrot.slane %v4255_v61, 5  ;;  %v4286_v56 = vrot.slane %v4254_v53, 9  ;;  %v5551_v13 = vmax.bf16 %v5089_v54, %v6720_v38  ;;  %v1808_v32 = vsel %vm1001_vm4, %v1804_v11, %v1807_v34 }
 0x155   : > { %6733 = vst [vmem:[#allocation73_spill] sm:$0xff] %v5546_v41  ;;  %v1902_v62 = vmax.bf16 %v1807_v34, %v1726_v40  ;;  %v1442_v44 = vshrl.u32 %v5546_v41, 16  ;;  %v1444_v57 = vshll.u32 %v5546_v41, 16  ;;  %v1901_v26 = vmax.bf16 %v1808_v32, %v1725_v31 }
 0x156   : > { %6734 = vst [vmem:[#allocation74_spill] sm:$0xff] %v5551_v13  ;;  %v3696_v12 = vrot.slane %v3694_v19, 4  ;;  %v3695_v10 = vsel %vm5303_vm9, %v4286_v56, %v3694_v19  ;;  %v1449_v28 = vshll.u32 %v5551_v13, 16  ;;  %v1453_v51 = vshrl.u32 %v5551_v13, 16 }
 0x157   : > { %3780 = vrot.lane.b32.xlu0 %v3695_v10, %s4368_s13  ;;  %v2014_v33 = vmax.bf16 %v1943_v39, %v1902_v62  ;;  %v1446_v11 = vrot.slane %v1444_v57, 1  ;;  %v1657_v48 = vrot.slane %v5546_v41, 1  ;;  %v2013_v53 = vmax.bf16 %v1944_v45, %v1901_v26 }
 0x158   : > { %v3698_v61 = vsel %vm5303_vm9, %v3696_v12, %v3697_v15  ;;  %v1451_v40 = vrot.slane %v1449_v28, 1  ;;  %v1658_v31 = vrot.slane %v5551_v13, 1  ;;  %v1809_v56 = vrot.slane %v1442_v44, 1 }
 0x159   : > { %3782 = vrot.lane.b32.xlu1 %v3698_v61, %s4368_s13  ;;  %v2823_v34 = vrot.slane %v2014_v33, 2  ;;  %v1447_v19 = vor.u32 %v1446_v11, %v1442_v44  ;;  %v1810_v32 = vrot.slane %v1444_v57, 2  ;;  %v2822_v10 = vrot.slane %v2013_v53, 2  ;;  %v5576_v44 = vpop.permute.xlu0 %3396  ;;  %v5578_v57 = vpop.permute.xlu1 %3398 }
 0x15a   : > { %v1455_v39 = vor.u32 %v1453_v51, %v1451_v40  ;;  %v1659_v62 = vsel %vm888_vm1, %v1657_v48, %v1658_v31  ;;  %v1812_v0 = vrot.slane %v1453_v51, 1  ;;  %v1813_v15 = vrot.slane %v1449_v28, 2 }
 0x15b   : > { %v2894_v43 = vmax.bf16 %v2823_v34, %v2014_v33  ;;  %v1452_v38 = vsel %vm551_vm3, %v1447_v19, %v1451_v40  ;;  %v1811_v18 = vor.u32 %v1810_v32, %v1809_v56  ;;  %v2824_v45 = vsel %vm1178_vm2, %v2822_v10, %v2823_v34 }
 0x15c   : > { %v1583_v12 = vmax.bf16 %v1452_v38, %v5546_v41  ;;  %v1584_v26 = vmax.bf16 %v1455_v39, %v5551_v13  ;;  %v1945_v11 = vrot.slane %v5546_v41, 2  ;;  %v2893_v61 = vmax.bf16 %v2824_v45, %v2013_v53 }
 0x15d   : > { %v4259_v48 = vcombine.low %v2894_v43, %v2894_v43  ;;  %v1814_v51 = vor.u32 %v1813_v15, %v1812_v0  ;;  %v1946_v33 = vrot.slane %v5551_v13, 2  ;;  %v5583_v28 = vmax.bf16 %v5131_v9, %v4931_v60 }
 0x15e   : > { %v1727_v40 = vmax.bf16 %v1659_v62, %v1583_v12  ;;  %v1728_v19 = vmax.bf16 %v1658_v31, %v1584_v26  ;;  %v5587_v38 = vmax.bf16 %v5134_v4, %v6723_v29  ;;  %v4258_v34 = vcombine.high %v2893_v61, %v2893_v61 }
 0x15f   : > { %6735 = vst [vmem:[#allocation75_spill] sm:$0xff] %v5583_v28  ;;  %v3704_v56 = vrot.slane %v4259_v48, 5  ;;  %v4257_v32 = vcombine.low %v2893_v61, %v2893_v61  ;;  %v1815_v10 = vsel %vm1001_vm4, %v1811_v18, %v1814_v51  ;;  %v1947_v0 = vsel %vm1178_vm2, %v1945_v11, %v1946_v33  ;;  %v5596_v48 = vpop.permute.xlu0 %3400  ;;  %v5598_v18 = vpop.permute.xlu1 %3402 }
 0x160   : > { %v1903_v53 = vmax.bf16 %v1815_v10, %v1727_v40  ;;  %v1904_v43 = vmax.bf16 %v1814_v51, %v1728_v19  ;;  %v1457_v39 = vshrl.u32 %v5583_v28, 16  ;;  %v3701_v31 = vrot.slane %v4258_v34, 5 }
 0x161   : > { %v4287_v62 = vrot.slane %v4257_v32, 9  ;;  %v1459_v15 = vshll.u32 %v5583_v28, 16  ;;  %v1464_v45 = vshll.u32 %v5587_v38, 16  ;;  %v1468_v41 = vshrl.u32 %v5587_v38, 16 }
 0x162   : > { %v2015_v12 = vmax.bf16 %v1947_v0, %v1903_v53  ;;  %v2016_v26 = vmax.bf16 %v1946_v33, %v1904_v43  ;;  %v1660_v61 = vrot.slane %v5583_v28, 1  ;;  %v3703_v51 = vrot.slane %v3701_v31, 4 }
 0x163   : > { %v3702_v11 = vsel %vm5303_vm9, %v4287_v62, %v3701_v31  ;;  %v1461_v40 = vrot.slane %v1459_v15, 1  ;;  %v1466_v19 = vrot.slane %v1464_v45, 1  ;;  %v1661_v33 = vrot.slane %v5587_v38, 1 }
 0x164   : > { %3784 = vrot.lane.b32.xlu0 %v3702_v11, %s4368_s13  ;;  %v2825_v34 = vrot.slane %v2015_v12, 2  ;;  %v2826_v32 = vrot.slane %v2016_v26, 2  ;;  %v1816_v10 = vrot.slane %v1457_v39, 1  ;;  %v3705_v53 = vsel %vm5303_vm9, %v3703_v51, %v3704_v56  ;;  %v5613_v51 = vpop.permute.xlu0 %3404 }
 0x165   : > { %v1462_v43 = vor.u32 %v1461_v40, %v1457_v39  ;;  %v1470_v0 = vor.u32 %v1468_v41, %v1466_v19  ;;  %v1817_v29 = vrot.slane %v1459_v15, 2  ;;  %3786 = vrot.lane.b32.xlu1 %v3705_v53, %s4368_s13  ;;  %v1662_v62 = vsel %vm888_vm1, %v1660_v61, %v1661_v33  ;;  %v5615_v40 = vpop.permute.xlu1 %3406 }
 0x166   : > { %v2827_v60 = vsel %vm1178_vm2, %v2825_v34, %v2826_v32  ;;  %v2896_v31 = vmax.bf16 %v2826_v32, %v2016_v26  ;;  %v1819_v22 = vrot.slane %v1468_v41, 1  ;;  %v1820_v39 = vrot.slane %v1464_v45, 2 }
 0x167   : > { %v2895_v11 = vmax.bf16 %v2827_v60, %v2015_v12  ;;  %v1467_v1 = vsel %vm551_vm3, %v1462_v43, %v1466_v19  ;;  %v1586_v4 = vmax.bf16 %v1470_v0, %v5587_v38  ;;  %v1818_v9 = vor.u32 %v1817_v29, %v1816_v10 }
 0x168   : > { %v4262_v13 = vcombine.low %v2896_v31, %v2896_v31  ;;  %v1585_v56 = vmax.bf16 %v1467_v1, %v5583_v28  ;;  %v1948_v15 = vrot.slane %v5583_v28, 2  ;;  %v1949_v60 = vrot.slane %v5587_v38, 2 }
 0x169   : > { %v4261_v26 = vcombine.high %v2895_v11, %v2895_v11  ;;  %v4260_v34 = vcombine.low %v2895_v11, %v2895_v11  ;;  %v1730_v61 = vmax.bf16 %v1661_v33, %v1586_v4  ;;  %v1821_v19 = vor.u32 %v1820_v39, %v1819_v22  ;;  %v5636_v39 = vpop.permute.xlu0 %3408 }
 0x16a   : > { %v3711_v41 = vrot.slane %v4262_v13, 5  ;;  %v1729_v12 = vmax.bf16 %v1662_v62, %v1585_v56  ;;  %v5620_v29 = vmax.bf16 %v5141_v6, %v6725_v59  ;;  %v1950_v32 = vsel %vm1178_vm2, %v1948_v15, %v1949_v60  ;;  %v5638_v15 = vpop.permute.xlu1 %3410 }
 0x16b   : > { %v3708_v1 = vrot.slane %v4261_v26, 5  ;;  %v4288_v45 = vrot.slane %v4260_v34, 9  ;;  %v5625_v10 = vmax.bf16 %v5163_v55, %v6727_v36  ;;  %v1822_v53 = vsel %vm1001_vm4, %v1818_v9, %v1821_v19 }
 0x16c   : > { %v1906_v4 = vmax.bf16 %v1821_v19, %v1730_v61  ;;  %v1472_v33 = vshrl.u32 %v5620_v29, 16  ;;  %v1474_v13 = vshll.u32 %v5620_v29, 16  ;;  %v1905_v0 = vmax.bf16 %v1822_v53, %v1729_v12 }
 0x16d   : > { %6736 = vst [vmem:[#allocation76_spill] sm:$0xff] %v5625_v10  ;;  %v3710_v22 = vrot.slane %v3708_v1, 4  ;;  %v3709_v43 = vsel %vm5303_vm9, %v4288_v45, %v3708_v1  ;;  %v1479_v31 = vshll.u32 %v5625_v10, 16  ;;  %v1483_v56 = vshrl.u32 %v5625_v10, 16 }
 0x16e   : > { %3788 = vrot.lane.b32.xlu0 %v3709_v43, %s4368_s13  ;;  %v2018_v62 = vmax.bf16 %v1949_v60, %v1906_v4  ;;  %v1476_v11 = vrot.slane %v1474_v13, 1  ;;  %v1663_v9 = vrot.slane %v5620_v29, 1  ;;  %v2017_v34 = vmax.bf16 %v1950_v32, %v1905_v0 }
 0x16f   : > { %v3712_v26 = vsel %vm5303_vm9, %v3710_v22, %v3711_v41  ;;  %v1481_v61 = vrot.slane %v1479_v31, 1  ;;  %v1664_v12 = vrot.slane %v5625_v10, 1  ;;  %v1823_v1 = vrot.slane %v1472_v33, 1 }
 0x170   : > { %3790 = vrot.lane.b32.xlu1 %v3712_v26, %s4368_s13  ;;  %v2829_v60 = vrot.slane %v2018_v62, 2  ;;  %v1477_v19 = vor.u32 %v1476_v11, %v1472_v33  ;;  %v1824_v45 = vrot.slane %v1474_v13, 2  ;;  %v2828_v53 = vrot.slane %v2017_v34, 2 }
 0x171   : > { %v1485_v4 = vor.u32 %v1483_v56, %v1481_v61  ;;  %v1665_v43 = vsel %vm888_vm1, %v1663_v9, %v1664_v12  ;;  %v1826_v28 = vrot.slane %v1483_v56, 1  ;;  %v1827_v32 = vrot.slane %v1479_v31, 2  ;;  %v5662_v9 = vpop.permute.xlu0 %3412 }
 0x172   : > { %v2898_v55 = vmax.bf16 %v2829_v60, %v2018_v62  ;;  %v1482_v6 = vsel %vm551_vm3, %v1477_v19, %v1481_v61  ;;  %v1825_v41 = vor.u32 %v1824_v45, %v1823_v1  ;;  %v2830_v22 = vsel %vm1178_vm2, %v2828_v53, %v2829_v60  ;;  %v6737_v60 = vld [vmem:[#allocation2_spill] sm:$0xff]  ;;  %v6738_v19 = vld [vmem:[#allocation3_spill] sm:$0xff]  ;;  %v6739_v1 = vld [vmem:[#allocation4_spill] sm:$0xff] }
 0x173   : > { %v1587_v33 = vmax.bf16 %v1482_v6, %v5620_v29  ;;  %v1588_v13 = vmax.bf16 %v1485_v4, %v5625_v10  ;;  %v1951_v0 = vrot.slane %v5620_v29, 2  ;;  %v5657_v62 = vmax.bf16 %v2830_v22, %v2017_v34  ;;  %v5664_v6 = vpop.permute.xlu1 %3414  ;;  %3101 = vst.msk [vmem:[%s5651_s16] sm:$0xf] %vm3100_vm10, %v6737_v60  ;;  %3102 = vst.msk [vmem:[%s5651_s16 + $0x4] sm:$0xf] %vm3100_vm10, %v6738_v19  ;;  %v6740_v45 = vld [vmem:[#allocation5_spill] sm:$0xff] }
 0x174   : > { %v4265_v31 = vcombine.low %v2898_v55, %v2898_v55  ;;  %v5659_v11 = vor.u32 %v1827_v32, %v1826_v28  ;;  %v1952_v56 = vrot.slane %v5625_v10, 2  ;;  %3103 = vst.msk [vmem:[%s5651_s16 + $0x8] sm:$0xf] %vm3100_vm10, %v6739_v1  ;;  %3104 = vst.msk [vmem:[%s5651_s16 + $0xc] sm:$0xf] %vm3100_vm10, %v6740_v45  ;;  %v6741_v53 = vld [vmem:[#allocation6_spill] sm:$0xff] }
 0x175   : > { %v5666_v26 = vmax.bf16 %v1665_v43, %v1587_v33  ;;  %v5668_v34 = vmax.bf16 %v1664_v12, %v1588_v13  ;;  %v4264_v55 = vcombine.high %v5657_v62, %v5657_v62  ;;  %v4263_v61 = vcombine.low %v5657_v62, %v5657_v62  ;;  %3105 = vst.msk [vmem:[%s5651_s16 + $0x10] sm:$0xf] %vm3100_vm10, %v6741_v53  ;;  %v6742_v4 = vld [vmem:[#allocation7_spill] sm:$0xff]  ;;  %v6743_v43 = vld [vmem:[#allocation8_spill] sm:$0xff]  ;;  %v6745_v32 = vld [vmem:[#allocation10_spill] sm:$0xff] }
 0x176   : > { %v5672_v28 = vrot.slane %v4265_v31, 5  ;;  %v1829_v12 = vsel %vm1001_vm4, %v1825_v41, %v5659_v11  ;;  %3106 = vst.msk [vmem:[%s5651_s16 + $0x14] sm:$0xf] %vm3100_vm10, %v6742_v4  ;;  %3107 = vst.msk [vmem:[%s5651_s16 + $0x18] sm:$0xf] %vm3100_vm10, %v6743_v43  ;;  %v6744_v41 = vld [vmem:[#allocation9_spill] sm:$0xff] }
 0x177   : > { %3108 = vst.msk [vmem:[%s5651_s16 + $0x1c] sm:$0xf] %vm3100_vm10, %v6744_v41  ;;  %3109 = vst.msk [vmem:[%s5651_s16 + $0x20] sm:$0xf] %vm3100_vm10, %v6745_v32  ;;  %v6746_v22 = vld [vmem:[#allocation11_spill] sm:$0xff]  ;;  %v6747_v33 = vld [vmem:[#allocation12_spill] sm:$0xff] }
 0x178   : > { %3110 = vst.msk [vmem:[%s5651_s16 + $0x24] sm:$0xf] %vm3100_vm10, %v6746_v22  ;;  %3111 = vst.msk [vmem:[%s5651_s16 + $0x28] sm:$0xf] %vm3100_vm10, %v6747_v33  ;;  %v6748_v13 = vld [vmem:[#allocation13_spill] sm:$0xff]  ;;  %v6749_v62 = vld [vmem:[#allocation14_spill] sm:$0xff] }
 0x179   : > { %3112 = vst.msk [vmem:[%s5651_s16 + $0x2c] sm:$0xf] %vm3100_vm10, %v6748_v13  ;;  %3113 = vst.msk [vmem:[%s5651_s16 + $0x30] sm:$0xf] %vm3100_vm10, %v6749_v62  ;;  %v6750_v31 = vld [vmem:[#allocation15_spill] sm:$0xff]  ;;  %v6752_v19 = vld [vmem:[#allocation20_spill] sm:$0xff] }
 0x17a   : > { %3114 = vst.msk [vmem:[%s5651_s16 + $0x34] sm:$0xf] %vm3100_vm10, %v6750_v31  ;;  %v6751_v60 = vld [vmem:[#allocation19_spill] sm:$0xff]  ;;  %3116 = vst.msk [vmem:[%s5651_s16 + $0x3c] sm:$0xf] %vm3100_vm10, %v6752_v19  ;;  %v6753_v1 = vld [vmem:[#allocation21_spill] sm:$0xff] }
 0x17b   : > { %3115 = vst.msk [vmem:[%s5651_s16 + $0x38] sm:$0xf] %vm3100_vm10, %v6751_v60  ;;  %3117 = vst.msk [vmem:[%s5651_s16 + $0x40] sm:$0xf] %vm3100_vm10, %v6753_v1  ;;  %v6754_v45 = vld [vmem:[#allocation22_spill] sm:$0xff]  ;;  %v6755_v53 = vld [vmem:[#allocation25_spill] sm:$0xff] }
 0x17c   : > { %3118 = vst.msk [vmem:[%s5651_s16 + $0x44] sm:$0xf] %vm3100_vm10, %v6754_v45  ;;  %3119 = vst.msk [vmem:[%s5651_s16 + $0x48] sm:$0xf] %vm3100_vm10, %v6755_v53  ;;  %v6756_v4 = vld [vmem:[#allocation26_spill] sm:$0xff]  ;;  %v6757_v43 = vld [vmem:[#allocation27_spill] sm:$0xff]  ;;  %v1907_v53 = vmax.bf16 %v1829_v12, %v5666_v26  ;;  %v5788_v26 = vmax.bf16 %v5188_v27, %v6729_v30 }
 0x17d   : > { %3120 = vst.msk [vmem:[%s5651_s16 + $0x4c] sm:$0xf] %vm3100_vm10, %v6756_v4  ;;  %3121 = vst.msk [vmem:[%s5651_s16 + $0x50] sm:$0xf] %vm3100_vm10, %v6757_v43  ;;  %v6758_v41 = vld [vmem:[#allocation28_spill] sm:$0xff]  ;;  %v6759_v32 = vld [vmem:[#allocation33_spill] sm:$0xff]  ;;  %v1908_v4 = vmax.bf16 %v5659_v11, %v5668_v34  ;;  %v1953_v43 = vsel %vm1178_vm2, %v1951_v0, %v1952_v56 }
 0x17e   : > { %3122 = vst.msk [vmem:[%s5651_s16 + $0x54] sm:$0xf] %vm3100_vm10, %v6758_v41  ;;  %3123 = vst.msk [vmem:[%s5651_s16 + $0x58] sm:$0xf] %vm3100_vm10, %v6759_v32  ;;  %v6760_v22 = vld [vmem:[#allocation34_spill] sm:$0xff]  ;;  %v6761_v33 = vld [vmem:[#allocation35_spill] sm:$0xff] }
 0x17f   : > { %3124 = vst.msk [vmem:[%s5651_s16 + $0x5c] sm:$0xf] %vm3100_vm10, %v6760_v22  ;;  %3125 = vst.msk [vmem:[%s5651_s16 + $0x60] sm:$0xf] %vm3100_vm10, %v6761_v33  ;;  %v6762_v13 = vld [vmem:[#allocation36_spill] sm:$0xff]  ;;  %v6763_v62 = vld [vmem:[#allocation41_spill] sm:$0xff] }
 0x180   : > { %3126 = vst.msk [vmem:[%s5651_s16 + $0x64] sm:$0xf] %vm3100_vm10, %v6762_v13  ;;  %3127 = vst.msk [vmem:[%s5651_s16 + $0x68] sm:$0xf] %vm3100_vm10, %v6763_v62  ;;  %v6764_v31 = vld [vmem:[#allocation42_spill] sm:$0xff]  ;;  %v6765_v60 = vld [vmem:[#allocation45_spill] sm:$0xff] }
 0x181   : > { %3128 = vst.msk [vmem:[%s5651_s16 + $0x6c] sm:$0xf] %vm3100_vm10, %v6764_v31  ;;  %3129 = vst.msk [vmem:[%s5651_s16 + $0x70] sm:$0xf] %vm3100_vm10, %v6765_v60  ;;  %v6766_v19 = vld [vmem:[#allocation46_spill] sm:$0xff]  ;;  %v6767_v1 = vld [vmem:[#allocation47_spill] sm:$0xff] }
 0x182   : > { %3130 = vst.msk [vmem:[%s5651_s16 + $0x74] sm:$0xf] %vm3100_vm10, %v6766_v19  ;;  %3131 = vst.msk [vmem:[%s5651_s16 + $0x78] sm:$0xf] %vm3100_vm10, %v6767_v1  ;;  %v6768_v45 = vld [vmem:[#allocation48_spill] sm:$0xff] }
 0x183   : > { %3132 = vst.msk [vmem:[%s5651_s16 + $0x7c] sm:$0xf] %vm3100_vm10, %v6768_v45  ;;  %6769 = vst [vmem:[#allocation2_spill] sm:$0xff] %v5788_v26 }
 0x184   : > { %3473 = vst.msk [vmem:[%s5651_s16] sm:$0xf] %vm3472_vm11, %v5482_v63  ;;  %3475 = vst.msk [vmem:[%s5651_s16 + $0x8] sm:$0xf] %vm3472_vm11, %v5484_v20  ;;  %v5846_v63 = vmax.bf16 %v5196_v23, %v6731_v47  ;;  %v365_v20 = vmax.bf16 %v5096_v24, %v5068_v37  ;;  %v3419_v37 = vpop.permute.xlu1 %3418 }
 0x185   : > { %3474 = vst.msk [vmem:[%s5651_s16 + $0x4] sm:$0xf] %vm3472_vm11, %v5498_v7  ;;  %3476 = vst.msk [vmem:[%s5651_s16 + $0xc] sm:$0xf] %vm3472_vm11, %v5500_v49  ;;  %v2019_v7 = vmax.bf16 %v1953_v43, %v1907_v53  ;;  %v2020_v49 = vmax.bf16 %v1952_v56, %v1908_v4  ;;  %v1954_v53 = vrot.slane %v5788_v26, 2 }
 0x186   : > { %3477 = vst.msk [vmem:[%s5651_s16 + $0x10] sm:$0xf] %vm3472_vm11, %v5520_v8  ;;  %3478 = vst.msk [vmem:[%s5651_s16 + $0x14] sm:$0xf] %vm3472_vm11, %v5522_v16  ;;  %v4289_v16 = vrot.slane %v4263_v61, 9  ;;  %v1487_v8 = vshrl.u32 %v5788_v26, 16 }
 0x187   : > { %3479 = vst.msk [vmem:[%s5651_s16 + $0x18] sm:$0xf] %vm3472_vm11, %v5537_v21  ;;  %3480 = vst.msk [vmem:[%s5651_s16 + $0x1c] sm:$0xf] %vm3472_vm11, %v5539_v17  ;;  %v3715_v21 = vrot.slane %v4264_v55, 5  ;;  %v1489_v17 = vshll.u32 %v5788_v26, 16 }
 0x188   : > { %3481 = vst.msk [vmem:[%s5651_s16 + $0x20] sm:$0xf] %vm3472_vm11, %v5559_v25  ;;  %3482 = vst.msk [vmem:[%s5651_s16 + $0x24] sm:$0xf] %vm3472_vm11, %v5561_v50  ;;  %v1667_v11 = vrot.slane %v5846_v63, 1  ;;  %v1830_v56 = vrot.slane %v1487_v8, 1 }
 0x189   : > { %3483 = vst.msk [vmem:[%s5651_s16 + $0x28] sm:$0xf] %vm3472_vm11, %v5576_v44  ;;  %3484 = vst.msk [vmem:[%s5651_s16 + $0x2c] sm:$0xf] %vm3472_vm11, %v5578_v57  ;;  %v3717_v25 = vrot.slane %v3715_v21, 4  ;;  %v3716_v50 = vsel %vm5303_vm9, %v4289_v16, %v3715_v21  ;;  %v1494_v44 = vshll.u32 %v5846_v63, 16 }
 0x18a   : > { %3485 = vst.msk [vmem:[%s5651_s16 + $0x30] sm:$0xf] %vm3472_vm11, %v5596_v48  ;;  %3486 = vst.msk [vmem:[%s5651_s16 + $0x34] sm:$0xf] %vm3472_vm11, %v5598_v18  ;;  %v1498_v57 = vshrl.u32 %v5846_v63, 16  ;;  %v3417_v48 = vpop.permute.xlu0 %3416  ;;  %3792 = vrot.lane.b32.xlu0 %v3716_v50, %s4368_s13  ;;  %v2831_v18 = vrot.slane %v2019_v7, 2 }
 0x18b   : > { %3487 = vst.msk [vmem:[%s5651_s16 + $0x38] sm:$0xf] %vm3472_vm11, %v5613_v51  ;;  %3488 = vst.msk [vmem:[%s5651_s16 + $0x3c] sm:$0xf] %vm3472_vm11, %v5615_v40  ;;  %v2832_v51 = vrot.slane %v2020_v49, 2  ;;  %v1491_v40 = vrot.slane %v1489_v17, 1 }
 0x18c   : > { %3489 = vst.msk [vmem:[%s5651_s16 + $0x40] sm:$0xf] %vm3472_vm11, %v5636_v39  ;;  %3490 = vst.msk [vmem:[%s5651_s16 + $0x44] sm:$0xf] %vm3472_vm11, %v5638_v15  ;;  %v1666_v39 = vrot.slane %v5788_v26, 1  ;;  %v3719_v15 = vsel %vm5303_vm9, %v3717_v25, %v5672_v28  ;;  %v1496_v0 = vrot.slane %v1494_v44, 1 }
 0x18d   : > { %3491 = vst.msk [vmem:[%s5651_s16 + $0x48] sm:$0xf] %vm3472_vm11, %v5662_v9  ;;  %3492 = vst.msk [vmem:[%s5651_s16 + $0x4c] sm:$0xf] %vm3472_vm11, %v5664_v6  ;;  %3794 = vrot.lane.b32.xlu1 %v3719_v15, %s4368_s13  ;;  %v2833_v9 = vsel %vm1178_vm2, %v2831_v18, %v2832_v51  ;;  %v2900_v6 = vmax.bf16 %v2832_v51, %v2020_v49  ;;  %v1492_v34 = vor.u32 %v1491_v40, %v1487_v8  ;;  %v6772_v25 = vld [vmem:[#allocation52_spill] sm:$0xff]  ;;  %v3423_v40 = vpop.permute.xlu1 %3422 }
 0x18e   : > { %6770 = vst [vmem:[#allocation3_spill] sm:$0xff] %v5846_v63  ;;  %3493 = vst.msk [vmem:[%s5651_s16 + $0x50] sm:$0xf] %vm3472_vm11, %v3417_v48  ;;  %v1831_v55 = vrot.slane %v1489_v17, 2  ;;  %v2899_v61 = vmax.bf16 %v2833_v9, %v2019_v7  ;;  %v1500_v12 = vor.u32 %v1498_v57, %v1496_v0  ;;  %v1668_v41 = vsel %vm888_vm1, %v1666_v39, %v1667_v11  ;;  %v6771_v17 = vld [vmem:[#allocation51_spill] sm:$0xff]  ;;  %v3421_v51 = vpop.permute.xlu0 %3420 }
 0x18f   : > { %3494 = vst.msk [vmem:[%s5651_s16 + $0x54] sm:$0xf] %vm3472_vm11, %v3419_v37  ;;  %v1833_v32 = vrot.slane %v1498_v57, 1  ;;  %v4268_v22 = vcombine.low %v2900_v6, %v2900_v6  ;;  %v1497_v33 = vsel %vm551_vm3, %v1492_v34, %v1496_v0  ;;  %v1834_v13 = vrot.slane %v1494_v44, 2  ;;  %3495 = vst.msk [vmem:[%s5651_s16 + $0x58] sm:$0xf] %vm3472_vm11, %v3421_v51 }
 0x190   : > { %v1832_v28 = vor.u32 %v1831_v55, %v1830_v56  ;;  %v4267_v62 = vcombine.high %v2899_v61, %v2899_v61  ;;  %v4266_v31 = vcombine.low %v2899_v61, %v2899_v61  ;;  %v1589_v60 = vmax.bf16 %v1497_v33, %v5788_v26  ;;  %3496 = vst.msk [vmem:[%s5651_s16 + $0x5c] sm:$0xf] %vm3472_vm11, %v3423_v40 }
 0x191   : > { %v1590_v19 = vmax.bf16 %v1500_v12, %v5846_v63  ;;  %v3725_v1 = vrot.slane %v4268_v22, 5  ;;  %v1835_v45 = vor.u32 %v1834_v13, %v1833_v32  ;;  %v1955_v4 = vrot.slane %v5846_v63, 2  ;;  %v6774_v22 = vld [vmem:[#allocation16_spill] sm:$0xff] }
 0x192   : > { %v3722_v43 = vrot.slane %v4267_v62, 5  ;;  %v4290_v21 = vrot.slane %v4266_v31, 9  ;;  %v1733_v16 = vmax.bf16 %v1668_v41, %v1589_v60  ;;  %v366_v50 = vmax.bf16 %v6772_v25, %v6771_v17 }
 0x193   : > { %v1734_v7 = vmax.bf16 %v1667_v11, %v1590_v19  ;;  %v1836_v49 = vsel %vm1001_vm4, %v1832_v28, %v1835_v45  ;;  %v1956_v8 = vsel %vm1178_vm2, %v1954_v53, %v1955_v4  ;;  %v401_v44 = vmax.bf16 %v365_v20, %v4399_v2  ;;  %v6775_v53 = vld [vmem:[#allocation74_spill] sm:$0xff] }
 0x194   : > { %v3724_v57 = vrot.slane %v3722_v43, 4  ;;  %v3723_v48 = vsel %vm5303_vm9, %v4290_v21, %v3722_v43  ;;  %v1909_v37 = vmax.bf16 %v1836_v49, %v1733_v16  ;;  %v402_v39 = vmax.bf16 %v366_v50, %v4402_v3 }
 0x195   : > { %v1910_v18 = vmax.bf16 %v1835_v45, %v1734_v7  ;;  %3796 = vrot.lane.b32.xlu0 %v3723_v48, %s4368_s13  ;;  %v439_v15 = vmax.bf16 %v401_v44, %v4399_v2  ;;  %v367_v0 = vmax.bf16 %v5096_v24, %v4399_v2  ;;  %v368_v20 = vmax.bf16 %v6772_v25, %v4402_v3  ;;  %v3425_v48 = vpop.permute.xlu0 %3424 }
 0x196   : > { %v3726_v11 = vsel %vm5303_vm9, %v3724_v57, %v3725_v1  ;;  %v2021_v56 = vmax.bf16 %v1956_v8, %v1909_v37  ;;  %v5898_v6 = vmax.bf16 %v5225_v5, %v4402_v3  ;;  %v440_v24 = vmax.bf16 %v402_v39, %v4402_v3  ;;  %v3427_v37 = vpop.permute.xlu1 %3426  ;;  %3497 = vst.msk [vmem:[%s5651_s16 + $0x60] sm:$0xf] %vm3472_vm11, %v3425_v48 }
 0x197   : > { %v2022_v9 = vmax.bf16 %v1955_v4, %v1910_v18  ;;  %3798 = vrot.lane.b32.xlu1 %v3726_v11, %s4368_s13  ;;  %v5903_v34 = vmax.bf16 %v439_v15, %v4399_v2  ;;  %v403_v55 = vmax.bf16 %v367_v0, %v4399_v2  ;;  %v404_v61 = vmax.bf16 %v368_v20, %v4402_v3 }
 0x198   : > { %6773 = vst [vmem:[#allocation4_spill] sm:$0xff] %v5898_v6  ;;  %v2834_v12 = vrot.slane %v2021_v56, 2  ;;  %v515_v32 = vmax.bf16 %v5228_v52, %v4499_v46  ;;  %v516_v5 = vmax.bf16 %v5898_v6, %v6774_v22  ;;  %v480_v33 = vmax.bf16 %v440_v24, %v4402_v3  ;;  %3498 = vst.msk [vmem:[%s5651_s16 + $0x64] sm:$0xf] %vm3472_vm11, %v3427_v37 }
 0x199   : > { %v2835_v41 = vrot.slane %v2022_v9, 2  ;;  %v511_v28 = vmax.bf16 %v5903_v34, %v5080_v14  ;;  %v441_v13 = vmax.bf16 %v403_v55, %v4399_v2  ;;  %v442_v62 = vmax.bf16 %v404_v61, %v4402_v3 }
 0x19a   : > { %v5918_v19 = vmax.bf16 %v515_v32, %v4667_v35  ;;  %v5921_v46 = vmax.bf16 %v516_v5, %v4670_v58  ;;  %v5924_v45 = vmax.bf16 %v480_v33, %v5089_v54  ;;  %v5927_v4 = vmax.bf16 %v6775_v53, %v480_v33  ;;  %v6776_v53 = vld [vmem:[#allocation53_spill] sm:$0xff] }
 0x19b   : > { %v2836_v31 = vsel %vm1178_vm2, %v2834_v12, %v2835_v41  ;;  %v2902_v60 = vmax.bf16 %v2835_v41, %v2022_v9  ;;  %v1502_v43 = vshrl.u32 %v511_v28, 16  ;;  %v1504_v16 = vshll.u32 %v511_v28, 16 }
 0x19c   : > { %v2901_v1 = vmax.bf16 %v2836_v31, %v2021_v56  ;;  %v1669_v7 = vrot.slane %v511_v28, 1  ;;  %v1957_v49 = vrot.slane %v511_v28, 2  ;;  %v1509_v17 = vshll.u32 %v5924_v45, 16 }
 0x19d   : > { %v4271_v21 = vcombine.low %v2902_v60, %v2902_v60  ;;  %v1513_v58 = vshrl.u32 %v5924_v45, 16  ;;  %v1506_v50 = vrot.slane %v1504_v16, 1  ;;  %v1670_v44 = vrot.slane %v5924_v45, 1 }
 0x19e   : > { %v4270_v8 = vcombine.high %v2901_v1, %v2901_v1  ;;  %v4269_v35 = vcombine.low %v2901_v1, %v2901_v1  ;;  %v1837_v57 = vrot.slane %v1502_v43, 1  ;;  %v1511_v40 = vrot.slane %v1509_v17, 1 }
 0x19f   : > { %v3732_v25 = vrot.slane %v4271_v21, 5  ;;  %v1838_v39 = vrot.slane %v1504_v16, 2  ;;  %v1507_v15 = vor.u32 %v1506_v50, %v1502_v43  ;;  %v1671_v0 = vsel %vm888_vm1, %v1669_v7, %v1670_v44  ;;  %v6777_v16 = vld [vmem:[#allocation54_spill] sm:$0xff] }
 0x1a0   : > { %v3729_v18 = vrot.slane %v4270_v8, 5  ;;  %v4291_v51 = vrot.slane %v4269_v35, 9  ;;  %v1840_v20 = vrot.slane %v1513_v58, 1  ;;  %v1841_v11 = vrot.slane %v1509_v17, 2 }
 0x1a1   : > { %v1515_v24 = vor.u32 %v1513_v58, %v1511_v40  ;;  %v1839_v55 = vor.u32 %v1838_v39, %v1837_v57  ;;  %v1512_v61 = vsel %vm551_vm3, %v1507_v15, %v1511_v40  ;;  %v1958_v41 = vrot.slane %v5924_v45, 2 }
 0x1a2   : > { %v3731_v56 = vrot.slane %v3729_v18, 4  ;;  %v3730_v9 = vsel %vm5303_vm9, %v4291_v51, %v3729_v18  ;;  %v1842_v12 = vor.u32 %v1841_v11, %v1840_v20  ;;  %v5943_v32 = vmax.bf16 %v441_v13, %v4399_v2  ;;  %v3431_v20 = vpop.permute.xlu1 %3430 }
 0x1a3   : > { %3800 = vrot.lane.b32.xlu0 %v3730_v9, %s4368_s13  ;;  %v1591_v5 = vmax.bf16 %v1512_v61, %v511_v28  ;;  %v1592_v33 = vmax.bf16 %v1515_v24, %v5924_v45  ;;  %v482_v31 = vmax.bf16 %v442_v62, %v4402_v3  ;;  %v1959_v1 = vsel %vm1178_vm2, %v1957_v49, %v1958_v41 }
 0x1a4   : > { %v3733_v22 = vsel %vm5303_vm9, %v3731_v56, %v3732_v25  ;;  %v1843_v60 = vsel %vm1001_vm4, %v1839_v55, %v1842_v12  ;;  %v513_v43 = vmax.bf16 %v5943_v32, %v6776_v53  ;;  %v2028_v2 = vshrl.u32 %v5918_v19, 16  ;;  %3500 = vst.msk [vmem:[%s5651_s16 + $0x6c] sm:$0xf] %vm3472_vm11, %v3431_v20 }
 0x1a5   : > { %3802 = vrot.lane.b32.xlu1 %v3733_v22, %s4368_s13  ;;  %v1735_v13 = vmax.bf16 %v1671_v0, %v1591_v5  ;;  %v1736_v21 = vmax.bf16 %v1670_v44, %v1592_v33  ;;  %v514_v7 = vmax.bf16 %v482_v31, %v6777_v16  ;;  %v5957_v28 = vmax.bf16 %v5587_v38, %v482_v31  ;;  %v3429_v0 = vpop.permute.xlu0 %3428 }
 0x1a6   : > { %v1517_v45 = vshrl.u32 %v513_v43, 16  ;;  %v1519_v3 = vshll.u32 %v513_v43, 16  ;;  %v1672_v62 = vrot.slane %v513_v43, 1  ;;  %v1960_v8 = vrot.slane %v513_v43, 2  ;;  %3499 = vst.msk [vmem:[%s5651_s16 + $0x68] sm:$0xf] %vm3472_vm11, %v3429_v0 }
 0x1a7   : > { %v1911_v35 = vmax.bf16 %v1843_v60, %v1735_v13  ;;  %v1912_v17 = vmax.bf16 %v1842_v12, %v1736_v21  ;;  %v1524_v58 = vshll.u32 %v514_v7, 16  ;;  %v1528_v49 = vshrl.u32 %v514_v7, 16 }
 0x1a8   : > { %v1521_v25 = vrot.slane %v1519_v3, 1  ;;  %v1673_v50 = vrot.slane %v514_v7, 1  ;;  %v1844_v57 = vrot.slane %v1517_v45, 1  ;;  %v1845_v48 = vrot.slane %v1519_v3, 2 }
 0x1a9   : > { %v2023_v44 = vmax.bf16 %v1959_v1, %v1911_v35  ;;  %v2024_v37 = vmax.bf16 %v1958_v41, %v1912_v17  ;;  %v1526_v18 = vrot.slane %v1524_v58, 1  ;;  %v1847_v51 = vrot.slane %v1528_v49, 1 }
 0x1aa   : > { %v1522_v38 = vor.u32 %v1521_v25, %v1517_v45  ;;  %v1674_v40 = vsel %vm888_vm1, %v1672_v62, %v1673_v50  ;;  %v1846_v39 = vor.u32 %v1845_v48, %v1844_v57  ;;  %v1848_v15 = vrot.slane %v1524_v58, 2 }
 0x1ab   : > { %v2837_v11 = vrot.slane %v2023_v44, 2  ;;  %v2838_v56 = vrot.slane %v2024_v37, 2  ;;  %v1530_v9 = vor.u32 %v1528_v49, %v1526_v18  ;;  %v1961_v24 = vrot.slane %v514_v7, 2 }
 0x1ac   : > { %v1527_v55 = vsel %vm551_vm3, %v1522_v38, %v1526_v18  ;;  %v1849_v61 = vor.u32 %v1848_v15, %v1847_v51  ;;  %v2030_v12 = vshll.u32 %v5918_v19, 16  ;;  %v2035_v41 = vshll.u32 %v5921_v46, 16 }
 0x1ad   : > { %v2839_v22 = vsel %vm1178_vm2, %v2837_v11, %v2838_v56  ;;  %v2904_v5 = vmax.bf16 %v2838_v56, %v2024_v37  ;;  %v1593_v33 = vmax.bf16 %v1527_v55, %v513_v43  ;;  %v1594_v31 = vmax.bf16 %v1530_v9, %v514_v7  ;;  %v3433_v11 = vpop.permute.xlu0 %3432  ;;  %v3435_v56 = vpop.permute.xlu1 %3434 }
 0x1ae   : > { %v2903_v60 = vmax.bf16 %v2839_v22, %v2023_v44  ;;  %v1850_v1 = vsel %vm1001_vm4, %v1846_v39, %v1849_v61  ;;  %v1962_v13 = vsel %vm1178_vm2, %v1960_v8, %v1961_v24  ;;  %v2032_v21 = vrot.slane %v2030_v12, 1  ;;  %3501 = vst.msk [vmem:[%s5651_s16 + $0x70] sm:$0xf] %vm3472_vm11, %v3433_v11  ;;  %3502 = vst.msk [vmem:[%s5651_s16 + $0x74] sm:$0xf] %vm3472_vm11, %v3435_v56 }
 0x1af   : > { %v4274_v45 = vcombine.low %v2904_v5, %v2904_v5  ;;  %v1737_v3 = vmax.bf16 %v1674_v40, %v1593_v33  ;;  %v1738_v62 = vmax.bf16 %v1673_v50, %v1594_v31  ;;  %v2037_v35 = vrot.slane %v2035_v41, 1 }
 0x1b0   : > { %v4273_v17 = vcombine.high %v2903_v60, %v2903_v60  ;;  %v4272_v58 = vcombine.low %v2903_v60, %v2903_v60  ;;  %v2033_v49 = vor.u32 %v2032_v21, %v2028_v2  ;;  %v2039_v25 = vshrl.u32 %v5921_v46, 16 }
 0x1b1   : > { %v3739_v57 = vrot.slane %v4274_v45, 5  ;;  %v1913_v43 = vmax.bf16 %v1850_v1, %v1737_v3  ;;  %v1914_v7 = vmax.bf16 %v1849_v61, %v1738_v62  ;;  %v2363_v48 = vrot.slane %v5918_v19, 1 }
 0x1b2   : > { %v3736_v44 = vrot.slane %v4273_v17, 5  ;;  %v4292_v37 = vrot.slane %v4272_v58, 9  ;;  %v2038_v8 = vsel %vm551_vm3, %v2033_v49, %v2037_v35  ;;  %v2041_v18 = vor.u32 %v2039_v25, %v2037_v35  ;;  %v6778_v35 = vld [vmem:[#allocation17_spill] sm:$0xff]  ;;  %v6779_v58 = vld [vmem:[#allocation18_spill] sm:$0xff] }
 0x1b3   : > { %v2025_v50 = vmax.bf16 %v1962_v13, %v1913_v43  ;;  %v2026_v51 = vmax.bf16 %v1961_v24, %v1914_v7  ;;  %v2299_v38 = vmax.bf16 %v2038_v8, %v5918_v19  ;;  %v2364_v40 = vrot.slane %v5921_v46, 1  ;;  %v6780_v7 = vld [vmem:[#allocation29_spill] sm:$0xff] }
 0x1b4   : > { %v3738_v39 = vrot.slane %v3736_v44, 4  ;;  %v3737_v15 = vsel %vm5303_vm9, %v4292_v37, %v3736_v44  ;;  %v2300_v0 = vmax.bf16 %v2041_v18, %v5921_v46  ;;  %v2475_v20 = vrot.slane %v2028_v2, 1  ;;  %v6782_v37 = vld [vmem:[#allocation23_spill] sm:$0xff] }
 0x1b5   : > { %3804 = vrot.lane.b32.xlu0 %v3737_v15, %s4368_s13  ;;  %v2840_v9 = vrot.slane %v2025_v50, 2  ;;  %v2841_v55 = vrot.slane %v2026_v51, 2  ;;  %v2365_v24 = vsel %vm888_vm1, %v2363_v48, %v2364_v40  ;;  %v2476_v61 = vrot.slane %v2030_v12, 2 }
 0x1b6   : > { %v3740_v22 = vsel %vm5303_vm9, %v3738_v39, %v3739_v57  ;;  %v2443_v5 = vmax.bf16 %v2365_v24, %v2299_v38  ;;  %v2444_v33 = vmax.bf16 %v2364_v40, %v2300_v0  ;;  %v2478_v31 = vrot.slane %v2039_v25, 1  ;;  %v6783_v38 = vld [vmem:[#allocation24_spill] sm:$0xff]  ;;  %v3437_v24 = vpop.permute.xlu0 %3436 }
 0x1b7   : > { %3806 = vrot.lane.b32.xlu1 %v3740_v22, %s4368_s13  ;;  %v2842_v2 = vsel %vm1178_vm2, %v2840_v9, %v2841_v55  ;;  %v2906_v60 = vmax.bf16 %v2841_v55, %v2026_v51  ;;  %v2477_v1 = vor.u32 %v2476_v61, %v2475_v20  ;;  %v2479_v13 = vrot.slane %v2035_v41, 2  ;;  %v6781_v41 = vld [vmem:[#allocation59_spill] sm:$0xff]  ;;  %v3439_v61 = vpop.permute.xlu1 %3438  ;;  %3503 = vst.msk [vmem:[%s5651_s16 + $0x78] sm:$0xf] %vm3472_vm11, %v3437_v24 }
 0x1b8   : > { %v2905_v21 = vmax.bf16 %v2842_v2, %v2025_v50  ;;  %v2651_v12 = vrot.slane %v5918_v19, 2  ;;  %v2652_v45 = vrot.slane %v5921_v46, 2  ;;  %v517_v17 = vmax.bf16 %v6778_v35, %v5228_v52  ;;  %3504 = vst.msk [vmem:[%s5651_s16 + $0x7c] sm:$0xf] %vm3472_vm11, %v3439_v61 }
 0x1b9   : > { %v4277_v3 = vcombine.low %v2906_v60, %v2906_v60  ;;  %v2480_v62 = vor.u32 %v2479_v13, %v2478_v31  ;;  %v518_v49 = vmax.bf16 %v6779_v58, %v5898_v6  ;;  %v6001_v48 = vmax.bf16 %v6781_v41, %v6780_v7 }
 0x1ba   : > { %v4276_v25 = vcombine.high %v2905_v21, %v2905_v21  ;;  %v4275_v57 = vcombine.low %v2905_v21, %v2905_v21  ;;  %v2653_v43 = vsel %vm1178_vm2, %v2651_v12, %v2652_v45  ;;  %v521_v8 = vmax.bf16 %v517_v17, %v6782_v37  ;;  %v6784_v37 = vld [vmem:[#allocation30_spill] sm:$0xff] }
 0x1bb   : > { %v3746_v19 = vrot.slane %v4277_v3, 5  ;;  %v2481_v46 = vsel %vm1001_vm4, %v2477_v1, %v2480_v62  ;;  %v2620_v44 = vmax.bf16 %v2480_v62, %v2444_v33  ;;  %v6006_v40 = vmax.bf16 %v518_v49, %v6783_v38 }
 0x1bc   : > { %v3743_v18 = vrot.slane %v4276_v25, 5  ;;  %v4293_v50 = vrot.slane %v4275_v57, 9  ;;  %v2619_v51 = vmax.bf16 %v2481_v46, %v2443_v5  ;;  %v2043_v15 = vshrl.u32 %v521_v8, 16 }
 0x1bd   : > { %v2732_v39 = vmax.bf16 %v2652_v45, %v2620_v44  ;;  %v2045_v0 = vshll.u32 %v521_v8, 16  ;;  %v2366_v20 = vrot.slane %v521_v8, 1  ;;  %v2050_v55 = vshll.u32 %v6006_v40, 16 }
 0x1be   : > { %v3745_v11 = vrot.slane %v3743_v18, 4  ;;  %v3744_v56 = vsel %vm5303_vm9, %v4293_v50, %v3743_v18  ;;  %v2731_v9 = vmax.bf16 %v2653_v43, %v2619_v51  ;;  %v2054_v31 = vshrl.u32 %v6006_v40, 16  ;;  %v6785_v18 = vld [vmem:[#allocation60_spill] sm:$0xff] }
 0x1bf   : > { %3808 = vrot.lane.b32.xlu0 %v3744_v56, %s4368_s13  ;;  %v2940_v22 = vrot.slane %v2732_v39, 2  ;;  %v3021_v5 = vrot.slane %v2732_v39, 4  ;;  %v2047_v33 = vrot.slane %v2045_v0, 1  ;;  %v2052_v13 = vrot.slane %v2050_v55, 1 }
 0x1c0   : > { %v3747_v2 = vsel %vm5303_vm9, %v3745_v11, %v3746_v19  ;;  %v2939_v60 = vrot.slane %v2731_v9, 2  ;;  %v3020_v1 = vrot.slane %v2731_v9, 4  ;;  %v2367_v12 = vrot.slane %v6006_v40, 1 }
 0x1c1   : > { %3810 = vrot.lane.b32.xlu1 %v3747_v2, %s4368_s13  ;;  %v2048_v21 = vor.u32 %v2047_v33, %v2043_v15  ;;  %v2482_v45 = vrot.slane %v2043_v15, 1  ;;  %v2483_v3 = vrot.slane %v2045_v0, 2  ;;  %v2056_v17 = vor.u32 %v2054_v31, %v2052_v13 }
 0x1c2   : > { %v2941_v62 = vsel %vm1178_vm2, %v2939_v60, %v2940_v22  ;;  %v3022_v35 = vsel %vm3019_vm12, %v3020_v1, %v3021_v5  ;;  %v2485_v58 = vrot.slane %v2054_v31, 1  ;;  %v2368_v25 = vsel %vm888_vm1, %v2366_v20, %v2367_v12 }
 0x1c3   : > { %v3003_v49 = vmax.bf16 %v2941_v62, %v2731_v9  ;;  %v2053_v42 = vsel %vm551_vm3, %v2048_v21, %v2052_v13  ;;  %v2484_v57 = vor.u32 %v2483_v3, %v2482_v45  ;;  %v2302_v7 = vmax.bf16 %v2056_v17, %v6006_v40 }
 0x1c4   : > { %v2301_v43 = vmax.bf16 %v2053_v42, %v521_v8  ;;  %v2486_v41 = vrot.slane %v2050_v55, 2  ;;  %v2654_v19 = vrot.slane %v521_v8, 2  ;;  %v2655_v44 = vrot.slane %v6006_v40, 2 }
 0x1c5   : > { %v3084_v46 = vmax.bf16 %v3022_v35, %v3003_v49  ;;  %v6029_v50 = vmax.bf16 %v6785_v18, %v6784_v37  ;;  %v2058_v51 = vshrl.u32 %v6001_v48, 16  ;;  %v2446_v39 = vmax.bf16 %v2367_v12, %v2302_v7 }
 0x1c6   : > { %v2445_v38 = vmax.bf16 %v2368_v25, %v2301_v43  ;;  %v2487_v15 = vor.u32 %v2486_v41, %v2485_v58  ;;  %v2060_v0 = vshll.u32 %v6001_v48, 16  ;;  %v2656_v56 = vsel %vm1178_vm2, %v2654_v19, %v2655_v44  ;;  %v6786_v41 = vld [vmem:[#allocation31_spill] sm:$0xff]  ;;  %v6787_v19 = vld [vmem:[#allocation61_spill] sm:$0xff] }
 0x1c7   : > { %v4295_v20 = vcombine.high %v3084_v46, %v3084_v46  ;;  %v4294_v11 = vcombine.low %v3084_v46, %v3084_v46  ;;  %v2065_v8 = vshll.u32 %v6029_v50, 16  ;;  %v2069_v24 = vshrl.u32 %v6029_v50, 16 }
 0x1c8   : > { %v2488_v9 = vsel %vm1001_vm4, %v2484_v57, %v2487_v15  ;;  %v2622_v40 = vmax.bf16 %v2487_v15, %v2446_v39  ;;  %v2062_v55 = vrot.slane %v2060_v0, 1  ;;  %v2369_v5 = vrot.slane %v6001_v48, 1 }
 0x1c9   : > { %3959 = vrot.lane.b32.xlu1 %v4295_v20, %s4369_s17  ;;  %3957 = vrot.lane.b32.xlu0 %v4294_v11, %s4369_s17  ;;  %v2621_v61 = vmax.bf16 %v2488_v9, %v2445_v38  ;;  %v2067_v22 = vrot.slane %v2065_v8, 1  ;;  %v2370_v33 = vrot.slane %v6029_v50, 1  ;;  %v2489_v60 = vrot.slane %v2058_v51, 1  ;;  %v6789_v20 = vld [vmem:[#allocation62_spill] sm:$0xff] }
 0x1ca   : > { %v2734_v31 = vmax.bf16 %v2655_v44, %v2622_v40  ;;  %v2063_v2 = vor.u32 %v2062_v55, %v2058_v51  ;;  %v2490_v1 = vrot.slane %v2060_v0, 2  ;;  %v2492_v45 = vrot.slane %v2069_v24, 1  ;;  %v6788_v0 = vld [vmem:[#allocation32_spill] sm:$0xff] }
 0x1cb   : > { %v2733_v13 = vmax.bf16 %v2656_v56, %v2621_v61  ;;  %v2071_v21 = vor.u32 %v2069_v24, %v2067_v22  ;;  %v2371_v12 = vsel %vm888_vm1, %v2369_v5, %v2370_v33  ;;  %v2493_v57 = vrot.slane %v2065_v8, 2 }
 0x1cc   : > { %v2943_v3 = vrot.slane %v2734_v31, 2  ;;  %v3024_v62 = vrot.slane %v2734_v31, 4  ;;  %v2068_v35 = vsel %vm551_vm3, %v2063_v2, %v2067_v22  ;;  %v2491_v17 = vor.u32 %v2490_v1, %v2489_v60 }
 0x1cd   : > { %v2942_v58 = vrot.slane %v2733_v13, 2  ;;  %v3023_v49 = vrot.slane %v2733_v13, 4  ;;  %v2303_v42 = vmax.bf16 %v2068_v35, %v6001_v48  ;;  %v2304_v25 = vmax.bf16 %v2071_v21, %v6029_v50 }
 0x1ce   : > { %v2657_v43 = vrot.slane %v6001_v48, 2  ;;  %v2658_v7 = vrot.slane %v6029_v50, 2  ;;  %v525_v46 = vmax.bf16 %v6787_v19, %v6786_v41  ;;  %v2494_v39 = vor.u32 %v2493_v57, %v2492_v45 }
 0x1cf   : > { %v2944_v44 = vsel %vm1178_vm2, %v2942_v58, %v2943_v3  ;;  %v3025_v37 = vsel %vm3019_vm12, %v3023_v49, %v3024_v62  ;;  %v2447_v18 = vmax.bf16 %v2371_v12, %v2303_v42  ;;  %v2448_v51 = vmax.bf16 %v2370_v33, %v2304_v25 }
 0x1d0   : > { %v3004_v38 = vmax.bf16 %v2944_v44, %v2733_v13  ;;  %v2659_v15 = vsel %vm1178_vm2, %v2657_v43, %v2658_v7  ;;  %v526_v11 = vmax.bf16 %v6789_v20, %v6788_v0  ;;  %v2073_v56 = vshrl.u32 %v525_v46, 16 }
 0x1d1   : > { %v2075_v48 = vshll.u32 %v525_v46, 16  ;;  %v2372_v8 = vrot.slane %v525_v46, 1  ;;  %v2660_v50 = vrot.slane %v525_v46, 2  ;;  %v2495_v40 = vsel %vm1001_vm4, %v2491_v17, %v2494_v39 }
 0x1d2   : > { %v3085_v9 = vmax.bf16 %v3025_v37, %v3004_v38  ;;  %v2624_v55 = vmax.bf16 %v2494_v39, %v2448_v51  ;;  %v2080_v24 = vshll.u32 %v526_v11, 16  ;;  %v2623_v61 = vmax.bf16 %v2495_v40, %v2447_v18  ;;  %v6790_v18 = vld [vmem:[#allocation37_spill] sm:$0xff] }
 0x1d3   : > { %v2077_v22 = vrot.slane %v2075_v48, 1  ;;  %v2084_v5 = vshrl.u32 %v526_v11, 16  ;;  %v2373_v33 = vrot.slane %v526_v11, 1  ;;  %v2496_v45 = vrot.slane %v2073_v56, 1  ;;  %v6791_v51 = vld [vmem:[#allocation57_spill] sm:$0xff] }
 0x1d4   : > { %v4297_v31 = vcombine.high %v3085_v9, %v3085_v9  ;;  %v4296_v2 = vcombine.low %v3085_v9, %v3085_v9  ;;  %v2736_v60 = vmax.bf16 %v2658_v7, %v2624_v55  ;;  %v2082_v1 = vrot.slane %v2080_v24, 1 }
 0x1d5   : > { %v2735_v13 = vmax.bf16 %v2659_v15, %v2623_v61  ;;  %v2078_v21 = vor.u32 %v2077_v22, %v2073_v56  ;;  %v2374_v12 = vsel %vm888_vm1, %v2372_v8, %v2373_v33  ;;  %v2497_v17 = vrot.slane %v2075_v48, 2  ;;  %v6792_v48 = vld [vmem:[#allocation38_spill] sm:$0xff] }
 0x1d6   : > { %3963 = vrot.lane.b32.xlu1 %v4297_v31, %s4369_s17  ;;  %3961 = vrot.lane.b32.xlu0 %v4296_v2, %s4369_s17  ;;  %v2946_v3 = vrot.slane %v2736_v60, 2  ;;  %v3027_v62 = vrot.slane %v2736_v60, 4  ;;  %v2086_v35 = vor.u32 %v2084_v5, %v2082_v1  ;;  %v2499_v25 = vrot.slane %v2084_v5, 1  ;;  %v6793_v8 = vld [vmem:[#allocation58_spill] sm:$0xff]  ;;  %v6071_v2 = vpop.permute.xlu0 %3748 }
 0x1d7   : > { %v2945_v58 = vrot.slane %v2735_v13, 2  ;;  %v3026_v49 = vrot.slane %v2735_v13, 4  ;;  %v2083_v42 = vsel %vm551_vm3, %v2078_v21, %v2082_v1  ;;  %v2498_v7 = vor.u32 %v2497_v17, %v2496_v45  ;;  %3845 = vst.msk [vmem:[%s5651_s16] sm:$0xf] %vm3844_vm13, %v6071_v2 }
 0x1d8   : > { %v2305_v57 = vmax.bf16 %v2083_v42, %v525_v46  ;;  %v2306_v43 = vmax.bf16 %v2086_v35, %v526_v11  ;;  %v2500_v41 = vrot.slane %v2080_v24, 2  ;;  %v2661_v37 = vrot.slane %v526_v11, 2 }
 0x1d9   : > { %v2947_v19 = vsel %vm1178_vm2, %v2945_v58, %v2946_v3  ;;  %v3028_v44 = vsel %vm3019_vm12, %v3026_v49, %v3027_v62  ;;  %v527_v38 = vmax.bf16 %v6791_v51, %v6790_v18  ;;  %v6066_v46 = vmax.bf16 %v6793_v8, %v6792_v48 }
 0x1da   : > { %v3005_v39 = vmax.bf16 %v2947_v19, %v2735_v13  ;;  %v2449_v15 = vmax.bf16 %v2374_v12, %v2305_v57  ;;  %v2450_v0 = vmax.bf16 %v2373_v33, %v2306_v43  ;;  %v2501_v20 = vor.u32 %v2500_v41, %v2499_v25 }
 0x1db   : > { %v2662_v56 = vsel %vm1178_vm2, %v2660_v50, %v2661_v37  ;;  %v2088_v9 = vshrl.u32 %v527_v38, 16  ;;  %v2090_v40 = vshll.u32 %v527_v38, 16  ;;  %v2375_v11 = vrot.slane %v527_v38, 1  ;;  %v6073_v50 = vpop.permute.xlu1 %3750 }
 0x1dc   : > { %v3086_v55 = vmax.bf16 %v3028_v44, %v3005_v39  ;;  %v2502_v24 = vsel %vm1001_vm4, %v2498_v7, %v2501_v20  ;;  %v2626_v61 = vmax.bf16 %v2501_v20, %v2450_v0  ;;  %v2095_v31 = vshll.u32 %v6066_v46, 16  ;;  %3846 = vst.msk [vmem:[%s5651_s16 + $0x4] sm:$0xf] %vm3844_vm13, %v6073_v50 }
 0x1dd   : > { %v2625_v22 = vmax.bf16 %v2502_v24, %v2449_v15  ;;  %v2092_v5 = vrot.slane %v2090_v40, 1  ;;  %v2099_v33 = vshrl.u32 %v6066_v46, 16  ;;  %v2376_v21 = vrot.slane %v6066_v46, 1  ;;  %v6083_v15 = vpop.permute.xlu0 %3752 }
 0x1de   : > { %v4299_v60 = vcombine.high %v3086_v55, %v3086_v55  ;;  %v4298_v1 = vcombine.low %v3086_v55, %v3086_v55  ;;  %v2738_v13 = vmax.bf16 %v2661_v37, %v2626_v61  ;;  %v2097_v3 = vrot.slane %v2095_v31, 1  ;;  %v6795_v55 = vld [vmem:[#allocation63_spill] sm:$0xff]  ;;  %v6796_v61 = vld [vmem:[#allocation40_spill] sm:$0xff]  ;;  %3847 = vst.msk [vmem:[%s5651_s16 + $0x8] sm:$0xf] %vm3844_vm13, %v6083_v15 }
 0x1df   : > { %v2737_v12 = vmax.bf16 %v2662_v56, %v2625_v22  ;;  %v2093_v45 = vor.u32 %v2092_v5, %v2088_v9  ;;  %v2503_v62 = vrot.slane %v2088_v9, 1  ;;  %v2377_v58 = vsel %vm888_vm1, %v2375_v11, %v2376_v21  ;;  %v6085_v0 = vpop.permute.xlu1 %3754  ;;  %v6797_v11 = vld [vmem:[#allocation64_spill] sm:$0xff]  ;;  %v6798_v5 = vld [vmem:[#allocation65_spill] sm:$0xff] }
 0x1e0   : > { %3967 = vrot.lane.b32.xlu1 %v4299_v60, %s4369_s17  ;;  %3965 = vrot.lane.b32.xlu0 %v4298_v1, %s4369_s17  ;;  %v2949_v35 = vrot.slane %v2738_v13, 2  ;;  %v3030_v17 = vrot.slane %v2738_v13, 4  ;;  %v2504_v49 = vrot.slane %v2090_v40, 2  ;;  %v2101_v43 = vor.u32 %v2099_v33, %v2097_v3  ;;  %v6794_v40 = vld [vmem:[#allocation39_spill] sm:$0xff]  ;;  %v6799_v1 = vld [vmem:[#allocation66_spill] sm:$0xff] }
 0x1e1   : > { %v2948_v42 = vrot.slane %v2737_v12, 2  ;;  %v3029_v25 = vrot.slane %v2737_v12, 4  ;;  %v2098_v57 = vsel %vm551_vm3, %v2093_v45, %v2097_v3  ;;  %v2506_v19 = vrot.slane %v2099_v33, 1  ;;  %3848 = vst.msk [vmem:[%s5651_s16 + $0xc] sm:$0xf] %vm3844_vm13, %v6085_v0 }
 0x1e2   : > { %v2307_v7 = vmax.bf16 %v2098_v57, %v527_v38  ;;  %v2505_v41 = vor.u32 %v2504_v49, %v2503_v62  ;;  %v2507_v44 = vrot.slane %v2095_v31, 2  ;;  %v2308_v51 = vmax.bf16 %v2101_v43, %v6066_v46 }
 0x1e3   : > { %v2950_v37 = vsel %vm1178_vm2, %v2948_v42, %v2949_v35  ;;  %v3031_v18 = vsel %vm3019_vm12, %v3029_v25, %v3030_v17  ;;  %v2663_v39 = vrot.slane %v527_v38, 2  ;;  %v2664_v8 = vrot.slane %v6066_v46, 2  ;;  %v6106_v25 = vpop.permute.xlu0 %3756  ;;  %v6108_v57 = vpop.permute.xlu1 %3758 }
 0x1e4   : > { %v3006_v20 = vmax.bf16 %v2950_v37, %v2737_v12  ;;  %v2451_v56 = vmax.bf16 %v2377_v58, %v2307_v7  ;;  %v2508_v48 = vor.u32 %v2507_v44, %v2506_v19  ;;  %v2452_v9 = vmax.bf16 %v2376_v21, %v2308_v51  ;;  %3849 = vst.msk [vmem:[%s5651_s16 + $0x10] sm:$0xf] %vm3844_vm13, %v6106_v25 }
 0x1e5   : > { %v529_v24 = vmax.bf16 %v6795_v55, %v6794_v40  ;;  %v6092_v22 = vmax.bf16 %v6797_v11, %v6796_v61  ;;  %v6096_v38 = vmax.bf16 %v6798_v5, %v6725_v59  ;;  %v2665_v60 = vsel %vm1178_vm2, %v2663_v39, %v2664_v8  ;;  %3850 = vst.msk [vmem:[%s5651_s16 + $0x14] sm:$0xf] %vm3844_vm13, %v6108_v57 }
 0x1e6   : > { %v3087_v31 = vmax.bf16 %v3031_v18, %v3006_v20  ;;  %v2509_v33 = vsel %vm1001_vm4, %v2505_v41, %v2508_v48  ;;  %v6102_v46 = vmax.bf16 %v6799_v1, %v6727_v36  ;;  %v2628_v21 = vmax.bf16 %v2508_v48, %v2452_v9 }
 0x1e7   : > { %v2627_v13 = vmax.bf16 %v2509_v33, %v2451_v56  ;;  %v2103_v12 = vshrl.u32 %v529_v24, 16  ;;  %v2105_v45 = vshll.u32 %v529_v24, 16  ;;  %v2110_v35 = vshll.u32 %v6092_v22, 16 }
 0x1e8   : > { %v4301_v3 = vcombine.high %v3087_v31, %v3087_v31  ;;  %v4300_v62 = vcombine.low %v3087_v31, %v3087_v31  ;;  %v2114_v59 = vshrl.u32 %v6092_v22, 16  ;;  %v2740_v58 = vmax.bf16 %v2664_v8, %v2628_v21  ;;  %v6122_v21 = vpop.permute.xlu0 %3760 }
 0x1e9   : > { %v2739_v17 = vmax.bf16 %v2665_v60, %v2627_v13  ;;  %v2107_v49 = vrot.slane %v2105_v45, 1  ;;  %v2378_v42 = vrot.slane %v529_v24, 1  ;;  %v2112_v36 = vrot.slane %v2110_v35, 1  ;;  %v6120_v13 = vpop.permute.xlu1 %3762  ;;  %3851 = vst.msk [vmem:[%s5651_s16 + $0x18] sm:$0xf] %vm3844_vm13, %v6122_v21 }
 0x1ea   : > { %3971 = vrot.lane.b32.xlu1 %v4301_v3, %s4369_s17  ;;  %3969 = vrot.lane.b32.xlu0 %v4300_v62, %s4369_s17  ;;  %v2379_v43 = vrot.slane %v6092_v22, 1  ;;  %v2510_v7 = vrot.slane %v2103_v12, 1  ;;  %v2511_v41 = vrot.slane %v2105_v45, 2  ;;  %v2952_v44 = vrot.slane %v2740_v58, 2  ;;  %3852 = vst.msk [vmem:[%s5651_s16 + $0x1c] sm:$0xf] %vm3844_vm13, %v6120_v13 }
 0x1eb   : > { %v2951_v19 = vrot.slane %v2739_v17, 2  ;;  %v3032_v37 = vrot.slane %v2739_v17, 4  ;;  %v3033_v18 = vrot.slane %v2740_v58, 4  ;;  %v2108_v51 = vor.u32 %v2107_v49, %v2103_v12 }
 0x1ec   : > { %v2116_v39 = vor.u32 %v2114_v59, %v2112_v36  ;;  %v2380_v20 = vsel %vm888_vm1, %v2378_v42, %v2379_v43  ;;  %v2512_v56 = vor.u32 %v2511_v41, %v2510_v7  ;;  %v2513_v9 = vrot.slane %v2114_v59, 1 }
 0x1ed   : > { %v2953_v48 = vsel %vm1178_vm2, %v2951_v19, %v2952_v44  ;;  %v3034_v8 = vsel %vm3019_vm12, %v3032_v37, %v3033_v18  ;;  %v2514_v40 = vrot.slane %v2110_v35, 2  ;;  %v2113_v61 = vsel %vm551_vm3, %v2108_v51, %v2112_v36 }
 0x1ee   : > { %v3007_v55 = vmax.bf16 %v2953_v48, %v2739_v17  ;;  %v2310_v11 = vmax.bf16 %v2116_v39, %v6092_v22  ;;  %v2666_v5 = vrot.slane %v529_v24, 2  ;;  %v2309_v31 = vmax.bf16 %v2113_v61, %v529_v24  ;;  %v6134_v48 = vpop.permute.xlu1 %3766 }
 0x1ef   : > { %v2515_v33 = vor.u32 %v2514_v40, %v2513_v9  ;;  %v2667_v60 = vrot.slane %v6092_v22, 2  ;;  %v2118_v1 = vshrl.u32 %v6096_v38, 16  ;;  %v2120_v3 = vshll.u32 %v6096_v38, 16  ;;  %3854 = vst.msk [vmem:[%s5651_s16 + $0x24] sm:$0xf] %vm3844_vm13, %v6134_v48 }
 0x1f0   : > { %v3088_v12 = vmax.bf16 %v3034_v8, %v3007_v55  ;;  %v2454_v45 = vmax.bf16 %v2379_v43, %v2310_v11  ;;  %v2125_v62 = vshll.u32 %v6102_v46, 16  ;;  %v2453_v35 = vmax.bf16 %v2380_v20, %v2309_v31  ;;  %v6136_v8 = vpop.permute.xlu0 %3764 }
 0x1f1   : > { %v2516_v59 = vsel %vm1001_vm4, %v2512_v56, %v2515_v33  ;;  %v2668_v24 = vsel %vm1178_vm2, %v2666_v5, %v2667_v60  ;;  %v2129_v17 = vshrl.u32 %v6102_v46, 16  ;;  %v2122_v42 = vrot.slane %v2120_v3, 1  ;;  %3853 = vst.msk [vmem:[%s5651_s16 + $0x20] sm:$0xf] %vm3844_vm13, %v6136_v8 }
 0x1f2   : > { %v4303_v22 = vcombine.high %v3088_v12, %v3088_v12  ;;  %v4302_v58 = vcombine.low %v3088_v12, %v3088_v12  ;;  %v2630_v49 = vmax.bf16 %v2515_v33, %v2454_v45  ;;  %v2629_v36 = vmax.bf16 %v2516_v59, %v2453_v35  ;;  %v6800_v45 = vld [vmem:[#allocation67_spill] sm:$0xff] }
 0x1f3   : > { %v2127_v7 = vrot.slane %v2125_v62, 1  ;;  %v2381_v41 = vrot.slane %v6096_v38, 1  ;;  %v2382_v43 = vrot.slane %v6102_v46, 1  ;;  %v2123_v44 = vor.u32 %v2122_v42, %v2118_v1  ;;  %v6801_v42 = vld [vmem:[#allocation68_spill] sm:$0xff] }
 0x1f4   : > { %3975 = vrot.lane.b32.xlu1 %v4303_v22, %s4369_s17  ;;  %3973 = vrot.lane.b32.xlu0 %v4302_v58, %s4369_s17  ;;  %v2742_v19 = vmax.bf16 %v2667_v60, %v2630_v49  ;;  %v2517_v37 = vrot.slane %v2118_v1, 1  ;;  %v2518_v18 = vrot.slane %v2120_v3, 2  ;;  %v2741_v51 = vmax.bf16 %v2668_v24, %v2629_v36 }
 0x1f5   : > { %v2131_v39 = vor.u32 %v2129_v17, %v2127_v7  ;;  %v2383_v20 = vsel %vm888_vm1, %v2381_v41, %v2382_v43  ;;  %v2520_v56 = vrot.slane %v2129_v17, 1  ;;  %v2128_v55 = vsel %vm551_vm3, %v2123_v44, %v2127_v7  ;;  %v6152_v41 = vpop.permute.xlu1 %3770 }
 0x1f6   : > { %v2955_v9 = vrot.slane %v2742_v19, 2  ;;  %v3036_v40 = vrot.slane %v2742_v19, 4  ;;  %v2519_v61 = vor.u32 %v2518_v18, %v2517_v37  ;;  %v2954_v11 = vrot.slane %v2741_v51, 2  ;;  %3856 = vst.msk [vmem:[%s5651_s16 + $0x2c] sm:$0xf] %vm3844_vm13, %v6152_v41 }
 0x1f7   : > { %v3035_v5 = vrot.slane %v2741_v51, 4  ;;  %v2311_v31 = vmax.bf16 %v2128_v55, %v6096_v38  ;;  %v2312_v33 = vmax.bf16 %v2131_v39, %v6102_v46  ;;  %v2521_v60 = vrot.slane %v2125_v62, 2 }
 0x1f8   : > { %v2669_v1 = vrot.slane %v6096_v38, 2  ;;  %v2670_v12 = vrot.slane %v6102_v46, 2  ;;  %v533_v3 = vmax.bf16 %v6800_v45, %v6729_v30  ;;  %v2956_v35 = vsel %vm1178_vm2, %v2954_v11, %v2955_v9  ;;  %v6154_v30 = vpop.permute.xlu0 %3768 }
 0x1f9   : > { %v3037_v59 = vsel %vm3019_vm12, %v3035_v5, %v3036_v40  ;;  %v2455_v24 = vmax.bf16 %v2383_v20, %v2311_v31  ;;  %v2456_v17 = vmax.bf16 %v2382_v43, %v2312_v33  ;;  %v3008_v22 = vmax.bf16 %v2956_v35, %v2741_v51  ;;  %3855 = vst.msk [vmem:[%s5651_s16 + $0x28] sm:$0xf] %vm3844_vm13, %v6154_v30 }
 0x1fa   : > { %v2522_v58 = vor.u32 %v2521_v60, %v2520_v56  ;;  %v2671_v49 = vsel %vm1178_vm2, %v2669_v1, %v2670_v12  ;;  %v6150_v62 = vmax.bf16 %v6801_v42, %v6731_v47  ;;  %v2133_v38 = vshrl.u32 %v533_v3, 16 }
 0x1fb   : > { %v2135_v36 = vshll.u32 %v533_v3, 16  ;;  %v2384_v46 = vrot.slane %v533_v3, 1  ;;  %v2672_v7 = vrot.slane %v533_v3, 2  ;;  %v3089_v19 = vmax.bf16 %v3037_v59, %v3008_v22 }
 0x1fc   : > { %v2523_v44 = vsel %vm1001_vm4, %v2519_v61, %v2522_v58  ;;  %v2632_v43 = vmax.bf16 %v2522_v58, %v2456_v17  ;;  %v2140_v37 = vshll.u32 %v6150_v62, 16  ;;  %v2144_v39 = vshrl.u32 %v6150_v62, 16  ;;  %v6166_v17 = vpop.permute.xlu0 %3772 }
 0x1fd   : > { %v2631_v18 = vmax.bf16 %v2523_v44, %v2455_v24  ;;  %v2137_v51 = vrot.slane %v2135_v36, 1  ;;  %v2385_v47 = vrot.slane %v6150_v62, 1  ;;  %v4305_v20 = vcombine.high %v3089_v19, %v3089_v19  ;;  %3857 = vst.msk [vmem:[%s5651_s16 + $0x30] sm:$0xf] %vm3844_vm13, %v6166_v17 }
 0x1fe   : > { %v4304_v56 = vcombine.low %v3089_v19, %v3089_v19  ;;  %v2744_v9 = vmax.bf16 %v2670_v12, %v2632_v43  ;;  %v2142_v40 = vrot.slane %v2140_v37, 1  ;;  %v2524_v31 = vrot.slane %v2133_v38, 1  ;;  %v6164_v12 = vpop.permute.xlu1 %3774  ;;  %v6802_v19 = vld [vmem:[#allocation69_spill] sm:$0xff] }
 0x1ff   : > { %v2743_v55 = vmax.bf16 %v2671_v49, %v2631_v18  ;;  %v2138_v11 = vor.u32 %v2137_v51, %v2133_v38  ;;  %v2386_v5 = vsel %vm888_vm1, %v2384_v46, %v2385_v47  ;;  %3979 = vrot.lane.b32.xlu1 %v4305_v20, %s4369_s17  ;;  %v2525_v1 = vrot.slane %v2135_v36, 2  ;;  %3858 = vst.msk [vmem:[%s5651_s16 + $0x34] sm:$0xf] %vm3844_vm13, %v6164_v12 }
 0x200   : > { %3977 = vrot.lane.b32.xlu0 %v4304_v56, %s4369_s17  ;;  %v2958_v61 = vrot.slane %v2744_v9, 2  ;;  %v3039_v33 = vrot.slane %v2744_v9, 4  ;;  %v2146_v60 = vor.u32 %v2144_v39, %v2142_v40  ;;  %v2527_v24 = vrot.slane %v2144_v39, 1 }
 0x201   : > { %v2957_v45 = vrot.slane %v2743_v55, 2  ;;  %v3038_v35 = vrot.slane %v2743_v55, 4  ;;  %v2143_v59 = vsel %vm551_vm3, %v2138_v11, %v2142_v40  ;;  %v2526_v49 = vor.u32 %v2525_v1, %v2524_v31 }
 0x202   : > { %v2313_v22 = vmax.bf16 %v2143_v59, %v533_v3  ;;  %v2314_v58 = vmax.bf16 %v2146_v60, %v6150_v62  ;;  %v2528_v42 = vrot.slane %v2140_v37, 2  ;;  %v2673_v36 = vrot.slane %v6150_v62, 2  ;;  %v6803_v3 = vld [vmem:[#allocation70_spill] sm:$0xff] }
 0x203   : > { %v2959_v38 = vsel %vm1178_vm2, %v2957_v45, %v2958_v61  ;;  %v3040_v46 = vsel %vm3019_vm12, %v3038_v35, %v3039_v33  ;;  %v535_v44 = vmax.bf16 %v6802_v19, %v5080_v14  ;;  %v6177_v56 = vmax.bf16 %v6803_v3, %v5089_v54 }
 0x204   : > { %v3009_v43 = vmax.bf16 %v2959_v38, %v2743_v55  ;;  %v2457_v18 = vmax.bf16 %v2386_v5, %v2313_v22  ;;  %v2458_v51 = vmax.bf16 %v2385_v47, %v2314_v58  ;;  %v2529_v39 = vor.u32 %v2528_v42, %v2527_v24  ;;  %v6182_v55 = vpop.permute.xlu1 %3778 }
 0x205   : > { %v2674_v20 = vsel %vm1178_vm2, %v2672_v7, %v2673_v36  ;;  %v2148_v37 = vshrl.u32 %v535_v44, 16  ;;  %v2150_v9 = vshll.u32 %v535_v44, 16  ;;  %v2387_v62 = vrot.slane %v535_v44, 1  ;;  %v6184_v7 = vpop.permute.xlu0 %3776  ;;  %3860 = vst.msk [vmem:[%s5651_s16 + $0x3c] sm:$0xf] %vm3844_vm13, %v6182_v55 }
 0x206   : > { %v3090_v40 = vmax.bf16 %v3040_v46, %v3009_v43  ;;  %v2530_v11 = vsel %vm1001_vm4, %v2526_v49, %v2529_v39  ;;  %v2634_v31 = vmax.bf16 %v2529_v39, %v2458_v51  ;;  %v2155_v14 = vshll.u32 %v6177_v56, 16  ;;  %3859 = vst.msk [vmem:[%s5651_s16 + $0x38] sm:$0xf] %vm3844_vm13, %v6184_v7 }
 0x207   : > { %v2633_v61 = vmax.bf16 %v2530_v11, %v2457_v18  ;;  %v2152_v33 = vrot.slane %v2150_v9, 1  ;;  %v2159_v47 = vshrl.u32 %v6177_v56, 16  ;;  %v2388_v1 = vrot.slane %v6177_v56, 1 }
 0x208   : > { %v4307_v5 = vcombine.high %v3090_v40, %v3090_v40  ;;  %v4306_v54 = vcombine.low %v3090_v40, %v3090_v40  ;;  %v2746_v60 = vmax.bf16 %v2673_v36, %v2634_v31  ;;  %v2157_v59 = vrot.slane %v2155_v14, 1  ;;  %v6194_v11 = vpop.permute.xlu1 %3782 }
 0x209   : > { %v2745_v45 = vmax.bf16 %v2674_v20, %v2633_v61  ;;  %v2153_v35 = vor.u32 %v2152_v33, %v2148_v37  ;;  %v2531_v24 = vrot.slane %v2148_v37, 1  ;;  %v2389_v49 = vsel %vm888_vm1, %v2387_v62, %v2388_v1  ;;  %v6196_v31 = vpop.permute.xlu0 %3780  ;;  %3862 = vst.msk [vmem:[%s5651_s16 + $0x44] sm:$0xf] %vm3844_vm13, %v6194_v11 }
 0x20a   : > { %3983 = vrot.lane.b32.xlu1 %v4307_v5, %s4369_s17  ;;  %3981 = vrot.lane.b32.xlu0 %v4306_v54, %s4369_s17  ;;  %v2961_v22 = vrot.slane %v2746_v60, 2  ;;  %v3042_v58 = vrot.slane %v2746_v60, 4  ;;  %v2532_v42 = vrot.slane %v2150_v9, 2  ;;  %v2161_v36 = vor.u32 %v2159_v47, %v2157_v59  ;;  %v6805_v54 = vld [vmem:[#allocation72_spill] sm:$0xff]  ;;  %3861 = vst.msk [vmem:[%s5651_s16 + $0x40] sm:$0xf] %vm3844_vm13, %v6196_v31 }
 0x20b   : > { %v2960_v38 = vrot.slane %v2745_v45, 2  ;;  %v3041_v46 = vrot.slane %v2745_v45, 4  ;;  %v2158_v19 = vsel %vm551_vm3, %v2153_v35, %v2157_v59  ;;  %v2534_v51 = vrot.slane %v2159_v47, 1  ;;  %v6804_v47 = vld [vmem:[#allocation71_spill] sm:$0xff] }
 0x20c   : > { %v2315_v43 = vmax.bf16 %v2158_v19, %v535_v44  ;;  %v2533_v18 = vor.u32 %v2532_v42, %v2531_v24  ;;  %v2535_v39 = vrot.slane %v2155_v14, 2  ;;  %v2316_v37 = vmax.bf16 %v2161_v36, %v6177_v56  ;;  %v6806_v35 = vld [vmem:[#allocation55_spill] sm:$0xff] }
 0x20d   : > { %v2962_v20 = vsel %vm1178_vm2, %v2960_v38, %v2961_v22  ;;  %v3043_v3 = vsel %vm3019_vm12, %v3041_v46, %v3042_v58  ;;  %v2675_v40 = vrot.slane %v535_v44, 2  ;;  %v2676_v33 = vrot.slane %v6177_v56, 2  ;;  %v6807_v59 = vld [vmem:[#allocation43_spill] sm:$0xff]  ;;  %v6808_v58 = vld [vmem:[#allocation56_spill] sm:$0xff] }
 0x20e   : > { %v3010_v9 = vmax.bf16 %v2962_v20, %v2745_v45  ;;  %v2459_v62 = vmax.bf16 %v2389_v49, %v2315_v43  ;;  %v2536_v61 = vor.u32 %v2535_v39, %v2534_v51  ;;  %v2460_v5 = vmax.bf16 %v2388_v1, %v2316_v37  ;;  %v6809_v49 = vld [vmem:[#allocation44_spill] sm:$0xff]  ;;  %v6217_v20 = vpop.permute.xlu1 %3786 }
 0x20f   : > { %v537_v14 = vmax.bf16 %v6804_v47, %v6776_v53  ;;  %v6203_v60 = vmax.bf16 %v6805_v54, %v6777_v16  ;;  %v6207_v44 = vmax.bf16 %v6807_v59, %v6806_v35  ;;  %v2677_v45 = vsel %vm1178_vm2, %v2675_v40, %v2676_v33  ;;  %3864 = vst.msk [vmem:[%s5651_s16 + $0x4c] sm:$0xf] %vm3844_vm13, %v6217_v20 }
 0x210   : > { %v3091_v24 = vmax.bf16 %v3043_v3, %v3010_v9  ;;  %v2537_v22 = vsel %vm1001_vm4, %v2533_v18, %v2536_v61  ;;  %v6213_v56 = vmax.bf16 %v6809_v49, %v6808_v58  ;;  %v2636_v42 = vmax.bf16 %v2536_v61, %v2460_v5  ;;  %v6219_v3 = vpop.permute.xlu0 %3784 }
 0x211   : > { %v2635_v1 = vmax.bf16 %v2537_v22, %v2459_v62  ;;  %v2163_v53 = vshrl.u32 %v537_v14, 16  ;;  %v2165_v38 = vshll.u32 %v537_v14, 16  ;;  %v2170_v19 = vshll.u32 %v6203_v60, 16  ;;  %3863 = vst.msk [vmem:[%s5651_s16 + $0x48] sm:$0xf] %vm3844_vm13, %v6219_v3 }
 0x212   : > { %v4309_v46 = vcombine.high %v3091_v24, %v3091_v24  ;;  %v4308_v16 = vcombine.low %v3091_v24, %v3091_v24  ;;  %v2174_v36 = vshrl.u32 %v6203_v60, 16  ;;  %v2748_v51 = vmax.bf16 %v2676_v33, %v2636_v42 }
 0x213   : > { %v2747_v43 = vmax.bf16 %v2677_v45, %v2635_v1  ;;  %v2167_v39 = vrot.slane %v2165_v38, 1  ;;  %v2390_v18 = vrot.slane %v537_v14, 1  ;;  %v2172_v37 = vrot.slane %v2170_v19, 1 }
 0x214   : > { %3987 = vrot.lane.b32.xlu1 %v4309_v46, %s4369_s17  ;;  %3985 = vrot.lane.b32.xlu0 %v4308_v16, %s4369_s17  ;;  %v2391_v40 = vrot.slane %v6203_v60, 1  ;;  %v2538_v9 = vrot.slane %v2163_v53, 1  ;;  %v2539_v62 = vrot.slane %v2165_v38, 2  ;;  %v2964_v5 = vrot.slane %v2748_v51, 2 }
 0x215   : > { %v2963_v61 = vrot.slane %v2747_v43, 2  ;;  %v3044_v47 = vrot.slane %v2747_v43, 4  ;;  %v3045_v54 = vrot.slane %v2748_v51, 4  ;;  %v2168_v33 = vor.u32 %v2167_v39, %v2163_v53  ;;  %v6231_v39 = vpop.permute.xlu1 %3790 }
 0x216   : > { %v2176_v35 = vor.u32 %v2174_v36, %v2172_v37  ;;  %v2392_v59 = vsel %vm888_vm1, %v2390_v18, %v2391_v40  ;;  %v2540_v24 = vor.u32 %v2539_v62, %v2538_v9  ;;  %v2541_v58 = vrot.slane %v2174_v36, 1  ;;  %v6233_v18 = vpop.permute.xlu0 %3788  ;;  %3866 = vst.msk [vmem:[%s5651_s16 + $0x54] sm:$0xf] %vm3844_vm13, %v6231_v39 }
 0x217   : > { %v2965_v22 = vsel %vm1178_vm2, %v2963_v61, %v2964_v5  ;;  %v3046_v45 = vsel %vm3019_vm12, %v3044_v47, %v3045_v54  ;;  %v2542_v49 = vrot.slane %v2170_v19, 2  ;;  %v2173_v42 = vsel %vm551_vm3, %v2168_v33, %v2172_v37  ;;  %3865 = vst.msk [vmem:[%s5651_s16 + $0x50] sm:$0xf] %vm3844_vm13, %v6233_v18 }
 0x218   : > { %v3011_v1 = vmax.bf16 %v2965_v22, %v2747_v43  ;;  %v2318_v38 = vmax.bf16 %v2176_v35, %v6203_v60  ;;  %v2678_v46 = vrot.slane %v537_v14, 2  ;;  %v2317_v16 = vmax.bf16 %v2173_v42, %v537_v14 }
 0x219   : > { %v2543_v63 = vor.u32 %v2542_v49, %v2541_v58  ;;  %v2679_v53 = vrot.slane %v6203_v60, 2  ;;  %v2178_v51 = vshrl.u32 %v6207_v44, 16  ;;  %v2180_v19 = vshll.u32 %v6207_v44, 16 }
 0x21a   : > { %v3092_v9 = vmax.bf16 %v3046_v45, %v3011_v1  ;;  %v2462_v62 = vmax.bf16 %v2391_v40, %v2318_v38  ;;  %v2185_v36 = vshll.u32 %v6213_v56, 16  ;;  %v2461_v43 = vmax.bf16 %v2392_v59, %v2317_v16  ;;  %v6245_v38 = vpop.permute.xlu1 %3794 }
 0x21b   : > { %v2544_v37 = vsel %vm1001_vm4, %v2540_v24, %v2543_v63  ;;  %v2680_v14 = vsel %vm1178_vm2, %v2678_v46, %v2679_v53  ;;  %v2189_v61 = vshrl.u32 %v6213_v56, 16  ;;  %v2182_v54 = vrot.slane %v2180_v19, 1  ;;  %v6247_v46 = vpop.permute.xlu0 %3792  ;;  %3868 = vst.msk [vmem:[%s5651_s16 + $0x5c] sm:$0xf] %vm3844_vm13, %v6245_v38 }
 0x21c   : > { %v4311_v60 = vcombine.high %v3092_v9, %v3092_v9  ;;  %v4310_v5 = vcombine.low %v3092_v9, %v3092_v9  ;;  %v2638_v47 = vmax.bf16 %v2543_v63, %v2462_v62  ;;  %v2637_v33 = vmax.bf16 %v2544_v37, %v2461_v43  ;;  %3867 = vst.msk [vmem:[%s5651_s16 + $0x58] sm:$0xf] %vm3844_vm13, %v6247_v46 }
 0x21d   : > { %v2187_v35 = vrot.slane %v2185_v36, 1  ;;  %v2393_v22 = vrot.slane %v6207_v44, 1  ;;  %v2394_v40 = vrot.slane %v6213_v56, 1  ;;  %v2183_v24 = vor.u32 %v2182_v54, %v2178_v51 }
 0x21e   : > { %3991 = vrot.lane.b32.xlu1 %v4311_v60, %s4369_s17  ;;  %3989 = vrot.lane.b32.xlu0 %v4310_v5, %s4369_s17  ;;  %v2750_v59 = vmax.bf16 %v2679_v53, %v2638_v47  ;;  %v2545_v45 = vrot.slane %v2178_v51, 1  ;;  %v2546_v58 = vrot.slane %v2180_v19, 2  ;;  %v2749_v49 = vmax.bf16 %v2680_v14, %v2637_v33  ;;  %v6810_v5 = vld [vmem:[#allocation49_spill] sm:$0xff]  ;;  %v6263_v26 = vpop.permute.xlu1 %3798 }
 0x21f   : > { %v2191_v1 = vor.u32 %v2189_v61, %v2187_v35  ;;  %v2395_v42 = vsel %vm888_vm1, %v2393_v22, %v2394_v40  ;;  %v2548_v63 = vrot.slane %v2189_v61, 1  ;;  %v2188_v62 = vsel %vm551_vm3, %v2183_v24, %v2187_v35  ;;  %3870 = vst.msk [vmem:[%s5651_s16 + $0x64] sm:$0xf] %vm3844_vm13, %v6263_v26 }
 0x220   : > { %v2967_v16 = vrot.slane %v2750_v59, 2  ;;  %v3048_v9 = vrot.slane %v2750_v59, 4  ;;  %v2547_v43 = vor.u32 %v2546_v58, %v2545_v45  ;;  %v2966_v37 = vrot.slane %v2749_v49, 2  ;;  %v6811_v58 = vld [vmem:[#allocation50_spill] sm:$0xff] }
 0x221   : > { %v3047_v60 = vrot.slane %v2749_v49, 4  ;;  %v2319_v53 = vmax.bf16 %v2188_v62, %v6207_v44  ;;  %v2320_v51 = vmax.bf16 %v2191_v1, %v6213_v56  ;;  %v2549_v19 = vrot.slane %v2185_v36, 2 }
 0x222   : > { %v2681_v14 = vrot.slane %v6207_v44, 2  ;;  %v2682_v61 = vrot.slane %v6213_v56, 2  ;;  %v541_v47 = vmax.bf16 %v6810_v5, %v5188_v27  ;;  %v2968_v54 = vsel %vm1178_vm2, %v2966_v37, %v2967_v16  ;;  %v6265_v27 = vpop.permute.xlu0 %3796 }
 0x223   : > { %v3049_v33 = vsel %vm3019_vm12, %v3047_v60, %v3048_v9  ;;  %v2463_v35 = vmax.bf16 %v2395_v42, %v2319_v53  ;;  %v2464_v22 = vmax.bf16 %v2394_v40, %v2320_v51  ;;  %v3012_v59 = vmax.bf16 %v2968_v54, %v2749_v49  ;;  %3869 = vst.msk [vmem:[%s5651_s16 + $0x60] sm:$0xf] %vm3844_vm13, %v6265_v27 }
 0x224   : > { %v2550_v24 = vor.u32 %v2549_v19, %v2548_v63  ;;  %v2683_v45 = vsel %vm1178_vm2, %v2681_v14, %v2682_v61  ;;  %v6261_v36 = vmax.bf16 %v6811_v58, %v5196_v23  ;;  %v2193_v44 = vshrl.u32 %v541_v47, 16 }
 0x225   : > { %v2195_v1 = vshll.u32 %v541_v47, 16  ;;  %v2396_v56 = vrot.slane %v541_v47, 1  ;;  %v2684_v62 = vrot.slane %v541_v47, 2  ;;  %v3093_v16 = vmax.bf16 %v3049_v33, %v3012_v59 }
 0x226   : > { %v2551_v42 = vsel %vm1001_vm4, %v2547_v43, %v2550_v24  ;;  %v2640_v40 = vmax.bf16 %v2550_v24, %v2464_v22  ;;  %v2200_v49 = vshll.u32 %v6261_v36, 16  ;;  %v2204_v37 = vshrl.u32 %v6261_v36, 16 }
 0x227   : > { %v2639_v63 = vmax.bf16 %v2551_v42, %v2463_v35  ;;  %v2197_v9 = vrot.slane %v2195_v1, 1  ;;  %v2397_v23 = vrot.slane %v6261_v36, 1  ;;  %v4313_v60 = vcombine.high %v3093_v16, %v3093_v16 }
 0x228   : > { %v4312_v53 = vcombine.low %v3093_v16, %v3093_v16  ;;  %v2752_v51 = vmax.bf16 %v2682_v61, %v2640_v40  ;;  %v2202_v19 = vrot.slane %v2200_v49, 1  ;;  %v2552_v33 = vrot.slane %v2193_v44, 1  ;;  %v6275_v61 = vpop.permute.xlu1 %3802 }
 0x229   : > { %v2751_v14 = vmax.bf16 %v2683_v45, %v2639_v63  ;;  %v2198_v5 = vor.u32 %v2197_v9, %v2193_v44  ;;  %v2398_v54 = vsel %vm888_vm1, %v2396_v56, %v2397_v23  ;;  %3995 = vrot.lane.b32.xlu1 %v4313_v60, %s4369_s17  ;;  %v2553_v59 = vrot.slane %v2195_v1, 2  ;;  %v6277_v45 = vpop.permute.xlu0 %3800  ;;  %3872 = vst.msk [vmem:[%s5651_s16 + $0x6c] sm:$0xf] %vm3844_vm13, %v6275_v61 }
 0x22a   : > { %3993 = vrot.lane.b32.xlu0 %v4312_v53, %s4369_s17  ;;  %v2970_v43 = vrot.slane %v2752_v51, 2  ;;  %v3051_v35 = vrot.slane %v2752_v51, 4  ;;  %v2206_v22 = vor.u32 %v2204_v37, %v2202_v19  ;;  %v2555_v16 = vrot.slane %v2204_v37, 1  ;;  %v6812_v53 = vld [vmem:[#allocation73_spill] sm:$0xff]  ;;  %3871 = vst.msk [vmem:[%s5651_s16 + $0x68] sm:$0xf] %vm3844_vm13, %v6277_v45 }
 0x22b   : > { %v2969_v24 = vrot.slane %v2751_v14, 2  ;;  %v3050_v58 = vrot.slane %v2751_v14, 4  ;;  %v2203_v42 = vsel %vm551_vm3, %v2198_v5, %v2202_v19  ;;  %v2554_v56 = vor.u32 %v2553_v59, %v2552_v33 }
 0x22c   : > { %v2321_v40 = vmax.bf16 %v2203_v42, %v541_v47  ;;  %v2322_v44 = vmax.bf16 %v2206_v22, %v6261_v36  ;;  %v2556_v63 = vrot.slane %v2200_v49, 2  ;;  %v2685_v1 = vrot.slane %v6261_v36, 2 }
 0x22d   : > { %v2971_v9 = vsel %vm1178_vm2, %v2969_v24, %v2970_v43  ;;  %v3052_v60 = vsel %vm3019_vm12, %v3050_v58, %v3051_v35  ;;  %v543_v51 = vmax.bf16 %v6812_v53, %v5903_v34  ;;  %v2215_v33 = vshll.u32 %v5927_v4, 16 }
 0x22e   : > { %v3013_v19 = vmax.bf16 %v2971_v9, %v2751_v14  ;;  %v2465_v37 = vmax.bf16 %v2398_v54, %v2321_v40  ;;  %v2466_v5 = vmax.bf16 %v2397_v23, %v2322_v44  ;;  %v2557_v10 = vor.u32 %v2556_v63, %v2555_v16  ;;  %v6289_v14 = vpop.permute.xlu1 %3806  ;;  %v6291_v23 = vpop.permute.xlu0 %3804 }
 0x22f   : > { %v2686_v6 = vsel %vm1178_vm2, %v2684_v62, %v2685_v1  ;;  %v2208_v47 = vshrl.u32 %v543_v51, 16  ;;  %v2210_v42 = vshll.u32 %v543_v51, 16  ;;  %v2219_v35 = vshrl.u32 %v5927_v4, 16  ;;  %3874 = vst.msk [vmem:[%s5651_s16 + $0x74] sm:$0xf] %vm3844_vm13, %v6289_v14 }
 0x230   : > { %v3094_v49 = vmax.bf16 %v3052_v60, %v3013_v19  ;;  %v2558_v43 = vsel %vm1001_vm4, %v2554_v56, %v2557_v10  ;;  %v2642_v22 = vmax.bf16 %v2557_v10, %v2466_v5  ;;  %v2217_v24 = vrot.slane %v2215_v33, 1  ;;  %3873 = vst.msk [vmem:[%s5651_s16 + $0x70] sm:$0xf] %vm3844_vm13, %v6291_v23 }
 0x231   : > { %v2641_v36 = vmax.bf16 %v2558_v43, %v2465_v37  ;;  %v2212_v59 = vrot.slane %v2210_v42, 1  ;;  %v2399_v34 = vrot.slane %v543_v51, 1  ;;  %v2400_v16 = vrot.slane %v5927_v4, 1 }
 0x232   : > { %v4315_v54 = vcombine.high %v3094_v49, %v3094_v49  ;;  %v4314_v62 = vcombine.low %v3094_v49, %v3094_v49  ;;  %v2754_v58 = vmax.bf16 %v2685_v1, %v2642_v22  ;;  %v2221_v63 = vor.u32 %v2219_v35, %v2217_v24 }
 0x233   : > { %v2753_v40 = vmax.bf16 %v2686_v6, %v2641_v36  ;;  %v2213_v44 = vor.u32 %v2212_v59, %v2208_v47  ;;  %v2559_v56 = vrot.slane %v2208_v47, 1  ;;  %v2401_v60 = vsel %vm888_vm1, %v2399_v34, %v2400_v16  ;;  %v3811_v34 = vpop.permute.xlu1 %3810 }
 0x234   : > { %3999 = vrot.lane.b32.xlu1 %v4315_v54, %s4369_s17  ;;  %3997 = vrot.lane.b32.xlu0 %v4314_v62, %s4369_s17  ;;  %v2973_v10 = vrot.slane %v2754_v58, 2  ;;  %v3054_v9 = vrot.slane %v2754_v58, 4  ;;  %v2560_v53 = vrot.slane %v2210_v42, 2  ;;  %v2324_v1 = vmax.bf16 %v2221_v63, %v5927_v4  ;;  %v3809_v42 = vpop.permute.xlu0 %3808  ;;  %3876 = vst.msk [vmem:[%s5651_s16 + $0x7c] sm:$0xf] %vm3844_vm13, %v3811_v34 }
 0x235   : > { %v2972_v19 = vrot.slane %v2753_v40, 2  ;;  %v3053_v37 = vrot.slane %v2753_v40, 4  ;;  %v2218_v5 = vsel %vm551_vm3, %v2213_v44, %v2217_v24  ;;  %v2562_v43 = vrot.slane %v2219_v35, 1  ;;  %v6813_v35 = vld [vmem:[#allocation75_spill] sm:$0xff]  ;;  %3875 = vst.msk [vmem:[%s5651_s16 + $0x78] sm:$0xf] %vm3844_vm13, %v3809_v42 }
 0x236   : > { %v2323_v49 = vmax.bf16 %v2218_v5, %v543_v51  ;;  %v2561_v6 = vor.u32 %v2560_v53, %v2559_v56  ;;  %v2563_v22 = vrot.slane %v2215_v33, 2  ;;  %v2468_v59 = vmax.bf16 %v2400_v16, %v2324_v1  ;;  %v6814_v53 = vld [vmem:[#allocation4_spill] sm:$0xff]  ;;  %v6816_v5 = vld [vmem:[#allocation2_spill] sm:$0xff] }
 0x237   : > { %v2974_v47 = vsel %vm1178_vm2, %v2972_v19, %v2973_v10  ;;  %v3055_v36 = vsel %vm3019_vm12, %v3053_v37, %v3054_v9  ;;  %v2687_v54 = vrot.slane %v543_v51, 2  ;;  %v2688_v33 = vrot.slane %v5927_v4, 2  ;;  %v6815_v19 = vld [vmem:[#allocation76_spill] sm:$0xff] }
 0x238   : > { %v3014_v62 = vmax.bf16 %v2974_v47, %v2753_v40  ;;  %v2467_v24 = vmax.bf16 %v2401_v60, %v2323_v49  ;;  %v2564_v58 = vor.u32 %v2563_v22, %v2562_v43  ;;  %v6304_v16 = vmax.bf16 %v6813_v35, %v5943_v32 }
 0x239   : > { %v2230_v51 = vshll.u32 %v5957_v28, 16  ;;  %v2234_v40 = vshrl.u32 %v5957_v28, 16  ;;  %v2689_v56 = vsel %vm1178_vm2, %v2687_v54, %v2688_v33  ;;  %v2403_v8 = vrot.slane %v5957_v28, 1 }
 0x23a   : > { %v3095_v44 = vmax.bf16 %v3055_v36, %v3014_v62  ;;  %v2565_v63 = vsel %vm1001_vm4, %v2561_v6, %v2564_v58  ;;  %v2644_v4 = vmax.bf16 %v2564_v58, %v2468_v59  ;;  %v2223_v32 = vshrl.u32 %v6304_v16, 16 }
 0x23b   : > { %v2643_v26 = vmax.bf16 %v2565_v63, %v2467_v24  ;;  %v2225_v2 = vshll.u32 %v6304_v16, 16  ;;  %v2232_v50 = vrot.slane %v2230_v51, 1  ;;  %v2402_v57 = vrot.slane %v6304_v16, 1 }
 0x23c   : > { %v4317_v15 = vcombine.high %v3095_v44, %v3095_v44  ;;  %v4316_v0 = vcombine.low %v3095_v44, %v3095_v44  ;;  %v2756_v25 = vmax.bf16 %v2688_v33, %v2644_v4  ;;  %v2566_v12 = vrot.slane %v2223_v32, 1 }
 0x23d   : > { %v2755_v13 = vmax.bf16 %v2689_v56, %v2643_v26  ;;  %v2227_v21 = vrot.slane %v2225_v2, 1  ;;  %v2236_v48 = vor.u32 %v2234_v40, %v2232_v50  ;;  %v2567_v17 = vrot.slane %v2225_v2, 2 }
 0x23e   : > { %4003 = vrot.lane.b32.xlu1 %v4317_v15, %s4369_s17  ;;  %4001 = vrot.lane.b32.xlu0 %v4316_v0, %s4369_s17  ;;  %v2976_v41 = vrot.slane %v2756_v25, 2  ;;  %v3057_v30 = vrot.slane %v2756_v25, 4  ;;  %v2404_v20 = vsel %vm888_vm1, %v2402_v57, %v2403_v8  ;;  %v2569_v39 = vrot.slane %v2234_v40, 1  ;;  %v6438_v15 = vpop.permute.xlu0 %3957 }
 0x23f   : > { %v2975_v55 = vrot.slane %v2755_v13, 2  ;;  %v3056_v7 = vrot.slane %v2755_v13, 4  ;;  %v2228_v11 = vor.u32 %v2227_v21, %v2223_v32  ;;  %v2326_v31 = vmax.bf16 %v2236_v48, %v5957_v28  ;;  %4054 = vst.msk [vmem:[%s5651_s16] sm:$0xf] %vm4053_vm14, %v6438_v15 }
 0x240   : > { %v2568_v3 = vor.u32 %v2567_v17, %v2566_v12  ;;  %v2570_v18 = vrot.slane %v2230_v51, 2  ;;  %v2690_v10 = vrot.slane %v6304_v16, 2  ;;  %v2691_v9 = vrot.slane %v5957_v28, 2 }
 0x241   : > { %v2977_v38 = vsel %vm1178_vm2, %v2975_v55, %v2976_v41  ;;  %v3058_v46 = vsel %vm3019_vm12, %v3056_v7, %v3057_v30  ;;  %v2233_v27 = vsel %vm551_vm3, %v2228_v11, %v2232_v50  ;;  %v2470_v61 = vmax.bf16 %v2403_v8, %v2326_v31  ;;  %v6436_v50 = vpop.permute.xlu1 %3959  ;;  %v6817_v11 = vld [vmem:[#allocation3_spill] sm:$0xff] }
 0x242   : > { %v3015_v45 = vmax.bf16 %v2977_v38, %v2755_v13  ;;  %v2325_v14 = vmax.bf16 %v2233_v27, %v6304_v16  ;;  %v2571_v23 = vor.u32 %v2570_v18, %v2569_v39  ;;  %v547_v60 = vmax.bf16 %v5620_v29, %v5228_v52  ;;  %4055 = vst.msk [vmem:[%s5651_s16 + $0x4] sm:$0xf] %vm4053_vm14, %v6436_v50 }
 0x243   : > { %v6422_v37 = vmax.bf16 %v6815_v19, %v6814_v53  ;;  %v6426_v1 = vmax.bf16 %v6816_v5, %v5228_v52  ;;  %v2692_v47 = vsel %vm1178_vm2, %v2690_v10, %v2691_v9  ;;  %v550_v31 = vmax.bf16 %v6817_v11, %v6814_v53 }
 0x244   : > { %v3096_v49 = vmax.bf16 %v3058_v46, %v3015_v45  ;;  %v2469_v6 = vmax.bf16 %v2404_v20, %v2325_v14  ;;  %v2572_v43 = vsel %vm1001_vm4, %v2568_v3, %v2571_v23  ;;  %v2646_v22 = vmax.bf16 %v2571_v23, %v2470_v61 }
 0x245   : > { %v2238_v36 = vshrl.u32 %v547_v60, 16  ;;  %v2240_v28 = vshll.u32 %v547_v60, 16  ;;  %v2245_v59 = vshll.u32 %v6422_v37, 16  ;;  %v2249_v52 = vshrl.u32 %v6422_v37, 16 }
 0x246   : > { %v4319_v29 = vcombine.high %v3096_v49, %v3096_v49  ;;  %v4318_v54 = vcombine.low %v3096_v49, %v3096_v49  ;;  %v2645_v34 = vmax.bf16 %v2572_v43, %v2469_v6  ;;  %v2758_v42 = vmax.bf16 %v2691_v9, %v2646_v22 }
 0x247   : > { %v2242_v62 = vrot.slane %v2240_v28, 1  ;;  %v2247_v24 = vrot.slane %v2245_v59, 1  ;;  %v2405_v58 = vrot.slane %v547_v60, 1  ;;  %v2406_v51 = vrot.slane %v6422_v37, 1 }
 0x248   : > { %4007 = vrot.lane.b32.xlu1 %v4319_v29, %s4369_s17  ;;  %4005 = vrot.lane.b32.xlu0 %v4318_v54, %s4369_s17  ;;  %v2757_v33 = vmax.bf16 %v2692_v47, %v2645_v34  ;;  %v2979_v35 = vrot.slane %v2758_v42, 2  ;;  %v3060_v16 = vrot.slane %v2758_v42, 4  ;;  %v2573_v63 = vrot.slane %v2238_v36, 1  ;;  %v3964_v23 = vpop.permute.xlu1 %3963  ;;  %v3962_v10 = vpop.permute.xlu0 %3961 }
 0x249   : > { %v2243_v40 = vor.u32 %v2242_v62, %v2238_v36  ;;  %v2251_v44 = vor.u32 %v2249_v52, %v2247_v24  ;;  %v2574_v4 = vrot.slane %v2240_v28, 2  ;;  %v2407_v32 = vsel %vm888_vm1, %v2405_v58, %v2406_v51  ;;  %4057 = vst.msk [vmem:[%s5651_s16 + $0xc] sm:$0xf] %vm4053_vm14, %v3964_v23  ;;  %4056 = vst.msk [vmem:[%s5651_s16 + $0x8] sm:$0xf] %vm4053_vm14, %v3962_v10 }
 0x24a   : > { %v2978_v56 = vrot.slane %v2757_v33, 2  ;;  %v3059_v26 = vrot.slane %v2757_v33, 4  ;;  %v2576_v2 = vrot.slane %v2249_v52, 1  ;;  %v2577_v13 = vrot.slane %v2245_v59, 2 }
 0x24b   : > { %v2248_v0 = vsel %vm551_vm3, %v2243_v40, %v2247_v24  ;;  %v2328_v25 = vmax.bf16 %v2251_v44, %v6422_v37  ;;  %v2575_v57 = vor.u32 %v2574_v4, %v2573_v63  ;;  %v2693_v41 = vrot.slane %v547_v60, 2 }
 0x24c   : > { %v2980_v21 = vsel %vm1178_vm2, %v2978_v56, %v2979_v35  ;;  %v3061_v48 = vsel %vm3019_vm12, %v3059_v26, %v3060_v16  ;;  %v2327_v8 = vmax.bf16 %v2248_v0, %v547_v60  ;;  %v2578_v17 = vor.u32 %v2577_v13, %v2576_v2 }
 0x24d   : > { %v3016_v30 = vmax.bf16 %v2980_v21, %v2757_v33  ;;  %v2472_v12 = vmax.bf16 %v2406_v51, %v2328_v25  ;;  %v2694_v55 = vrot.slane %v6422_v37, 2  ;;  %v2253_v20 = vshrl.u32 %v6426_v1, 16 }
 0x24e   : > { %v2471_v7 = vmax.bf16 %v2407_v32, %v2327_v8  ;;  %v2255_v3 = vshll.u32 %v6426_v1, 16  ;;  %v2579_v18 = vsel %vm1001_vm4, %v2575_v57, %v2578_v17  ;;  %v2260_v45 = vshll.u32 %v550_v31, 16 }
 0x24f   : > { %v3097_v39 = vmax.bf16 %v3061_v48, %v3016_v30  ;;  %v2648_v38 = vmax.bf16 %v2578_v17, %v2472_v12  ;;  %v2695_v46 = vsel %vm1178_vm2, %v2693_v41, %v2694_v55  ;;  %v2264_v14 = vshrl.u32 %v550_v31, 16 }
 0x250   : > { %v2647_v27 = vmax.bf16 %v2579_v18, %v2471_v7  ;;  %v2257_v61 = vrot.slane %v2255_v3, 1  ;;  %v2408_v53 = vrot.slane %v6426_v1, 1  ;;  %v2262_v49 = vrot.slane %v2260_v45, 1 }
 0x251   : > { %v4321_v9 = vcombine.high %v3097_v39, %v3097_v39  ;;  %v4320_v60 = vcombine.low %v3097_v39, %v3097_v39  ;;  %v2760_v19 = vmax.bf16 %v2694_v55, %v2648_v38  ;;  %v2409_v6 = vrot.slane %v550_v31, 1 }
 0x252   : > { %v2759_v37 = vmax.bf16 %v2695_v46, %v2647_v27  ;;  %v2258_v5 = vor.u32 %v2257_v61, %v2253_v20  ;;  %v2580_v47 = vrot.slane %v2253_v20, 1  ;;  %v2581_v36 = vrot.slane %v2255_v3, 2  ;;  %v3968_v16 = vpop.permute.xlu1 %3967  ;;  %v3966_v51 = vpop.permute.xlu0 %3965 }
 0x253   : > { %4011 = vrot.lane.b32.xlu1 %v4321_v9, %s4369_s17  ;;  %4009 = vrot.lane.b32.xlu0 %v4320_v60, %s4369_s17  ;;  %v2982_v43 = vrot.slane %v2760_v19, 2  ;;  %v3063_v22 = vrot.slane %v2760_v19, 4  ;;  %v2266_v54 = vor.u32 %v2264_v14, %v2262_v49  ;;  %v2410_v42 = vsel %vm888_vm1, %v2408_v53, %v2409_v6  ;;  %4059 = vst.msk [vmem:[%s5651_s16 + $0x14] sm:$0xf] %vm4053_vm14, %v3968_v16 }
 0x254   : > { %v2981_v28 = vrot.slane %v2759_v37, 2  ;;  %v3062_v59 = vrot.slane %v2759_v37, 4  ;;  %v2263_v29 = vsel %vm551_vm3, %v2258_v5, %v2262_v49  ;;  %v2582_v62 = vor.u32 %v2581_v36, %v2580_v47  ;;  %4058 = vst.msk [vmem:[%s5651_s16 + $0x10] sm:$0xf] %vm4053_vm14, %v3966_v51 }
 0x255   : > { %v2329_v34 = vmax.bf16 %v2263_v29, %v6426_v1  ;;  %v2583_v24 = vrot.slane %v2264_v14, 1  ;;  %v2330_v33 = vmax.bf16 %v2266_v54, %v550_v31  ;;  %v2584_v35 = vrot.slane %v2260_v45, 2 }
 0x256   : > { %v2983_v52 = vsel %vm1178_vm2, %v2981_v28, %v2982_v43  ;;  %v3064_v58 = vsel %vm3019_vm12, %v3062_v59, %v3063_v22  ;;  %v2696_v63 = vrot.slane %v6426_v1, 2  ;;  %v2697_v4 = vrot.slane %v550_v31, 2 }
 0x257   : > { %v3017_v40 = vmax.bf16 %v2983_v52, %v2759_v37  ;;  %v2473_v44 = vmax.bf16 %v2410_v42, %v2329_v34  ;;  %v2474_v56 = vmax.bf16 %v2409_v6, %v2330_v33  ;;  %v2585_v26 = vor.u32 %v2584_v35, %v2583_v24 }
 0x258   : > { %v2698_v0 = vsel %vm1178_vm2, %v2696_v63, %v2697_v4 }
 0x259   : > { %v3098_v32 = vmax.bf16 %v3064_v58, %v3017_v40  ;;  %v2586_v1 = vsel %vm1001_vm4, %v2582_v62, %v2585_v26  ;;  %v2650_v2 = vmax.bf16 %v2585_v26, %v2474_v56 }
 0x25a   : > { %v2649_v57 = vmax.bf16 %v2586_v1, %v2473_v44 }
 0x25b   : > { %v4323_v25 = vcombine.high %v3098_v32, %v3098_v32  ;;  %v4322_v50 = vcombine.low %v3098_v32, %v3098_v32  ;;  %v2762_v13 = vmax.bf16 %v2697_v4, %v2650_v2 }
 0x25c   : > { %v3972_v15 = vpop.permute.xlu1 %3971  ;;  %v3970_v21 = vpop.permute.xlu0 %3969  ;;  %v2761_v48 = vmax.bf16 %v2698_v0, %v2649_v57 }
 0x25d   : > { %4015 = vrot.lane.b32.xlu1 %v4323_v25, %s4369_s17  ;;  %4013 = vrot.lane.b32.xlu0 %v4322_v50, %s4369_s17  ;;  %4061 = vst.msk [vmem:[%s5651_s16 + $0x1c] sm:$0xf] %vm4053_vm14, %v3972_v15  ;;  %4060 = vst.msk [vmem:[%s5651_s16 + $0x18] sm:$0xf] %vm4053_vm14, %v3970_v21  ;;  %v2985_v8 = vrot.slane %v2762_v13, 2  ;;  %v3066_v41 = vrot.slane %v2762_v13, 4 }
 0x25e   : > { %v2984_v30 = vrot.slane %v2761_v48, 2  ;;  %v3065_v12 = vrot.slane %v2761_v48, 4 }
 0x260   : > { %v2986_v17 = vsel %vm1178_vm2, %v2984_v30, %v2985_v8  ;;  %v3067_v55 = vsel %vm3019_vm12, %v3065_v12, %v3066_v41 }
 0x261   : > { %v3018_v7 = vmax.bf16 %v2986_v17, %v2761_v48 }
 0x263   : > { %v3099_v11 = vmax.bf16 %v3067_v55, %v3018_v7 }
 0x265   : > { %v4325_v31 = vcombine.high %v3099_v11, %v3099_v11  ;;  %v4324_v20 = vcombine.low %v3099_v11, %v3099_v11 }
 0x266   : > { %v3976_v3 = vpop.permute.xlu1 %3975  ;;  %v3974_v39 = vpop.permute.xlu0 %3973 }
 0x267   : > { %4063 = vst.msk [vmem:[%s5651_s16 + $0x24] sm:$0xf] %vm4053_vm14, %v3976_v3  ;;  %4062 = vst.msk [vmem:[%s5651_s16 + $0x20] sm:$0xf] %vm4053_vm14, %v3974_v39  ;;  %4019 = vrot.lane.b32.xlu1 %v4325_v31, %s4369_s17  ;;  %4017 = vrot.lane.b32.xlu0 %v4324_v20, %s4369_s17 }
 0x271   : > { %v3980_v18 = vpop.permute.xlu1 %3979 }
 0x272   : > { %v3978_v38 = vpop.permute.xlu0 %3977  ;;  %4065 = vst.msk [vmem:[%s5651_s16 + $0x2c] sm:$0xf] %vm4053_vm14, %v3980_v18 }
 0x273   : > { %4064 = vst.msk [vmem:[%s5651_s16 + $0x28] sm:$0xf] %vm4053_vm14, %v3978_v38 }
 0x27c   : > { %v3984_v46 = vpop.permute.xlu1 %3983  ;;  %v3982_v27 = vpop.permute.xlu0 %3981 }
 0x27d   : > { %4067 = vst.msk [vmem:[%s5651_s16 + $0x34] sm:$0xf] %vm4053_vm14, %v3984_v46  ;;  %4066 = vst.msk [vmem:[%s5651_s16 + $0x30] sm:$0xf] %vm4053_vm14, %v3982_v27 }
 0x286   : > { %v3988_v61 = vpop.permute.xlu1 %3987  ;;  %v3986_v45 = vpop.permute.xlu0 %3985 }
 0x287   : > { %4069 = vst.msk [vmem:[%s5651_s16 + $0x3c] sm:$0xf] %vm4053_vm14, %v3988_v61  ;;  %4068 = vst.msk [vmem:[%s5651_s16 + $0x38] sm:$0xf] %vm4053_vm14, %v3986_v45 }
 0x290   : > { %v3992_v14 = vpop.permute.xlu1 %3991  ;;  %v3990_v23 = vpop.permute.xlu0 %3989 }
 0x291   : > { %4071 = vst.msk [vmem:[%s5651_s16 + $0x44] sm:$0xf] %vm4053_vm14, %v3992_v14  ;;  %4070 = vst.msk [vmem:[%s5651_s16 + $0x40] sm:$0xf] %vm4053_vm14, %v3990_v23 }
 0x29b   : > { %v3996_v10 = vpop.permute.xlu1 %3995 }
 0x29c   : > { %v3994_v9 = vpop.permute.xlu0 %3993  ;;  %4073 = vst.msk [vmem:[%s5651_s16 + $0x4c] sm:$0xf] %vm4053_vm14, %v3996_v10 }
 0x29d   : > { %4072 = vst.msk [vmem:[%s5651_s16 + $0x48] sm:$0xf] %vm4053_vm14, %v3994_v9 }
 0x2a6   : > { %v4000_v60 = vpop.permute.xlu1 %3999  ;;  %v3998_v19 = vpop.permute.xlu0 %3997 }
 0x2a7   : > { %4075 = vst.msk [vmem:[%s5651_s16 + $0x54] sm:$0xf] %vm4053_vm14, %v4000_v60  ;;  %4074 = vst.msk [vmem:[%s5651_s16 + $0x50] sm:$0xf] %vm4053_vm14, %v3998_v19 }
 0x2b0   : > { %v4004_v53 = vpop.permute.xlu1 %4003  ;;  %v4002_v37 = vpop.permute.xlu0 %4001 }
 0x2b1   : > { %4077 = vst.msk [vmem:[%s5651_s16 + $0x5c] sm:$0xf] %vm4053_vm14, %v4004_v53  ;;  %4076 = vst.msk [vmem:[%s5651_s16 + $0x58] sm:$0xf] %vm4053_vm14, %v4002_v37 }
 0x2ba   : > { %v4008_v5 = vpop.permute.xlu1 %4007  ;;  %v4006_v49 = vpop.permute.xlu0 %4005 }
 0x2bb   : > { %4079 = vst.msk [vmem:[%s5651_s16 + $0x64] sm:$0xf] %vm4053_vm14, %v4008_v5  ;;  %4078 = vst.msk [vmem:[%s5651_s16 + $0x60] sm:$0xf] %vm4053_vm14, %v4006_v49 }
 0x2c5   : > { %v4012_v6 = vpop.permute.xlu1 %4011  ;;  %v4010_v43 = vpop.permute.xlu0 %4009 }
 0x2c6   : > { %4081 = vst.msk [vmem:[%s5651_s16 + $0x6c] sm:$0xf] %vm4053_vm14, %v4012_v6  ;;  %4080 = vst.msk [vmem:[%s5651_s16 + $0x68] sm:$0xf] %vm4053_vm14, %v4010_v43 }
 0x2cf   : > { %v4016_v22 = vpop.permute.xlu1 %4015  ;;  %v4014_v47 = vpop.permute.xlu0 %4013 }
 0x2d0   : > { %4083 = vst.msk [vmem:[%s5651_s16 + $0x74] sm:$0xf] %vm4053_vm14, %v4016_v22  ;;  %4082 = vst.msk [vmem:[%s5651_s16 + $0x70] sm:$0xf] %vm4053_vm14, %v4014_v47 }
 0x2d9   : > { %v4020_v36 = vpop.permute.xlu1 %4019  ;;  %v4018_v28 = vpop.permute.xlu0 %4017 }
 0x2da   : > { %4085 = vst.msk [vmem:[%s5651_s16 + $0x7c] sm:$0xf] %vm4053_vm14, %v4020_v36  ;;  %4084 = vst.msk [vmem:[%s5651_s16 + $0x78] sm:$0xf] %vm4053_vm14, %v4018_v28 }
 0x2db PF: > { %s11_s6 = sadd.s32 1, %s4364_s6  }
 0x2dc   : > { %p8_p4 = scmp.ge.s32.totalorder %s11_s6, 4  }
 0x2de   :  { %10 = sbr.rel (!%p8_p4) target bundleno = 1 (0x1), region = 54 }

</bundles_post_ra>
